<compile_context>
chip_gen: v5e
topology: v5e:2x2
jax: 0.10.0
libtpu: 0.0.40
codegen_flags: <defaults>
</compile_context>

<pallas_src>
import functools

import jax
import jax.numpy as jnp
from jax.experimental import pallas as pl
from jax.experimental.pallas import tpu as pltpu


# ----------------------------------------------------------------------------
# helpers
# ----------------------------------------------------------------------------
def _cdiv(a, b):
    return (a + b - 1) // b


def _round_up(x, m):
    return _cdiv(x, m) * m


def _pick_tile(n, candidates):
    """Largest candidate (descending order) that divides n."""
    for c in candidates:
        if c <= n and n % c == 0:
            return c
    return n


def _halo_rows(tm, need):
    """Smallest multiple-of-8 divisor of tm that is >= need (tm always works)."""
    need = max(need, 1)
    d = 8
    while d < tm and (d < need or tm % d != 0):
        d += 8
    return d


# ----------------------------------------------------------------------------
# Pallas kernel 1: Conv1d (+ bias + ReLU) with in-kernel fused-tap reduction
# ----------------------------------------------------------------------------
def _conv_tap_kernel(xc_ref, xh_ref, w_ref, b_ref, o_ref, xbuf_ref, *,
                     rtaps, tm, hr):
    """One (cout-tile, batch, out-time-tile) block of
           out = relu( conv1d(x, w, stride, padding) + b ).

    The input arrives as a core time slab (tm grouped rows) plus a SMALL halo
    slab (hr >= rtaps-1 grouped rows, the head of the next tile).  Both are
    staged once into a contiguous VMEM scratch; each fused tap is then a
    single static slice of that scratch fed to one MXU matmul.  The tap
    reduction is a value chain (bias folded into the first accumulate), so
    there is no zero-init store and no explicit per-tap scratch RMW.
    """
    # Stage core + halo contiguously (one copy per block, aligned stores).
    xbuf_ref[0:tm, :] = xc_ref[0]
    xbuf_ref[tm:tm + hr, :] = xh_ref[0]

    acc = jnp.dot(xbuf_ref[0:tm, :], w_ref[0],
                  preferred_element_type=jnp.float32) + b_ref[...]
    for r in range(1, rtaps):
        acc = acc + jnp.dot(xbuf_ref[r:r + tm, :], w_ref[r],
                            preferred_element_type=jnp.float32)

    o_ref[0] = jnp.maximum(acc, 0.0).astype(o_ref.dtype)


def conv1d_relu_nlc(x, length, w_fused, bias, *, kernel, stride, padding,
                    tm=256, tn=256, vmem_limit=32 * 1024 * 1024):
    """x: (B, T_any, Cin_p) activations, valid rows [0, length).
    w_fused: (ceil(K/S), S*Cin_p, Cout_p) stride-fused tap stack.
    bias: (1, Cout_p) f32.
    Returns ((B, Mi*tm, Cout_p), L_out) — valid output rows are [0, L_out)."""
    B, _, cin_p = x.shape
    rtaps, width, cout_p = w_fused.shape
    assert rtaps == _cdiv(kernel, stride) and width == stride * cin_p

    l_out = (length + 2 * padding - kernel) // stride + 1
    # Large tiles, clamped so tiny inputs still tile and one core+halo pair
    # always covers a full receptive field.
    tm = max(8, min(tm, _round_up(l_out, 8)), _round_up(rtaps, 8))
    tn = _pick_tile(cout_p, (tn, 256, 128))
    mi = _cdiv(l_out, tm)
    nj = cout_p // tn
    hr = _halo_rows(tm, rtaps - 1)           # small halo; hr | tm, hr % 8 == 0

    # grouped-time rows to allocate: all core tiles + one halo block, and at
    # least enough to hold [left pad | valid input].
    t_alloc_g = max(mi * tm + hr, _cdiv(padding + length, stride))
    t_alloc = t_alloc_g * stride

    # one cheap pad of the (un-inflated) activation: [P zeros | x | zeros].
    x_p = jnp.pad(x[:, :length, :],
                  ((0, 0), (padding, t_alloc - padding - length), (0, 0)))
    # time-grouping: (B, T, Cin_p) -> (B, T//S, S*Cin_p); turns strided taps
    # into contiguous lane-aligned slices inside the kernel.
    x_g = x_p.reshape(B, t_alloc_g, width)

    kern = functools.partial(_conv_tap_kernel, rtaps=rtaps, tm=tm, hr=hr)

    if nj > 1:
        # output-channel tile outermost: the per-tap weight slab is DMA'd once
        # per j and reused across all (batch, time) tiles.
        grid = (nj, B, mi)
        sem = ("parallel", "parallel", "parallel")
        in_specs = [
            pl.BlockSpec((1, tm, width), lambda j, b, i: (b, i, 0)),
            pl.BlockSpec((1, hr, width),
                         lambda j, b, i: (b, (i + 1) * (tm // hr), 0)),
            pl.BlockSpec((rtaps, width, tn), lambda j, b, i: (0, 0, j)),
            pl.BlockSpec((1, tn), lambda j, b, i: (0, j)),
        ]
        out_spec = pl.BlockSpec((1, tm, tn), lambda j, b, i: (b, i, j))
    else:
        # single cout tile: put the largest truly-parallel axis (time tiles)
        # outermost so v7x's two TensorCores both get work.
        grid = (mi, B)
        sem = ("parallel", "parallel")
        in_specs = [
            pl.BlockSpec((1, tm, width), lambda i, b: (b, i, 0)),
            pl.BlockSpec((1, hr, width),
                         lambda i, b: (b, (i + 1) * (tm // hr), 0)),
            pl.BlockSpec((rtaps, width, tn), lambda i, b: (0, 0, 0)),
            pl.BlockSpec((1, tn), lambda i, b: (0, 0)),
        ]
        out_spec = pl.BlockSpec((1, tm, tn), lambda i, b: (b, i, 0))

    out = pl.pallas_call(
        kern,
        out_shape=jax.ShapeDtypeStruct((B, mi * tm, cout_p), x.dtype),
        grid_spec=pltpu.PrefetchScalarGridSpec(
            num_scalar_prefetch=0,
            grid=grid,
            in_specs=in_specs,
            out_specs=out_spec,
            scratch_shapes=[pltpu.VMEM((tm + hr, width), x.dtype)],
        ),
        compiler_params=pltpu.CompilerParams(
            dimension_semantics=sem,
            vmem_limit_bytes=vmem_limit,
        ),
    )(x_g, x_g, w_fused, bias)
    return out, l_out


# ----------------------------------------------------------------------------
# Pallas kernel 2: full-K / full-N matmul + bias + ReLU (1x1 convs)
# ----------------------------------------------------------------------------
def _matmul_bias_relu_kernel(x_ref, w_ref, b_ref, o_ref, *, apply_relu):
    y = jnp.dot(x_ref[...], w_ref[...],
                preferred_element_type=jnp.float32) + b_ref[...]
    if apply_relu:
        y = jnp.maximum(y, 0.0)
    o_ref[...] = y.astype(o_ref.dtype)


def matmul_bias_relu(x, w, b, *, apply_relu=True, tm=256,
                     vmem_limit=32 * 1024 * 1024):
    """out[M, N] = relu(x[M, K] @ w[K, N] + b[1, N]).
    Grid only over M; the full (K, N) weight block is fetched once and the
    activation streams exactly once — no k-loop, no accumulator scratch.
    (Largest weight here is 2048x2048 bf16 = 8 MiB, so full-K/N fits VMEM.)"""
    m, kd = x.shape
    kd2, n = w.shape
    assert kd == kd2
    tm = _pick_tile(m, (tm, 128, 64, 32, 16, 8))
    grid = (m // tm,)
    return pl.pallas_call(
        functools.partial(_matmul_bias_relu_kernel, apply_relu=apply_relu),
        out_shape=jax.ShapeDtypeStruct((m, n), x.dtype),
        grid_spec=pltpu.PrefetchScalarGridSpec(
            num_scalar_prefetch=0,
            grid=grid,
            in_specs=[
                pl.BlockSpec((tm, kd), lambda i: (i, 0)),
                pl.BlockSpec((kd, n), lambda i: (0, 0)),
                pl.BlockSpec((1, n), lambda i: (0, 0)),
            ],
            out_specs=pl.BlockSpec((tm, n), lambda i: (i, 0)),
        ),
        compiler_params=pltpu.CompilerParams(
            dimension_semantics=("parallel",),
            vmem_limit_bytes=vmem_limit,
        ),
    )(x, w, b)


# ----------------------------------------------------------------------------
# Wav2Letter module (JAX / Pallas)
# ----------------------------------------------------------------------------
class Wav2LetterPallas:
    def __init__(self, input_dim, output_dim, upstream_rate, total_rate=320,
                 *, key, compute_dtype=jnp.bfloat16):
        first_stride = 1 if total_rate == -1 else total_rate // upstream_rate
        self.downsample_rate = first_stride
        self.output_dim = output_dim
        self.compute_dtype = compute_dtype

        # (C_in, C_out, kernel, stride, padding) — mirrors the nn.Sequential.
        cfgs = [(input_dim, 250, 48, first_stride, 23)]
        cfgs += [(250, 250, 7, 1, 3)] * 7
        cfgs += [(250, 2000, 32, 1, 16),
                 (2000, 2000, 1, 1, 0),
                 (2000, output_dim, 1, 1, 0)]
        self.cfgs = cfgs

        # All weight prep happens ONCE at init: transpose, channel-pad to
        # multiples of 128 (padded channels stay exactly 0 end-to-end),
        # stride-fuse the taps, and cast to the compute dtype.
        layers = []
        for i, (cin, cout, k, s, p) in enumerate(cfgs):
            cin_p, cout_p = _round_up(cin, 128), _round_up(cout, 128)
            bound = 1.0 / (cin * k) ** 0.5        # PyTorch Conv1d default init
            wkey = jax.random.fold_in(key, 2 * i)
            bkey = jax.random.fold_in(key, 2 * i + 1)
            w = jax.random.uniform(wkey, (cout, cin, k), jnp.float32,
                                   minval=-bound, maxval=bound)
            b = jax.random.uniform(bkey, (cout,), jnp.float32,
                                   minval=-bound, maxval=bound)
            bias = jnp.pad(b, (0, cout_p - cout)).reshape(1, cout_p)  # keep f32
            if k == 1:
                # 1x1 conv == dense matmul: (Cin_p, Cout_p) weight.
                w2 = jnp.pad(w[:, :, 0].T,
                             ((0, cin_p - cin), (0, cout_p - cout)))
                layers.append(dict(kind="dense", w=w2.astype(compute_dtype),
                                   b=bias, cfg=(cin_p, cout_p, k, s, p)))
            else:
                # stride-fused tap stack: (ceil(K/S), S*Cin_p, Cout_p) so each
                # in-kernel matmul contracts over the full grouped row.
                rtaps = _cdiv(k, s)
                wt = jnp.transpose(w, (2, 1, 0))          # (K, Cin, Cout)
                wt = jnp.pad(wt, ((0, rtaps * s - k),
                                  (0, cin_p - cin), (0, cout_p - cout)))
                wf = wt.reshape(rtaps, s * cin_p, cout_p)
                tn = 512 if cout_p >= 1024 else 256       # 250->2000 layer: nj=4
                layers.append(dict(kind="conv", w=wf.astype(compute_dtype),
                                   b=bias, tn=tn,
                                   cfg=(cin_p, cout_p, k, s, p)))
        self.layers = layers
        self.cin_p0 = _round_up(input_dim, 128)

    def __call__(self, x, x_len):
        """x: (B, T, input_dim) float32; x_len: (B,) int32.
        Returns ((B, L_final, output_dim) float32, x_len // downsample_rate)."""
        B, T, din = x.shape
        # pad channels to the lane-aligned width once, cast to compute dtype.
        h = jnp.pad(x, ((0, 0), (0, 0), (0, self.cin_p0 - din)))
        h = h.astype(self.compute_dtype)
        length = T
        for layer in self.layers:
            _, cout_p, k, s, p = layer["cfg"]
            if layer["kind"] == "conv":
                h, length = conv1d_relu_nlc(h, length, layer["w"], layer["b"],
                                            kernel=k, stride=s, padding=p,
                                            tn=layer["tn"])
            else:
                # Trim to round_up(length, 8) rows before the dense layers so
                # no padded-time garbage rows go through the 2048x2048 matmul.
                bb, ta, cc = h.shape
                lr = min(ta, _round_up(length, 8))
                h = h[:, :lr, :]
                # NOTE: the s3prl reference Sequential ends with ReLU after the
                # final classifier Conv1d too, so apply_relu=True everywhere.
                h = matmul_bias_relu(h.reshape(bb * lr, cc),
                                     layer["w"], layer["b"], apply_relu=True)
                h = h.reshape(bb, lr, cout_p)
                # length unchanged for 1x1 convs
        out = h[:, :length, :self.output_dim].astype(jnp.float32)
        return out, x_len // self.downsample_rate


# ----------------------------------------------------------------------------
if __name__ == "__main__":
    key = jax.random.PRNGKey(0)

    # small, forward-consistent shapes
    B, T, input_dim, output_dim = 2, 32, 40, 31
    upstream_rate, total_rate = 160, 320              # -> first_stride = 2

    model = Wav2LetterPallas(input_dim, output_dim, upstream_rate, total_rate,
                             key=jax.random.fold_in(key, 123))

    x = jax.random.normal(jax.random.fold_in(key, 1), (B, T, input_dim),
                          dtype=jnp.float32)
    x_len = jnp.array([T, T - 4], dtype=jnp.int32)

    out, out_len = model(x, x_len)
    jax.block_until_ready(out)
    jax.block_until_ready(out_len)

    # expected: out (B, 17, output_dim) for T=32, stride=2 (same as PyTorch)
    assert out.shape == (B, 17, output_dim), out.shape
    assert out_len.shape == (B,)
    print("KERNEL_OK")
</pallas_src>

<mosaic_0001>
module attributes {stable_mosaic.version = 11 : i64} {
  func.func @_conv_tap_kernel(%arg0: i32, %arg1: i32, %arg2: memref<1x24x256xbf16, #tpu.memory_space<vmem>>, %arg3: memref<1x24x256xbf16, #tpu.memory_space<vmem>>, %arg4: memref<24x256x256xbf16, #tpu.memory_space<vmem>>, %arg5: memref<1x256xf32, #tpu.memory_space<vmem>>, %arg6: memref<1x24x256xbf16, #tpu.memory_space<vmem>>, %arg7: memref<48x256xbf16, #tpu.memory_space<vmem>>) attributes {dimension_semantics = [#tpu.dimension_semantics<parallel>, #tpu.dimension_semantics<parallel>], iteration_bounds = array<i64: 1, 2>, scalar_prefetch = 0 : i64, scratch_operands = 1 : i64, tpu.core_type = #tpu.core_type<tc>, window_params = [{transform_indices = @transform_0, window_bounds = array<i64: 1, 24, 256>}, {transform_indices = @transform_1, window_bounds = array<i64: 1, 24, 256>}, {pipeline_mode = #tpu.pipeline_mode<synchronous>, transform_indices = @transform_2, window_bounds = array<i64: 24, 256, 256>}, {pipeline_mode = #tpu.pipeline_mode<synchronous>, transform_indices = @transform_3, window_bounds = array<i64: 1, 256>}, {transform_indices = @transform_4, window_bounds = array<i64: 1, 24, 256>}]} {
    %c0 = arith.constant 0 : index
    %c0_0 = arith.constant 0 : index
    %c0_1 = arith.constant 0 : index
    %0 = vector.load %arg2[%c0, %c0_0, %c0_1] : memref<1x24x256xbf16, #tpu.memory_space<vmem>>, vector<1x24x256xbf16>
    %1 = vector.shape_cast %0 : vector<1x24x256xbf16> to vector<24x256xbf16>
    %c0_2 = arith.constant 0 : index
    %c0_3 = arith.constant 0 : index
    %2 = vector.load %arg7[%c0_2, %c0_3] : memref<48x256xbf16, #tpu.memory_space<vmem>>, vector<24x256xbf16>
    tpu.vector_store %arg7[%c0_2, %c0_3], %1 {strides = array<i32>} : memref<48x256xbf16, #tpu.memory_space<vmem>>, vector<24x256xbf16>,
    %c0_4 = arith.constant 0 : index
    %c0_5 = arith.constant 0 : index
    %c0_6 = arith.constant 0 : index
    %3 = vector.load %arg3[%c0_4, %c0_5, %c0_6] : memref<1x24x256xbf16, #tpu.memory_space<vmem>>, vector<1x24x256xbf16>
    %4 = vector.shape_cast %3 : vector<1x24x256xbf16> to vector<24x256xbf16>
    %c24 = arith.constant 24 : index
    %c0_7 = arith.constant 0 : index
    %5 = vector.load %arg7[%c24, %c0_7] : memref<48x256xbf16, #tpu.memory_space<vmem>>, vector<24x256xbf16>
    tpu.vector_store %arg7[%c24, %c0_7], %4 {strides = array<i32>} : memref<48x256xbf16, #tpu.memory_space<vmem>>, vector<24x256xbf16>,
    %c0_8 = arith.constant 0 : index
    %c0_9 = arith.constant 0 : index
    %6 = vector.load %arg7[%c0_8, %c0_9] : memref<48x256xbf16, #tpu.memory_space<vmem>>, vector<24x256xbf16>
    %c0_10 = arith.constant 0 : index
    %c0_11 = arith.constant 0 : index
    %c0_12 = arith.constant 0 : index
    %7 = vector.load %arg4[%c0_10, %c0_11, %c0_12] : memref<24x256x256xbf16, #tpu.memory_space<vmem>>, vector<1x256x256xbf16>
    %8 = vector.shape_cast %7 : vector<1x256x256xbf16> to vector<256x256xbf16>
    %cst = arith.constant dense<0.000000e+00> : vector<24x256xf32>
    %9 = tpu.matmul %6, %8, %cst {dimension_numbers = #tpu.dot_dimension_numbers<[1], [0], [0], [1], [0, 0, 1, 1], [], []>} : vector<24x256xbf16>, vector<256x256xbf16>, vector<24x256xf32> -> vector<24x256xf32>
    %c0_13 = arith.constant 0 : index
    %c0_14 = arith.constant 0 : index
    %10 = vector.load %arg5[%c0_13, %c0_14] : memref<1x256xf32, #tpu.memory_space<vmem>>, vector<1x256xf32>
    %11 = vector.broadcast %10 : vector<1x256xf32> to vector<24x256xf32>
    %12 = arith.addf %9, %11 : vector<24x256xf32>
    %c1 = arith.constant 1 : index
    %c0_15 = arith.constant 0 : index
    %13 = vector.load %arg7[%c1, %c0_15] : memref<48x256xbf16, #tpu.memory_space<vmem>>, vector<24x256xbf16>
    %c1_16 = arith.constant 1 : index
    %c0_17 = arith.constant 0 : index
    %c0_18 = arith.constant 0 : index
    %14 = vector.load %arg4[%c1_16, %c0_17, %c0_18] : memref<24x256x256xbf16, #tpu.memory_space<vmem>>, vector<1x256x256xbf16>
    %15 = vector.shape_cast %14 : vector<1x256x256xbf16> to vector<256x256xbf16>
    %cst_19 = arith.constant dense<0.000000e+00> : vector<24x256xf32>
    %16 = tpu.matmul %13, %15, %cst_19 {dimension_numbers = #tpu.dot_dimension_numbers<[1], [0], [0], [1], [0, 0, 1, 1], [], []>} : vector<24x256xbf16>, vector<256x256xbf16>, vector<24x256xf32> -> vector<24x256xf32>
    %17 = arith.addf %12, %16 : vector<24x256xf32>
    %c2 = arith.constant 2 : index
    %c0_20 = arith.constant 0 : index
    %18 = vector.load %arg7[%c2, %c0_20] : memref<48x256xbf16, #tpu.memory_space<vmem>>, vector<24x256xbf16>
    %c2_21 = arith.constant 2 : index
    %c0_22 = arith.constant 0 : index
    %c0_23 = arith.constant 0 : index
    %19 = vector.load %arg4[%c2_21, %c0_22, %c0_23] : memref<24x256x256xbf16, #tpu.memory_space<vmem>>, vector<1x256x256xbf16>
    %20 = vector.shape_cast %19 : vector<1x256x256xbf16> to vector<256x256xbf16>
    %cst_24 = arith.constant dense<0.000000e+00> : vector<24x256xf32>
    %21 = tpu.matmul %18, %20, %cst_24 {dimension_numbers = #tpu.dot_dimension_numbers<[1], [0], [0], [1], [0, 0, 1, 1], [], []>} : vector<24x256xbf16>, vector<256x256xbf16>, vector<24x256xf32> -> vector<24x256xf32>
    %22 = arith.addf %17, %21 : vector<24x256xf32>
    %c3 = arith.constant 3 : index
    %c0_25 = arith.constant 0 : index
    %23 = vector.load %arg7[%c3, %c0_25] : memref<48x256xbf16, #tpu.memory_space<vmem>>, vector<24x256xbf16>
    %c3_26 = arith.constant 3 : index
    %c0_27 = arith.constant 0 : index
    %c0_28 = arith.constant 0 : index
    %24 = vector.load %arg4[%c3_26, %c0_27, %c0_28] : memref<24x256x256xbf16, #tpu.memory_space<vmem>>, vector<1x256x256xbf16>
    %25 = vector.shape_cast %24 : vector<1x256x256xbf16> to vector<256x256xbf16>
    %cst_29 = arith.constant dense<0.000000e+00> : vector<24x256xf32>
    %26 = tpu.matmul %23, %25, %cst_29 {dimension_numbers = #tpu.dot_dimension_numbers<[1], [0], [0], [1], [0, 0, 1, 1], [], []>} : vector<24x256xbf16>, vector<256x256xbf16>, vector<24x256xf32> -> vector<24x256xf32>
    %27 = arith.addf %22, %26 : vector<24x256xf32>
    %c4 = arith.constant 4 : index
    %c0_30 = arith.constant 0 : index
    %28 = vector.load %arg7[%c4, %c0_30] : memref<48x256xbf16, #tpu.memory_space<vmem>>, vector<24x256xbf16>
    %c4_31 = arith.constant 4 : index
    %c0_32 = arith.constant 0 : index
    %c0_33 = arith.constant 0 : index
    %29 = vector.load %arg4[%c4_31, %c0_32, %c0_33] : memref<24x256x256xbf16, #tpu.memory_space<vmem>>, vector<1x256x256xbf16>
    %30 = vector.shape_cast %29 : vector<1x256x256xbf16> to vector<256x256xbf16>
    %cst_34 = arith.constant dense<0.000000e+00> : vector<24x256xf32>
    %31 = tpu.matmul %28, %30, %cst_34 {dimension_numbers = #tpu.dot_dimension_numbers<[1], [0], [0], [1], [0, 0, 1, 1], [], []>} : vector<24x256xbf16>, vector<256x256xbf16>, vector<24x256xf32> -> vector<24x256xf32>
    %32 = arith.addf %27, %31 : vector<24x256xf32>
    %c5 = arith.constant 5 : index
    %c0_35 = arith.constant 0 : index
    %33 = vector.load %arg7[%c5, %c0_35] : memref<48x256xbf16, #tpu.memory_space<vmem>>, vector<24x256xbf16>
    %c5_36 = arith.constant 5 : index
    %c0_37 = arith.constant 0 : index
    %c0_38 = arith.constant 0 : index
    %34 = vector.load %arg4[%c5_36, %c0_37, %c0_38] : memref<24x256x256xbf16, #tpu.memory_space<vmem>>, vector<1x256x256xbf16>
    %35 = vector.shape_cast %34 : vector<1x256x256xbf16> to vector<256x256xbf16>
    %cst_39 = arith.constant dense<0.000000e+00> : vector<24x256xf32>
    %36 = tpu.matmul %33, %35, %cst_39 {dimension_numbers = #tpu.dot_dimension_numbers<[1], [0], [0], [1], [0, 0, 1, 1], [], []>} : vector<24x256xbf16>, vector<256x256xbf16>, vector<24x256xf32> -> vector<24x256xf32>
    %37 = arith.addf %32, %36 : vector<24x256xf32>
    %c6 = arith.constant 6 : index
    %c0_40 = arith.constant 0 : index
    %38 = vector.load %arg7[%c6, %c0_40] : memref<48x256xbf16, #tpu.memory_space<vmem>>, vector<24x256xbf16>
    %c6_41 = arith.constant 6 : index
    %c0_42 = arith.constant 0 : index
    %c0_43 = arith.constant 0 : index
    %39 = vector.load %arg4[%c6_41, %c0_42, %c0_43] : memref<24x256x256xbf16, #tpu.memory_space<vmem>>, vector<1x256x256xbf16>
    %40 = vector.shape_cast %39 : vector<1x256x256xbf16> to vector<256x256xbf16>
    %cst_44 = arith.constant dense<0.000000e+00> : vector<24x256xf32>
    %41 = tpu.matmul %38, %40, %cst_44 {dimension_numbers = #tpu.dot_dimension_numbers<[1], [0], [0], [1], [0, 0, 1, 1], [], []>} : vector<24x256xbf16>, vector<256x256xbf16>, vector<24x256xf32> -> vector<24x256xf32>
    %42 = arith.addf %37, %41 : vector<24x256xf32>
    %c7 = arith.constant 7 : index
    %c0_45 = arith.constant 0 : index
    %43 = vector.load %arg7[%c7, %c0_45] : memref<48x256xbf16, #tpu.memory_space<vmem>>, vector<24x256xbf16>
    %c7_46 = arith.constant 7 : index
    %c0_47 = arith.constant 0 : index
    %c0_48 = arith.constant 0 : index
    %44 = vector.load %arg4[%c7_46, %c0_47, %c0_48] : memref<24x256x256xbf16, #tpu.memory_space<vmem>>, vector<1x256x256xbf16>
    %45 = vector.shape_cast %44 : vector<1x256x256xbf16> to vector<256x256xbf16>
    %cst_49 = arith.constant dense<0.000000e+00> : vector<24x256xf32>
    %46 = tpu.matmul %43, %45, %cst_49 {dimension_numbers = #tpu.dot_dimension_numbers<[1], [0], [0], [1], [0, 0, 1, 1], [], []>} : vector<24x256xbf16>, vector<256x256xbf16>, vector<24x256xf32> -> vector<24x256xf32>
    %47 = arith.addf %42, %46 : vector<24x256xf32>
    %c8 = arith.constant 8 : index
    %c0_50 = arith.constant 0 : index
    %48 = vector.load %arg7[%c8, %c0_50] : memref<48x256xbf16, #tpu.memory_space<vmem>>, vector<24x256xbf16>
    %c8_51 = arith.constant 8 : index
    %c0_52 = arith.constant 0 : index
    %c0_53 = arith.constant 0 : index
    %49 = vector.load %arg4[%c8_51, %c0_52, %c0_53] : memref<24x256x256xbf16, #tpu.memory_space<vmem>>, vector<1x256x256xbf16>
    %50 = vector.shape_cast %49 : vector<1x256x256xbf16> to vector<256x256xbf16>
    %cst_54 = arith.constant dense<0.000000e+00> : vector<24x256xf32>
    %51 = tpu.matmul %48, %50, %cst_54 {dimension_numbers = #tpu.dot_dimension_numbers<[1], [0], [0], [1], [0, 0, 1, 1], [], []>} : vector<24x256xbf16>, vector<256x256xbf16>, vector<24x256xf32> -> vector<24x256xf32>
    %52 = arith.addf %47, %51 : vector<24x256xf32>
    %c9 = arith.constant 9 : index
    %c0_55 = arith.constant 0 : index
    %53 = vector.load %arg7[%c9, %c0_55] : memref<48x256xbf16, #tpu.memory_space<vmem>>, vector<24x256xbf16>
    %c9_56 = arith.constant 9 : index
    %c0_57 = arith.constant 0 : index
    %c0_58 = arith.constant 0 : index
    %54 = vector.load %arg4[%c9_56, %c0_57, %c0_58] : memref<24x256x256xbf16, #tpu.memory_space<vmem>>, vector<1x256x256xbf16>
    %55 = vector.shape_cast %54 : vector<1x256x256xbf16> to vector<256x256xbf16>
    %cst_59 = arith.constant dense<0.000000e+00> : vector<24x256xf32>
    %56 = tpu.matmul %53, %55, %cst_59 {dimension_numbers = #tpu.dot_dimension_numbers<[1], [0], [0], [1], [0, 0, 1, 1], [], []>} : vector<24x256xbf16>, vector<256x256xbf16>, vector<24x256xf32> -> vector<24x256xf32>
    %57 = arith.addf %52, %56 : vector<24x256xf32>
    %c10 = arith.constant 10 : index
    %c0_60 = arith.constant 0 : index
    %58 = vector.load %arg7[%c10, %c0_60] : memref<48x256xbf16, #tpu.memory_space<vmem>>, vector<24x256xbf16>
    %c10_61 = arith.constant 10 : index
    %c0_62 = arith.constant 0 : index
    %c0_63 = arith.constant 0 : index
    %59 = vector.load %arg4[%c10_61, %c0_62, %c0_63] : memref<24x256x256xbf16, #tpu.memory_space<vmem>>, vector<1x256x256xbf16>
    %60 = vector.shape_cast %59 : vector<1x256x256xbf16> to vector<256x256xbf16>
    %cst_64 = arith.constant dense<0.000000e+00> : vector<24x256xf32>
    %61 = tpu.matmul %58, %60, %cst_64 {dimension_numbers = #tpu.dot_dimension_numbers<[1], [0], [0], [1], [0, 0, 1, 1], [], []>} : vector<24x256xbf16>, vector<256x256xbf16>, vector<24x256xf32> -> vector<24x256xf32>
    %62 = arith.addf %57, %61 : vector<24x256xf32>
    %c11 = arith.constant 11 : index
    %c0_65 = arith.constant 0 : index
    %63 = vector.load %arg7[%c11, %c0_65] : memref<48x256xbf16, #tpu.memory_space<vmem>>, vector<24x256xbf16>
    %c11_66 = arith.constant 11 : index
    %c0_67 = arith.constant 0 : index
    %c0_68 = arith.constant 0 : index
    %64 = vector.load %arg4[%c11_66, %c0_67, %c0_68] : memref<24x256x256xbf16, #tpu.memory_space<vmem>>, vector<1x256x256xbf16>
    %65 = vector.shape_cast %64 : vector<1x256x256xbf16> to vector<256x256xbf16>
    %cst_69 = arith.constant dense<0.000000e+00> : vector<24x256xf32>
    %66 = tpu.matmul %63, %65, %cst_69 {dimension_numbers = #tpu.dot_dimension_numbers<[1], [0], [0], [1], [0, 0, 1, 1], [], []>} : vector<24x256xbf16>, vector<256x256xbf16>, vector<24x256xf32> -> vector<24x256xf32>
    %67 = arith.addf %62, %66 : vector<24x256xf32>
    %c12 = arith.constant 12 : index
    %c0_70 = arith.constant 0 : index
    %68 = vector.load %arg7[%c12, %c0_70] : memref<48x256xbf16, #tpu.memory_space<vmem>>, vector<24x256xbf16>
    %c12_71 = arith.constant 12 : index
    %c0_72 = arith.constant 0 : index
    %c0_73 = arith.constant 0 : index
    %69 = vector.load %arg4[%c12_71, %c0_72, %c0_73] : memref<24x256x256xbf16, #tpu.memory_space<vmem>>, vector<1x256x256xbf16>
    %70 = vector.shape_cast %69 : vector<1x256x256xbf16> to vector<256x256xbf16>
    %cst_74 = arith.constant dense<0.000000e+00> : vector<24x256xf32>
    %71 = tpu.matmul %68, %70, %cst_74 {dimension_numbers = #tpu.dot_dimension_numbers<[1], [0], [0], [1], [0, 0, 1, 1], [], []>} : vector<24x256xbf16>, vector<256x256xbf16>, vector<24x256xf32> -> vector<24x256xf32>
    %72 = arith.addf %67, %71 : vector<24x256xf32>
    %c13 = arith.constant 13 : index
    %c0_75 = arith.constant 0 : index
    %73 = vector.load %arg7[%c13, %c0_75] : memref<48x256xbf16, #tpu.memory_space<vmem>>, vector<24x256xbf16>
    %c13_76 = arith.constant 13 : index
    %c0_77 = arith.constant 0 : index
    %c0_78 = arith.constant 0 : index
    %74 = vector.load %arg4[%c13_76, %c0_77, %c0_78] : memref<24x256x256xbf16, #tpu.memory_space<vmem>>, vector<1x256x256xbf16>
    %75 = vector.shape_cast %74 : vector<1x256x256xbf16> to vector<256x256xbf16>
    %cst_79 = arith.constant dense<0.000000e+00> : vector<24x256xf32>
    %76 = tpu.matmul %73, %75, %cst_79 {dimension_numbers = #tpu.dot_dimension_numbers<[1], [0], [0], [1], [0, 0, 1, 1], [], []>} : vector<24x256xbf16>, vector<256x256xbf16>, vector<24x256xf32> -> vector<24x256xf32>
    %77 = arith.addf %72, %76 : vector<24x256xf32>
    %c14 = arith.constant 14 : index
    %c0_80 = arith.constant 0 : index
    %78 = vector.load %arg7[%c14, %c0_80] : memref<48x256xbf16, #tpu.memory_space<vmem>>, vector<24x256xbf16>
    %c14_81 = arith.constant 14 : index
    %c0_82 = arith.constant 0 : index
    %c0_83 = arith.constant 0 : index
    %79 = vector.load %arg4[%c14_81, %c0_82, %c0_83] : memref<24x256x256xbf16, #tpu.memory_space<vmem>>, vector<1x256x256xbf16>
    %80 = vector.shape_cast %79 : vector<1x256x256xbf16> to vector<256x256xbf16>
    %cst_84 = arith.constant dense<0.000000e+00> : vector<24x256xf32>
    %81 = tpu.matmul %78, %80, %cst_84 {dimension_numbers = #tpu.dot_dimension_numbers<[1], [0], [0], [1], [0, 0, 1, 1], [], []>} : vector<24x256xbf16>, vector<256x256xbf16>, vector<24x256xf32> -> vector<24x256xf32>
    %82 = arith.addf %77, %81 : vector<24x256xf32>
    %c15 = arith.constant 15 : index
    %c0_85 = arith.constant 0 : index
    %83 = vector.load %arg7[%c15, %c0_85] : memref<48x256xbf16, #tpu.memory_space<vmem>>, vector<24x256xbf16>
    %c15_86 = arith.constant 15 : index
    %c0_87 = arith.constant 0 : index
    %c0_88 = arith.constant 0 : index
    %84 = vector.load %arg4[%c15_86, %c0_87, %c0_88] : memref<24x256x256xbf16, #tpu.memory_space<vmem>>, vector<1x256x256xbf16>
    %85 = vector.shape_cast %84 : vector<1x256x256xbf16> to vector<256x256xbf16>
    %cst_89 = arith.constant dense<0.000000e+00> : vector<24x256xf32>
    %86 = tpu.matmul %83, %85, %cst_89 {dimension_numbers = #tpu.dot_dimension_numbers<[1], [0], [0], [1], [0, 0, 1, 1], [], []>} : vector<24x256xbf16>, vector<256x256xbf16>, vector<24x256xf32> -> vector<24x256xf32>
    %87 = arith.addf %82, %86 : vector<24x256xf32>
    %c16 = arith.constant 16 : index
    %c0_90 = arith.constant 0 : index
    %88 = vector.load %arg7[%c16, %c0_90] : memref<48x256xbf16, #tpu.memory_space<vmem>>, vector<24x256xbf16>
    %c16_91 = arith.constant 16 : index
    %c0_92 = arith.constant 0 : index
    %c0_93 = arith.constant 0 : index
    %89 = vector.load %arg4[%c16_91, %c0_92, %c0_93] : memref<24x256x256xbf16, #tpu.memory_space<vmem>>, vector<1x256x256xbf16>
    %90 = vector.shape_cast %89 : vector<1x256x256xbf16> to vector<256x256xbf16>
    %cst_94 = arith.constant dense<0.000000e+00> : vector<24x256xf32>
    %91 = tpu.matmul %88, %90, %cst_94 {dimension_numbers = #tpu.dot_dimension_numbers<[1], [0], [0], [1], [0, 0, 1, 1], [], []>} : vector<24x256xbf16>, vector<256x256xbf16>, vector<24x256xf32> -> vector<24x256xf32>
    %92 = arith.addf %87, %91 : vector<24x256xf32>
    %c17 = arith.constant 17 : index
    %c0_95 = arith.constant 0 : index
    %93 = vector.load %arg7[%c17, %c0_95] : memref<48x256xbf16, #tpu.memory_space<vmem>>, vector<24x256xbf16>
    %c17_96 = arith.constant 17 : index
    %c0_97 = arith.constant 0 : index
    %c0_98 = arith.constant 0 : index
    %94 = vector.load %arg4[%c17_96, %c0_97, %c0_98] : memref<24x256x256xbf16, #tpu.memory_space<vmem>>, vector<1x256x256xbf16>
    %95 = vector.shape_cast %94 : vector<1x256x256xbf16> to vector<256x256xbf16>
    %cst_99 = arith.constant dense<0.000000e+00> : vector<24x256xf32>
    %96 = tpu.matmul %93, %95, %cst_99 {dimension_numbers = #tpu.dot_dimension_numbers<[1], [0], [0], [1], [0, 0, 1, 1], [], []>} : vector<24x256xbf16>, vector<256x256xbf16>, vector<24x256xf32> -> vector<24x256xf32>
    %97 = arith.addf %92, %96 : vector<24x256xf32>
    %c18 = arith.constant 18 : index
    %c0_100 = arith.constant 0 : index
    %98 = vector.load %arg7[%c18, %c0_100] : memref<48x256xbf16, #tpu.memory_space<vmem>>, vector<24x256xbf16>
    %c18_101 = arith.constant 18 : index
    %c0_102 = arith.constant 0 : index
    %c0_103 = arith.constant 0 : index
    %99 = vector.load %arg4[%c18_101, %c0_102, %c0_103] : memref<24x256x256xbf16, #tpu.memory_space<vmem>>, vector<1x256x256xbf16>
    %100 = vector.shape_cast %99 : vector<1x256x256xbf16> to vector<256x256xbf16>
    %cst_104 = arith.constant dense<0.000000e+00> : vector<24x256xf32>
    %101 = tpu.matmul %98, %100, %cst_104 {dimension_numbers = #tpu.dot_dimension_numbers<[1], [0], [0], [1], [0, 0, 1, 1], [], []>} : vector<24x256xbf16>, vector<256x256xbf16>, vector<24x256xf32> -> vector<24x256xf32>
    %102 = arith.addf %97, %101 : vector<24x256xf32>
    %c19 = arith.constant 19 : index
    %c0_105 = arith.constant 0 : index
    %103 = vector.load %arg7[%c19, %c0_105] : memref<48x256xbf16, #tpu.memory_space<vmem>>, vector<24x256xbf16>
    %c19_106 = arith.constant 19 : index
    %c0_107 = arith.constant 0 : index
    %c0_108 = arith.constant 0 : index
    %104 = vector.load %arg4[%c19_106, %c0_107, %c0_108] : memref<24x256x256xbf16, #tpu.memory_space<vmem>>, vector<1x256x256xbf16>
    %105 = vector.shape_cast %104 : vector<1x256x256xbf16> to vector<256x256xbf16>
    %cst_109 = arith.constant dense<0.000000e+00> : vector<24x256xf32>
    %106 = tpu.matmul %103, %105, %cst_109 {dimension_numbers = #tpu.dot_dimension_numbers<[1], [0], [0], [1], [0, 0, 1, 1], [], []>} : vector<24x256xbf16>, vector<256x256xbf16>, vector<24x256xf32> -> vector<24x256xf32>
    %107 = arith.addf %102, %106 : vector<24x256xf32>
    %c20 = arith.constant 20 : index
    %c0_110 = arith.constant 0 : index
    %108 = vector.load %arg7[%c20, %c0_110] : memref<48x256xbf16, #tpu.memory_space<vmem>>, vector<24x256xbf16>
    %c20_111 = arith.constant 20 : index
    %c0_112 = arith.constant 0 : index
    %c0_113 = arith.constant 0 : index
    %109 = vector.load %arg4[%c20_111, %c0_112, %c0_113] : memref<24x256x256xbf16, #tpu.memory_space<vmem>>, vector<1x256x256xbf16>
    %110 = vector.shape_cast %109 : vector<1x256x256xbf16> to vector<256x256xbf16>
    %cst_114 = arith.constant dense<0.000000e+00> : vector<24x256xf32>
    %111 = tpu.matmul %108, %110, %cst_114 {dimension_numbers = #tpu.dot_dimension_numbers<[1], [0], [0], [1], [0, 0, 1, 1], [], []>} : vector<24x256xbf16>, vector<256x256xbf16>, vector<24x256xf32> -> vector<24x256xf32>
    %112 = arith.addf %107, %111 : vector<24x256xf32>
    %c21 = arith.constant 21 : index
    %c0_115 = arith.constant 0 : index
    %113 = vector.load %arg7[%c21, %c0_115] : memref<48x256xbf16, #tpu.memory_space<vmem>>, vector<24x256xbf16>
    %c21_116 = arith.constant 21 : index
    %c0_117 = arith.constant 0 : index
    %c0_118 = arith.constant 0 : index
    %114 = vector.load %arg4[%c21_116, %c0_117, %c0_118] : memref<24x256x256xbf16, #tpu.memory_space<vmem>>, vector<1x256x256xbf16>
    %115 = vector.shape_cast %114 : vector<1x256x256xbf16> to vector<256x256xbf16>
    %cst_119 = arith.constant dense<0.000000e+00> : vector<24x256xf32>
    %116 = tpu.matmul %113, %115, %cst_119 {dimension_numbers = #tpu.dot_dimension_numbers<[1], [0], [0], [1], [0, 0, 1, 1], [], []>} : vector<24x256xbf16>, vector<256x256xbf16>, vector<24x256xf32> -> vector<24x256xf32>
    %117 = arith.addf %112, %116 : vector<24x256xf32>
    %c22 = arith.constant 22 : index
    %c0_120 = arith.constant 0 : index
    %118 = vector.load %arg7[%c22, %c0_120] : memref<48x256xbf16, #tpu.memory_space<vmem>>, vector<24x256xbf16>
    %c22_121 = arith.constant 22 : index
    %c0_122 = arith.constant 0 : index
    %c0_123 = arith.constant 0 : index
    %119 = vector.load %arg4[%c22_121, %c0_122, %c0_123] : memref<24x256x256xbf16, #tpu.memory_space<vmem>>, vector<1x256x256xbf16>
    %120 = vector.shape_cast %119 : vector<1x256x256xbf16> to vector<256x256xbf16>
    %cst_124 = arith.constant dense<0.000000e+00> : vector<24x256xf32>
    %121 = tpu.matmul %118, %120, %cst_124 {dimension_numbers = #tpu.dot_dimension_numbers<[1], [0], [0], [1], [0, 0, 1, 1], [], []>} : vector<24x256xbf16>, vector<256x256xbf16>, vector<24x256xf32> -> vector<24x256xf32>
    %122 = arith.addf %117, %121 : vector<24x256xf32>
    %c23 = arith.constant 23 : index
    %c0_125 = arith.constant 0 : index
    %123 = vector.load %arg7[%c23, %c0_125] : memref<48x256xbf16, #tpu.memory_space<vmem>>, vector<24x256xbf16>
    %c23_126 = arith.constant 23 : index
    %c0_127 = arith.constant 0 : index
    %c0_128 = arith.constant 0 : index
    %124 = vector.load %arg4[%c23_126, %c0_127, %c0_128] : memref<24x256x256xbf16, #tpu.memory_space<vmem>>, vector<1x256x256xbf16>
    %125 = vector.shape_cast %124 : vector<1x256x256xbf16> to vector<256x256xbf16>
    %cst_129 = arith.constant dense<0.000000e+00> : vector<24x256xf32>
    %126 = tpu.matmul %123, %125, %cst_129 {dimension_numbers = #tpu.dot_dimension_numbers<[1], [0], [0], [1], [0, 0, 1, 1], [], []>} : vector<24x256xbf16>, vector<256x256xbf16>, vector<24x256xf32> -> vector<24x256xf32>
    %127 = arith.addf %122, %126 : vector<24x256xf32>
    %cst_130 = arith.constant 0.000000e+00 : f32
    %128 = vector.broadcast %cst_130 : f32 to vector<24x256xf32>
    %129 = arith.maximumf %127, %128 : vector<24x256xf32>
    %130 = arith.truncf %129 : vector<24x256xf32> to vector<24x256xbf16>
    %c0_131 = arith.constant 0 : index
    %c0_132 = arith.constant 0 : index
    %c0_133 = arith.constant 0 : index
    %131 = vector.load %arg6[%c0_131, %c0_132, %c0_133] : memref<1x24x256xbf16, #tpu.memory_space<vmem>>, vector<1x24x256xbf16>
    %132 = vector.shape_cast %131 : vector<1x24x256xbf16> to vector<24x256xbf16>
    %133 = vector.shape_cast %130 : vector<24x256xbf16> to vector<1x24x256xbf16>
    tpu.vector_store %arg6[%c0_131, %c0_132, %c0_133], %133 {strides = array<i32>} : memref<1x24x256xbf16, #tpu.memory_space<vmem>>, vector<1x24x256xbf16>,
    return
  }
  func.func @transform_0(%arg0: i32, %arg1: i32) -> (i32, i32, i32) {
    %c0_i32 = arith.constant 0 : i32
    %c0_i32_0 = arith.constant 0 : i32
    return %arg1, %arg0, %c0_i32 : i32, i32, i32
  }
  func.func @transform_1(%arg0: i32, %arg1: i32) -> (i32, i32, i32) {
    %c1_i32 = arith.constant 1 : i32
    %0 = arith.addi %arg0, %c1_i32 : i32
    %c1_i32_0 = arith.constant 1 : i32
    %1 = arith.muli %0, %c1_i32_0 : i32
    %c0_i32 = arith.constant 0 : i32
    %c0_i32_1 = arith.constant 0 : i32
    return %arg1, %1, %c0_i32 : i32, i32, i32
  }
  func.func @transform_2(%arg0: i32, %arg1: i32) -> (i32, i32, i32) {
    %c0_i32 = arith.constant 0 : i32
    %c0_i32_0 = arith.constant 0 : i32
    %c0_i32_1 = arith.constant 0 : i32
    %c0_i32_2 = arith.constant 0 : i32
    return %c0_i32, %c0_i32_0, %c0_i32_1 : i32, i32, i32
  }
  func.func @transform_3(%arg0: i32, %arg1: i32) -> (i32, i32) {
    %c0_i32 = arith.constant 0 : i32
    %c0_i32_0 = arith.constant 0 : i32
    %c0_i32_1 = arith.constant 0 : i32
    return %c0_i32, %c0_i32_0 : i32, i32
  }
  func.func @transform_4(%arg0: i32, %arg1: i32) -> (i32, i32, i32) {
    %c0_i32 = arith.constant 0 : i32
    %c0_i32_0 = arith.constant 0 : i32
    return %arg1, %arg0, %c0_i32 : i32, i32, i32
  }
}

</mosaic_0001>

<bundles_post_ra>
// kernel: tpu_custom_call.1
= control target key start
LH: loop header
LB: loop body
LE: loop exit
PB: predicated region body
PF: predicated region fallthrough
CT: control target
= control target key end

     0   :  { %s13286_s0 = inlined_call_operand.hbm [shape: bf16[2,48,256], index: 0, kind: input, shape index: {}]   ;;  %s13287_s1 = inlined_call_operand.hbm [shape: bf16[2,48,256], index: 1, kind: input, shape index: {}]   ;;  %s13288_s2 = inlined_call_operand.hbm [shape: bf16[24,256,256], index: 2, kind: input, shape index: {}]   ;;  %s13289_s3 = inlined_call_operand.hbm [shape: f32[1,256], index: 3, kind: input, shape index: {}]   ;;  %s13290_s4 = inlined_call_operand.hbm [shape: bf16[2,24,256], index: 4, kind: output, shape index: {}]  }
   0x1   :  { %13298 = sst [smem:[#allocation21_spill]] %s13288_s2 }
   0x2   :  { %13299 = sst [smem:[#allocation22_spill]] %s13289_s3 }
   0x3   :  { %9 = vsyncpa [#allocation4], 0 }
   0x4   :  { %11 = vsyncpa [#allocation4 + $0x1], 0 }
   0x5   :  { %12 = vsyncpa [#allocation7], 0 }
   0x6   :  { %14 = vsyncpa [#allocation7 + $0x1], 0 }
   0x7   :  { %15 = vsyncpa [#allocation10], 0 }
   0x8   :  { %16 = vsyncpa [#allocation5], 0 }
   0x9   :  { %18 = vsyncpa [#allocation5 + $0x1], 0  ;;  %s11954_s15 = smov 0   ;;  %s11956_s16 = smov 0  }
   0xa   :  { %s11958_s17 = smov 0   ;;  %s11960_s18 = smov 0  }
   0xb   :  { %s11962_s19 = smov 0   ;;  %s11964_s20 = smov 0  }
   0xc LB: > { %13300 = sst [smem:[#allocation17_spill]] %s11909_s17  ;;  %s11985_s21 = sadd.s32 4294967295, %s11921_s20   ;;  %s11921_s20 = sphi %s11964_s20, %s24_s20   ;;  %s11917_s19 = sphi %s11962_s19, %s13316_s19   ;;  %s11913_s18 = sphi %s11960_s18, %s13315_s18   ;;  %s11909_s17 = sphi %s11958_s17, %s13314_s17   ;;  %s11905_s16 = sphi %s11956_s16, %s13318_s16   ;;  %s11901_s15 = sphi %s11954_s15, %s13317_s15  }
   0xd   : > { %13301 = sst [smem:[#allocation18_spill]] %s11917_s19  ;;  %s7747_s22 = sadd.s32 4294967294, %s11921_s20  }
   0xe   : > { %p58_p0 = scmp.ne.s32.totalorder %s11905_s16, %s11901_s15  ;;  %p59_p1 = scmp.eq.s32.totalorder %s11985_s21, 0 }
   0xf   : > { %p156_p2 = scmp.eq.s32.totalorder %s11985_s21, 1  ;;  %p162_p3 = scmp.eq.s32.totalorder %s7747_s22, 1 }
  0x10   : > { %p11994_p4 = por %p59_p1, %p58_p0  ;;  %p7748_p5 = scmp.ge.s32.totalorder %s11921_s20, 1 }
  0x11   : > { %p11999_p6 = por %p162_p3, %p58_p0  ;;  %p169_p7 = scmp.lt.s32.totalorder %s11921_s20, 3 }
  0x12   : > { %s13304_s2 = sld [smem:[#allocation21_spill]]  ;;  %s11923_s29 = smov [#allocation8]  }
  0x13   : > { %p12007_p8 = pnand %p7748_p5, %p169_p7  ;;  %s182_s30 = sshll.u32 %s11923_s29, 4  ;;  %s183_s30 = int_to_ptr.vmem [resolvable:$true] %s182_s30 }
  0x14   : > { %p7751_p11 = scmp.ge.s32.totalorder %s11921_s20, 2  ;;  %s13306_s3 = sld [smem:[#allocation22_spill]] }
  0x15   : > { %p11629_p9 = pneg %p12007_p8  ;;  %s13291_s8 = smov 128  }
  0x16   : > { %s13293_s9 = smov 8   ;;  %s11926_s10 = smov [#allocation9]  }
  0x17   : > { %p11630_p10 = pnand %p11629_p9, %p59_p1  ;;  %s197_s11 = sshll.u32 %s11926_s10, 4  ;;  %s198_s11 = int_to_ptr.vmem [resolvable:$true] %s197_s11 }
  0x18   : > { %s180_s27 = sshll.u32 %s13304_s2, 4  ;;  %s33_s12 = sadd.s32 1, %s11917_s19  ;;  %s181_s27 = int_to_ptr.hbm [resolvable:$true] %s180_s27 }
  0x19   : > { %11632 = dma.hbm_to_vmem [thread:$0]  (!%p11630_p10), %s181_s27, 98304, %s183_s30, [#allocation7], %s13291_s8, %s13291_s8, %s13293_s9  }
  0x1a   : > { %s195_s7 = sshll.u32 %s13306_s3, 4  ;;  %s45_s13 = sadd.s32 1, %s11909_s17  ;;  %s196_s7 = int_to_ptr.hbm [resolvable:$true] %s195_s7 }
  0x1b   : > { %11635 = dma.hbm_to_vmem [thread:$0]  (!%p11630_p10), %s196_s7, 32, %s198_s11, [#allocation10]  }
  0x1c   : > { %p34_p12 = scmp.ge.s32.totalorder %s33_s12, 2  ;;  %p52_p13 = scmp.ne.s32.totalorder %s11909_s17, %s11905_s16 }
  0x1d   : > { %p53_p0 = scmp.eq.s32.totalorder %s11921_s20, 0  ;;  %p11649_p3 = scmp.lt.s32.totalorder %s11921_s20, 2 }
  0x1e   : > { %s13320_s12 = smov (%p34_p12, %s33_s12), 0  ;;  %p12032_p7 = por %p156_p2, %p52_p13 }
  0x1f   : > { %13307 = sst [smem:[#allocation19_spill]] %s13320_s12  ;;  %p54_p5 = por %p53_p0, %p52_p13 }
  0x20   : > { %s40_s22 = ssub.s32 %s11917_s19, %s13320_s12  ;;  %s208_s25 = sand.u32 1, %s11909_s17  }
  0x21   : > { %p43_p9 = scmp.eq.s32.totalorder %s40_s22, 0  ;;  %s11610_s26 = smul.u32 24, %s208_s25 }
  0x22   : > { %p12039_p10 = pnand %p11649_p3, %p54_p5  ;;  %s11611_s30 = smul.u32 48, %s11917_s19 }
  0x23   : > { %s12044_s29 = scalar_select %p43_p9, %s11909_s17, %s45_s13  }
  0x24   : > { %s212_s5 = scalar_lea.vmem [#allocation3], %s11610_s26  ;;  %s220_s11 = scalar_lea.hbm %s13286_s0, %s11611_s30 }
  0x25   : > { %13310 = sst [smem:[#allocation20_spill]] %s12044_s29  ;;  %s223_s6 = sshll.u32 %s212_s5, 4  ;;  %s224_s6 = int_to_ptr.vmem [resolvable:$true] %s223_s6 }
  0x26   : > { %s221_s8 = sshll.u32 %s220_s11, 4  ;;  %s233_s9 = sand.u32 1, %s11921_s20   ;;  %s222_s8 = int_to_ptr.hbm [resolvable:$true] %s221_s8 }
  0x27   : > { %s209_s22 = scalar_lea.sflag [#allocation4], %s208_s25  ;;  %s13311_s2 = smov 8  }
  0x28   : > { %s13312_s3 = smov 128   ;;  %s7659_s19 = scalar_lea.hbm %s13287_s1, %s11611_s30 }
  0x29   : > { %11639 = dma.hbm_to_vmem [thread:$0]  (!%p12039_p10), %s222_s8, 384, %s224_s6, %s209_s22, %s13312_s3, %s13312_s3, %s13311_s2  }
  0x2a   : > { %s7660_s5 = scalar_lea.hbm %s7659_s19, 24  ;;  %s237_s29 = scalar_lea.vmem [#allocation6], %s11610_s26 }
  0x2b   : > { %s249_s17 = sshll.u32 %s237_s29, 4  ;;  %s247_s7 = sshll.u32 %s7660_s5, 4  ;;  %s250_s17 = int_to_ptr.vmem [resolvable:$true] %s249_s17  ;;  %s248_s7 = int_to_ptr.hbm [resolvable:$true] %s247_s7 }
  0x2c   : > { %s234_s10 = scalar_lea.sflag [#allocation7], %s233_s9  ;;  %261 = sbr.rel (%p12007_p8) target bundleno = 993 (0x3e1), region = 36 }
  0x2d   : > { %11642 = dma.hbm_to_vmem [thread:$0]  (!%p12039_p10), %s248_s7, 384, %s250_s17, %s234_s10, %s13312_s3, %s13312_s3, %s13311_s2  }
  0x2e   : > { %s12067_s8 = sand.u32 (!%p12007_p8), 1, %s11905_s16  }
  0x2f   : > { %s12070_s19 = smul.u32 (!%p12007_p8), 24, %s12067_s8  ;;  %s264_s12 = scalar_lea.sflag (!%p12007_p8), [#allocation4], %s12067_s8 }
  0x31   : > { %s12074_s25 = scalar_lea.vmem [#allocation3], %s12070_s19 }
  0x32   : > { %11880 = dma.done.wait (%p11994_p4), %s264_s12, 384  }
  0x33   : > { %11882 = vsyncadd (%p11994_p4), %s264_s12, 4294966912  ;;  %s273_s2 = sand.u32 1, %s11985_s21   ;;  %s12082_s17 = scalar_lea.vmem [#allocation6], %s12070_s19 }
  0x34   : > { %s274_s3 = scalar_lea.sflag [#allocation7], %s273_s2 }
  0x35   : > { %11884 = dma.done.wait (%p11994_p4), %s274_s3, 384  }
  0x36   : > { %11886 = vsyncadd (%p11994_p4), %s274_s3, 4294966912 }
  0x37   : > { %11888 = dma.done.wait (%p59_p1), [#allocation7], 98304  }
  0x38   : > { %11890 = vsyncadd (%p59_p1), [#allocation7], 4294868992 }
  0x39   : > { %11892 = dma.done.wait (%p59_p1), [#allocation10], 32  }
  0x3a   : > { %11894 = vsyncadd (%p59_p1), [#allocation10], 4294967264  ;;  %v7823_v0 = vld [vmem:[#allocation8 + $0x70] sm:$0xf]  ;;  %v10857_v1 = vld [vmem:[#allocation8 + $0x74] sm:$0xf0] }
  0x3b   : > { %v7887_v2 = vld [vmem:[#allocation8 + $0xf0] sm:$0xf]  ;;  %v7824_v3 = vor.u32 %v10857_v1, %v7823_v0  ;;  %v10873_v4 = vld [vmem:[#allocation8 + $0xf4] sm:$0xf0]  ;;  %v10856_v5 = vld [vmem:[#allocation8 + $0x74] sm:$0xf] }
  0x3c   : > { %v7825_v6 = vld [vmem:[#allocation8 + $0x78] sm:$0xf0]  ;;  %v7888_v7 = vor.u32 %v10873_v4, %v7887_v2  ;;  %v10872_v9 = vld [vmem:[#allocation8 + $0xf4] sm:$0xf]  ;;  %v7815_v11 = vld [vmem:[#allocation8 + $0x60] sm:$0xf] }
  0x3d   : > { %v7828_v8 = vor.u32 %v10856_v5, %v7825_v6  ;;  %v7889_v10 = vld [vmem:[#allocation8 + $0xf8] sm:$0xf0]  ;;  %552 = vmatpush.bf16.msra.mxu0 %v7824_v3  ;;  %v10855_v13 = vld [vmem:[#allocation8 + $0x64] sm:$0xf0]  ;;  %v7879_v14 = vld [vmem:[#allocation8 + $0xe0] sm:$0xf] }
  0x3e   : > { %v7892_v12 = vor.u32 %v10872_v9, %v7889_v10  ;;  %v10871_v15 = vld [vmem:[#allocation8 + $0xe4] sm:$0xf0]  ;;  %570 = vmatpush.bf16.msra.mxu1 %v7888_v7  ;;  %v7816_v16 = vor.u32 %v10855_v13, %v7815_v11  ;;  %v10854_v18 = vld [vmem:[#allocation8 + $0x64] sm:$0xf]  ;;  %v7817_v19 = vld [vmem:[#allocation8 + $0x68] sm:$0xf0] }
  0x3f   : > { %588 = vmatpush.bf16.msra.mxu2 %v7828_v8  ;;  %v7880_v17 = vor.u32 %v10871_v15, %v7879_v14  ;;  %v10870_v20 = vld [vmem:[#allocation8 + $0xe4] sm:$0xf]  ;;  %v7820_v21 = vor.u32 %v10854_v18, %v7817_v19  ;;  %v7881_v22 = vld [vmem:[#allocation8 + $0xe8] sm:$0xf0]  ;;  %v7807_v23 = vld [vmem:[#allocation8 + $0x50] sm:$0xf] }
  0x40   : > { %606 = vmatpush.bf16.msra.mxu3 %v7892_v12  ;;  %v10853_v24 = vld [vmem:[#allocation8 + $0x54] sm:$0xf0]  ;;  %v7884_v25 = vor.u32 %v10870_v20, %v7881_v22  ;;  %v7871_v26 = vld [vmem:[#allocation8 + $0xd0] sm:$0xf]  ;;  %v10852_v28 = vld [vmem:[#allocation8 + $0x54] sm:$0xf] }
  0x41   : > { %v10869_v27 = vld [vmem:[#allocation8 + $0xd4] sm:$0xf0]  ;;  %553 = vmatpush.bf16.msra.mxu0 %v7816_v16  ;;  %v7808_v29 = vor.u32 %v10853_v24, %v7807_v23  ;;  %v7809_v30 = vld [vmem:[#allocation8 + $0x58] sm:$0xf0]  ;;  %v10868_v31 = vld [vmem:[#allocation8 + $0xd4] sm:$0xf] }
  0x42   : > { %v7873_v32 = vld [vmem:[#allocation8 + $0xd8] sm:$0xf0]  ;;  %571 = vmatpush.bf16.msra.mxu1 %v7880_v17  ;;  %v7872_v33 = vor.u32 %v10869_v27, %v7871_v26  ;;  %v7812_v34 = vor.u32 %v10852_v28, %v7809_v30  ;;  %v7799_v35 = vld [vmem:[#allocation8 + $0x40] sm:$0xf]  ;;  %v10851_v36 = vld [vmem:[#allocation8 + $0x44] sm:$0xf0] }
  0x43   : > { %589 = vmatpush.bf16.msra.mxu2 %v7820_v21  ;;  %v7863_v37 = vld [vmem:[#allocation8 + $0xc0] sm:$0xf]  ;;  %v7876_v38 = vor.u32 %v10868_v31, %v7873_v32  ;;  %v10867_v39 = vld [vmem:[#allocation8 + $0xc4] sm:$0xf0]  ;;  %v10850_v40 = vld [vmem:[#allocation8 + $0x44] sm:$0xf]  ;;  %v7800_v44 = vor.u32 %v10851_v36, %v7799_v35 }
  0x44   : > { %607 = vmatpush.bf16.msra.mxu3 %v7884_v25  ;;  %v7801_v41 = vld [vmem:[#allocation8 + $0x48] sm:$0xf0]  ;;  %v10866_v42 = vld [vmem:[#allocation8 + $0xc4] sm:$0xf]  ;;  %v7864_v45 = vor.u32 %v10867_v39, %v7863_v37  ;;  %v7791_v47 = vld [vmem:[#allocation8 + $0x30] sm:$0xf] }
  0x45   : > { %v7865_v43 = vld [vmem:[#allocation8 + $0xc8] sm:$0xf0]  ;;  %554 = vmatpush.bf16.msra.mxu0 %v7808_v29  ;;  %v7804_v46 = vor.u32 %v10850_v40, %v7801_v41  ;;  %v10849_v48 = vld [vmem:[#allocation8 + $0x34] sm:$0xf0]  ;;  %v7855_v49 = vld [vmem:[#allocation8 + $0xb0] sm:$0xf] }
  0x46   : > { %572 = vmatpush.bf16.msra.mxu1 %v7872_v33  ;;  %v7868_v50 = vor.u32 %v10866_v42, %v7865_v43  ;;  %v10865_v51 = vld [vmem:[#allocation8 + $0xb4] sm:$0xf0]  ;;  %v10848_v52 = vld [vmem:[#allocation8 + $0x34] sm:$0xf]  ;;  %v7793_v53 = vld [vmem:[#allocation8 + $0x38] sm:$0xf0]  ;;  %v7792_v56 = vor.u32 %v10849_v48, %v7791_v47 }
  0x47   : > { %590 = vmatpush.bf16.msra.mxu2 %v7812_v34  ;;  %v10864_v54 = vld [vmem:[#allocation8 + $0xb4] sm:$0xf]  ;;  %v7857_v55 = vld [vmem:[#allocation8 + $0xb8] sm:$0xf0]  ;;  %v7856_v57 = vor.u32 %v10865_v51, %v7855_v49  ;;  %v7796_v58 = vor.u32 %v10848_v52, %v7793_v53  ;;  %v7783_v59 = vld [vmem:[#allocation8 + $0x20] sm:$0xf] }
  0x48   : > { %608 = vmatpush.bf16.msra.mxu3 %v7876_v38  ;;  %v10847_v60 = vld [vmem:[#allocation8 + $0x24] sm:$0xf0]  ;;  %v7847_v61 = vld [vmem:[#allocation8 + $0xa0] sm:$0xf]  ;;  %v7860_v62 = vor.u32 %v10864_v54, %v7857_v55  ;;  %v10846_v0 = vld [vmem:[#allocation8 + $0x24] sm:$0xf] }
  0x49   : > { %555 = vmatpush.bf16.msra.mxu0 %v7800_v44  ;;  %v10863_v63 = vld [vmem:[#allocation8 + $0xa4] sm:$0xf0]  ;;  %v7785_v1 = vld [vmem:[#allocation8 + $0x28] sm:$0xf0]  ;;  %v10862_v2 = vld [vmem:[#allocation8 + $0xa4] sm:$0xf]  ;;  %v7784_v4 = vor.u32 %v10847_v60, %v7783_v59 }
  0x4a   : > { %573 = vmatpush.bf16.msra.mxu1 %v7864_v45  ;;  %v7849_v3 = vld [vmem:[#allocation8 + $0xa8] sm:$0xf0]  ;;  %v7775_v5 = vld [vmem:[#allocation8 + $0x10] sm:$0xf]  ;;  %v10845_v6 = vld [vmem:[#allocation8 + $0x14] sm:$0xf0]  ;;  %v7848_v7 = vor.u32 %v10863_v63, %v7847_v61  ;;  %v7788_v8 = vor.u32 %v10846_v0, %v7785_v1 }
  0x4b   : > { %591 = vmatpush.bf16.msra.mxu2 %v7804_v46  ;;  %v7839_v9 = vld [vmem:[#allocation8 + $0x90] sm:$0xf]  ;;  %v10861_v10 = vld [vmem:[#allocation8 + $0x94] sm:$0xf0]  ;;  %v10844_v11 = vld [vmem:[#allocation8 + $0x14] sm:$0xf]  ;;  %v7852_v12 = vor.u32 %v10862_v2, %v7849_v3  ;;  %v7776_v18 = vor.u32 %v10845_v6, %v7775_v5 }
  0x4c   : > { %609 = vmatpush.bf16.msra.mxu3 %v7868_v50  ;;  %v7777_v13 = vld [vmem:[#allocation8 + $0x18] sm:$0xf0]  ;;  %v12100_v15 = vld [vmem:[%s12074_s25 + $0x8] sm:$0xff]  ;;  %v10860_v16 = vld [vmem:[#allocation8 + $0x94] sm:$0xf]  ;;  %v7840_v20 = vor.u32 %v10861_v10, %v7839_v9  ;;  %vm989_vm1 = vcmask 1046528  }
  0x4d   : > { %556 = vmatpush.bf16.msra.mxu0 %v7792_v56  ;;  %v12097_v14 = vld [vmem:[%s12074_s25] sm:$0xff]  ;;  %326 = vst [vmem:[#allocation2 + $0x8] sm:$0xff] %v12100_v15  ;;  %v7780_v21 = vor.u32 %v10844_v11, %v7777_v13  ;;  %v10843_v22 = vld [vmem:[#allocation8 + $0x4] sm:$0xf0]  ;;  %v7769_v27 = vld [vmem:[#allocation8 + $0x8] sm:$0xf0] }
  0x4e   : > { %574 = vmatpush.bf16.msra.mxu1 %v7856_v57  ;;  %v7841_v17 = vld [vmem:[#allocation8 + $0x98] sm:$0xf0]  ;;  %325 = vst [vmem:[#allocation2] sm:$0xff] %v12097_v14  ;;  %v7767_v19 = vld [vmem:[#allocation8] sm:$0xf]  ;;  %v324_v56 = vld [vmem:[%s12074_s25 + $0x10] sm:$0xff] }
  0x4f   : > { %592 = vmatpush.bf16.msra.mxu2 %v7796_v58  ;;  %v7831_v23 = vld [vmem:[#allocation8 + $0x80] sm:$0xf]  ;;  %v10859_v24 = vld [vmem:[#allocation8 + $0x84] sm:$0xf0]  ;;  %v7844_v25 = vor.u32 %v10860_v16, %v7841_v17  ;;  %v10842_v26 = vld [vmem:[#allocation8 + $0x4] sm:$0xf]  ;;  %v7768_v32 = vor.u32 %v10843_v22, %v7767_v19 }
  0x50   : > { %610 = vmatpush.bf16.msra.mxu3 %v7860_v62  ;;  %v10858_v28 = vld [vmem:[#allocation8 + $0x84] sm:$0xf]  ;;  %v7833_v29 = vld [vmem:[#allocation8 + $0x88] sm:$0xf0]  ;;  %v10888_v30 = vld [vmem:[#allocation8 + $0x174] sm:$0xf]  ;;  %v7832_v36 = vor.u32 %v10859_v24, %v7831_v23  ;;  %v7772_v37 = vor.u32 %v10842_v26, %v7769_v27  ;;  %v12106_v26 = vunpack.c.l.b16 %v324_v56 }
  0x51   : > { %557 = vmatpush.bf16.msra.mxu0 %v7784_v4  ;;  %v7953_v31 = vld [vmem:[#allocation8 + $0x178] sm:$0xf0]  ;;  %v10904_v33 = vld [vmem:[#allocation8 + $0x1f4] sm:$0xf]  ;;  %v7951_v35 = vld [vmem:[#allocation8 + $0x170] sm:$0xf]  ;;  %v7836_v41 = vor.u32 %v10858_v28, %v7833_v29  ;;  %v12108_v29 = vunpack.c.h.b16 %v324_v56 }
  0x52   : > { %575 = vmatpush.bf16.msra.mxu1 %v7848_v7  ;;  %v8017_v34 = vld [vmem:[#allocation8 + $0x1f8] sm:$0xf0]  ;;  %v10889_v38 = vld [vmem:[#allocation8 + $0x174] sm:$0xf0]  ;;  %v8015_v39 = vld [vmem:[#allocation8 + $0x1f0] sm:$0xf]  ;;  %v7956_v44 = vor.u32 %v10888_v30, %v7953_v31 }
  0x53   : > { %593 = vmatpush.bf16.msra.mxu2 %v7788_v8  ;;  %v10905_v40 = vld [vmem:[#allocation8 + $0x1f4] sm:$0xf0]  ;;  %v10886_v45 = vld [vmem:[#allocation8 + $0x164] sm:$0xf]  ;;  %v8020_v48 = vor.u32 %v10904_v33, %v8017_v34  ;;  %v7945_v49 = vld [vmem:[#allocation8 + $0x168] sm:$0xf0]  ;;  %v7952_v54 = vor.u32 %v10889_v38, %v7951_v35  ;;  %v665_v34 = vunpack.c.l.b16 %v12097_v14  ;;  %v12112_v35 = vunpack.c.l.b16 %v12100_v15 }
  0x54   : > { %611 = vmatpush.bf16.msra.mxu3 %v7852_v12  ;;  %v10841_v46 = vld [vmem:[#allocation2 + $0x4] sm:$0xf0]  ;;  %v7761_v47 = vld [vmem:[#allocation2 + $0x8] sm:$0xf0]  ;;  %v10902_v52 = vld [vmem:[#allocation8 + $0x1e4] sm:$0xf]  ;;  %v8016_v57 = vor.u32 %v10905_v40, %v8015_v39  ;;  %v7948_v58 = vor.u32 %v10886_v45, %v7945_v49  ;;  %v666_v40 = vunpack.c.h.b16 %v12097_v14 }
  0x55   : > { %558 = vmatpush.bf16.msra.mxu0 %v7776_v18  ;;  %v7759_v42 = vld [vmem:[#allocation2] sm:$0xf]  ;;  %v10840_v43 = vld [vmem:[#allocation2 + $0x4] sm:$0xf]  ;;  %v8009_v53 = vld [vmem:[#allocation8 + $0x1e8] sm:$0xf0] }
  0x56   : > { %576 = vmatpush.bf16.msra.mxu1 %v7840_v20  ;;  %v7760_v50 = vor.u32 %v10841_v46, %v7759_v42  ;;  %v7764_v51 = vor.u32 %v10840_v43, %v7761_v47  ;;  %v7943_v55 = vld [vmem:[#allocation8 + $0x160] sm:$0xf]  ;;  %v10887_v59 = vld [vmem:[#allocation8 + $0x164] sm:$0xf0]  ;;  %v8012_v62 = vor.u32 %v10902_v52, %v8009_v53  ;;  %v10884_v63 = vld [vmem:[#allocation8 + $0x154] sm:$0xf]  ;;  %v386_v42 = vpack.c.b16 %v12106_v26, %v12106_v26 }
  0x57   : > { %594 = vmatpush.bf16.msra.mxu2 %v7780_v21  ;;  %v8007_v60 = vld [vmem:[#allocation8 + $0x1e0] sm:$0xf]  ;;  %v10903_v61 = vld [vmem:[#allocation8 + $0x1e4] sm:$0xf0]  ;;  %v7937_v0 = vld [vmem:[#allocation8 + $0x158] sm:$0xf0]  ;;  %v7944_v3 = vor.u32 %v10887_v59, %v7943_v55  ;;  %v387_v47 = vpack.c.b16 %v12108_v29, %v12108_v29 }
  0x58   : > { %612 = vmatpush.bf16.msra.mxu3 %v7844_v25  ;;  %327 = vst [vmem:[#allocation2 + $0x10] sm:$0xff] %v324_v56  ;;  %v10900_v1 = vld [vmem:[#allocation8 + $0x1d4] sm:$0xf]  ;;  %v8001_v2 = vld [vmem:[#allocation8 + $0x1d8] sm:$0xf0]  ;;  %v8008_v4 = vor.u32 %v10903_v61, %v8007_v60  ;;  %v7940_v5 = vor.u32 %v10884_v63, %v7937_v0  ;;  %vm1593_vm3 = vcmask 1045504  }
  0x59   : > { %559 = vmatpush.bf16.msra.mxu0 %v7768_v32  ;;  %v7935_v6 = vld [vmem:[#allocation8 + $0x150] sm:$0xf]  ;;  %v10885_v7 = vld [vmem:[#allocation8 + $0x154] sm:$0xf0]  ;;  %v8004_v9 = vor.u32 %v10900_v1, %v8001_v2  ;;  %v10882_v11 = vld [vmem:[#allocation8 + $0x144] sm:$0xf] }
  0x5a   : > { %577 = vmatpush.bf16.msra.mxu1 %v7832_v36  ;;  %v7999_v8 = vld [vmem:[#allocation8 + $0x1d0] sm:$0xf]  ;;  %v10901_v10 = vld [vmem:[#allocation8 + $0x1d4] sm:$0xf0]  ;;  %v7929_v12 = vld [vmem:[#allocation8 + $0x148] sm:$0xf0]  ;;  %v7936_v17 = vor.u32 %v10885_v7, %v7935_v6 }
  0x5b   : > { %595 = vmatpush.bf16.msra.mxu2 %v7772_v37  ;;  %v10898_v13 = vld [vmem:[#allocation8 + $0x1c4] sm:$0xf]  ;;  %v7993_v16 = vld [vmem:[#allocation8 + $0x1c8] sm:$0xf0]  ;;  %v8000_v19 = vor.u32 %v10901_v10, %v7999_v8  ;;  %v7932_v20 = vor.u32 %v10882_v11, %v7929_v12  ;;  %v7927_v21 = vld [vmem:[#allocation8 + $0x140] sm:$0xf] }
  0x5c   : > { %613 = vmatpush.bf16.msra.mxu3 %v7836_v41  ;;  %560 = vmatmul.bf16.vlgmr.msra.gmra.mxu0 %v7760_v50  ;;  %v328_v18 = vld [vmem:[%s12082_s17] sm:$0xff]  ;;  %v7991_v23 = vld [vmem:[#allocation8 + $0x1c0] sm:$0xf]  ;;  %v7996_v24 = vor.u32 %v10898_v13, %v7993_v16  ;;  %v7921_v28 = vld [vmem:[#allocation8 + $0x138] sm:$0xf0]  ;;  %v12116_v41 = vunpack.c.h.b16 %v12100_v15  ;;  %v12123_v15 = vpack.c.b16 %v12112_v35, %v665_v34  ;;  %vm2197_vm5 = vcmask 1044480  }
  0x5d   : > { %578 = vmatmul.bf16.vlgmr.msra.gmra.mxu1 %v7764_v51  ;;  %872 = vmatpush.bf16.msrb.mxu0 %v7952_v54  ;;  %v10883_v22 = vld [vmem:[#allocation8 + $0x144] sm:$0xf0]  ;;  %v10880_v27 = vld [vmem:[#allocation8 + $0x134] sm:$0xf]  ;;  %v7985_v31 = vld [vmem:[#allocation8 + $0x1b8] sm:$0xf0] }
  0x5e   : > { %596 = vmatmul.bf16.vlgmr.msra.gmra.mxu2 %v7760_v50  ;;  %890 = vmatpush.bf16.msrb.mxu1 %v8016_v57  ;;  %v10899_v25 = vld [vmem:[#allocation8 + $0x1c4] sm:$0xf0]  ;;  %v10896_v30 = vld [vmem:[#allocation8 + $0x1b4] sm:$0xf]  ;;  %v7928_v32 = vor.u32 %v10883_v22, %v7927_v21  ;;  %v7919_v33 = vld [vmem:[#allocation8 + $0x130] sm:$0xf]  ;;  %v7924_v37 = vor.u32 %v10880_v27, %v7921_v28  ;;  %v12126_v57 = vpack.c.b16 %v12116_v41, %v666_v40 }
  0x5f   : > { %908 = vmatpush.bf16.msrb.mxu2 %v7956_v44  ;;  %614 = vmatmul.bf16.vlgmr.msra.gmra.mxu3 %v7764_v51  ;;  %v7992_v36 = vor.u32 %v10899_v25, %v7991_v23  ;;  %v10881_v38 = vld [vmem:[#allocation8 + $0x134] sm:$0xf0]  ;;  %v7983_v39 = vld [vmem:[#allocation8 + $0x1b0] sm:$0xf]  ;;  %331 = vst [vmem:[#allocation2 + $0x18] sm:$0xff] %v328_v18  ;;  %v7988_v43 = vor.u32 %v10896_v30, %v7985_v31  ;;  %s13240_s21 = scalar_lea.vmem [#allocation11], %s12070_s19 }
  0x60   : > { %926 = vmatpush.bf16.msrb.mxu3 %v8020_v48  ;;  %v10897_v44 = vld [vmem:[#allocation8 + $0x1b4] sm:$0xf0]  ;;  %v10878_v45 = vld [vmem:[#allocation8 + $0x124] sm:$0xf]  ;;  %v7913_v46 = vld [vmem:[#allocation8 + $0x128] sm:$0xf0]  ;;  %v7920_v50 = vor.u32 %v10881_v38, %v7919_v33 }
  0x61   : > { %873 = vmatpush.bf16.msrb.mxu0 %v7944_v3  ;;  %v10894_v48 = vld [vmem:[#allocation8 + $0x1a4] sm:$0xf]  ;;  %v7977_v49 = vld [vmem:[#allocation8 + $0x1a8] sm:$0xf0]  ;;  %v7911_v51 = vld [vmem:[#allocation8 + $0x120] sm:$0xf]  ;;  %v7984_v52 = vor.u32 %v10897_v44, %v7983_v39  ;;  %v7916_v53 = vor.u32 %v10878_v45, %v7913_v46 }
  0x62   : > { %891 = vmatpush.bf16.msrb.mxu1 %v8008_v4  ;;  %v10879_v14 = vld [vmem:[#allocation8 + $0x124] sm:$0xf0]  ;;  %v7975_v54 = vld [vmem:[#allocation8 + $0x1a0] sm:$0xf]  ;;  %v10876_v56 = vld [vmem:[#allocation8 + $0x114] sm:$0xf] }
  0x63   : > { %909 = vmatpush.bf16.msrb.mxu2 %v7948_v58  ;;  %v10895_v55 = vld [vmem:[#allocation8 + $0x1a4] sm:$0xf0]  ;;  %v7980_v58 = vor.u32 %v10894_v48, %v7977_v49  ;;  %v7905_v59 = vld [vmem:[#allocation8 + $0x118] sm:$0xf0]  ;;  %v10892_v60 = vld [vmem:[#allocation8 + $0x194] sm:$0xf]  ;;  %v7912_v1 = vor.u32 %v10879_v14, %v7911_v51 }
  0x64   : > { %927 = vmatpush.bf16.msrb.mxu3 %v8012_v62  ;;  %v7969_v61 = vld [vmem:[#allocation8 + $0x198] sm:$0xf0]  ;;  %v7903_v62 = vld [vmem:[#allocation8 + $0x110] sm:$0xf]  ;;  %v10877_v63 = vld [vmem:[#allocation8 + $0x114] sm:$0xf0]  ;;  %v7976_v2 = vor.u32 %v10895_v55, %v7975_v54  ;;  %v7908_v6 = vor.u32 %v10876_v56, %v7905_v59 }
  0x65   : > { %874 = vmatpush.bf16.msrb.mxu0 %v7936_v17  ;;  %v7967_v0 = vld [vmem:[#allocation8 + $0x190] sm:$0xf]  ;;  %v10893_v3 = vld [vmem:[#allocation8 + $0x194] sm:$0xf0]  ;;  %v10874_v7 = vld [vmem:[#allocation8 + $0x104] sm:$0xf]  ;;  %v7972_v12 = vor.u32 %v10892_v60, %v7969_v61 }
  0x66   : > { %892 = vmatpush.bf16.msrb.mxu1 %v8000_v19  ;;  %v627_v4 = vld [vmem:[#allocation2 + $0x18] sm:$0x11]  ;;  %v693_v11 = vshll.u32 %v12126_v57, 16  ;;  %v10890_v13 = vld [vmem:[#allocation8 + $0x184] sm:$0xf]  ;;  %v679_v17 = vshrl.u32 %v12123_v15, 16  ;;  %v7968_v25 = vor.u32 %v10893_v3, %v7967_v0 }
  0x67   : > { %910 = vmatpush.bf16.msrb.mxu2 %v7940_v5  ;;  %v681_v5 = vshll.u32 %v12123_v15, 16  ;;  %v7897_v8 = vld [vmem:[#allocation8 + $0x108] sm:$0xf0]  ;;  %v672_v10 = vunpack.c.h.b16 %v627_v4  ;;  %v7895_v18 = vld [vmem:[#allocation8 + $0x100] sm:$0xf]  ;;  %s11614_s23 = smul.u32 24, %s11913_s18 }
  0x68   : > { %928 = vmatpush.bf16.msrb.mxu3 %v8004_v9  ;;  %v671_v9 = vunpack.c.l.b16 %v627_v4  ;;  %v7961_v16 = vld [vmem:[#allocation8 + $0x188] sm:$0xf0]  ;;  %v10875_v19 = vld [vmem:[#allocation8 + $0x104] sm:$0xf0]  ;;  %v10920_v22 = vld [vmem:[#allocation8 + $0x274] sm:$0xf]  ;;  %v7900_v27 = vor.u32 %v10874_v7, %v7897_v8 }
  0x69   : > { %875 = vmatpush.bf16.msrb.mxu0 %v7928_v32  ;;  %v12135_v21 = vpack.c.b16 %v672_v10, %v12108_v29  ;;  %v8081_v23 = vld [vmem:[#allocation8 + $0x278] sm:$0xf0]  ;;  %v7959_v28 = vld [vmem:[#allocation8 + $0x180] sm:$0xf]  ;;  %v683_v30 = vrot.slane %v681_v5, 1  ;;  %v7964_v39 = vor.u32 %v10890_v13, %v7961_v16  ;;  %v7896_v49 = vor.u32 %v10875_v19, %v7895_v18  ;;  %s7609_s26 = scalar_lea.hbm %s13290_s4, %s11614_s23  ;;  %s7610_s18 = sshll.u32 %s13240_s21, 4  ;;  %s7611_s18 = int_to_ptr.vmem [resolvable:$true] %s7610_s18 }
  0x6a   : > { %893 = vmatpush.bf16.msrb.mxu1 %v7992_v36  ;;  %v10936_v31 = vld [vmem:[#allocation8 + $0x2f4] sm:$0xf]  ;;  %v8145_v32 = vld [vmem:[#allocation8 + $0x2f8] sm:$0xf0]  ;;  %v10891_v33 = vld [vmem:[#allocation8 + $0x184] sm:$0xf0]  ;;  %v8084_v40 = vor.u32 %v10920_v22, %v8081_v23 }
  0x6b   : > { %911 = vmatpush.bf16.msrb.mxu2 %v7932_v20  ;;  %v12132_v20 = vpack.c.b16 %v671_v9, %v12106_v26  ;;  %v691_v36 = vshrl.u32 %v12126_v57, 16  ;;  %v698_v38 = vshll.u32 %v12135_v21, 16  ;;  %v8143_v44 = vld [vmem:[#allocation8 + $0x2f0] sm:$0xf]  ;;  %v8148_v45 = vor.u32 %v10936_v31, %v8145_v32  ;;  %v10937_v46 = vld [vmem:[#allocation8 + $0x2f4] sm:$0xf0] }
  0x6c   : > { %929 = vmatpush.bf16.msrb.mxu3 %v7996_v24  ;;  %565 = vmatmul.bf16.gmra.mxu0 %v386_v42  ;;  %v7904_v24 = vor.u32 %v10877_v63, %v7903_v62  ;;  %v8073_v48 = vld [vmem:[#allocation8 + $0x268] sm:$0xf0]  ;;  %vm677_vm0 = vsmask.f32 7424  ;;  %v7960_v14 = vor.u32 %v10891_v33, %v7959_v28  ;;  %v10934_v54 = vld [vmem:[#allocation8 + $0x2e4] sm:$0xf]  ;;  %v8144_v56 = vor.u32 %v10937_v46, %v8143_v44 }
  0x6d   : > { %583 = vmatmul.bf16.gmra.mxu1 %v387_v47  ;;  %876 = vmatpush.bf16.msrb.mxu0 %v7920_v50  ;;  %v686_v34 = vshll.u32 %v12132_v20, 16  ;;  %v684_v50 = vor.u32 %v683_v30, %v679_v17  ;;  %v8137_v55 = vld [vmem:[#allocation8 + $0x2e8] sm:$0xf0]  ;;  %v10919_v59 = vld [vmem:[#allocation8 + $0x264] sm:$0xf0]  ;;  %s7612_s27 = sshll.u32 %s7609_s26, 4  ;;  %s7613_s27 = int_to_ptr.hbm [resolvable:$true] %s7612_s27 }
  0x6e   : > { %601 = vmatmul.bf16.gmra.mxu2 %v386_v42  ;;  %894 = vmatpush.bf16.msrb.mxu1 %v7984_v52  ;;  %v8079_v42 = vld [vmem:[#allocation8 + $0x270] sm:$0xf]  ;;  %v12142_v52 = vrot.slane %v698_v38, 1  ;;  %v8135_v60 = vld [vmem:[#allocation8 + $0x2e0] sm:$0xf]  ;;  %s7595_s29 = scalar_lea.sflag [#allocation5], %s12067_s8 }
  0x6f   : > { %912 = vmatpush.bf16.msrb.mxu2 %v7924_v37  ;;  %619 = vmatmul.bf16.gmra.mxu3 %v387_v47  ;;  %v695_v37 = vrot.slane %v693_v11, 1  ;;  %v10918_v47 = vld [vmem:[#allocation8 + $0x264] sm:$0xf]  ;;  %v12140_v51 = vrot.slane %v686_v34, 1  ;;  %v10935_v61 = vld [vmem:[#allocation8 + $0x2e4] sm:$0xf0] }
  0x70   : > { %930 = vmatpush.bf16.msrb.mxu3 %v7988_v43  ;;  %v10921_v43 = vld [vmem:[#allocation8 + $0x274] sm:$0xf0]  ;;  %v8076_v57 = vor.u32 %v10918_v47, %v8073_v48  ;;  %v10916_v62 = vld [vmem:[#allocation8 + $0x254] sm:$0xf]  ;;  %v8065_v63 = vld [vmem:[#allocation8 + $0x258] sm:$0xf0] }
  0x71   : > { %877 = vmatpush.bf16.msrb.mxu0 %v7912_v1  ;;  %v696_v15 = vor.u32 %v695_v37, %v691_v36  ;;  %v689_v0 = vsel %vm677_vm0, %v684_v50, %v12140_v51  ;;  %v10932_v4 = vld [vmem:[#allocation8 + $0x2d4] sm:$0xf]  ;;  %v8129_v5 = vld [vmem:[#allocation8 + $0x2d8] sm:$0xf0]  ;;  %v8068_v7 = vor.u32 %v10916_v62, %v8065_v63  ;;  %v8063_v8 = vld [vmem:[#allocation8 + $0x250] sm:$0xf] }
  0x72   : > { %895 = vmatpush.bf16.msrb.mxu1 %v7976_v2  ;;  %v8140_v2 = vor.u32 %v10934_v54, %v8137_v55  ;;  %v10917_v9 = vld [vmem:[#allocation8 + $0x254] sm:$0xf0]  ;;  %v8127_v10 = vld [vmem:[#allocation8 + $0x2d0] sm:$0xf]  ;;  %v8057_v13 = vld [vmem:[#allocation8 + $0x248] sm:$0xf0]  ;;  %v8132_v16 = vor.u32 %v10932_v4, %v8129_v5 }
  0x73   : > { %913 = vmatpush.bf16.msrb.mxu2 %v7916_v53  ;;  %v8080_v53 = vor.u32 %v10921_v43, %v8079_v42  ;;  %v701_v1 = vsel %vm677_vm0, %v696_v15, %v12142_v52  ;;  %v10933_v11 = vld [vmem:[#allocation8 + $0x2d4] sm:$0xf0]  ;;  %v8064_v17 = vor.u32 %v10917_v9, %v8063_v8  ;;  %v10930_v18 = vld [vmem:[#allocation8 + $0x2c4] sm:$0xf]  ;;  %v8121_v19 = vld [vmem:[#allocation8 + $0x2c8] sm:$0xf0] }
  0x74   : > { %931 = vmatpush.bf16.msrb.mxu3 %v7980_v58  ;;  %v8071_v58 = vld [vmem:[#allocation8 + $0x260] sm:$0xf]  ;;  %v8128_v22 = vor.u32 %v10933_v11, %v8127_v10  ;;  %v10931_v28 = vld [vmem:[#allocation8 + $0x2c4] sm:$0xf0]  ;;  %v10912_v30 = vld [vmem:[#allocation8 + $0x234] sm:$0xf]  ;;  %v8124_v32 = vor.u32 %v10930_v18, %v8121_v19 }
  0x75   : > { %878 = vmatpush.bf16.msrb.mxu0 %v7904_v24  ;;  %v8072_v3 = vor.u32 %v10919_v59, %v8071_v58  ;;  %v8055_v24 = vld [vmem:[#allocation8 + $0x240] sm:$0xf]  ;;  %v8049_v31 = vld [vmem:[#allocation8 + $0x238] sm:$0xf0]  ;;  %v702_v34 = vshrl.u32 %v12132_v20, 16  ;;  %v705_v47 = vshrl.u32 %v12135_v21, 16 }
  0x76   : > { %896 = vmatpush.bf16.msrb.mxu1 %v7968_v25  ;;  %v10915_v25 = vld [vmem:[#allocation8 + $0x244] sm:$0xf0]  ;;  %v10928_v36 = vld [vmem:[#allocation8 + $0x2b4] sm:$0xf]  ;;  %v8113_v37 = vld [vmem:[#allocation8 + $0x2b8] sm:$0xf0] }
  0x77   : > { %914 = vmatpush.bf16.msrb.mxu2 %v7908_v6  ;;  %v8136_v6 = vor.u32 %v10935_v61, %v8135_v60  ;;  %v8056_v33 = vor.u32 %v10915_v25, %v8055_v24  ;;  %v10913_v42 = vld [vmem:[#allocation8 + $0x234] sm:$0xf0]  ;;  %v8111_v43 = vld [vmem:[#allocation8 + $0x2b0] sm:$0xf]  ;;  %v8041_v46 = vld [vmem:[#allocation8 + $0x228] sm:$0xf0]  ;;  %v8116_v48 = vor.u32 %v10928_v36, %v8113_v37  ;;  %v707_v61 = vor.u32 %v705_v47, %v12142_v52 }
  0x78   : > { %932 = vmatpush.bf16.msrb.mxu3 %v7972_v12  ;;  %v10914_v12 = vld [vmem:[#allocation8 + $0x244] sm:$0xf]  ;;  %v10929_v44 = vld [vmem:[#allocation8 + $0x2b4] sm:$0xf0]  ;;  %v8039_v54 = vld [vmem:[#allocation8 + $0x220] sm:$0xf] }
  0x79   : > { %879 = vmatpush.bf16.msrb.mxu0 %v7896_v49  ;;  %v8060_v23 = vor.u32 %v10914_v12, %v8057_v13  ;;  %v10926_v50 = vld [vmem:[#allocation8 + $0x2a4] sm:$0xf]  ;;  %v8112_v15 = vor.u32 %v10929_v44, %v8111_v43  ;;  %v10911_v55 = vld [vmem:[#allocation8 + $0x224] sm:$0xf0]  ;;  %v10908_v59 = vld [vmem:[#allocation8 + $0x214] sm:$0xf] }
  0x7a   : > { %897 = vmatpush.bf16.msrb.mxu1 %v7960_v14  ;;  %v8105_v14 = vld [vmem:[#allocation8 + $0x2a8] sm:$0xf0]  ;;  %v10927_v58 = vld [vmem:[#allocation8 + $0x2a4] sm:$0xf0]  ;;  %v8033_v60 = vld [vmem:[#allocation8 + $0x218] sm:$0xf0]  ;;  %v8040_v63 = vor.u32 %v10911_v55, %v8039_v54 }
  0x7b   : > { %915 = vmatpush.bf16.msrb.mxu2 %v7900_v27  ;;  %v8119_v27 = vld [vmem:[#allocation8 + $0x2c0] sm:$0xf]  ;;  %v8108_v62 = vor.u32 %v10926_v50, %v8105_v14  ;;  %v8036_v4 = vor.u32 %v10908_v59, %v8033_v60  ;;  %v8031_v5 = vld [vmem:[#allocation8 + $0x210] sm:$0xf]  ;;  %v10906_v8 = vld [vmem:[#allocation8 + $0x204] sm:$0xf] }
  0x7c   : > { %933 = vmatpush.bf16.msrb.mxu3 %v7964_v39  ;;  %880 = vmatmul.bf16.vlgmr.msrb.gmra.mxu0 %v689_v0  ;;  %v8120_v38 = vor.u32 %v10931_v28, %v8119_v27  ;;  %v8052_v39 = vor.u32 %v10912_v30, %v8049_v31  ;;  %v8025_v9 = vld [vmem:[#allocation8 + $0x208] sm:$0xf0]  ;;  %v10952_v10 = vld [vmem:[#allocation8 + $0x374] sm:$0xf]  ;;  %v8209_v11 = vld [vmem:[#allocation8 + $0x378] sm:$0xf0] }
  0x7d   : > { %1160 = vmatpush.bf16.msra.mxu0 %v8080_v53  ;;  %898 = vmatmul.bf16.vlgmr.msrb.gmra.mxu1 %v701_v1  ;;  %v8023_v18 = vld [vmem:[#allocation8 + $0x200] sm:$0xf]  ;;  %v10907_v24 = vld [vmem:[#allocation8 + $0x204] sm:$0xf0]  ;;  %v8212_v28 = vor.u32 %v10952_v10, %v8209_v11  ;;  %v10968_v30 = vld [vmem:[#allocation8 + $0x3f4] sm:$0xf] }
  0x7e   : > { %1178 = vmatpush.bf16.msra.mxu1 %v8144_v56  ;;  %916 = vmatmul.bf16.vlgmr.msrb.gmra.mxu2 %v689_v0  ;;  %v8103_v56 = vld [vmem:[#allocation8 + $0x2a0] sm:$0xf]  ;;  %v10924_v0 = vld [vmem:[#allocation8 + $0x294] sm:$0xf]  ;;  %v10923_v27 = vld [vmem:[#allocation8 + $0x284] sm:$0xf0] }
  0x7f   : > { %1196 = vmatpush.bf16.msra.mxu2 %v8084_v40  ;;  %934 = vmatmul.bf16.vlgmr.msrb.gmra.mxu3 %v701_v1  ;;  %v8047_v40 = vld [vmem:[#allocation8 + $0x230] sm:$0xf]  ;;  %v8097_v1 = vld [vmem:[#allocation8 + $0x298] sm:$0xf0]  ;;  %v8087_v25 = vld [vmem:[#allocation8 + $0x280] sm:$0xf] }
  0x80   : > { %1214 = vmatpush.bf16.msra.mxu3 %v8148_v45  ;;  %v10910_v45 = vld [vmem:[#allocation8 + $0x224] sm:$0xf]  ;;  %v8048_v49 = vor.u32 %v10913_v42, %v8047_v40  ;;  %v8100_v12 = vor.u32 %v10924_v0, %v8097_v1  ;;  %v8273_v31 = vld [vmem:[#allocation8 + $0x3f8] sm:$0xf0]  ;;  %v8271_v36 = vld [vmem:[#allocation8 + $0x3f0] sm:$0xf]  ;;  %v8088_v44 = vor.u32 %v10923_v27, %v8087_v25 }
  0x81   : > { %1161 = vmatpush.bf16.msra.mxu0 %v8072_v3  ;;  %v8044_v53 = vor.u32 %v10910_v45, %v8041_v46  ;;  %v8104_v3 = vor.u32 %v10927_v58, %v8103_v56  ;;  %v10969_v37 = vld [vmem:[#allocation8 + $0x3f4] sm:$0xf0]  ;;  %v10950_v42 = vld [vmem:[#allocation8 + $0x364] sm:$0xf]  ;;  %v8201_v43 = vld [vmem:[#allocation8 + $0x368] sm:$0xf0]  ;;  %v8276_v45 = vor.u32 %v10968_v30, %v8273_v31 }
  0x82   : > { %1179 = vmatpush.bf16.msra.mxu1 %v8136_v6  ;;  %v10909_v6 = vld [vmem:[#allocation8 + $0x214] sm:$0xf0]  ;;  %v8272_v47 = vor.u32 %v10969_v37, %v8271_v36  ;;  %v12160_v14 = vrot.slane %v12132_v20, 1  ;;  %v12164_v54 = vrot.slane %v12135_v21, 1  ;;  %v8199_v55 = vld [vmem:[#allocation8 + $0x360] sm:$0xf] }
  0x83   : > { %1197 = vmatpush.bf16.msra.mxu2 %v8076_v57  ;;  %v704_v57 = vor.u32 %v702_v34, %v12140_v51  ;;  %v10925_v51 = vld [vmem:[#allocation8 + $0x294] sm:$0xf0]  ;;  %v8032_v13 = vor.u32 %v10909_v6, %v8031_v5  ;;  %v10951_v56 = vld [vmem:[#allocation8 + $0x364] sm:$0xf0]  ;;  %v8263_v58 = vld [vmem:[#allocation8 + $0x3e0] sm:$0xf] }
  0x84   : > { %1215 = vmatpush.bf16.msra.mxu3 %v8140_v2  ;;  %v950_v2 = vld [vmem:[#allocation2] sm:$0xee]  ;;  %v10953_v34 = vld [vmem:[#allocation8 + $0x374] sm:$0xf0]  ;;  %v10967_v59 = vld [vmem:[#allocation8 + $0x3e4] sm:$0xf0]  ;;  %v8200_v0 = vor.u32 %v10951_v56, %v8199_v55 }
  0x85   : > { %1162 = vmatpush.bf16.msra.mxu0 %v8064_v17  ;;  %v985_v52 = vunpack.c.l.b16 %v950_v2  ;;  %v8089_v17 = vld [vmem:[#allocation8 + $0x288] sm:$0xf0]  ;;  %v986_v19 = vunpack.c.h.b16 %v950_v2  ;;  %v10948_v60 = vld [vmem:[#allocation8 + $0x354] sm:$0xf]  ;;  %v8193_v20 = vld [vmem:[#allocation8 + $0x358] sm:$0xf0]  ;;  %v8264_v1 = vor.u32 %v10967_v59, %v8263_v58 }
  0x86   : > { %1180 = vmatpush.bf16.msra.mxu1 %v8128_v22  ;;  %v8191_v2 = vld [vmem:[#allocation8 + $0x350] sm:$0xf]  ;;  %v8241_v25 = vld [vmem:[#allocation8 + $0x3b8] sm:$0xf0]  ;;  %v1238_v27 = vld [vmem:[#allocation2 + $0x18] sm:$0x33] }
  0x87   : > { %1198 = vmatpush.bf16.msra.mxu2 %v8068_v7  ;;  %v8095_v7 = vld [vmem:[#allocation8 + $0x290] sm:$0xf]  ;;  %v12156_v40 = vpack.c.b16 %v12116_v41, %v986_v19  ;;  %v10963_v19 = vld [vmem:[#allocation8 + $0x3c4] sm:$0xf0]  ;;  %v8161_v58 = vld [vmem:[#allocation8 + $0x318] sm:$0xf0] }
  0x88   : > { %1216 = vmatpush.bf16.msra.mxu3 %v8132_v16  ;;  %v10922_v16 = vld [vmem:[#allocation8 + $0x284] sm:$0xf]  ;;  %v8096_v22 = vor.u32 %v10925_v51, %v8095_v7  ;;  %v8255_v6 = vld [vmem:[#allocation8 + $0x3d0] sm:$0xf]  ;;  %v10965_v7 = vld [vmem:[#allocation8 + $0x3d4] sm:$0xf0] }
  0x89   : > { %1163 = vmatpush.bf16.msra.mxu0 %v8056_v33  ;;  %v12153_v33 = vpack.c.b16 %v12112_v35, %v985_v52  ;;  %v10946_v51 = vld [vmem:[#allocation8 + $0x344] sm:$0xf]  ;;  %v8249_v52 = vld [vmem:[#allocation8 + $0x3c8] sm:$0xf0]  ;;  %v8256_v11 = vor.u32 %v10965_v7, %v8255_v6  ;;  %v8175_v31 = vld [vmem:[#allocation8 + $0x330] sm:$0xf] }
  0x8a   : > { %1181 = vmatpush.bf16.msra.mxu1 %v8120_v38  ;;  %v8092_v38 = vor.u32 %v10922_v16, %v8089_v17  ;;  %v8247_v16 = vld [vmem:[#allocation8 + $0x3c0] sm:$0xf]  ;;  %v8239_v37 = vld [vmem:[#allocation8 + $0x3b0] sm:$0xf]  ;;  %v10959_v56 = vld [vmem:[#allocation8 + $0x3a4] sm:$0xf0] }
  0x8b   : > { %1199 = vmatpush.bf16.msra.mxu2 %v8060_v23  ;;  %v8028_v23 = vor.u32 %v10906_v8, %v8025_v9  ;;  %v990_v50 = vrot.slane %v12153_v33, 1  ;;  %v8185_v8 = vld [vmem:[#allocation8 + $0x348] sm:$0xf0]  ;;  %v10962_v9 = vld [vmem:[#allocation8 + $0x3c4] sm:$0xf]  ;;  %v8248_v30 = vor.u32 %v10963_v19, %v8247_v16  ;;  %v1299_v16 = vshll.u32 %v12156_v40, 16 }
  0x8c   : > { %1217 = vmatpush.bf16.msra.mxu3 %v8124_v32  ;;  %885 = vmatmul.bf16.gmra.mxu0 %v704_v57  ;;  %v8207_v32 = vld [vmem:[#allocation8 + $0x370] sm:$0xf]  ;;  %v8188_v17 = vor.u32 %v10946_v51, %v8185_v8  ;;  %v10954_v8 = vld [vmem:[#allocation8 + $0x384] sm:$0xf]  ;;  %vm1277_vm2 = vsmask.f32 6400 }
  0x8d   : > { %1164 = vmatpush.bf16.msra.mxu0 %v8048_v49  ;;  %903 = vmatmul.bf16.gmra.mxu1 %v707_v61  ;;  %v8208_v46 = vor.u32 %v10953_v34, %v8207_v32  ;;  %v8265_v49 = vld [vmem:[#allocation8 + $0x3e8] sm:$0xf0]  ;;  %v10945_v32 = vld [vmem:[#allocation8 + $0x334] sm:$0xf0]  ;;  %vm1881_vm4 = vsmask.f32 5376 }
  0x8e   : > { %1182 = vmatpush.bf16.msra.mxu1 %v8112_v15  ;;  %921 = vmatmul.bf16.gmra.mxu2 %v704_v57  ;;  %v8204_v15 = vor.u32 %v10950_v42, %v8201_v43  ;;  %v1273_v42 = vunpack.c.l.b16 %v1238_v27  ;;  %v8169_v43 = vld [vmem:[#allocation8 + $0x328] sm:$0xf0]  ;;  %vm2485_vm6 = vsmask.f32 4352  ;;  %s11841_s30 = sshra.s32 %s7613_s27, 4  ;;  %s11847_s13 = scalar_lea.hbm %s13290_s4, 48  ;;  %s11842_s30 = int_to_ptr.hbm [resolvable:$true] %s11841_s30 }
  0x8f   : > { %1200 = vmatpush.bf16.msra.mxu2 %v8052_v39  ;;  %939 = vmatmul.bf16.gmra.mxu3 %v707_v61  ;;  %v8024_v39 = vor.u32 %v10907_v24, %v8023_v18  ;;  %v10964_v61 = vld [vmem:[#allocation8 + $0x3d4] sm:$0xf]  ;;  %v8252_v18 = vor.u32 %v10962_v9, %v8249_v52  ;;  %v8217_v9 = vld [vmem:[#allocation8 + $0x388] sm:$0xf0]  ;;  %s11843_s6 = scalar_lea.hbm %s11842_s30, 24  ;;  %p11848_p8 = scmp.lt.s32.totalorder %s11842_s30, %s13290_s4 }
  0x90   : > { %1218 = vmatpush.bf16.msra.mxu3 %v8116_v48  ;;  %v10966_v48 = vld [vmem:[#allocation8 + $0x3e4] sm:$0xf]  ;;  %v10960_v24 = vld [vmem:[#allocation8 + $0x3b4] sm:$0xf]  ;;  %v12171_v59 = vpack.c.b16 %v1273_v42, %v12106_v26  ;;  %v11001_v42 = vld [vmem:[#allocation8 + $0x4f4] sm:$0xf0]  ;;  %p11844_p1 = scmp.ne.s32.totalorder %s11842_s30, %s11843_s6  ;;  %p11849_p12 = scmp.lt.s32.totalorder %s11847_s13, %s11843_s6 }
  0x91   : > { %1165 = vmatpush.bf16.msra.mxu0 %v8040_v63  ;;  %v8268_v57 = vor.u32 %v10966_v48, %v8265_v49  ;;  %v992_v63 = vsel %vm989_vm1, %v990_v50, %v12160_v14  ;;  %v8244_v36 = vor.u32 %v10960_v24, %v8241_v25  ;;  %v8167_v48 = vld [vmem:[#allocation8 + $0x320] sm:$0xf]  ;;  %v10943_v49 = vld [vmem:[#allocation8 + $0x324] sm:$0xf0]  ;;  %v8401_v24 = vld [vmem:[#allocation8 + $0x4f8] sm:$0xf0] }
  0x92   : > { %1183 = vmatpush.bf16.msra.mxu1 %v8104_v3  ;;  %v10949_v3 = vld [vmem:[#allocation8 + $0x354] sm:$0xf0]  ;;  %v8231_v50 = vld [vmem:[#allocation8 + $0x3a0] sm:$0xf]  ;;  %v1287_v52 = vshrl.u32 %v12171_v59, 16  ;;  %p11845_p2 = pnand %p11844_p1, %p12032_p7  ;;  %p11850_p13 = por %p11849_p12, %p11848_p8 }
  0x93   : > { %1201 = vmatpush.bf16.msra.mxu2 %v8044_v53  ;;  %v993_v53 = vrot.slane %v12156_v40, 1  ;;  %v8192_v10 = vor.u32 %v10949_v3, %v8191_v2  ;;  %v10938_v2 = vld [vmem:[#allocation8 + $0x304] sm:$0xf]  ;;  %v8153_v3 = vld [vmem:[#allocation8 + $0x308] sm:$0xf0] }
  0x94   : > { %1219 = vmatpush.bf16.msra.mxu3 %v8108_v62  ;;  %v8257_v62 = vld [vmem:[#allocation8 + $0x3d8] sm:$0xf0]  ;;  %p11846_p4 = pneg %p11845_p2 }
  0x95   : > { %1166 = vmatpush.bf16.msra.mxu0 %v8032_v13  ;;  %v995_v21 = vsel %vm989_vm1, %v993_v53, %v12164_v54  ;;  %v8260_v5 = vor.u32 %v10964_v61, %v8257_v62  ;;  %v10947_v13 = vld [vmem:[#allocation8 + $0x344] sm:$0xf0]  ;;  %v8159_v61 = vld [vmem:[#allocation8 + $0x310] sm:$0xf]  ;;  %v8168_v62 = vor.u32 %v10943_v49, %v8167_v48  ;;  %v8393_v48 = vld [vmem:[#allocation8 + $0x4e8] sm:$0xf0] }
  0x96   : > { %1184 = vmatpush.bf16.msra.mxu1 %v8096_v22  ;;  %v10944_v22 = vld [vmem:[#allocation8 + $0x334] sm:$0xf]  ;;  %p11851_p0 = pnand %p11850_p13, %p11846_p4 }
  0x97   : > { %1202 = vmatpush.bf16.msra.mxu2 %v8036_v4  ;;  %v8196_v4 = vor.u32 %v10948_v60, %v8193_v20  ;;  %v10956_v60 = vld [vmem:[#allocation8 + $0x394] sm:$0xf]  ;;  %v8225_v20 = vld [vmem:[#allocation8 + $0x398] sm:$0xf0] }
  0x98   : > { %1220 = vmatpush.bf16.msra.mxu3 %v8100_v12  ;;  %v8183_v12 = vld [vmem:[#allocation8 + $0x340] sm:$0xf]  ;;  %v8228_v51 = vor.u32 %v10956_v60, %v8225_v20  ;;  %v10983_v20 = vld [vmem:[#allocation8 + $0x464] sm:$0xf0] }
  0x99   : > { %1167 = vmatpush.bf16.msra.mxu0 %v8024_v39  ;;  %v10942_v39 = vld [vmem:[#allocation8 + $0x324] sm:$0xf] }
  0x9a   : > { %1185 = vmatpush.bf16.msra.mxu1 %v8088_v44  ;;  %v10958_v44 = vld [vmem:[#allocation8 + $0x3a4] sm:$0xf]  ;;  %v8172_v53 = vor.u32 %v10942_v39, %v8169_v43  ;;  %v8399_v39 = vld [vmem:[#allocation8 + $0x4f0] sm:$0xf] }
  0x9b   : > { %1203 = vmatpush.bf16.msra.mxu2 %v8028_v23  ;;  %v8177_v23 = vld [vmem:[#allocation8 + $0x338] sm:$0xf0]  ;;  %v10982_v43 = vld [vmem:[#allocation8 + $0x464] sm:$0xf] }
  0x9c   : > { %1221 = vmatpush.bf16.msra.mxu3 %v8092_v38  ;;  %1168 = vmatmul.bf16.vlgmr.msra.gmra.mxu0 %v992_v63  ;;  %v8180_v34 = vor.u32 %v10944_v22, %v8177_v23  ;;  %v10961_v38 = vld [vmem:[#allocation8 + $0x3b4] sm:$0xf0]  ;;  %v8337_v22 = vld [vmem:[#allocation8 + $0x478] sm:$0xf0]  ;;  %v11000_v23 = vld [vmem:[#allocation8 + $0x4f4] sm:$0xf] }
  0x9d   : > { %1476 = vmatpush.bf16.msrb.mxu0 %v8208_v46  ;;  %1186 = vmatmul.bf16.vlgmr.msra.gmra.mxu1 %v995_v21  ;;  %v8176_v46 = vor.u32 %v10945_v32, %v8175_v31  ;;  %v8220_v31 = vor.u32 %v10954_v8, %v8217_v9  ;;  %v8319_v8 = vld [vmem:[#allocation8 + $0x450] sm:$0xf]  ;;  %v10981_v9 = vld [vmem:[#allocation8 + $0x454] sm:$0xf0] }
  0x9e   : > { %1494 = vmatpush.bf16.msrb.mxu1 %v8272_v47  ;;  %1204 = vmatmul.bf16.vlgmr.msra.gmra.mxu2 %v992_v63  ;;  %v8240_v47 = vor.u32 %v10961_v38, %v8239_v37  ;;  %v10941_v63 = vld [vmem:[#allocation8 + $0x314] sm:$0xf0]  ;;  %v8404_v38 = vor.u32 %v11000_v23, %v8401_v24  ;;  %v8377_v23 = vld [vmem:[#allocation8 + $0x4c8] sm:$0xf0]  ;;  %v8311_v24 = vld [vmem:[#allocation8 + $0x440] sm:$0xf] }
  0x9f   : > { %1512 = vmatpush.bf16.msrb.mxu2 %v8212_v28  ;;  %1222 = vmatmul.bf16.vlgmr.msra.gmra.mxu3 %v995_v21  ;;  %v8184_v28 = vor.u32 %v10947_v13, %v8183_v12  ;;  %v8223_v21 = vld [vmem:[#allocation8 + $0x390] sm:$0xf]  ;;  %v10939_v12 = vld [vmem:[#allocation8 + $0x304] sm:$0xf0]  ;;  %v1296_v13 = vshrl.u32 %v12156_v40, 16 }
  0xa0   : > { %1530 = vmatpush.bf16.msrb.mxu3 %v8276_v45  ;;  %v8233_v45 = vld [vmem:[#allocation8 + $0x3a8] sm:$0xf0] }
  0xa1   : > { %1477 = vmatpush.bf16.msrb.mxu0 %v8200_v0  ;;  %v8236_v55 = vor.u32 %v10958_v44, %v8233_v45  ;;  %v10957_v0 = vld [vmem:[#allocation8 + $0x394] sm:$0xf0]  ;;  %v1298_v49 = vrot.slane %v1296_v13, 1 }
  0xa2   : > { %1495 = vmatpush.bf16.msrb.mxu1 %v8264_v1  ;;  %v8232_v1 = vor.u32 %v10959_v56, %v8231_v50  ;;  %v8224_v19 = vor.u32 %v10957_v0, %v8223_v21  ;;  %v1301_v50 = vrot.slane %v1299_v16, 2  ;;  %v8400_v56 = vor.u32 %v11001_v42, %v8399_v39  ;;  %v10978_v16 = vld [vmem:[#allocation8 + $0x444] sm:$0xf]  ;;  %v8367_v39 = vld [vmem:[#allocation8 + $0x4b0] sm:$0xf] }
  0xa3   : > { %1513 = vmatpush.bf16.msrb.mxu2 %v8204_v15  ;;  %v1274_v15 = vunpack.c.h.b16 %v1238_v27  ;;  %v10993_v42 = vld [vmem:[#allocation8 + $0x4b4] sm:$0xf0] }
  0xa4   : > { %1531 = vmatpush.bf16.msrb.mxu3 %v8268_v57  ;;  %v10940_v57 = vld [vmem:[#allocation8 + $0x314] sm:$0xf]  ;;  %v1302_v0 = vor.u32 %v1301_v50, %v1298_v49  ;;  %v10990_v49 = vld [vmem:[#allocation8 + $0x4a4] sm:$0xf]  ;;  %v8361_v50 = vld [vmem:[#allocation8 + $0x4a8] sm:$0xf0] }
  0xa5   : > { %1478 = vmatpush.bf16.msrb.mxu0 %v8192_v10  ;;  %v12176_v6 = vpack.c.b16 %v1274_v15, %v12108_v29  ;;  %v8164_v7 = vor.u32 %v10940_v57, %v8161_v58  ;;  %v1290_v10 = vshll.u32 %v12171_v59, 16  ;;  %v8327_v57 = vld [vmem:[#allocation8 + $0x460] sm:$0xf] }
  0xa6   : > { %1496 = vmatpush.bf16.msrb.mxu1 %v8256_v11  ;;  %v8151_v11 = vld [vmem:[#allocation8 + $0x300] sm:$0xf] }
  0xa7   : > { %1514 = vmatpush.bf16.msrb.mxu2 %v8196_v4  ;;  %v1279_v4 = vshrl.u32 %v12153_v33, 16  ;;  %v1307_v40 = vshll.u32 %v12176_v6, 16  ;;  %v1292_v32 = vrot.slane %v1290_v10, 2  ;;  %v8152_v44 = vor.u32 %v10939_v12, %v8151_v11  ;;  %v10997_v10 = vld [vmem:[#allocation8 + $0x4d4] sm:$0xf0] }
  0xa8   : > { %1532 = vmatpush.bf16.msrb.mxu3 %v8260_v5  ;;  %v1282_v5 = vshll.u32 %v12153_v33, 16  ;;  %v8215_v33 = vld [vmem:[#allocation8 + $0x380] sm:$0xf] }
  0xa9   : > { %1479 = vmatpush.bf16.msrb.mxu0 %v8184_v28  ;;  %v12186_v25 = vrot.slane %v1279_v4, 1  ;;  %v1304_v28 = vshrl.u32 %v12176_v6, 16  ;;  %v8328_v4 = vor.u32 %v10983_v20, %v8327_v57  ;;  %v8289_v20 = vld [vmem:[#allocation8 + $0x418] sm:$0xf0] }
  0xaa   : > { %1497 = vmatpush.bf16.msrb.mxu1 %v8248_v30  ;;  %v1284_v27 = vrot.slane %v1282_v5, 2  ;;  %v8156_v30 = vor.u32 %v10938_v2, %v8153_v3  ;;  %v10980_v2 = vld [vmem:[#allocation8 + $0x454] sm:$0xf]  ;;  %v8321_v3 = vld [vmem:[#allocation8 + $0x458] sm:$0xf0] }
  0xab   : > { %1515 = vmatpush.bf16.msrb.mxu2 %v8188_v17  ;;  %v10984_v17 = vld [vmem:[#allocation8 + $0x474] sm:$0xf]  ;;  %v1306_v15 = vrot.slane %v1304_v28, 1 }
  0xac   : > { %1533 = vmatpush.bf16.msrb.mxu3 %v8252_v18  ;;  %1173 = vmatmul.bf16.gmra.mxu0 %v12160_v14  ;;  %v8160_v18 = vor.u32 %v10941_v63, %v8159_v61  ;;  %v8340_v37 = vor.u32 %v10984_v17, %v8337_v22  ;;  %v8391_v61 = vld [vmem:[#allocation8 + $0x4e0] sm:$0xf]  ;;  %v1285_v63 = vor.u32 %v1284_v27, %v12186_v25  ;;  %v8313_v17 = vld [vmem:[#allocation8 + $0x448] sm:$0xf0]  ;;  %v10994_v22 = vld [vmem:[#allocation8 + $0x4c4] sm:$0xf] }
  0xad   : > { %1480 = vmatpush.bf16.msrb.mxu0 %v8176_v46  ;;  %1191 = vmatmul.bf16.gmra.mxu1 %v12164_v54  ;;  %v8329_v46 = vld [vmem:[#allocation8 + $0x468] sm:$0xf0]  ;;  %v8375_v25 = vld [vmem:[#allocation8 + $0x4c0] sm:$0xf]  ;;  %v10995_v27 = vld [vmem:[#allocation8 + $0x4c4] sm:$0xf0]  ;;  %v8316_v28 = vor.u32 %v10978_v16, %v8313_v17 }
  0xae   : > { %1498 = vmatpush.bf16.msrb.mxu1 %v8240_v47  ;;  %1209 = vmatmul.bf16.gmra.mxu2 %v12160_v14  ;;  %v10955_v14 = vld [vmem:[#allocation8 + $0x384] sm:$0xf0]  ;;  %v10998_v47 = vld [vmem:[#allocation8 + $0x4e4] sm:$0xf]  ;;  %v8332_v58 = vor.u32 %v10982_v43, %v8329_v46  ;;  %v8297_v46 = vld [vmem:[#allocation8 + $0x428] sm:$0xf0] }
  0xaf   : > { %1516 = vmatpush.bf16.msrb.mxu2 %v8180_v34  ;;  %1227 = vmatmul.bf16.gmra.mxu3 %v12164_v54  ;;  %v1289_v54 = vrot.slane %v1287_v52, 1  ;;  %v8335_v34 = vld [vmem:[#allocation8 + $0x470] sm:$0xf]  ;;  %v8216_v45 = vor.u32 %v10955_v14, %v8215_v33  ;;  %v8396_v60 = vor.u32 %v10998_v47, %v8393_v48  ;;  %v8324_v33 = vor.u32 %v10980_v2, %v8321_v3  ;;  %v10979_v14 = vld [vmem:[#allocation8 + $0x444] sm:$0xf0] }
  0xb0   : > { %1534 = vmatpush.bf16.msrb.mxu3 %v8244_v36  ;;  %v10985_v36 = vld [vmem:[#allocation8 + $0x474] sm:$0xf0]  ;;  %v8383_v52 = vld [vmem:[#allocation8 + $0x4d0] sm:$0xf]  ;;  %v8368_v48 = vor.u32 %v10993_v42, %v8367_v39  ;;  %v10971_v16 = vld [vmem:[#allocation8 + $0x404] sm:$0xf0] }
  0xb1   : > { %1481 = vmatpush.bf16.msrb.mxu0 %v8168_v62  ;;  %v10999_v62 = vld [vmem:[#allocation8 + $0x4e4] sm:$0xf0]  ;;  %v12191_v21 = vor.u32 %v1292_v32, %v1289_v54  ;;  %v8312_v54 = vor.u32 %v10979_v14, %v8311_v24  ;;  %v8376_v32 = vor.u32 %v10995_v27, %v8375_v25  ;;  %v8287_v2 = vld [vmem:[#allocation8 + $0x410] sm:$0xf]  ;;  %v10973_v3 = vld [vmem:[#allocation8 + $0x414] sm:$0xf0] }
  0xb2   : > { %1499 = vmatpush.bf16.msrb.mxu1 %v8232_v1  ;;  %v8392_v5 = vor.u32 %v10999_v62, %v8391_v61  ;;  %v8343_v17 = vld [vmem:[#allocation8 + $0x480] sm:$0xf]  ;;  %v11032_v14 = vld [vmem:[#allocation8 + $0x5f4] sm:$0xf]  ;;  %v8529_v25 = vld [vmem:[#allocation8 + $0x5f8] sm:$0xf0] }
  0xb3   : > { %1517 = vmatpush.bf16.msrb.mxu2 %v8172_v53  ;;  %v1309_v53 = vrot.slane %v1307_v40, 2  ;;  %v1294_v11 = vsel %vm1277_vm2, %v1285_v63, %v12191_v21  ;;  %v8380_v40 = vor.u32 %v10994_v22, %v8377_v23  ;;  %v10988_v63 = vld [vmem:[#allocation8 + $0x494] sm:$0xf]  ;;  %v8465_v23 = vld [vmem:[#allocation8 + $0x578] sm:$0xf0] }
  0xb4   : > { %1535 = vmatpush.bf16.msrb.mxu3 %v8236_v55  ;;  %v8336_v55 = vor.u32 %v10985_v36, %v8335_v34  ;;  %v10992_v34 = vld [vmem:[#allocation8 + $0x4b4] sm:$0xf]  ;;  %v8369_v36 = vld [vmem:[#allocation8 + $0x4b8] sm:$0xf0]  ;;  %v8463_v27 = vld [vmem:[#allocation8 + $0x570] sm:$0xf] }
  0xb5   : > { %1482 = vmatpush.bf16.msrb.mxu0 %v8160_v18  ;;  %v12193_v1 = vor.u32 %v1309_v53, %v1306_v15  ;;  %v8320_v18 = vor.u32 %v10981_v9, %v8319_v8  ;;  %v8295_v15 = vld [vmem:[#allocation8 + $0x420] sm:$0xf]  ;;  %v10975_v53 = vld [vmem:[#allocation8 + $0x424] sm:$0xf0]  ;;  %v11016_v22 = vld [vmem:[#allocation8 + $0x574] sm:$0xf] }
  0xb6   : > { %1500 = vmatpush.bf16.msrb.mxu1 %v8224_v19  ;;  %v8384_v19 = vor.u32 %v10997_v10, %v8383_v52  ;;  %v8296_v61 = vor.u32 %v10975_v53, %v8295_v15  ;;  %v8281_v52 = vld [vmem:[#allocation8 + $0x408] sm:$0xf0]  ;;  %v10986_v10 = vld [vmem:[#allocation8 + $0x484] sm:$0xf] }
  0xb7   : > { %1518 = vmatpush.bf16.msrb.mxu2 %v8164_v7  ;;  %v10996_v7 = vld [vmem:[#allocation8 + $0x4d4] sm:$0xf]  ;;  %v1311_v12 = vsel %vm1277_vm2, %v1302_v0, %v12193_v1  ;;  %v8353_v0 = vld [vmem:[#allocation8 + $0x498] sm:$0xf0]  ;;  %v8457_v39 = vld [vmem:[#allocation8 + $0x568] sm:$0xf0] }
  0xb8   : > { %1536 = vmatpush.bf16.msrb.mxu3 %v8228_v51  ;;  %v8385_v51 = vld [vmem:[#allocation8 + $0x4d8] sm:$0xf0]  ;;  %v8356_v9 = vor.u32 %v10988_v63, %v8353_v0  ;;  %v11028_v0 = vld [vmem:[#allocation8 + $0x5d4] sm:$0xf] }
  0xb9   : > { %1483 = vmatpush.bf16.msrb.mxu0 %v8152_v44  ;;  %v8388_v13 = vor.u32 %v10996_v7, %v8385_v51  ;;  %v8372_v44 = vor.u32 %v10992_v34, %v8369_v36  ;;  %v10970_v7 = vld [vmem:[#allocation8 + $0x404] sm:$0xf]  ;;  %v1554_v51 = vld [vmem:[#allocation2] sm:$0xcc]  ;;  %v369_v34 = vld [vmem:[#allocation9] sm:$0x3] }
  0xba   : > { %1501 = vmatpush.bf16.msrb.mxu1 %v8216_v45  ;;  %v10974_v45 = vld [vmem:[#allocation8 + $0x424] sm:$0xf]  ;;  %v1590_v24 = vunpack.c.h.b16 %v1554_v51  ;;  %v12209_v15 = vperm.slane %v369_v34, 0  ;;  %v8449_v63 = vld [vmem:[#allocation8 + $0x558] sm:$0xf0] }
  0xbb   : > { %1519 = vmatpush.bf16.msrb.mxu2 %v8156_v30  ;;  %v10976_v30 = vld [vmem:[#allocation8 + $0x434] sm:$0xf]  ;;  %v8300_v57 = vor.u32 %v10974_v45, %v8297_v46  ;;  %v11030_v45 = vld [vmem:[#allocation8 + $0x5e4] sm:$0xf]  ;;  %v8521_v46 = vld [vmem:[#allocation8 + $0x5e8] sm:$0xf0] }
  0xbc   : > { %1537 = vmatpush.bf16.msrb.mxu3 %v8220_v31  ;;  %1484 = vmatmul.bf16.vlgmr.msrb.gmra.mxu0 %v1294_v11  ;;  %v8305_v31 = vld [vmem:[#allocation8 + $0x438] sm:$0xf0]  ;;  %v12207_v42 = vpack.c.b16 %v12116_v41, %v1590_v24  ;;  %v8503_v24 = vld [vmem:[#allocation8 + $0x5c0] sm:$0xf] }
  0xbd   : > { %1764 = vmatpush.bf16.msra.mxu0 %v8336_v55  ;;  %1502 = vmatmul.bf16.vlgmr.msrb.gmra.mxu1 %v1311_v12  ;;  %v8308_v43 = vor.u32 %v10976_v30, %v8305_v31  ;;  %v8359_v55 = vld [vmem:[#allocation8 + $0x4a0] sm:$0xf]  ;;  %v11017_v30 = vld [vmem:[#allocation8 + $0x574] sm:$0xf0]  ;;  %v8527_v31 = vld [vmem:[#allocation8 + $0x5f0] sm:$0xf] }
  0xbe   : > { %1782 = vmatpush.bf16.msra.mxu1 %v8400_v56  ;;  %1520 = vmatmul.bf16.vlgmr.msrb.gmra.mxu2 %v1294_v11  ;;  %v10991_v56 = vld [vmem:[#allocation8 + $0x4a4] sm:$0xf0]  ;;  %v8345_v11 = vld [vmem:[#allocation8 + $0x488] sm:$0xf0] }
  0xbf   : > { %1800 = vmatpush.bf16.msra.mxu2 %v8340_v37  ;;  %1538 = vmatmul.bf16.vlgmr.msrb.gmra.mxu3 %v1311_v12  ;;  %v8303_v37 = vld [vmem:[#allocation8 + $0x430] sm:$0xf]  ;;  %v8360_v62 = vor.u32 %v10991_v56, %v8359_v55  ;;  %v8288_v12 = vor.u32 %v10973_v3, %v8287_v2  ;;  %v8524_v56 = vor.u32 %v11030_v45, %v8521_v46  ;;  %v8513_v2 = vld [vmem:[#allocation8 + $0x5d8] sm:$0xf0]  ;;  %v11025_v46 = vld [vmem:[#allocation8 + $0x5b4] sm:$0xf0] }
  0xc0   : > { %1818 = vmatpush.bf16.msra.mxu3 %v8404_v38  ;;  %v10977_v38 = vld [vmem:[#allocation8 + $0x434] sm:$0xf0]  ;;  %v8447_v3 = vld [vmem:[#allocation8 + $0x550] sm:$0xf] }
  0xc1   : > { %1765 = vmatpush.bf16.msra.mxu0 %v8328_v4  ;;  %v8304_v47 = vor.u32 %v10977_v38, %v8303_v37  ;;  %v8351_v4 = vld [vmem:[#allocation8 + $0x490] sm:$0xf]  ;;  %v8532_v37 = vor.u32 %v11032_v14, %v8529_v25  ;;  %v11014_v38 = vld [vmem:[#allocation8 + $0x564] sm:$0xf]  ;;  %v11027_v14 = vld [vmem:[#allocation8 + $0x5c4] sm:$0xf0] }
  0xc2   : > { %1783 = vmatpush.bf16.msra.mxu1 %v8392_v5  ;;  %v10989_v5 = vld [vmem:[#allocation8 + $0x494] sm:$0xf0]  ;;  %v8460_v55 = vor.u32 %v11014_v38, %v8457_v39  ;;  %v12228_v25 = vld [vmem:[#allocation2 + $0x18] sm:$0x77]  ;;  %v8495_v45 = vld [vmem:[#allocation8 + $0x5b0] sm:$0xf] }
  0xc3   : > { %1801 = vmatpush.bf16.msra.mxu2 %v8332_v58  ;;  %v8364_v58 = vor.u32 %v10990_v49, %v8361_v50  ;;  %v8519_v49 = vld [vmem:[#allocation8 + $0x5e0] sm:$0xf]  ;;  %v11031_v50 = vld [vmem:[#allocation8 + $0x5e4] sm:$0xf0]  ;;  %v1877_v38 = vunpack.c.l.b16 %v12228_v25 }
  0xc4   : > { %1819 = vmatpush.bf16.msra.mxu3 %v8396_v60  ;;  %v10972_v60 = vld [vmem:[#allocation8 + $0x414] sm:$0xf] }
  0xc5   : > { %1766 = vmatpush.bf16.msra.mxu0 %v8320_v18  ;;  %v8292_v8 = vor.u32 %v10972_v60, %v8289_v20  ;;  %v10987_v18 = vld [vmem:[#allocation8 + $0x484] sm:$0xf0]  ;;  %v8520_v20 = vor.u32 %v11031_v50, %v8519_v49 }
  0xc6   : > { %1784 = vmatpush.bf16.msra.mxu1 %v8384_v19  ;;  %v1589_v19 = vunpack.c.l.b16 %v1554_v51 }
  0xc7   : > { %1802 = vmatpush.bf16.msra.mxu2 %v8324_v33  ;;  %v8352_v33 = vor.u32 %v10989_v5, %v8351_v4  ;;  %v8511_v5 = vld [vmem:[#allocation8 + $0x5d0] sm:$0xf] }
  0xc8   : > { %1820 = vmatpush.bf16.msra.mxu3 %v8388_v13  ;;  %v8279_v13 = vld [vmem:[#allocation8 + $0x400] sm:$0xf]  ;;  %v12204_v36 = vpack.c.b16 %v12112_v35, %v1589_v19  ;;  %v8505_v19 = vld [vmem:[#allocation8 + $0x5c8] sm:$0xf0] }
  0xc9   : > { %1767 = vmatpush.bf16.msra.mxu0 %v8312_v54  ;;  %v11033_v54 = vld [vmem:[#allocation8 + $0x5f4] sm:$0xf0] }
  0xca   : > { %1785 = vmatpush.bf16.msra.mxu1 %v8376_v32  ;;  %v8344_v32 = vor.u32 %v10987_v18, %v8343_v17  ;;  %v1594_v53 = vrot.slane %v12204_v36, 2 }
  0xcb   : > { %1803 = vmatpush.bf16.msra.mxu2 %v8316_v28  ;;  %v8284_v28 = vor.u32 %v10970_v7, %v8281_v52  ;;  %v11029_v7 = vld [vmem:[#allocation8 + $0x5d4] sm:$0xf0]  ;;  %v12222_v52 = vperm.slane %v369_v34, 1  ;;  %v8497_v34 = vld [vmem:[#allocation8 + $0x5b8] sm:$0xf0] }
  0xcc   : > { %1821 = vmatpush.bf16.msra.mxu3 %v8380_v40  ;;  %1489 = vmatmul.bf16.gmra.mxu0 %v12191_v21  ;;  %v8348_v40 = vor.u32 %v10986_v10, %v8345_v11  ;;  %v8516_v11 = vor.u32 %v11028_v0, %v8513_v2  ;;  %v8512_v18 = vor.u32 %v11029_v7, %v8511_v5  ;;  %v8423_v0 = vld [vmem:[#allocation8 + $0x520] sm:$0xf]  ;;  %v11007_v2 = vld [vmem:[#allocation8 + $0x524] sm:$0xf0]  ;;  %v12240_v5 = vld [vmem:[#allocation8 + $0x514] sm:$0xf]  ;;  %v1878_v7 = vunpack.c.h.b16 %v12228_v25 }
  0xcd   : > { %1768 = vmatpush.bf16.msra.mxu0 %v8304_v47  ;;  %1507 = vmatmul.bf16.gmra.mxu1 %v12193_v1  ;;  %v8455_v47 = vld [vmem:[#allocation8 + $0x560] sm:$0xf] }
  0xce   : > { %1786 = vmatpush.bf16.msra.mxu1 %v8368_v48  ;;  %1525 = vmatmul.bf16.gmra.mxu2 %v12191_v21  ;;  %v8280_v21 = vor.u32 %v10971_v16, %v8279_v13  ;;  %v11015_v48 = vld [vmem:[#allocation8 + $0x564] sm:$0xf0]  ;;  %v11026_v13 = vld [vmem:[#allocation8 + $0x5c4] sm:$0xf] }
  0xcf   : > { %1804 = vmatpush.bf16.msra.mxu2 %v8308_v43  ;;  %1543 = vmatmul.bf16.gmra.mxu3 %v12193_v1  ;;  %v8468_v1 = vor.u32 %v11016_v22, %v8465_v23  ;;  %v8464_v43 = vor.u32 %v11017_v30, %v8463_v27  ;;  %v8456_v60 = vor.u32 %v11015_v48, %v8455_v47  ;;  %v8439_v22 = vld [vmem:[#allocation8 + $0x540] sm:$0xf]  ;;  %v11011_v23 = vld [vmem:[#allocation8 + $0x544] sm:$0xf0]  ;;  %v8433_v30 = vld [vmem:[#allocation8 + $0x538] sm:$0xf0] }
  0xd0   : > { %1822 = vmatpush.bf16.msra.mxu3 %v8372_v44  ;;  %v8528_v44 = vor.u32 %v11033_v54, %v8527_v31  ;;  %v11024_v31 = vld [vmem:[#allocation8 + $0x5b4] sm:$0xf] }
  0xd1   : > { %1769 = vmatpush.bf16.msra.mxu0 %v8296_v61  ;;  %v12217_v61 = vrot.slane %v12176_v6, 2 }
  0xd2   : > { %1787 = vmatpush.bf16.msra.mxu1 %v8360_v62  ;;  %v11012_v62 = vld [vmem:[#allocation8 + $0x554] sm:$0xf] }
  0xd3   : > { %1805 = vmatpush.bf16.msra.mxu2 %v8300_v57  ;;  %v12213_v57 = vrot.slane %v12171_v59, 2  ;;  %v11013_v59 = vld [vmem:[#allocation8 + $0x554] sm:$0xf0]  ;;  %v8452_v10 = vor.u32 %v11012_v62, %v8449_v63  ;;  %v8496_v62 = vor.u32 %v11025_v46, %v8495_v45  ;;  %v8489_v63 = vld [vmem:[#allocation8 + $0x5a8] sm:$0xf0] }
  0xd4   : > { %1823 = vmatpush.bf16.msra.mxu3 %v8364_v58  ;;  %v1597_v58 = vrot.slane %v12207_v42, 2  ;;  %v8448_v17 = vor.u32 %v11013_v59, %v8447_v3  ;;  %v12238_v3 = vpack.c.b16 %v1877_v38, %v12106_v26  ;;  %v11023_v59 = vld [vmem:[#allocation8 + $0x5a4] sm:$0xf0]  ;;  %v12260_v38 = vld [vmem:[#allocation8 + $0x500] sm:$0xf] }
  0xd5   : > { %1770 = vmatpush.bf16.msra.mxu0 %v8288_v12  ;;  %v11010_v12 = vld [vmem:[#allocation8 + $0x544] sm:$0xf]  ;;  %v8471_v45 = vld [vmem:[#allocation8 + $0x580] sm:$0xf] }
  0xd6   : > { %1788 = vmatpush.bf16.msra.mxu1 %v8352_v33  ;;  %v1599_v6 = vsel %vm1593_vm3, %v1597_v58, %v12217_v61  ;;  %v8441_v33 = vld [vmem:[#allocation8 + $0x548] sm:$0xf0] }
  0xd7   : > { %1806 = vmatpush.bf16.msra.mxu2 %v8292_v8  ;;  %v8444_v27 = vor.u32 %v11010_v12, %v8441_v33  ;;  %v8425_v58 = vld [vmem:[#allocation8 + $0x528] sm:$0xf0]  ;;  %v11005_v12 = vld [vmem:[#allocation8 + $0x514] sm:$0xf0]  ;;  %v1883_v33 = vshrl.u32 %v12204_v36, 16 }
  0xd8   : > { %1824 = vmatpush.bf16.msra.mxu3 %v8356_v9  ;;  %v1596_v9 = vsel %vm1593_vm3, %v1594_v53, %v12213_v57  ;;  %v8500_v53 = vor.u32 %v11024_v31, %v8497_v34 }
  0xd9   : > { %1771 = vmatpush.bf16.msra.mxu0 %v8280_v21  ;;  %v561_v4 = vpop.f32.mrf.mxu0  ;;  %v8440_v21 = vor.u32 %v11011_v23, %v8439_v22  ;;  %v8479_v22 = vld [vmem:[#allocation8 + $0x590] sm:$0xf]  ;;  %v11021_v23 = vld [vmem:[#allocation8 + $0x594] sm:$0xf0]  ;;  %v12264_v46 = vrot.slane %v1883_v33, 2 }
  0xda   : > { %1789 = vmatpush.bf16.msra.mxu1 %v8344_v32  ;;  %v562_v51 = vadd.f32 %v561_v4, %v12209_v15  ;;  %v579_v8 = vpop.f32.mrf.mxu1  ;;  %v8504_v32 = vor.u32 %v11027_v14, %v8503_v24  ;;  %v8487_v4 = vld [vmem:[#allocation8 + $0x5a0] sm:$0xf]  ;;  %v1891_v24 = vshrl.u32 %v12238_v3, 16 }
  0xdb   : > { %1807 = vmatpush.bf16.msra.mxu2 %v8284_v28  ;;  %v8508_v28 = vor.u32 %v11026_v13, %v8505_v19  ;;  %v1886_v13 = vshll.u32 %v12204_v36, 16  ;;  %v8488_v19 = vor.u32 %v11023_v59, %v8487_v4  ;;  %v12255_v36 = vpack.c.b16 %v1878_v7, %v12108_v29  ;;  %v8655_v7 = vld [vmem:[#allocation8 + $0x6f0] sm:$0xf] }
  0xdc   : > { %1825 = vmatpush.bf16.msra.mxu3 %v8348_v40  ;;  %v12226_v16 = vadd.f32 %v579_v8, %v562_v51  ;;  %1772 = vmatmul.bf16.vlgmr.msra.gmra.mxu0 %v1596_v9  ;;  %v11008_v40 = vld [vmem:[#allocation8 + $0x534] sm:$0xf]  ;;  %v8417_v51 = vld [vmem:[#allocation8 + $0x518] sm:$0xf0] }
  0xdd   : > { %2080 = vmatpush.bf16.msrb.mxu0 %v8464_v43  ;;  %1790 = vmatmul.bf16.vlgmr.msra.gmra.mxu1 %v1599_v6  ;;  %v8436_v49 = vor.u32 %v11008_v40, %v8433_v30  ;;  %v11020_v8 = vld [vmem:[#allocation8 + $0x594] sm:$0xf]  ;;  %v12251_v40 = vld [vmem:[#allocation8 + $0x508] sm:$0xf0]  ;;  %v1894_v30 = vshll.u32 %v12238_v3, 16 }
  0xde   : > { %2098 = vmatpush.bf16.msrb.mxu1 %v8528_v44  ;;  %1808 = vmatmul.bf16.vlgmr.msra.gmra.mxu2 %v1596_v9  ;;  %v8481_v9 = vld [vmem:[#allocation8 + $0x598] sm:$0xf0] }
  0xdf   : > { %2116 = vmatpush.bf16.msrb.mxu2 %v8468_v1  ;;  %1826 = vmatmul.bf16.vlgmr.msra.gmra.mxu3 %v1599_v6  ;;  %v8431_v1 = vld [vmem:[#allocation8 + $0x530] sm:$0xf] }
  0xe0   : > { %2134 = vmatpush.bf16.msrb.mxu3 %v8532_v37  ;;  %v11009_v37 = vld [vmem:[#allocation8 + $0x534] sm:$0xf0] }
  0xe1   : > { %2081 = vmatpush.bf16.msrb.mxu0 %v8456_v60  ;;  %v597_v54 = vpop.f32.mrf.mxu2  ;;  %v563_v44 = vpop.f32.mrf.mxu0  ;;  %v11022_v60 = vld [vmem:[#allocation8 + $0x5a4] sm:$0xf] }
  0xe2   : > { %2099 = vmatpush.bf16.msrb.mxu1 %v8520_v20  ;;  %v598_v39 = vadd.f32 %v597_v54, %v12222_v52  ;;  %v615_v43 = vpop.f32.mrf.mxu3  ;;  %v564_v47 = vadd.f32 %v563_v44, %v12209_v15  ;;  %v581_v48 = vpop.f32.mrf.mxu1  ;;  %v11003_v44 = vld [vmem:[#allocation8 + $0x504] sm:$0xf0] }
  0xe3   : > { %2117 = vmatpush.bf16.msrb.mxu2 %v8460_v55  ;;  %v8432_v55 = vor.u32 %v11009_v37, %v8431_v1  ;;  %v11018_v1 = vld [vmem:[#allocation8 + $0x584] sm:$0xf]  ;;  %v8473_v37 = vld [vmem:[#allocation8 + $0x588] sm:$0xf0] }
  0xe4   : > { %2135 = vmatpush.bf16.msrb.mxu3 %v8524_v56  ;;  %v12233_v50 = vadd.f32 %v615_v43, %v598_v39  ;;  %v11006_v56 = vld [vmem:[#allocation8 + $0x524] sm:$0xf]  ;;  %v12235_v20 = vadd.f32 %v581_v48, %v564_v47  ;;  %v8480_v43 = vor.u32 %v11021_v23, %v8479_v22  ;;  %v11019_v48 = vld [vmem:[#allocation8 + $0x584] sm:$0xf0]  ;;  %v8476_v4 = vor.u32 %v11018_v1, %v8473_v37  ;;  %v8585_v22 = vld [vmem:[#allocation8 + $0x668] sm:$0xf0] }
  0xe5   : > { %2082 = vmatpush.bf16.msrb.mxu0 %v8448_v17  ;;  %v8428_v6 = vor.u32 %v11006_v56, %v8425_v58  ;;  %v1908_v56 = vshrl.u32 %v12255_v36, 16  ;;  %v1911_v58 = vshll.u32 %v12255_v36, 16  ;;  %v8472_v59 = vor.u32 %v11019_v48, %v8471_v45  ;;  %v8577_v45 = vld [vmem:[#allocation8 + $0x658] sm:$0xf0] }
  0xe6   : > { %2100 = vmatpush.bf16.msrb.mxu1 %v8512_v18  ;;  %v8424_v18 = vor.u32 %v11007_v2, %v8423_v0  ;;  %v11064_v0 = vld [vmem:[#allocation8 + $0x6f4] sm:$0xf]  ;;  %v8657_v2 = vld [vmem:[#allocation8 + $0x6f8] sm:$0xf0] }
  0xe7   : > { %2118 = vmatpush.bf16.msrb.mxu2 %v8452_v10  ;;  %v8492_v10 = vor.u32 %v11022_v60, %v8489_v63  ;;  %v11048_v60 = vld [vmem:[#allocation8 + $0x674] sm:$0xf] }
  0xe8   : > { %2136 = vmatpush.bf16.msrb.mxu3 %v8516_v11  ;;  %v12243_v11 = vld [vmem:[#allocation8 + $0x510] sm:$0xf] }
  0xe9   : > { %2083 = vmatpush.bf16.msrb.mxu0 %v8440_v21  ;;  %v599_v17 = vpop.f32.mrf.mxu2  ;;  %v8420_v21 = vor.u32 %v12240_v5, %v8417_v51  ;;  %v8416_v34 = vor.u32 %v11005_v12, %v12243_v11  ;;  %v11049_v5 = vld [vmem:[#allocation8 + $0x674] sm:$0xf0] }
  0xea   : > { %2101 = vmatpush.bf16.msrb.mxu1 %v8504_v32  ;;  %v600_v14 = vadd.f32 %v599_v17, %v12222_v52  ;;  %v617_v25 = vpop.f32.mrf.mxu3  ;;  %v584_v54 = vpop.f32.mrf.mxu1  ;;  %v8484_v32 = vor.u32 %v11020_v8, %v8481_v9  ;;  %v11065_v51 = vld [vmem:[#allocation8 + $0x6f4] sm:$0xf0]  ;;  %v1896_v9 = vrot.slane %v1894_v30, 3  ;;  %v1913_v17 = vrot.slane %v1911_v58, 3  ;;  %v11047_v30 = vld [vmem:[#allocation8 + $0x664] sm:$0xf0] }
  0xeb   : > { %2119 = vmatpush.bf16.msrb.mxu2 %v8444_v27  ;;  %v566_v27 = vpop.f32.mrf.mxu0  ;;  %v11061_v58 = vld [vmem:[#allocation8 + $0x6d4] sm:$0xf0] }
  0xec   : > { %2137 = vmatpush.bf16.msrb.mxu3 %v8508_v28  ;;  %v12249_v28 = vld [vmem:[#allocation8 + $0x504] sm:$0xf]  ;;  %v567_v31 = vadd.f32 %v566_v27, %v12209_v15  ;;  %v12262_v39 = vadd.f32 %v617_v25, %v600_v14  ;;  %v12266_v15 = vrot.slane %v1886_v13, 3  ;;  %1777 = vmatmul.bf16.gmra.mxu0 %v12213_v57  ;;  %v1910_v13 = vrot.slane %v1908_v56, 2  ;;  %v8649_v27 = vld [vmem:[#allocation8 + $0x6e8] sm:$0xf0] }
  0xed   : > { %2084 = vmatpush.bf16.msrb.mxu0 %v8432_v55  ;;  %v1903_v55 = vshll.u32 %v12207_v42, 16  ;;  %1795 = vmatmul.bf16.gmra.mxu1 %v12217_v61  ;;  %v8412_v63 = vor.u32 %v12249_v28, %v12251_v40  ;;  %v8656_v14 = vor.u32 %v11065_v51, %v8655_v7  ;;  %v11062_v25 = vld [vmem:[#allocation8 + $0x6e4] sm:$0xf]  ;;  %v8583_v28 = vld [vmem:[#allocation8 + $0x660] sm:$0xf] }
  0xee   : > { %2102 = vmatpush.bf16.msrb.mxu1 %v8496_v62  ;;  %v12268_v47 = vadd.f32 %v584_v54, %v567_v31  ;;  %1813 = vmatmul.bf16.gmra.mxu2 %v12213_v57  ;;  %v8593_v62 = vld [vmem:[#allocation8 + $0x678] sm:$0xf0]  ;;  %v8408_v57 = vor.u32 %v11003_v44, %v12260_v38  ;;  %v8647_v31 = vld [vmem:[#allocation8 + $0x6e0] sm:$0xf]  ;;  %v1889_v54 = vor.u32 %v12266_v15, %v12264_v46  ;;  %v11044_v44 = vld [vmem:[#allocation8 + $0x654] sm:$0xf] }
  0xef   : > { %2120 = vmatpush.bf16.msrb.mxu2 %v8436_v49  ;;  %v1893_v49 = vrot.slane %v1891_v24, 2  ;;  %1831 = vmatmul.bf16.gmra.mxu3 %v12217_v61  ;;  %v8584_v1 = vor.u32 %v11047_v30, %v8583_v28  ;;  %v8575_v46 = vld [vmem:[#allocation8 + $0x650] sm:$0xf]  ;;  %v11045_v56 = vld [vmem:[#allocation8 + $0x654] sm:$0xf0] }
  0xf0   : > { %2138 = vmatpush.bf16.msrb.mxu3 %v8500_v53  ;;  %v1900_v53 = vshrl.u32 %v12207_v42, 16  ;;  %v8591_v42 = vld [vmem:[#allocation8 + $0x670] sm:$0xf]  ;;  %v11058_v51 = vld [vmem:[#allocation8 + $0x6c4] sm:$0xf] }
  0xf1   : > { %2085 = vmatpush.bf16.msrb.mxu0 %v8424_v18  ;;  %v602_v8 = vpop.f32.mrf.mxu2  ;;  %v8660_v18 = vor.u32 %v11064_v0, %v8657_v2  ;;  %v8592_v24 = vor.u32 %v11049_v5, %v8591_v42  ;;  %v8580_v2 = vor.u32 %v11044_v44, %v8577_v45  ;;  %v8576_v5 = vor.u32 %v11045_v56, %v8575_v46  ;;  %v11057_v28 = vld [vmem:[#allocation8 + $0x6b4] sm:$0xf0]  ;;  %v11039_v46 = vld [vmem:[#allocation8 + $0x624] sm:$0xf0] }
  0xf2   : > { %2103 = vmatpush.bf16.msrb.mxu1 %v8488_v19  ;;  %v1902_v61 = vrot.slane %v1900_v53, 2  ;;  %v603_v11 = vadd.f32 %v602_v8, %v12222_v52  ;;  %v620_v12 = vpop.f32.mrf.mxu3  ;;  %v11046_v19 = vld [vmem:[#allocation8 + $0x664] sm:$0xf]  ;;  %v586_v23 = vpop.f32.mrf.mxu1  ;;  %v11063_v52 = vld [vmem:[#allocation8 + $0x6e4] sm:$0xf0] }
  0xf3   : > { %2121 = vmatpush.bf16.msrb.mxu2 %v8428_v6  ;;  %v1905_v6 = vrot.slane %v1903_v55, 3  ;;  %v568_v33 = vpop.f32.mrf.mxu0  ;;  %v8648_v37 = vor.u32 %v11063_v52, %v8647_v31  ;;  %v11060_v53 = vld [vmem:[#allocation8 + $0x6d4] sm:$0xf]  ;;  %v8641_v55 = vld [vmem:[#allocation8 + $0x6d8] sm:$0xf0] }
  0xf4   : > { %2139 = vmatpush.bf16.msrb.mxu3 %v8492_v10  ;;  %v8596_v10 = vor.u32 %v11048_v60, %v8593_v62  ;;  %v12282_v40 = vadd.f32 %v620_v12, %v603_v11  ;;  %v8644_v42 = vor.u32 %v11060_v53, %v8641_v55  ;;  %v8633_v8 = vld [vmem:[#allocation8 + $0x6c8] sm:$0xf0]  ;;  %v8551_v55 = vld [vmem:[#allocation8 + $0x620] sm:$0xf]  ;;  %v11055_v56 = vld [vmem:[#allocation8 + $0x6a4] sm:$0xf0] }
  0xf5   : > { %2086 = vmatpush.bf16.msrb.mxu0 %v8416_v34  ;;  %v12286_v34 = vor.u32 %v1896_v9, %v1893_v49  ;;  %v1906_v38 = vor.u32 %v1905_v6, %v1902_v61  ;;  %v8639_v49 = vld [vmem:[#allocation8 + $0x6d0] sm:$0xf]  ;;  %v8567_v9 = vld [vmem:[#allocation8 + $0x640] sm:$0xf]  ;;  %v11043_v61 = vld [vmem:[#allocation8 + $0x644] sm:$0xf0]  ;;  %v8636_v33 = vor.u32 %v11058_v51, %v8633_v8 }
  0xf6   : > { %2104 = vmatpush.bf16.msrb.mxu1 %v8480_v43  ;;  %v12288_v43 = vor.u32 %v1913_v17, %v1910_v13  ;;  %v8640_v7 = vor.u32 %v11061_v58, %v8639_v49  ;;  %v8631_v6 = vld [vmem:[#allocation8 + $0x6c0] sm:$0xf]  ;;  %v11040_v13 = vld [vmem:[#allocation8 + $0x634] sm:$0xf]  ;;  %v8561_v17 = vld [vmem:[#allocation8 + $0x638] sm:$0xf0] }
  0xf7   : > { %2122 = vmatpush.bf16.msrb.mxu2 %v8420_v21  ;;  %v8588_v21 = vor.u32 %v11046_v19, %v8585_v22  ;;  %v1898_v62 = vsel %vm1881_vm4, %v1889_v54, %v12286_v34  ;;  %v8568_v22 = vor.u32 %v11043_v61, %v8567_v9  ;;  %v8564_v54 = vor.u32 %v11040_v13, %v8561_v17  ;;  %v8617_v53 = vld [vmem:[#allocation8 + $0x6a8] sm:$0xf0]  ;;  %v11053_v51 = vld [vmem:[#allocation8 + $0x694] sm:$0xf0]  ;;  %v11034_v9 = vld [vmem:[#allocation8 + $0x604] sm:$0xf] }
  0xf8   : > { %2140 = vmatpush.bf16.msrb.mxu3 %v8484_v32  ;;  %v8652_v32 = vor.u32 %v11062_v25, %v8649_v27  ;;  %v1915_v0 = vsel %vm1881_vm4, %v1906_v38, %v12288_v43  ;;  %v11041_v25 = vld [vmem:[#allocation8 + $0x634] sm:$0xf0]  ;;  %v2158_v61 = vld [vmem:[#allocation2] sm:$0x88]  ;;  %v8537_v13 = vld [vmem:[#allocation8 + $0x608] sm:$0xf0] }
  0xf9   : > { %2087 = vmatpush.bf16.msrb.mxu0 %v8408_v57  ;;  %v604_v48 = vpop.f32.mrf.mxu2  ;;  %v8569_v57 = vld [vmem:[#allocation8 + $0x648] sm:$0xf0]  ;;  %v11050_v17 = vld [vmem:[#allocation8 + $0x684] sm:$0xf] }
  0xfa   : > { %2105 = vmatpush.bf16.msrb.mxu1 %v8472_v59  ;;  %v622_v15 = vpop.f32.mrf.mxu3  ;;  %v11054_v48 = vld [vmem:[#allocation8 + $0x6a4] sm:$0xf] }
  0xfb   : > { %2123 = vmatpush.bf16.msrb.mxu2 %v8412_v63  ;;  %v881_v60 = vpop.f32.mrf.mxu0  ;;  %v899_v63 = vpop.f32.mrf.mxu1  ;;  %v8615_v15 = vld [vmem:[#allocation8 + $0x6a0] sm:$0xf] }
  0xfc   : > { %2141 = vmatpush.bf16.msrb.mxu3 %v8476_v4  ;;  %v11042_v4 = vld [vmem:[#allocation8 + $0x644] sm:$0xf]  ;;  %v900_v59 = vadd.f32 %v899_v63, %v881_v60  ;;  %2088 = vmatmul.bf16.vlgmr.msrb.gmra.mxu0 %v1898_v62  ;;  %v8620_v60 = vor.u32 %v11054_v48, %v8617_v53  ;;  %v11052_v63 = vld [vmem:[#allocation8 + $0x694] sm:$0xf] }
  0xfd   : > { %2368 = vmatpush.bf16.msra.mxu0 %v8592_v24  ;;  %2106 = vmatmul.bf16.vlgmr.msrb.gmra.mxu1 %v1915_v0  ;;  %v8572_v12 = vor.u32 %v11042_v4, %v8569_v57  ;;  %v8625_v24 = vld [vmem:[#allocation8 + $0x6b8] sm:$0xf0]  ;;  %v8543_v57 = vld [vmem:[#allocation8 + $0x610] sm:$0xf] }
  0xfe   : > { %2386 = vmatpush.bf16.msra.mxu1 %v8656_v14  ;;  %2124 = vmatmul.bf16.vlgmr.msrb.gmra.mxu2 %v1898_v62  ;;  %v12295_v11 = vadd.f32 %v900_v59, %v12226_v16  ;;  %v8559_v14 = vld [vmem:[#allocation8 + $0x630] sm:$0xf]  ;;  %v11036_v62 = vld [vmem:[#allocation8 + $0x614] sm:$0xf]  ;;  %v8609_v4 = vld [vmem:[#allocation8 + $0x698] sm:$0xf0] }
  0xff   : > { %2404 = vmatpush.bf16.msra.mxu2 %v8596_v10  ;;  %v11059_v10 = vld [vmem:[#allocation8 + $0x6c4] sm:$0xf0]  ;;  %2142 = vmatmul.bf16.vlgmr.msrb.gmra.mxu3 %v1915_v0  ;;  %v8623_v16 = vld [vmem:[#allocation8 + $0x6b0] sm:$0xf]  ;;  %v11037_v59 = vld [vmem:[#allocation8 + $0x614] sm:$0xf0] }
 0x100   : > { %2422 = vmatpush.bf16.msra.mxu3 %v8660_v18  ;;  %v11056_v18 = vld [vmem:[#allocation8 + $0x6b4] sm:$0xf]  ;;  %v8632_v23 = vor.u32 %v11059_v10, %v8631_v6  ;;  %v8624_v45 = vor.u32 %v11057_v28, %v8623_v16  ;;  %v2193_v16 = vunpack.c.l.b16 %v2158_v61 }
 0x101   : > { %2369 = vmatpush.bf16.msra.mxu0 %v8584_v1  ;;  %v917_v19 = vpop.f32.mrf.mxu2  ;;  %v11038_v1 = vld [vmem:[#allocation8 + $0x624] sm:$0xf]  ;;  %v11080_v28 = vld [vmem:[#allocation8 + $0x774] sm:$0xf] }
 0x102   : > { %2387 = vmatpush.bf16.msra.mxu1 %v8648_v37  ;;  %v935_v27 = vpop.f32.mrf.mxu3  ;;  %v8553_v37 = vld [vmem:[#allocation8 + $0x628] sm:$0xf0] }
 0x103   : > { %2405 = vmatpush.bf16.msra.mxu2 %v8588_v21  ;;  %v936_v30 = vadd.f32 %v935_v27, %v917_v19  ;;  %v883_v31 = vpop.f32.mrf.mxu0  ;;  %v901_v52 = vpop.f32.mrf.mxu1  ;;  %v8628_v21 = vor.u32 %v11056_v18, %v8625_v24  ;;  %v8556_v58 = vor.u32 %v11038_v1, %v8553_v37  ;;  %v8601_v18 = vld [vmem:[#allocation8 + $0x688] sm:$0xf0]  ;;  %v8535_v24 = vld [vmem:[#allocation8 + $0x600] sm:$0xf]  ;;  %v11051_v27 = vld [vmem:[#allocation8 + $0x684] sm:$0xf0] }
 0x104   : > { %2423 = vmatpush.bf16.msra.mxu3 %v8652_v32  ;;  %v8560_v32 = vor.u32 %v11041_v25, %v8559_v14  ;;  %v902_v44 = vadd.f32 %v901_v52, %v883_v31  ;;  %v11035_v14 = vld [vmem:[#allocation8 + $0x604] sm:$0xf0]  ;;  %v8599_v25 = vld [vmem:[#allocation8 + $0x680] sm:$0xf]  ;;  %v11096_v52 = vld [vmem:[#allocation8 + $0x7f4] sm:$0xf]  ;;  %v8604_v1 = vor.u32 %v11050_v17, %v8601_v18 }
 0x105   : > { %2370 = vmatpush.bf16.msra.mxu0 %v8576_v5  ;;  %v12298_v38 = vadd.f32 %v936_v30, %v12233_v50  ;;  %v8545_v50 = vld [vmem:[#allocation8 + $0x618] sm:$0xf0]  ;;  %v8783_v37 = vld [vmem:[#allocation8 + $0x7f0] sm:$0xf]  ;;  %v8600_v48 = vor.u32 %v11051_v27, %v8599_v25  ;;  %v11092_v17 = vld [vmem:[#allocation8 + $0x7d4] sm:$0xf] }
 0x106   : > { %2388 = vmatpush.bf16.msra.mxu1 %v8640_v7  ;;  %v12301_v49 = vadd.f32 %v902_v44, %v12235_v20  ;;  %v8607_v7 = vld [vmem:[#allocation8 + $0x690] sm:$0xf]  ;;  %v8548_v10 = vor.u32 %v11036_v62, %v8545_v50  ;;  %v8721_v30 = vld [vmem:[#allocation8 + $0x778] sm:$0xf0]  ;;  %v11097_v44 = vld [vmem:[#allocation8 + $0x7f4] sm:$0xf0] }
 0x107   : > { %2406 = vmatpush.bf16.msra.mxu2 %v8580_v2  ;;  %v8552_v2 = vor.u32 %v11039_v46, %v8551_v55  ;;  %v12314_v55 = vpack.c.b16 %v12112_v35, %v2193_v16  ;;  %v8769_v18 = vld [vmem:[#allocation8 + $0x7d8] sm:$0xf0] }
 0x108   : > { %2424 = vmatpush.bf16.msra.mxu3 %v8644_v42  ;;  %v8616_v42 = vor.u32 %v11055_v56, %v8615_v15  ;;  %v11078_v15 = vld [vmem:[#allocation8 + $0x764] sm:$0xf]  ;;  %v8713_v56 = vld [vmem:[#allocation8 + $0x768] sm:$0xf0] }
 0x109   : > { %2371 = vmatpush.bf16.msra.mxu0 %v8568_v22  ;;  %v919_v0 = vpop.f32.mrf.mxu2 }
 0x10a   : > { %2389 = vmatpush.bf16.msra.mxu1 %v8632_v23  ;;  %v937_v5 = vpop.f32.mrf.mxu3  ;;  %v8608_v23 = vor.u32 %v11053_v51, %v8607_v7  ;;  %v2198_v51 = vrot.slane %v12314_v55, 3 }
 0x10b   : > { %2407 = vmatpush.bf16.msra.mxu2 %v8572_v12  ;;  %v938_v20 = vadd.f32 %v937_v5, %v919_v0  ;;  %v886_v8 = vpop.f32.mrf.mxu0  ;;  %v904_v6 = vpop.f32.mrf.mxu1  ;;  %v8612_v12 = vor.u32 %v11052_v63, %v8609_v4  ;;  %v8784_v63 = vor.u32 %v11097_v44, %v8783_v37  ;;  %v11094_v0 = vld [vmem:[#allocation8 + $0x7e4] sm:$0xf]  ;;  %v11095_v5 = vld [vmem:[#allocation8 + $0x7e4] sm:$0xf0]  ;;  %v8695_v37 = vld [vmem:[#allocation8 + $0x740] sm:$0xf] }
 0x10c   : > { %2425 = vmatpush.bf16.msra.mxu3 %v8636_v33  ;;  %v8544_v33 = vor.u32 %v11037_v59, %v8543_v57  ;;  %v905_v22 = vadd.f32 %v904_v6, %v886_v8  ;;  %2093 = vmatmul.bf16.gmra.mxu0 %v12286_v34  ;;  %v11079_v57 = vld [vmem:[#allocation8 + $0x764] sm:$0xf0]  ;;  %v8775_v59 = vld [vmem:[#allocation8 + $0x7e0] sm:$0xf] }
 0x10d   : > { %2372 = vmatpush.bf16.msra.mxu0 %v8560_v32  ;;  %v12304_v19 = vadd.f32 %v938_v20, %v12262_v39  ;;  %2111 = vmatmul.bf16.gmra.mxu1 %v12288_v43  ;;  %v2194_v39 = vunpack.c.h.b16 %v2158_v61  ;;  %v8540_v32 = vor.u32 %v11034_v9, %v8537_v13  ;;  %v8716_v20 = vor.u32 %v11078_v15, %v8713_v56  ;;  %v11075_v44 = vld [vmem:[#allocation8 + $0x744] sm:$0xf0]  ;;  %v8689_v15 = vld [vmem:[#allocation8 + $0x738] sm:$0xf0]  ;;  %v11088_v56 = vld [vmem:[#allocation8 + $0x7b4] sm:$0xf] }
 0x10e   : > { %2390 = vmatpush.bf16.msra.mxu1 %v8624_v45  ;;  %2129 = vmatmul.bf16.gmra.mxu2 %v12286_v34  ;;  %v12309_v31 = vadd.f32 %v905_v22, %v12268_v47  ;;  %v11081_v34 = vld [vmem:[#allocation8 + $0x774] sm:$0xf0]  ;;  %v8536_v47 = vor.u32 %v11035_v14, %v8535_v24  ;;  %v12324_v9 = vrot.slane %v12238_v3, 3  ;;  %v8703_v22 = vld [vmem:[#allocation8 + $0x750] sm:$0xf] }
 0x10f   : > { %2408 = vmatpush.bf16.msra.mxu2 %v8564_v54  ;;  %2147 = vmatmul.bf16.gmra.mxu3 %v12288_v43  ;;  %v8785_v54 = vld [vmem:[#allocation8 + $0x7f8] sm:$0xf0]  ;;  %v8724_v43 = vor.u32 %v11080_v28, %v8721_v30  ;;  %v12317_v62 = vpack.c.b16 %v12116_v41, %v2194_v39  ;;  %v11077_v3 = vld [vmem:[#allocation8 + $0x754] sm:$0xf0]  ;;  %v8767_v24 = vld [vmem:[#allocation8 + $0x7d0] sm:$0xf]  ;;  %v8772_v30 = vor.u32 %v11092_v17, %v8769_v18 }
 0x110   : > { %2426 = vmatpush.bf16.msra.mxu3 %v8628_v21  ;;  %v8719_v21 = vld [vmem:[#allocation8 + $0x770] sm:$0xf]  ;;  %v8788_v46 = vor.u32 %v11096_v52, %v8785_v54  ;;  %v11093_v14 = vld [vmem:[#allocation8 + $0x7d4] sm:$0xf0]  ;;  %v2200_v27 = vsel %vm2197_vm5, %v2198_v51, %v12324_v9  ;;  %v11074_v39 = vld [vmem:[#allocation8 + $0x744] sm:$0xf] }
 0x111   : > { %2373 = vmatpush.bf16.msra.mxu0 %v8552_v2  ;;  %v922_v45 = vpop.f32.mrf.mxu2  ;;  %v8720_v50 = vor.u32 %v11081_v34, %v8719_v21  ;;  %v8777_v2 = vld [vmem:[#allocation8 + $0x7e8] sm:$0xf0]  ;;  %v2201_v61 = vrot.slane %v12317_v62, 3  ;;  %v8704_v21 = vor.u32 %v11077_v3, %v8703_v22  ;;  %v11070_v51 = vld [vmem:[#allocation8 + $0x724] sm:$0xf] }
 0x112   : > { %2391 = vmatpush.bf16.msra.mxu1 %v8616_v42  ;;  %v940_v53 = vpop.f32.mrf.mxu3  ;;  %v8711_v42 = vld [vmem:[#allocation8 + $0x760] sm:$0xf]  ;;  %v8780_v8 = vor.u32 %v11094_v0, %v8777_v2  ;;  %v8697_v52 = vld [vmem:[#allocation8 + $0x748] sm:$0xf0]  ;;  %v8687_v0 = vld [vmem:[#allocation8 + $0x730] sm:$0xf] }
 0x113   : > { %2409 = vmatpush.bf16.msra.mxu2 %v8556_v58  ;;  %v941_v58 = vadd.f32 %v940_v53, %v922_v45  ;;  %v906_v4 = vpop.f32.mrf.mxu1  ;;  %v8712_v6 = vor.u32 %v11079_v57, %v8711_v42  ;;  %v8761_v34 = vld [vmem:[#allocation8 + $0x7c8] sm:$0xf0]  ;;  %v8759_v45 = vld [vmem:[#allocation8 + $0x7c0] sm:$0xf]  ;;  %v11072_v53 = vld [vmem:[#allocation8 + $0x734] sm:$0xf] }
 0x114   : > { %2427 = vmatpush.bf16.msra.mxu3 %v8620_v60  ;;  %v888_v60 = vpop.f32.mrf.mxu0  ;;  %v11073_v2 = vld [vmem:[#allocation8 + $0x734] sm:$0xf0]  ;;  %v2446_v42 = vld [vmem:[#allocation2 + $0x18] sm:$0xff]  ;;  %v8751_v4 = vld [vmem:[#allocation8 + $0x7b0] sm:$0xf] }
 0x115   : > { %2374 = vmatpush.bf16.msra.mxu0 %v8544_v33  ;;  %v12320_v7 = vadd.f32 %v941_v58, %v12282_v40  ;;  %v12328_v40 = vrot.slane %v12255_v36, 3  ;;  %v8705_v33 = vld [vmem:[#allocation8 + $0x758] sm:$0xf0]  ;;  %v11089_v57 = vld [vmem:[#allocation8 + $0x7b4] sm:$0xf0]  ;;  %v12337_v17 = vunpack.c.l.b16 %v2446_v42 }
 0x116   : > { %2392 = vmatpush.bf16.msra.mxu1 %v8608_v23  ;;  %v8753_v58 = vld [vmem:[#allocation8 + $0x7b8] sm:$0xf0]  ;;  %v11071_v3 = vld [vmem:[#allocation8 + $0x724] sm:$0xf0] }
 0x117   : > { %2410 = vmatpush.bf16.msra.mxu2 %v8548_v10  ;;  %v8776_v10 = vor.u32 %v11095_v5, %v8775_v59  ;;  %v2203_v16 = vsel %vm2197_vm5, %v2201_v61, %v12328_v40  ;;  %v8692_v61 = vor.u32 %v11072_v53, %v8689_v15 }
 0x118   : > { %2428 = vmatpush.bf16.msra.mxu3 %v8612_v12  ;;  %v11076_v12 = vld [vmem:[#allocation8 + $0x754] sm:$0xf] }
 0x119   : > { %2375 = vmatpush.bf16.msra.mxu0 %v8536_v47  ;;  %v924_v13 = vpop.f32.mrf.mxu2  ;;  %v8708_v28 = vor.u32 %v11076_v12, %v8705_v33  ;;  %v11091_v47 = vld [vmem:[#allocation8 + $0x7c4] sm:$0xf0]  ;;  %v11086_v12 = vld [vmem:[#allocation8 + $0x7a4] sm:$0xf]  ;;  %v8745_v33 = vld [vmem:[#allocation8 + $0x7a8] sm:$0xf0] }
 0x11a   : > { %2393 = vmatpush.bf16.msra.mxu1 %v8600_v48  ;;  %v942_v23 = vpop.f32.mrf.mxu3  ;;  %v8679_v13 = vld [vmem:[#allocation8 + $0x720] sm:$0xf] }
 0x11b   : > { %2411 = vmatpush.bf16.msra.mxu2 %v8540_v32  ;;  %v1187_v36 = vpop.f32.mrf.mxu1  ;;  %v8768_v32 = vor.u32 %v11093_v14, %v8767_v24  ;;  %v8752_v23 = vor.u32 %v11089_v57, %v8751_v4  ;;  %v8743_v24 = vld [vmem:[#allocation8 + $0x7a0] sm:$0xf]  ;;  %v11087_v14 = vld [vmem:[#allocation8 + $0x7a4] sm:$0xf0] }
 0x11c   : > { %2429 = vmatpush.bf16.msra.mxu3 %v8604_v1  ;;  %v1169_v25 = vpop.f32.mrf.mxu0  ;;  %v11090_v1 = vld [vmem:[#allocation8 + $0x7c4] sm:$0xf]  ;;  %2376 = vmatmul.bf16.vlgmr.msra.gmra.mxu0 %v2200_v27 }
 0x11d   : > { %2684 = vmatpush.bf16.msrb.mxu0 %v8720_v50  ;;  %v1188_v54 = vadd.f32 %v1187_v36, %v1169_v25  ;;  %2394 = vmatmul.bf16.vlgmr.msra.gmra.mxu1 %v2203_v16  ;;  %v8696_v50 = vor.u32 %v11075_v44, %v8695_v37  ;;  %v12342_v25 = vld [vmem:[#allocation8 + $0x714] sm:$0xf]  ;;  %v2490_v37 = vshll.u32 %v12314_v55, 16  ;;  %v8680_v44 = vor.u32 %v11071_v3, %v8679_v13 }
 0x11e   : > { %2702 = vmatpush.bf16.msrb.mxu1 %v8784_v63  ;;  %2412 = vmatmul.bf16.vlgmr.msra.gmra.mxu2 %v2200_v27  ;;  %v8760_v63 = vor.u32 %v11091_v47, %v8759_v45  ;;  %v12344_v27 = vld [vmem:[#allocation8 + $0x718] sm:$0xf0]  ;;  %v12346_v36 = vld [vmem:[#allocation8 + $0x794] sm:$0xf]  ;;  %v8744_v45 = vor.u32 %v11087_v14, %v8743_v24  ;;  %v8847_v24 = vld [vmem:[#allocation8 + $0x870] sm:$0xf] }
 0x11f   : > { %2720 = vmatpush.bf16.msrb.mxu2 %v8724_v43  ;;  %v12335_v48 = vadd.f32 %v1188_v54, %v12295_v11  ;;  %2430 = vmatmul.bf16.vlgmr.msra.gmra.mxu3 %v2203_v16  ;;  %v8700_v43 = vor.u32 %v11074_v39, %v8697_v52  ;;  %v12348_v16 = vunpack.c.h.b16 %v2446_v42  ;;  %v12353_v39 = vld [vmem:[#allocation8 + $0x710] sm:$0xf]  ;;  %v12355_v52 = vld [vmem:[#allocation8 + $0x714] sm:$0xf0]  ;;  %v8748_v54 = vor.u32 %v11086_v12, %v8745_v33  ;;  %v11112_v13 = vld [vmem:[#allocation8 + $0x874] sm:$0xf] }
 0x120   : > { %2738 = vmatpush.bf16.msrb.mxu3 %v8788_v46  ;;  %v8764_v46 = vor.u32 %v11090_v1, %v8761_v34  ;;  %v2483_v1 = vpack.c.b16 %v12337_v17, %v12106_v26  ;;  %v2487_v34 = vshrl.u32 %v12314_v55, 16  ;;  %v8676_v53 = vor.u32 %v12342_v25, %v12344_v27  ;;  %v11128_v3 = vld [vmem:[#allocation8 + $0x8f4] sm:$0xf]  ;;  %v11113_v27 = vld [vmem:[#allocation8 + $0x874] sm:$0xf0] }
 0x121   : > { %2685 = vmatpush.bf16.msrb.mxu0 %v8712_v6  ;;  %v1205_v60 = vpop.f32.mrf.mxu2  ;;  %v8756_v6 = vor.u32 %v11088_v56, %v8753_v58  ;;  %v2484_v15 = vpack.c.b16 %v12348_v16, %v12108_v29  ;;  %v12378_v57 = vrot.slane %v2490_v37, 4  ;;  %v11110_v37 = vld [vmem:[#allocation8 + $0x864] sm:$0xf] }
 0x122   : > { %2703 = vmatpush.bf16.msrb.mxu1 %v8776_v10  ;;  %v1223_v11 = vpop.f32.mrf.mxu3  ;;  %v8688_v10 = vor.u32 %v11073_v2, %v8687_v0  ;;  %v8729_v0 = vld [vmem:[#allocation8 + $0x788] sm:$0xf0]  ;;  %v12374_v2 = vld [vmem:[#allocation8 + $0x700] sm:$0xf]  ;;  %v12376_v4 = vrot.slane %v2487_v34, 3 }
 0x123   : > { %2721 = vmatpush.bf16.msrb.mxu2 %v8716_v20  ;;  %v1224_v59 = vadd.f32 %v1223_v11, %v1205_v60  ;;  %v8681_v20 = vld [vmem:[#allocation8 + $0x728] sm:$0xf0]  ;;  %v8672_v60 = vor.u32 %v12355_v52, %v12353_v39  ;;  %v11067_v11 = vld [vmem:[#allocation8 + $0x704] sm:$0xf0]  ;;  %v2512_v12 = vshrl.u32 %v2484_v15, 16  ;;  %v2515_v33 = vshll.u32 %v2484_v15, 16 }
 0x124   : > { %2739 = vmatpush.bf16.msrb.mxu3 %v8780_v8  ;;  %v1171_v5 = vpop.f32.mrf.mxu0  ;;  %v1189_v8 = vpop.f32.mrf.mxu1  ;;  %v8664_v14 = vor.u32 %v11067_v11, %v12374_v2  ;;  %v8839_v15 = vld [vmem:[#allocation8 + $0x860] sm:$0xf] }
 0x125   : > { %2686 = vmatpush.bf16.msrb.mxu0 %v8704_v21  ;;  %v12340_v18 = vadd.f32 %v1224_v59, %v12298_v38  ;;  %v1190_v22 = vadd.f32 %v1189_v8, %v1171_v5  ;;  %v8684_v38 = vor.u32 %v11070_v51, %v8681_v20  ;;  %v8735_v21 = vld [vmem:[#allocation8 + $0x790] sm:$0xf]  ;;  %v2495_v59 = vshrl.u32 %v2483_v1, 16  ;;  %v8727_v8 = vld [vmem:[#allocation8 + $0x780] sm:$0xf] }
 0x126   : > { %2704 = vmatpush.bf16.msrb.mxu1 %v8768_v32  ;;  %v11085_v32 = vld [vmem:[#allocation8 + $0x794] sm:$0xf0]  ;;  %v2498_v5 = vshll.u32 %v2483_v1, 16 }
 0x127   : > { %2722 = vmatpush.bf16.msrb.mxu2 %v8708_v28  ;;  %v12351_v28 = vadd.f32 %v1190_v22, %v12301_v49  ;;  %v8849_v22 = vld [vmem:[#allocation8 + $0x878] sm:$0xf0] }
 0x128   : > { %2740 = vmatpush.bf16.msrb.mxu3 %v8772_v30  ;;  %v8737_v30 = vld [vmem:[#allocation8 + $0x798] sm:$0xf0]  ;;  %v8852_v1 = vor.u32 %v11112_v13, %v8849_v22  ;;  %v11125_v13 = vld [vmem:[#allocation8 + $0x8d4] sm:$0xf0] }
 0x129   : > { %2687 = vmatpush.bf16.msrb.mxu0 %v8696_v50  ;;  %v1207_v49 = vpop.f32.mrf.mxu2  ;;  %v8740_v55 = vor.u32 %v12346_v36, %v8737_v30  ;;  %v8736_v50 = vor.u32 %v11085_v32, %v8735_v21  ;;  %v11129_v36 = vld [vmem:[#allocation8 + $0x8f4] sm:$0xf0]  ;;  %v2500_v30 = vrot.slane %v2498_v5, 4  ;;  %v2514_v21 = vrot.slane %v2512_v12, 3 }
 0x12a   : > { %2705 = vmatpush.bf16.msrb.mxu1 %v8760_v63  ;;  %v1225_v47 = vpop.f32.mrf.mxu3  ;;  %v12372_v63 = vld [vmem:[#allocation8 + $0x784] sm:$0xf]  ;;  %v2517_v32 = vrot.slane %v2515_v33, 4  ;;  %v11109_v12 = vld [vmem:[#allocation8 + $0x854] sm:$0xf0] }
 0x12b   : > { %2723 = vmatpush.bf16.msrb.mxu2 %v8700_v43  ;;  %v12363_v43 = vld [vmem:[#allocation8 + $0x704] sm:$0xf]  ;;  %v1226_v56 = vadd.f32 %v1225_v47, %v1207_v49  ;;  %v8841_v49 = vld [vmem:[#allocation8 + $0x868] sm:$0xf0]  ;;  %v8848_v47 = vor.u32 %v11113_v27, %v8847_v24  ;;  %v8895_v33 = vld [vmem:[#allocation8 + $0x8d0] sm:$0xf] }
 0x12c   : > { %2741 = vmatpush.bf16.msrb.mxu3 %v8764_v46  ;;  %v12365_v46 = vld [vmem:[#allocation8 + $0x708] sm:$0xf0]  ;;  %v1174_v58 = vpop.f32.mrf.mxu0  ;;  %v1192_v42 = vpop.f32.mrf.mxu1  ;;  %2381 = vmatmul.bf16.gmra.mxu0 %v12324_v9 }
 0x12d   : > { %2688 = vmatpush.bf16.msrb.mxu0 %v8688_v10  ;;  %v12381_v51 = vadd.f32 %v1226_v56, %v12304_v19  ;;  %v1193_v20 = vadd.f32 %v1192_v42, %v1174_v58  ;;  %v2507_v10 = vshll.u32 %v12317_v62, 16  ;;  %2399 = vmatmul.bf16.gmra.mxu1 %v12328_v40  ;;  %v11111_v58 = vld [vmem:[#allocation8 + $0x864] sm:$0xf0] }
 0x12e   : > { %2706 = vmatpush.bf16.msrb.mxu1 %v8752_v23  ;;  %2417 = vmatmul.bf16.gmra.mxu2 %v12324_v9  ;;  %v8668_v23 = vor.u32 %v12363_v43, %v12365_v46  ;;  %v8732_v9 = vor.u32 %v12372_v63, %v8729_v0  ;;  %v11126_v43 = vld [vmem:[#allocation8 + $0x8e4] sm:$0xf]  ;;  %v8905_v46 = vld [vmem:[#allocation8 + $0x8e8] sm:$0xf0]  ;;  %v2493_v63 = vor.u32 %v12378_v57, %v12376_v4  ;;  %v8831_v4 = vld [vmem:[#allocation8 + $0x850] sm:$0xf] }
 0x12f   : > { %2724 = vmatpush.bf16.msrb.mxu2 %v8692_v61  ;;  %v11083_v61 = vld [vmem:[#allocation8 + $0x784] sm:$0xf0]  ;;  %v12388_v19 = vadd.f32 %v1193_v20, %v12309_v31  ;;  %2435 = vmatmul.bf16.gmra.mxu3 %v12328_v40  ;;  %v8911_v31 = vld [vmem:[#allocation8 + $0x8f0] sm:$0xf]  ;;  %v2497_v40 = vrot.slane %v2495_v59, 3  ;;  %v2509_v52 = vrot.slane %v2507_v10, 4  ;;  %v8844_v0 = vor.u32 %v11110_v37, %v8841_v49 }
 0x130   : > { %2742 = vmatpush.bf16.msrb.mxu3 %v8756_v6  ;;  %v2504_v6 = vshrl.u32 %v12317_v62, 16  ;;  %v8913_v62 = vld [vmem:[#allocation8 + $0x8f8] sm:$0xf0]  ;;  %v8728_v25 = vor.u32 %v11083_v61, %v8727_v8  ;;  %v8908_v2 = vor.u32 %v11126_v43, %v8905_v46  ;;  %v8840_v11 = vor.u32 %v11111_v58, %v8839_v15  ;;  %v11120_v49 = vld [vmem:[#allocation8 + $0x8b4] sm:$0xf] }
 0x131   : > { %2689 = vmatpush.bf16.msrb.mxu0 %v8680_v44  ;;  %v8916_v34 = vor.u32 %v11128_v3, %v8913_v62  ;;  %v12401_v42 = vor.u32 %v2500_v30, %v2497_v40  ;;  %v12403_v20 = vor.u32 %v2517_v32, %v2514_v21  ;;  %v8833_v8 = vld [vmem:[#allocation8 + $0x858] sm:$0xf0]  ;;  %v8889_v40 = vld [vmem:[#allocation8 + $0x8c8] sm:$0xf0]  ;;  %v8823_v30 = vld [vmem:[#allocation8 + $0x840] sm:$0xf] }
 0x132   : > { %2707 = vmatpush.bf16.msrb.mxu1 %v8744_v45  ;;  %v2506_v39 = vrot.slane %v2504_v6, 3  ;;  %v11124_v6 = vld [vmem:[#allocation8 + $0x8d4] sm:$0xf]  ;;  %v8897_v10 = vld [vmem:[#allocation8 + $0x8d8] sm:$0xf0] }
 0x133   : > { %2725 = vmatpush.bf16.msrb.mxu2 %v8684_v38  ;;  %v1210_v38 = vpop.f32.mrf.mxu2  ;;  %v8817_v37 = vld [vmem:[#allocation8 + $0x838] sm:$0xf0]  ;;  %v8815_v43 = vld [vmem:[#allocation8 + $0x830] sm:$0xf]  ;;  %v11105_v46 = vld [vmem:[#allocation8 + $0x834] sm:$0xf0] }
 0x134   : > { %2743 = vmatpush.bf16.msrb.mxu3 %v8748_v54  ;;  %v1228_v54 = vpop.f32.mrf.mxu3  ;;  %v1176_v45 = vpop.f32.mrf.mxu0  ;;  %v2510_v5 = vor.u32 %v2509_v52, %v2506_v39  ;;  %v11107_v39 = vld [vmem:[#allocation8 + $0x844] sm:$0xf0]  ;;  %v8887_v52 = vld [vmem:[#allocation8 + $0x8c0] sm:$0xf] }
 0x135   : > { %2690 = vmatpush.bf16.msrb.mxu0 %v8672_v60  ;;  %v1229_v44 = vadd.f32 %v1228_v54, %v1210_v38  ;;  %v1194_v56 = vpop.f32.mrf.mxu1  ;;  %v11127_v60 = vld [vmem:[#allocation8 + $0x8e4] sm:$0xf0]  ;;  %v11122_v38 = vld [vmem:[#allocation8 + $0x8c4] sm:$0xf]  ;;  %v8824_v45 = vor.u32 %v11107_v39, %v8823_v30  ;;  %v8793_v39 = vld [vmem:[#allocation8 + $0x808] sm:$0xf0] }
 0x136   : > { %2708 = vmatpush.bf16.msrb.mxu1 %v8736_v50  ;;  %v2519_v62 = vsel %vm2485_vm6, %v2510_v5, %v12403_v20  ;;  %v11123_v54 = vld [vmem:[#allocation8 + $0x8c4] sm:$0xf0]  ;;  %v11121_v56 = vld [vmem:[#allocation8 + $0x8b4] sm:$0xf0]  ;;  %v11098_v30 = vld [vmem:[#allocation8 + $0x804] sm:$0xf] }
 0x137   : > { %2726 = vmatpush.bf16.msrb.mxu2 %v8676_v53  ;;  %v8912_v53 = vor.u32 %v11129_v36, %v8911_v31  ;;  %v12397_v50 = vadd.f32 %v1229_v44, %v12320_v7  ;;  %v11108_v7 = vld [vmem:[#allocation8 + $0x854] sm:$0xf]  ;;  %v8832_v31 = vor.u32 %v11109_v12, %v8831_v4  ;;  %v8896_v36 = vor.u32 %v11125_v13, %v8895_v33  ;;  %v11103_v4 = vld [vmem:[#allocation8 + $0x824] sm:$0xf0] }
 0x138   : > { %2744 = vmatpush.bf16.msrb.mxu3 %v8740_v55  ;;  %v8903_v55 = vld [vmem:[#allocation8 + $0x8e0] sm:$0xf]  ;;  %v8836_v24 = vor.u32 %v11108_v7, %v8833_v8  ;;  %v11119_v12 = vld [vmem:[#allocation8 + $0x8a4] sm:$0xf0] }
 0x139   : > { %2691 = vmatpush.bf16.msrb.mxu0 %v8664_v14  ;;  %v8904_v59 = vor.u32 %v11127_v60, %v8903_v55  ;;  %v11106_v14 = vld [vmem:[#allocation8 + $0x844] sm:$0xf] }
 0x13a   : > { %2709 = vmatpush.bf16.msrb.mxu1 %v8728_v25  ;;  %v8825_v25 = vld [vmem:[#allocation8 + $0x848] sm:$0xf0] }
 0x13b   : > { %2727 = vmatpush.bf16.msrb.mxu2 %v8668_v23  ;;  %v1212_v61 = vpop.f32.mrf.mxu2  ;;  %v2502_v23 = vsel %vm2485_vm6, %v2493_v63, %v12401_v42  ;;  %v8828_v32 = vor.u32 %v11106_v14, %v8825_v25  ;;  %v8865_v14 = vld [vmem:[#allocation8 + $0x898] sm:$0xf0]  ;;  %v8799_v25 = vld [vmem:[#allocation8 + $0x810] sm:$0xf] }
 0x13c   : > { %2745 = vmatpush.bf16.msrb.mxu3 %v8732_v9  ;;  %v1230_v57 = vpop.f32.mrf.mxu3  ;;  %v1485_v22 = vpop.f32.mrf.mxu0  ;;  %v8900_v9 = vor.u32 %v11124_v6, %v8897_v10  ;;  %2692 = vmatmul.bf16.vlgmr.msrb.gmra.mxu0 %v2502_v23  ;;  %v11118_v61 = vld [vmem:[#allocation8 + $0x8a4] sm:$0xf]  ;;  %v8873_v6 = vld [vmem:[#allocation8 + $0x8a8] sm:$0xf0]  ;;  %v8807_v10 = vld [vmem:[#allocation8 + $0x820] sm:$0xf] }
 0x13d   : > { %2963 = vmatpush.bf16.msra.mxu0 %v8848_v47  ;;  %v1503_v3 = vpop.f32.mrf.mxu1  ;;  %2710 = vmatmul.bf16.vlgmr.msrb.gmra.mxu1 %v2519_v62  ;;  %v8888_v47 = vor.u32 %v11123_v54, %v8887_v52  ;;  %v8871_v57 = vld [vmem:[#allocation8 + $0x8a0] sm:$0xf]  ;;  %v11114_v52 = vld [vmem:[#allocation8 + $0x884] sm:$0xf] }
 0x13e   : > { %2981 = vmatpush.bf16.msra.mxu1 %v8912_v53  ;;  %v1504_v27 = vadd.f32 %v1503_v3, %v1485_v22  ;;  %2728 = vmatmul.bf16.vlgmr.msrb.gmra.mxu2 %v2502_v23  ;;  %v8881_v53 = vld [vmem:[#allocation8 + $0x8b8] sm:$0xf0]  ;;  %v8876_v22 = vor.u32 %v11118_v61, %v8873_v6  ;;  %v11100_v23 = vld [vmem:[#allocation8 + $0x814] sm:$0xf] }
 0x13f   : > { %2999 = vmatpush.bf16.msra.mxu2 %v8852_v1  ;;  %2746 = vmatmul.bf16.vlgmr.msrb.gmra.mxu3 %v2519_v62  ;;  %v8892_v1 = vor.u32 %v11122_v38, %v8889_v40  ;;  %v11116_v3 = vld [vmem:[#allocation8 + $0x894] sm:$0xf]  ;;  %v11117_v38 = vld [vmem:[#allocation8 + $0x894] sm:$0xf0] }
 0x140   : > { %3017 = vmatpush.bf16.msra.mxu3 %v8916_v34  ;;  %v12410_v21 = vadd.f32 %v1504_v27, %v12335_v48  ;;  %v11104_v34 = vld [vmem:[#allocation8 + $0x834] sm:$0xf]  ;;  %v8879_v48 = vld [vmem:[#allocation8 + $0x8b0] sm:$0xf]  ;;  %v11101_v27 = vld [vmem:[#allocation8 + $0x814] sm:$0xf0] }
 0x141   : > { %2964 = vmatpush.bf16.msra.mxu0 %v8840_v11  ;;  %v8820_v63 = vor.u32 %v11104_v34, %v8817_v37  ;;  %v11102_v11 = vld [vmem:[#allocation8 + $0x824] sm:$0xf]  ;;  %v8880_v8 = vor.u32 %v11121_v56, %v8879_v48  ;;  %v8800_v34 = vor.u32 %v11101_v27, %v8799_v25  ;;  %v8857_v37 = vld [vmem:[#allocation8 + $0x888] sm:$0xf0]  ;;  %v8977_v48 = vld [vmem:[#allocation8 + $0x978] sm:$0xf0] }
 0x142   : > { %2982 = vmatpush.bf16.msra.mxu1 %v8904_v59  ;;  %v8809_v59 = vld [vmem:[#allocation8 + $0x828] sm:$0xf0]  ;;  %v11160_v56 = vld [vmem:[#allocation8 + $0x9f4] sm:$0xf] }
 0x143   : > { %3000 = vmatpush.bf16.msra.mxu2 %v8844_v0  ;;  %v1521_v44 = vpop.f32.mrf.mxu2  ;;  %v8884_v0 = vor.u32 %v11120_v49, %v8881_v53  ;;  %v8812_v13 = vor.u32 %v11102_v11, %v8809_v59  ;;  %v8791_v49 = vld [vmem:[#allocation8 + $0x800] sm:$0xf]  ;;  %v9039_v11 = vld [vmem:[#allocation8 + $0x9f0] sm:$0xf]  ;;  %v11161_v59 = vld [vmem:[#allocation8 + $0x9f4] sm:$0xf0] }
 0x144   : > { %3018 = vmatpush.bf16.msra.mxu3 %v8908_v2  ;;  %v1539_v15 = vpop.f32.mrf.mxu3  ;;  %v1487_v55 = vpop.f32.mrf.mxu0  ;;  %v8816_v2 = vor.u32 %v11105_v46, %v8815_v43  ;;  %v8855_v43 = vld [vmem:[#allocation8 + $0x880] sm:$0xf]  ;;  %v11115_v46 = vld [vmem:[#allocation8 + $0x884] sm:$0xf0] }
 0x145   : > { %2965 = vmatpush.bf16.msra.mxu0 %v8832_v31  ;;  %v1540_v58 = vadd.f32 %v1539_v15, %v1521_v44  ;;  %v1505_v60 = vpop.f32.mrf.mxu1  ;;  %v11099_v44 = vld [vmem:[#allocation8 + $0x804] sm:$0xf0]  ;;  %v11144_v15 = vld [vmem:[#allocation8 + $0x974] sm:$0xf] }
 0x146   : > { %2983 = vmatpush.bf16.msra.mxu1 %v8896_v36  ;;  %v1506_v7 = vadd.f32 %v1505_v60, %v1487_v55  ;;  %v8863_v36 = vld [vmem:[#allocation8 + $0x890] sm:$0xf]  ;;  %v11145_v60 = vld [vmem:[#allocation8 + $0x974] sm:$0xf0]  ;;  %v8980_v61 = vor.u32 %v11144_v15, %v8977_v48 }
 0x147   : > { %3001 = vmatpush.bf16.msra.mxu2 %v8836_v24  ;;  %v12413_v5 = vadd.f32 %v1540_v58, %v12340_v18  ;;  %v8801_v18 = vld [vmem:[#allocation8 + $0x818] sm:$0xf0]  ;;  %v8808_v24 = vor.u32 %v11103_v4, %v8807_v10  ;;  %v8864_v53 = vor.u32 %v11117_v38, %v8863_v36  ;;  %v11142_v10 = vld [vmem:[#allocation8 + $0x964] sm:$0xf]  ;;  %v11140_v38 = vld [vmem:[#allocation8 + $0x954] sm:$0xf] }
 0x148   : > { %3019 = vmatpush.bf16.msra.mxu3 %v8900_v9  ;;  %v12416_v33 = vadd.f32 %v1506_v7, %v12351_v28  ;;  %v8872_v9 = vor.u32 %v11119_v12, %v8871_v57  ;;  %v9041_v58 = vld [vmem:[#allocation8 + $0x9f8] sm:$0xf0]  ;;  %v8792_v7 = vor.u32 %v11099_v44, %v8791_v49  ;;  %v2796_v49 = vpack.c.b16 %v12108_v29, %v12116_v41  ;;  %v11136_v41 = vld [vmem:[#allocation8 + $0x934] sm:$0xf] }
 0x149   : > { %2966 = vmatpush.bf16.msra.mxu0 %v8824_v45  ;;  %v9044_v6 = vor.u32 %v11160_v56, %v9041_v58  ;;  %v8951_v58 = vld [vmem:[#allocation8 + $0x940] sm:$0xf] }
 0x14a   : > { %2984 = vmatpush.bf16.msra.mxu1 %v8888_v47 }
 0x14b   : > { %3002 = vmatpush.bf16.msra.mxu2 %v8828_v32  ;;  %v1523_v62 = vpop.f32.mrf.mxu2  ;;  %v8804_v32 = vor.u32 %v11100_v23, %v8801_v18  ;;  %v9033_v23 = vld [vmem:[#allocation8 + $0x9e8] sm:$0xf0]  ;;  %v8967_v18 = vld [vmem:[#allocation8 + $0x960] sm:$0xf] }
 0x14c   : > { %3020 = vmatpush.bf16.msra.mxu3 %v8892_v1  ;;  %v1541_v31 = vpop.f32.mrf.mxu3  ;;  %v1490_v40 = vpop.f32.mrf.mxu0  ;;  %v8868_v1 = vor.u32 %v11116_v3, %v8865_v14  ;;  %2697 = vmatmul.bf16.gmra.mxu0 %v12401_v42 }
 0x14d   : > { %2967 = vmatpush.bf16.msra.mxu0 %v8816_v2  ;;  %v1542_v28 = vadd.f32 %v1541_v31, %v1523_v62  ;;  %v1508_v54 = vpop.f32.mrf.mxu1  ;;  %2715 = vmatmul.bf16.gmra.mxu1 %v12403_v20  ;;  %v8860_v2 = vor.u32 %v11114_v52, %v8857_v37  ;;  %v11143_v62 = vld [vmem:[#allocation8 + $0x964] sm:$0xf0]  ;;  %v8959_v52 = vld [vmem:[#allocation8 + $0x950] sm:$0xf] }
 0x14e   : > { %2985 = vmatpush.bf16.msra.mxu1 %v8880_v8  ;;  %v1509_v47 = vadd.f32 %v1508_v54, %v1490_v40  ;;  %2733 = vmatmul.bf16.gmra.mxu2 %v12401_v42  ;;  %v8968_v31 = vor.u32 %v11143_v62, %v8967_v18 }
 0x14f   : > { %3003 = vmatpush.bf16.msra.mxu2 %v8820_v63  ;;  %v12419_v45 = vadd.f32 %v1542_v28, %v12381_v51  ;;  %2751 = vmatmul.bf16.gmra.mxu3 %v12403_v20  ;;  %v8975_v51 = vld [vmem:[#allocation8 + $0x970] sm:$0xf]  ;;  %v8969_v20 = vld [vmem:[#allocation8 + $0x968] sm:$0xf0]  ;;  %v8961_v28 = vld [vmem:[#allocation8 + $0x958] sm:$0xf0] }
 0x150   : > { %3021 = vmatpush.bf16.msra.mxu3 %v8884_v0  ;;  %v12424_v55 = vadd.f32 %v1509_v47, %v12388_v19  ;;  %v329_v63 = vld [vmem:[%s12082_s17 + $0x8] sm:$0xff]  ;;  %v8796_v0 = vor.u32 %v11098_v30, %v8793_v39  ;;  %v8856_v19 = vor.u32 %v11115_v46, %v8855_v43  ;;  %v8976_v12 = vor.u32 %v11145_v60, %v8975_v51  ;;  %v11138_v43 = vld [vmem:[#allocation8 + $0x944] sm:$0xf]  ;;  %v8953_v46 = vld [vmem:[#allocation8 + $0x948] sm:$0xf0] }
 0x151   : > { %2968 = vmatpush.bf16.msra.mxu0 %v8808_v24  ;;  %332 = vst [vmem:[#allocation2 + $0x20] sm:$0xff] %v329_v63  ;;  %v9031_v24 = vld [vmem:[#allocation8 + $0x9e0] sm:$0xf]  ;;  %v8972_v25 = vor.u32 %v11142_v10, %v8969_v20  ;;  %v11156_v30 = vld [vmem:[#allocation8 + $0x9d4] sm:$0xf]  ;;  %v8964_v47 = vor.u32 %v11140_v38, %v8961_v28 }
 0x152   : > { %2986 = vmatpush.bf16.msra.mxu1 %v8872_v9  ;;  %v11159_v9 = vld [vmem:[#allocation8 + $0x9e4] sm:$0xf0]  ;;  %v9025_v39 = vld [vmem:[#allocation8 + $0x9d8] sm:$0xf0]  ;;  %v9015_v60 = vld [vmem:[#allocation8 + $0x9c0] sm:$0xf] }
 0x153   : > { %3004 = vmatpush.bf16.msra.mxu2 %v8812_v13  ;;  %v1526_v42 = vpop.f32.mrf.mxu2  ;;  %v9040_v13 = vor.u32 %v11161_v59, %v9039_v11  ;;  %v9032_v36 = vor.u32 %v11159_v9, %v9031_v24  ;;  %v11139_v51 = vld [vmem:[#allocation8 + $0x944] sm:$0xf0]  ;;  %v11152_v59 = vld [vmem:[#allocation8 + $0x9b4] sm:$0xf]  ;;  %v9007_v10 = vld [vmem:[#allocation8 + $0x9b0] sm:$0xf] }
 0x154   : > { %3022 = vmatpush.bf16.msra.mxu3 %v8876_v22  ;;  %v1544_v8 = vpop.f32.mrf.mxu3  ;;  %v1492_v57 = vpop.f32.mrf.mxu0  ;;  %v11158_v22 = vld [vmem:[#allocation8 + $0x9e4] sm:$0xf]  ;;  %v11155_v63 = vld [vmem:[#allocation8 + $0x9c4] sm:$0xf0]  ;;  %v8937_v9 = vld [vmem:[#allocation8 + $0x928] sm:$0xf0] }
 0x155   : > { %2969 = vmatpush.bf16.msra.mxu0 %v8800_v34  ;;  %v1545_v4 = vadd.f32 %v1544_v8, %v1526_v42  ;;  %v1510_v3 = vpop.f32.mrf.mxu1  ;;  %v9036_v27 = vor.u32 %v11158_v22, %v9033_v23  ;;  %v11157_v34 = vld [vmem:[#allocation8 + $0x9d4] sm:$0xf0]  ;;  %v9009_v42 = vld [vmem:[#allocation8 + $0x9b8] sm:$0xf0]  ;;  %v8952_v8 = vor.u32 %v11139_v51, %v8951_v58  ;;  %v3042_v57 = vld [vmem:[#allocation2 + $0x10] sm:$0xff]  ;;  %v2797_v51 = vpack.c.b16 %v12337_v17, %v12337_v17 }
 0x156   : > { %2987 = vmatpush.bf16.msra.mxu1 %v8864_v53  ;;  %v9028_v53 = vor.u32 %v11156_v30, %v9025_v39  ;;  %v9012_v18 = vor.u32 %v11152_v59, %v9009_v42  ;;  %v11134_v24 = vld [vmem:[#allocation8 + $0x924] sm:$0xf]  ;;  %v8935_v38 = vld [vmem:[#allocation8 + $0x920] sm:$0xf]  ;;  %v11135_v28 = vld [vmem:[#allocation8 + $0x924] sm:$0xf0]  ;;  %v12442_v30 = vunpack.c.l.b16 %v3042_v57 }
 0x157   : > { %3005 = vmatpush.bf16.msra.mxu2 %v8804_v32  ;;  %v12430_v14 = vadd.f32 %v1545_v4, %v12397_v50  ;;  %v2795_v50 = vpack.c.b16 %v12106_v26, %v12112_v35  ;;  %v11141_v32 = vld [vmem:[#allocation8 + $0x954] sm:$0xf0]  ;;  %v11154_v26 = vld [vmem:[#allocation8 + $0x9c4] sm:$0xf]  ;;  %v9017_v35 = vld [vmem:[#allocation8 + $0x9c8] sm:$0xf0] }
 0x158   : > { %3023 = vmatpush.bf16.msra.mxu3 %v8868_v1  ;;  %v9023_v1 = vld [vmem:[#allocation8 + $0x9d0] sm:$0xf]  ;;  %v8960_v48 = vor.u32 %v11141_v32, %v8959_v52  ;;  %v9020_v11 = vor.u32 %v11154_v26, %v9017_v35  ;;  %v3041_v4 = vld [vmem:[#allocation2 + $0x8] sm:$0xff]  ;;  %v8999_v39 = vld [vmem:[#allocation8 + $0x9a0] sm:$0xf]  ;;  %v12444_v32 = vunpack.c.h.b16 %v3042_v57 }
 0x159   : > { %2970 = vmatpush.bf16.msra.mxu0 %v8792_v7  ;;  %v9024_v56 = vor.u32 %v11157_v34, %v9023_v1  ;;  %v8943_v7 = vld [vmem:[#allocation8 + $0x930] sm:$0xf]  ;;  %v11151_v52 = vld [vmem:[#allocation8 + $0x9a4] sm:$0xf0]  ;;  %v8929_v34 = vld [vmem:[#allocation8 + $0x918] sm:$0xf0] }
 0x15a   : > { %2988 = vmatpush.bf16.msra.mxu1 %v8856_v19  ;;  %v11149_v26 = vld [vmem:[#allocation8 + $0x994] sm:$0xf0]  ;;  %v12459_v59 = vld [vmem:[#allocation8 + $0x904] sm:$0xf]  ;;  %v8921_v42 = vld [vmem:[#allocation8 + $0x908] sm:$0xf0] }
 0x15b   : > { %3006 = vmatpush.bf16.msra.mxu2 %v8796_v0  ;;  %v1528_v40 = vpop.f32.mrf.mxu2  ;;  %v8945_v0 = vld [vmem:[#allocation8 + $0x938] sm:$0xf0] }
 0x15c   : > { %3024 = vmatpush.bf16.msra.mxu3 %v8860_v2  ;;  %v1546_v54 = vpop.f32.mrf.mxu3  ;;  %v1773_v37 = vpop.f32.mrf.mxu0  ;;  %2971 = vmatmul.bf16.vlgmr.msra.gmra.mxu0 %v2795_v50  ;;  %v8956_v2 = vor.u32 %v11138_v43, %v8953_v46  ;;  %v8948_v22 = vor.u32 %v11136_v41, %v8945_v0  ;;  %v3082_v40 = vunpack.c.l.b16 %v3041_v4  ;;  %v8936_v46 = vor.u32 %v11135_v28, %v8935_v38 }
 0x15d   : > { %3288 = vmatpush.bf16.msrb.mxu0 %v8976_v12  ;;  %v1791_v44 = vpop.f32.mrf.mxu1  ;;  %2989 = vmatmul.bf16.vlgmr.msra.gmra.mxu1 %v2796_v49  ;;  %v3044_v54 = vld [vmem:[#allocation2 + $0x20] sm:$0x11]  ;;  %v8924_v38 = vor.u32 %v12459_v59, %v8921_v42 }
 0x15e   : > { %3306 = vmatpush.bf16.msrb.mxu1 %v9040_v13  ;;  %v1792_v15 = vadd.f32 %v1791_v44, %v1773_v37  ;;  %3007 = vmatmul.bf16.vlgmr.msra.gmra.mxu2 %v2795_v50  ;;  %v3083_v50 = vunpack.c.h.b16 %v3041_v4  ;;  %v8940_v37 = vor.u32 %v11134_v24, %v8937_v9  ;;  %v11148_v44 = vld [vmem:[#allocation8 + $0x994] sm:$0xf]  ;;  %v3088_v35 = vunpack.c.l.b16 %v3044_v54  ;;  %v9105_v24 = vld [vmem:[#allocation8 + $0xa78] sm:$0xf0] }
 0x15f   : > { %3324 = vmatpush.bf16.msrb.mxu2 %v8980_v61  ;;  %3025 = vmatmul.bf16.vlgmr.msra.gmra.mxu3 %v2796_v49  ;;  %v9016_v61 = vor.u32 %v11155_v63, %v9015_v60  ;;  %v3089_v60 = vunpack.c.h.b16 %v3044_v54  ;;  %v11193_v54 = vld [vmem:[#allocation8 + $0xaf4] sm:$0xf0] }
 0x160   : > { %3342 = vmatpush.bf16.msrb.mxu3 %v9044_v6  ;;  %v12437_v29 = vadd.f32 %v1792_v15, %v12410_v21  ;;  %v11137_v6 = vld [vmem:[#allocation8 + $0x934] sm:$0xf0]  ;;  %v9000_v15 = vor.u32 %v11151_v52, %v8999_v39  ;;  %v12455_v63 = vpack.c.b16 %v12444_v32, %v3083_v50  ;;  %v9167_v52 = vld [vmem:[#allocation8 + $0xaf0] sm:$0xf] }
 0x161   : > { %3289 = vmatpush.bf16.msrb.mxu0 %v8968_v31  ;;  %v11153_v21 = vld [vmem:[#allocation8 + $0x9b4] sm:$0xf0]  ;;  %v8944_v3 = vor.u32 %v11137_v6, %v8943_v7  ;;  %v11146_v7 = vld [vmem:[#allocation8 + $0x984] sm:$0xf] }
 0x162   : > { %3307 = vmatpush.bf16.msrb.mxu1 %v9032_v36  ;;  %v9008_v62 = vor.u32 %v11153_v21, %v9007_v10  ;;  %v9001_v36 = vld [vmem:[#allocation8 + $0x9a8] sm:$0xf0]  ;;  %v8919_v21 = vld [vmem:[#allocation8 + $0x900] sm:$0xf]  ;;  %v11177_v39 = vld [vmem:[#allocation8 + $0xa74] sm:$0xf0] }
 0x163   : > { %3325 = vmatpush.bf16.msrb.mxu2 %v8972_v25  ;;  %v1809_v19 = vpop.f32.mrf.mxu2  ;;  %v11150_v25 = vld [vmem:[#allocation8 + $0x9a4] sm:$0xf]  ;;  %v8985_v10 = vld [vmem:[#allocation8 + $0x988] sm:$0xf0] }
 0x164   : > { %3343 = vmatpush.bf16.msrb.mxu3 %v9036_v27  ;;  %v1827_v20 = vpop.f32.mrf.mxu3  ;;  %v1775_v13 = vpop.f32.mrf.mxu0  ;;  %v9004_v49 = vor.u32 %v11150_v25, %v9001_v36  ;;  %v11192_v25 = vld [vmem:[#allocation8 + $0xaf4] sm:$0xf]  ;;  %v9103_v36 = vld [vmem:[#allocation8 + $0xa70] sm:$0xf]  ;;  %v8988_v28 = vor.u32 %v11146_v7, %v8985_v10 }
 0x165   : > { %3290 = vmatpush.bf16.msrb.mxu0 %v8960_v48  ;;  %v1828_v12 = vadd.f32 %v1827_v20, %v1809_v19  ;;  %v1793_v23 = vpop.f32.mrf.mxu1  ;;  %v11133_v48 = vld [vmem:[#allocation8 + $0x914] sm:$0xf0]  ;;  %v11131_v20 = vld [vmem:[#allocation8 + $0x904] sm:$0xf0]  ;;  %v11172_v10 = vld [vmem:[#allocation8 + $0xa54] sm:$0xf] }
 0x166   : > { %3308 = vmatpush.bf16.msrb.mxu1 %v9024_v56  ;;  %v1794_v31 = vadd.f32 %v1793_v23, %v1775_v13  ;;  %v8991_v56 = vld [vmem:[#allocation8 + $0x990] sm:$0xf]  ;;  %v11147_v13 = vld [vmem:[#allocation8 + $0x984] sm:$0xf0] }
 0x167   : > { %3326 = vmatpush.bf16.msrb.mxu2 %v8964_v47  ;;  %v12440_v27 = vadd.f32 %v1828_v12, %v12413_v5  ;;  %v11132_v5 = vld [vmem:[#allocation8 + $0x914] sm:$0xf]  ;;  %v8993_v47 = vld [vmem:[#allocation8 + $0x998] sm:$0xf0]  ;;  %v8992_v6 = vor.u32 %v11149_v26, %v8991_v56  ;;  %v8983_v12 = vld [vmem:[#allocation8 + $0x980] sm:$0xf]  ;;  %v9104_v26 = vor.u32 %v11177_v39, %v9103_v36 }
 0x168   : > { %3344 = vmatpush.bf16.msrb.mxu3 %v9028_v53  ;;  %v12447_v1 = vadd.f32 %v1794_v31, %v12416_v33  ;;  %v8927_v53 = vld [vmem:[#allocation8 + $0x910] sm:$0xf]  ;;  %v12450_v33 = vpack.c.b16 %v12442_v30, %v3082_v40  ;;  %v9169_v31 = vld [vmem:[#allocation8 + $0xaf8] sm:$0xf0]  ;;  %v8920_v40 = vor.u32 %v11131_v20, %v8919_v21  ;;  %v11188_v20 = vld [vmem:[#allocation8 + $0xad4] sm:$0xf] }
 0x169   : > { %3291 = vmatpush.bf16.msrb.mxu0 %v8952_v8  ;;  %v8996_v8 = vor.u32 %v11148_v44, %v8993_v47  ;;  %v9089_v21 = vld [vmem:[#allocation8 + $0xa58] sm:$0xf0] }
 0x16a   : > { %3309 = vmatpush.bf16.msrb.mxu1 %v9016_v61  ;;  %v8928_v61 = vor.u32 %v11133_v48, %v8927_v53  ;;  %v3097_v23 = vshll.u32 %v12450_v33, 16  ;;  %v9092_v36 = vor.u32 %v11172_v10, %v9089_v21 }
 0x16b   : > { %3327 = vmatpush.bf16.msrb.mxu2 %v8956_v2  ;;  %v1811_v43 = vpop.f32.mrf.mxu2  ;;  %v2798_v2 = vpack.c.b16 %v12348_v16, %v12348_v16 }
 0x16c   : > { %3345 = vmatpush.bf16.msrb.mxu3 %v9020_v11  ;;  %v1829_v58 = vpop.f32.mrf.mxu3  ;;  %v1778_v0 = vpop.f32.mrf.mxu0  ;;  %v8932_v11 = vor.u32 %v11132_v5, %v8929_v34  ;;  %2976 = vmatmul.bf16.gmra.mxu0 %v2797_v51  ;;  %v8984_v5 = vor.u32 %v11147_v13, %v8983_v12  ;;  %v9087_v12 = vld [vmem:[#allocation8 + $0xa50] sm:$0xf] }
 0x16d   : > { %3292 = vmatpush.bf16.msrb.mxu0 %v8944_v3  ;;  %v1830_v41 = vadd.f32 %v1829_v58, %v1811_v43  ;;  %v1796_v19 = vpop.f32.mrf.mxu1  ;;  %v12470_v3 = vpack.c.b16 %v3089_v60, %v12348_v16  ;;  %2994 = vmatmul.bf16.gmra.mxu1 %v2798_v2  ;;  %v9172_v43 = vor.u32 %v11192_v25, %v9169_v31  ;;  %v9161_v58 = vld [vmem:[#allocation8 + $0xae8] sm:$0xf0] }
 0x16e   : > { %3310 = vmatpush.bf16.msrb.mxu1 %v9008_v62  ;;  %v1797_v57 = vadd.f32 %v1796_v19, %v1778_v0  ;;  %3012 = vmatmul.bf16.gmra.mxu2 %v2797_v51  ;;  %v11176_v62 = vld [vmem:[#allocation8 + $0xa74] sm:$0xf]  ;;  %v9095_v51 = vld [vmem:[#allocation8 + $0xa60] sm:$0xf]  ;;  %v11191_v0 = vld [vmem:[#allocation8 + $0xae4] sm:$0xf0] }
 0x16f   : > { %3328 = vmatpush.bf16.msrb.mxu2 %v8948_v22  ;;  %v12462_v4 = vadd.f32 %v1830_v41, %v12419_v45  ;;  %v12465_v22 = vpack.c.b16 %v3088_v35, %v12337_v17  ;;  %v3109_v45 = vshll.u32 %v12455_v63, 16  ;;  %3030 = vmatmul.bf16.gmra.mxu3 %v2798_v2  ;;  %v3114_v47 = vshll.u32 %v12470_v3, 16  ;;  %v11175_v41 = vld [vmem:[#allocation8 + $0xa64] sm:$0xf0] }
 0x170   : > { %3346 = vmatpush.bf16.msrb.mxu3 %v9012_v18  ;;  %v3095_v18 = vshrl.u32 %v12450_v33, 16  ;;  %v12474_v9 = vadd.f32 %v1797_v57, %v12424_v55  ;;  %v3099_v55 = vrot.slane %v3097_v23, 1  ;;  %v9108_v53 = vor.u32 %v11176_v62, %v9105_v24  ;;  %v11190_v33 = vld [vmem:[#allocation8 + $0xae4] sm:$0xf]  ;;  %v9153_v57 = vld [vmem:[#allocation8 + $0xad8] sm:$0xf0] }
 0x171   : > { %3293 = vmatpush.bf16.msrb.mxu0 %v8936_v46  ;;  %v3102_v34 = vshll.u32 %v12465_v22, 16  ;;  %v3111_v44 = vrot.slane %v3109_v45, 1  ;;  %v11174_v46 = vld [vmem:[#allocation8 + $0xa64] sm:$0xf]  ;;  %v9168_v35 = vor.u32 %v11193_v54, %v9167_v52  ;;  %v9164_v59 = vor.u32 %v11190_v33, %v9161_v58  ;;  %v11173_v23 = vld [vmem:[#allocation8 + $0xa54] sm:$0xf0] }
 0x172   : > { %3311 = vmatpush.bf16.msrb.mxu1 %v9000_v15  ;;  %v9097_v15 = vld [vmem:[#allocation8 + $0xa68] sm:$0xf0]  ;;  %v3100_v42 = vor.u32 %v3099_v55, %v3095_v18  ;;  %v9096_v19 = vor.u32 %v11175_v41, %v9095_v51  ;;  %v9151_v18 = vld [vmem:[#allocation8 + $0xad0] sm:$0xf]  ;;  %v11189_v45 = vld [vmem:[#allocation8 + $0xad4] sm:$0xf0]  ;;  %v9088_v52 = vor.u32 %v11173_v23, %v9087_v12 }
 0x173   : > { %3329 = vmatpush.bf16.msrb.mxu2 %v8940_v37  ;;  %v1814_v50 = vpop.f32.mrf.mxu2  ;;  %v3107_v37 = vshrl.u32 %v12455_v63, 16  ;;  %v9159_v63 = vld [vmem:[#allocation8 + $0xae0] sm:$0xf]  ;;  %v12483_v7 = vrot.slane %v3102_v34, 1  ;;  %v9152_v54 = vor.u32 %v11189_v45, %v9151_v18  ;;  %v11171_v34 = vld [vmem:[#allocation8 + $0xa44] sm:$0xf0] }
 0x174   : > { %3347 = vmatpush.bf16.msrb.mxu3 %v9004_v49  ;;  %v1832_v49 = vpop.f32.mrf.mxu3  ;;  %v1780_v56 = vpop.f32.mrf.mxu0  ;;  %v9079_v55 = vld [vmem:[#allocation8 + $0xa40] sm:$0xf]  ;;  %v9071_v33 = vld [vmem:[#allocation8 + $0xa30] sm:$0xf]  ;;  %v11169_v58 = vld [vmem:[#allocation8 + $0xa34] sm:$0xf0] }
 0x175   : > { %3294 = vmatpush.bf16.msrb.mxu0 %v8928_v61  ;;  %v1833_v48 = vadd.f32 %v1832_v49, %v1814_v50  ;;  %v1798_v60 = vpop.f32.mrf.mxu1  ;;  %v3112_v61 = vor.u32 %v3111_v44, %v3107_v37  ;;  %v3105_v24 = vsel %vm677_vm0, %v3100_v42, %v12483_v7  ;;  %v11186_v50 = vld [vmem:[#allocation8 + $0xac4] sm:$0xf]  ;;  %v9143_v37 = vld [vmem:[#allocation8 + $0xac0] sm:$0xf]  ;;  %v11187_v49 = vld [vmem:[#allocation8 + $0xac4] sm:$0xf0]  ;;  %v9080_v56 = vor.u32 %v11171_v34, %v9079_v55 }
 0x176   : > { %3312 = vmatpush.bf16.msrb.mxu1 %v8992_v6  ;;  %v12485_v6 = vrot.slane %v3114_v47, 1  ;;  %v11185_v60 = vld [vmem:[#allocation8 + $0xab4] sm:$0xf0]  ;;  %v9063_v12 = vld [vmem:[#allocation8 + $0xa20] sm:$0xf] }
 0x177   : > { %3330 = vmatpush.bf16.msrb.mxu2 %v8932_v11  ;;  %v12481_v2 = vadd.f32 %v1833_v48, %v12430_v14  ;;  %v9100_v11 = vor.u32 %v11174_v46, %v9097_v15  ;;  %v9073_v46 = vld [vmem:[#allocation8 + $0xa38] sm:$0xf0]  ;;  %v11184_v15 = vld [vmem:[#allocation8 + $0xab4] sm:$0xf]  ;;  %v9127_v23 = vld [vmem:[#allocation8 + $0xaa0] sm:$0xf] }
 0x178   : > { %3348 = vmatpush.bf16.msrb.mxu3 %v8996_v8  ;;  %v9160_v8 = vor.u32 %v11191_v0, %v9159_v63  ;;  %v3117_v31 = vsel %vm677_vm0, %v3112_v61, %v12485_v6  ;;  %v9065_v61 = vld [vmem:[#allocation8 + $0xa28] sm:$0xf0]  ;;  %v11183_v18 = vld [vmem:[#allocation8 + $0xaa4] sm:$0xf0]  ;;  %v11181_v55 = vld [vmem:[#allocation8 + $0xa94] sm:$0xf0] }
 0x179   : > { %3295 = vmatpush.bf16.msrb.mxu0 %v8920_v40  ;;  %v9081_v40 = vld [vmem:[#allocation8 + $0xa48] sm:$0xf0] }
 0x17a   : > { %3313 = vmatpush.bf16.msrb.mxu1 %v8984_v5  ;;  %v9145_v5 = vld [vmem:[#allocation8 + $0xac8] sm:$0xf0] }
 0x17b   : > { %3331 = vmatpush.bf16.msrb.mxu2 %v8924_v38  ;;  %v1816_v14 = vpop.f32.mrf.mxu2  ;;  %v9156_v38 = vor.u32 %v11188_v20, %v9153_v57  ;;  %v11182_v20 = vld [vmem:[#allocation8 + $0xaa4] sm:$0xf]  ;;  %v9129_v57 = vld [vmem:[#allocation8 + $0xaa8] sm:$0xf0] }
 0x17c   : > { %3349 = vmatpush.bf16.msrb.mxu3 %v8988_v28  ;;  %v1834_v13 = vpop.f32.mrf.mxu3  ;;  %v2089_v62 = vpop.f32.mrf.mxu0  ;;  %v11170_v28 = vld [vmem:[#allocation8 + $0xa44] sm:$0xf]  ;;  %3296 = vmatmul.bf16.vlgmr.msrb.gmra.mxu0 %v3105_v24 }
 0x17d   : > { %3575 = vmatpush.bf16.msra.mxu0 %v9104_v26  ;;  %v2107_v25 = vpop.f32.mrf.mxu1  ;;  %3314 = vmatmul.bf16.vlgmr.msrb.gmra.mxu1 %v3117_v31  ;;  %v9084_v47 = vor.u32 %v11170_v28, %v9081_v40  ;;  %v9144_v26 = vor.u32 %v11187_v49, %v9143_v37  ;;  %v11167_v13 = vld [vmem:[#allocation8 + $0xa24] sm:$0xf0]  ;;  %v9128_v40 = vor.u32 %v11183_v18, %v9127_v23 }
 0x17e   : > { %3593 = vmatpush.bf16.msra.mxu1 %v9168_v35  ;;  %v2108_v39 = vadd.f32 %v2107_v25, %v2089_v62  ;;  %3332 = vmatmul.bf16.vlgmr.msrb.gmra.mxu2 %v3105_v24  ;;  %v9137_v35 = vld [vmem:[#allocation8 + $0xab8] sm:$0xf0]  ;;  %v3121_v62 = vshrl.u32 %v12470_v3, 16  ;;  %v11164_v25 = vld [vmem:[#allocation8 + $0xa14] sm:$0xf]  ;;  %v9064_v28 = vor.u32 %v11167_v13, %v9063_v12 }
 0x17f   : > { %3611 = vmatpush.bf16.msra.mxu2 %v9108_v53  ;;  %3350 = vmatmul.bf16.vlgmr.msrb.gmra.mxu3 %v3117_v31  ;;  %v9148_v53 = vor.u32 %v11186_v50, %v9145_v5  ;;  %v9140_v42 = vor.u32 %v11184_v15, %v9137_v35  ;;  %v9057_v31 = vld [vmem:[#allocation8 + $0xa18] sm:$0xf0]  ;;  %v9119_v5 = vld [vmem:[#allocation8 + $0xa90] sm:$0xf]  ;;  %v9113_v35 = vld [vmem:[#allocation8 + $0xa88] sm:$0xf0] }
 0x180   : > { %3629 = vmatpush.bf16.msra.mxu3 %v9172_v43  ;;  %v12492_v44 = vadd.f32 %v2108_v39, %v12437_v29  ;;  %v11168_v43 = vld [vmem:[#allocation8 + $0xa34] sm:$0xf]  ;;  %v9135_v29 = vld [vmem:[#allocation8 + $0xab0] sm:$0xf]  ;;  %v9121_v39 = vld [vmem:[#allocation8 + $0xa98] sm:$0xf0]  ;;  %v3123_v49 = vor.u32 %v3121_v62, %v12485_v6 }
 0x181   : > { %3576 = vmatpush.bf16.msra.mxu0 %v9096_v19  ;;  %v9072_v19 = vor.u32 %v11169_v58, %v9071_v33  ;;  %v9136_v14 = vor.u32 %v11185_v60, %v9135_v29  ;;  %v9120_v58 = vor.u32 %v11181_v55, %v9119_v5  ;;  %v11163_v6 = vld [vmem:[#allocation8 + $0xa04] sm:$0xf0]  ;;  %v9111_v29 = vld [vmem:[#allocation8 + $0xa80] sm:$0xf]  ;;  %v11206_v62 = vld [vmem:[#allocation8 + $0xb64] sm:$0xf] }
 0x182   : > { %3594 = vmatpush.bf16.msra.mxu1 %v9160_v8  ;;  %v11166_v8 = vld [vmem:[#allocation8 + $0xa24] sm:$0xf]  ;;  %v11179_v60 = vld [vmem:[#allocation8 + $0xa84] sm:$0xf0] }
 0x183   : > { %3612 = vmatpush.bf16.msra.mxu2 %v9100_v11  ;;  %v2125_v48 = vpop.f32.mrf.mxu2  ;;  %v3118_v11 = vshrl.u32 %v12465_v22, 16  ;;  %v9068_v24 = vor.u32 %v11166_v8, %v9065_v61  ;;  %v11223_v5 = vld [vmem:[#allocation8 + $0xbe4] sm:$0xf0] }
 0x184   : > { %3630 = vmatpush.bf16.msra.mxu3 %v9164_v59  ;;  %v2143_v51 = vpop.f32.mrf.mxu3  ;;  %v2091_v63 = vpop.f32.mrf.mxu0  ;;  %v9076_v59 = vor.u32 %v11168_v43, %v9073_v46  ;;  %v9060_v46 = vor.u32 %v11164_v25, %v9057_v31 }
 0x185   : > { %3577 = vmatpush.bf16.msra.mxu0 %v9088_v52  ;;  %v2144_v41 = vadd.f32 %v2143_v51, %v2125_v48  ;;  %v2109_v0 = vpop.f32.mrf.mxu1  ;;  %v9055_v52 = vld [vmem:[#allocation8 + $0xa10] sm:$0xf]  ;;  %v9047_v51 = vld [vmem:[#allocation8 + $0xa00] sm:$0xf] }
 0x186   : > { %3595 = vmatpush.bf16.msra.mxu1 %v9152_v54  ;;  %v2110_v21 = vadd.f32 %v2109_v0, %v2091_v63  ;;  %v11165_v54 = vld [vmem:[#allocation8 + $0xa14] sm:$0xf0]  ;;  %v9233_v63 = vld [vmem:[#allocation8 + $0xb78] sm:$0xf0]  ;;  %v9048_v12 = vor.u32 %v11163_v6, %v9047_v51  ;;  %v9279_v51 = vld [vmem:[#allocation8 + $0xbd0] sm:$0xf] }
 0x187   : > { %3613 = vmatpush.bf16.msra.mxu2 %v9092_v36  ;;  %v12496_v10 = vadd.f32 %v2144_v41, %v12440_v27  ;;  %v9132_v27 = vor.u32 %v11182_v20, %v9129_v57  ;;  %v11180_v36 = vld [vmem:[#allocation8 + $0xa94] sm:$0xf]  ;;  %v9056_v48 = vor.u32 %v11165_v54, %v9055_v52  ;;  %v11225_v20 = vld [vmem:[#allocation8 + $0xbf4] sm:$0xf0] }
 0x188   : > { %3631 = vmatpush.bf16.msra.mxu3 %v9156_v38  ;;  %v12499_v45 = vadd.f32 %v2110_v21, %v12447_v1  ;;  %v3120_v1 = vor.u32 %v3118_v11, %v12483_v7  ;;  %v9124_v15 = vor.u32 %v11180_v36, %v9121_v39  ;;  %v11208_v41 = vld [vmem:[#allocation8 + $0xb74] sm:$0xf]  ;;  %v11209_v21 = vld [vmem:[#allocation8 + $0xb74] sm:$0xf0]  ;;  %v9223_v39 = vld [vmem:[#allocation8 + $0xb60] sm:$0xf] }
 0x189   : > { %3578 = vmatpush.bf16.msra.mxu0 %v9080_v56  ;;  %v9049_v56 = vld [vmem:[#allocation8 + $0xa08] sm:$0xf0]  ;;  %v9236_v23 = vor.u32 %v11208_v41, %v9233_v63  ;;  %v11221_v6 = vld [vmem:[#allocation8 + $0xbd4] sm:$0xf0] }
 0x18a   : > { %3596 = vmatpush.bf16.msra.mxu1 %v9144_v26  ;;  %v11178_v26 = vld [vmem:[#allocation8 + $0xa84] sm:$0xf] }
 0x18b   : > { %3614 = vmatpush.bf16.msra.mxu2 %v9084_v47  ;;  %v2127_v38 = vpop.f32.mrf.mxu2  ;;  %v11162_v47 = vld [vmem:[#allocation8 + $0xa04] sm:$0xf]  ;;  %v9116_v8 = vor.u32 %v11178_v26, %v9113_v35  ;;  %v11220_v26 = vld [vmem:[#allocation8 + $0xbd4] sm:$0xf]  ;;  %v9281_v35 = vld [vmem:[#allocation8 + $0xbd8] sm:$0xf0] }
 0x18c   : > { %3632 = vmatpush.bf16.msra.mxu3 %v9148_v53  ;;  %v2145_v50 = vpop.f32.mrf.mxu3  ;;  %v2094_v37 = vpop.f32.mrf.mxu0  ;;  %v3366_v53 = vld [vmem:[#allocation2 + $0x8] sm:$0xee]  ;;  %3301 = vmatmul.bf16.gmra.mxu0 %v3120_v1 }
 0x18d   : > { %3579 = vmatpush.bf16.msra.mxu0 %v9072_v19  ;;  %v2146_v34 = vadd.f32 %v2145_v50, %v2127_v38  ;;  %v2112_v43 = vpop.f32.mrf.mxu1  ;;  %3319 = vmatmul.bf16.gmra.mxu1 %v3123_v49  ;;  %v3401_v11 = vunpack.c.l.b16 %v3366_v53  ;;  %v9052_v19 = vor.u32 %v11162_v47, %v9049_v56  ;;  %v3402_v61 = vunpack.c.h.b16 %v3366_v53  ;;  %v11207_v50 = vld [vmem:[#allocation8 + $0xb64] sm:$0xf0] }
 0x18e   : > { %3597 = vmatpush.bf16.msra.mxu1 %v9136_v14  ;;  %v2113_v7 = vadd.f32 %v2112_v43, %v2094_v37  ;;  %3337 = vmatmul.bf16.gmra.mxu2 %v3120_v1  ;;  %v9295_v14 = vld [vmem:[#allocation8 + $0xbf0] sm:$0xf]  ;;  %v9287_v1 = vld [vmem:[#allocation8 + $0xbe0] sm:$0xf]  ;;  %v12521_v47 = vrot.slane %v12465_v22, 1  ;;  %v9224_v53 = vor.u32 %v11207_v50, %v9223_v39 }
 0x18f   : > { %3615 = vmatpush.bf16.msra.mxu2 %v9076_v59  ;;  %v12505_v33 = vadd.f32 %v2146_v34, %v12462_v4  ;;  %3355 = vmatmul.bf16.gmra.mxu3 %v3123_v49  ;;  %v11224_v4 = vld [vmem:[#allocation8 + $0xbf4] sm:$0xf]  ;;  %v9297_v59 = vld [vmem:[#allocation8 + $0xbf8] sm:$0xf0]  ;;  %v12511_v31 = vpack.c.b16 %v12442_v30, %v3401_v11  ;;  %v9296_v38 = vor.u32 %v11225_v20, %v9295_v14  ;;  %v11205_v22 = vld [vmem:[#allocation8 + $0xb54] sm:$0xf0] }
 0x190   : > { %3633 = vmatpush.bf16.msra.mxu3 %v9140_v42  ;;  %v12508_v0 = vadd.f32 %v2113_v7, %v12474_v9  ;;  %v9231_v42 = vld [vmem:[#allocation8 + $0xb70] sm:$0xf]  ;;  %v9112_v9 = vor.u32 %v11179_v60, %v9111_v29  ;;  %v9300_v18 = vor.u32 %v11224_v4, %v9297_v59  ;;  %v12514_v54 = vpack.c.b16 %v12444_v32, %v3402_v61  ;;  %v11202_v4 = vld [vmem:[#allocation8 + $0xb44] sm:$0xf]  ;;  %v9209_v59 = vld [vmem:[#allocation8 + $0xb48] sm:$0xf0] }
 0x191   : > { %3580 = vmatpush.bf16.msra.mxu0 %v9064_v28  ;;  %v9232_v36 = vor.u32 %v11209_v21, %v9231_v42  ;;  %v11222_v28 = vld [vmem:[#allocation8 + $0xbe4] sm:$0xf]  ;;  %v3405_v49 = vrot.slane %v12511_v31, 1  ;;  %v9288_v43 = vor.u32 %v11223_v5, %v9287_v1  ;;  %v9215_v7 = vld [vmem:[#allocation8 + $0xb50] sm:$0xf]  ;;  %v9284_v11 = vor.u32 %v11220_v26, %v9281_v35 }
 0x192   : > { %3598 = vmatpush.bf16.msra.mxu1 %v9128_v40  ;;  %v9289_v40 = vld [vmem:[#allocation8 + $0xbe8] sm:$0xf0]  ;;  %v11218_v61 = vld [vmem:[#allocation8 + $0xbc4] sm:$0xf]  ;;  %v9207_v14 = vld [vmem:[#allocation8 + $0xb40] sm:$0xf] }
 0x193   : > { %3616 = vmatpush.bf16.msra.mxu2 %v9068_v24  ;;  %v2130_v57 = vpop.f32.mrf.mxu2  ;;  %v9225_v24 = vld [vmem:[#allocation8 + $0xb68] sm:$0xf0]  ;;  %v9292_v37 = vor.u32 %v11222_v28, %v9289_v40  ;;  %v3407_v60 = vsel %vm989_vm1, %v3405_v49, %v12521_v47  ;;  %v11203_v20 = vld [vmem:[#allocation8 + $0xb44] sm:$0xf0]  ;;  %v9199_v28 = vld [vmem:[#allocation8 + $0xb30] sm:$0xf] }
 0x194   : > { %3634 = vmatpush.bf16.msra.mxu3 %v9132_v27  ;;  %v2148_v13 = vpop.f32.mrf.mxu3  ;;  %v2096_v25 = vpop.f32.mrf.mxu0  ;;  %v9228_v34 = vor.u32 %v11206_v62, %v9225_v24  ;;  %v9273_v21 = vld [vmem:[#allocation8 + $0xbc8] sm:$0xf0]  ;;  %v9201_v62 = vld [vmem:[#allocation8 + $0xb38] sm:$0xf0]  ;;  %v11216_v24 = vld [vmem:[#allocation8 + $0xbb4] sm:$0xf] }
 0x195   : > { %3581 = vmatpush.bf16.msra.mxu0 %v9056_v48  ;;  %v2149_v27 = vadd.f32 %v2148_v13, %v2130_v57  ;;  %v2114_v52 = vpop.f32.mrf.mxu1  ;;  %v9217_v48 = vld [vmem:[#allocation8 + $0xb58] sm:$0xf0]  ;;  %v9271_v57 = vld [vmem:[#allocation8 + $0xbc0] sm:$0xf]  ;;  %v11200_v13 = vld [vmem:[#allocation8 + $0xb34] sm:$0xf] }
 0x196   : > { %3599 = vmatpush.bf16.msra.mxu1 %v9120_v58  ;;  %v11201_v40 = vld [vmem:[#allocation8 + $0xb34] sm:$0xf0]  ;;  %v3653_v39 = vld [vmem:[#allocation2 + $0x20] sm:$0x33] }
 0x197   : > { %3617 = vmatpush.bf16.msra.mxu2 %v9060_v46  ;;  %v12517_v55 = vadd.f32 %v2149_v27, %v12481_v2  ;;  %v3408_v46 = vrot.slane %v12514_v54, 1  ;;  %v12525_v2 = vrot.slane %v12470_v3, 1  ;;  %v9265_v27 = vld [vmem:[#allocation8 + $0xbb8] sm:$0xf0]  ;;  %v9263_v52 = vld [vmem:[#allocation8 + $0xbb0] sm:$0xf]  ;;  %v3688_v26 = vunpack.c.l.b16 %v3653_v39 }
 0x198   : > { %3635 = vmatpush.bf16.msra.mxu3 %v9124_v15  ;;  %v11204_v15 = vld [vmem:[#allocation8 + $0xb54] sm:$0xf]  ;;  %v11217_v50 = vld [vmem:[#allocation8 + $0xbb4] sm:$0xf0] }
 0x199   : > { %3582 = vmatpush.bf16.msra.mxu0 %v9048_v12  ;;  %v3410_v41 = vsel %vm989_vm1, %v3408_v46, %v12525_v2  ;;  %v9220_v63 = vor.u32 %v11204_v15, %v9217_v48  ;;  %v11219_v12 = vld [vmem:[#allocation8 + $0xbc4] sm:$0xf0]  ;;  %v9200_v46 = vor.u32 %v11201_v40, %v9199_v28  ;;  %v11214_v15 = vld [vmem:[#allocation8 + $0xba4] sm:$0xf]  ;;  %v9257_v48 = vld [vmem:[#allocation8 + $0xba8] sm:$0xf0] }
 0x19a   : > { %3600 = vmatpush.bf16.msra.mxu1 %v9112_v9  ;;  %v9241_v28 = vld [vmem:[#allocation8 + $0xb88] sm:$0xf0]  ;;  %v12569_v40 = vld [vmem:[#allocation8 + $0xb00] sm:$0xf] }
 0x19b   : > { %3618 = vmatpush.bf16.msra.mxu2 %v9052_v19  ;;  %v2132_v56 = vpop.f32.mrf.mxu2  ;;  %v9216_v19 = vor.u32 %v11205_v22, %v9215_v7  ;;  %v11199_v22 = vld [vmem:[#allocation8 + $0xb24] sm:$0xf0] }
 0x19c   : > { %3636 = vmatpush.bf16.msra.mxu3 %v9116_v8  ;;  %v2150_v58 = vpop.f32.mrf.mxu3  ;;  %v2377_v29 = vpop.f32.mrf.mxu0  ;;  %v9280_v8 = vor.u32 %v11221_v6, %v9279_v51  ;;  %3583 = vmatmul.bf16.vlgmr.msra.gmra.mxu0 %v3407_v60  ;;  %v9191_v56 = vld [vmem:[#allocation8 + $0xb20] sm:$0xf]  ;;  %v11215_v6 = vld [vmem:[#allocation8 + $0xba4] sm:$0xf0] }
 0x19d   : > { %3890 = vmatpush.bf16.msrb.mxu0 %v9232_v36  ;;  %v2395_v3 = vpop.f32.mrf.mxu1  ;;  %3601 = vmatmul.bf16.vlgmr.msra.gmra.mxu1 %v3410_v41  ;;  %v9208_v36 = vor.u32 %v11203_v20, %v9207_v14  ;;  %v9264_v58 = vor.u32 %v11217_v50, %v9263_v52  ;;  %v9255_v51 = vld [vmem:[#allocation8 + $0xba0] sm:$0xf]  ;;  %v3696_v14 = vshll.u32 %v12511_v31, 16  ;;  %v9192_v20 = vor.u32 %v11199_v22, %v9191_v56  ;;  %v11240_v56 = vld [vmem:[#allocation8 + $0xc74] sm:$0xf] }
 0x19e   : > { %3908 = vmatpush.bf16.msrb.mxu1 %v9296_v38  ;;  %v2396_v42 = vadd.f32 %v2395_v3, %v2377_v29  ;;  %3619 = vmatmul.bf16.vlgmr.msra.gmra.mxu2 %v3407_v60  ;;  %v9272_v38 = vor.u32 %v11219_v12, %v9271_v57  ;;  %v12537_v29 = vld [vmem:[#allocation8 + $0xb14] sm:$0xf]  ;;  %v12539_v60 = vld [vmem:[#allocation8 + $0xb18] sm:$0xf0]  ;;  %v9256_v57 = vor.u32 %v11215_v6, %v9255_v51  ;;  %v9359_v22 = vld [vmem:[#allocation8 + $0xc70] sm:$0xf] }
 0x19f   : > { %3926 = vmatpush.bf16.msrb.mxu2 %v9236_v23  ;;  %3637 = vmatmul.bf16.vlgmr.msra.gmra.mxu3 %v3410_v41  ;;  %v9212_v23 = vor.u32 %v11202_v4, %v9209_v59  ;;  %v12541_v3 = vld [vmem:[#allocation8 + $0xb94] sm:$0xf]  ;;  %v3689_v41 = vunpack.c.h.b16 %v3653_v39  ;;  %v12546_v4 = vld [vmem:[#allocation8 + $0xb10] sm:$0xf]  ;;  %v12548_v59 = vld [vmem:[#allocation8 + $0xb14] sm:$0xf0] }
 0x1a0   : > { %3944 = vmatpush.bf16.msrb.mxu3 %v9300_v18  ;;  %v12532_v9 = vadd.f32 %v2396_v42, %v12492_v44  ;;  %v9276_v18 = vor.u32 %v11218_v61, %v9273_v21  ;;  %v9260_v42 = vor.u32 %v11214_v15, %v9257_v48  ;;  %v12551_v61 = vpack.c.b16 %v3688_v26, %v12337_v17 }
 0x1a1   : > { %3891 = vmatpush.bf16.msrb.mxu0 %v9224_v53  ;;  %v9204_v53 = vor.u32 %v11200_v13, %v9201_v62  ;;  %v3693_v21 = vshrl.u32 %v12511_v31, 16  ;;  %v9188_v13 = vor.u32 %v12537_v29, %v12539_v60  ;;  %v12562_v62 = vpack.c.b16 %v3689_v41, %v12348_v16  ;;  %v11241_v29 = vld [vmem:[#allocation8 + $0xc74] sm:$0xf0] }
 0x1a2   : > { %3909 = vmatpush.bf16.msrb.mxu1 %v9288_v43  ;;  %v9268_v43 = vor.u32 %v11216_v24, %v9265_v27  ;;  %v12573_v50 = vrot.slane %v3696_v14, 2  ;;  %v11257_v60 = vld [vmem:[#allocation8 + $0xcf4] sm:$0xf0]  ;;  %v9353_v14 = vld [vmem:[#allocation8 + $0xc68] sm:$0xf0] }
 0x1a3   : > { %3927 = vmatpush.bf16.msrb.mxu2 %v9228_v34  ;;  %v2413_v25 = vpop.f32.mrf.mxu2  ;;  %v11198_v34 = vld [vmem:[#allocation8 + $0xb24] sm:$0xf]  ;;  %v12571_v52 = vrot.slane %v3693_v21, 1  ;;  %v3718_v15 = vshrl.u32 %v12562_v62, 16  ;;  %v3721_v48 = vshll.u32 %v12562_v62, 16 }
 0x1a4   : > { %3945 = vmatpush.bf16.msrb.mxu3 %v9292_v37  ;;  %v2431_v44 = vpop.f32.mrf.mxu3  ;;  %v2379_v5 = vpop.f32.mrf.mxu0  ;;  %v9193_v37 = vld [vmem:[#allocation8 + $0xb28] sm:$0xf0]  ;;  %v11238_v21 = vld [vmem:[#allocation8 + $0xc64] sm:$0xf] }
 0x1a5   : > { %3892 = vmatpush.bf16.msrb.mxu0 %v9216_v19  ;;  %v2432_v1 = vadd.f32 %v2431_v44, %v2413_v25  ;;  %v2397_v49 = vpop.f32.mrf.mxu1  ;;  %v9247_v19 = vld [vmem:[#allocation8 + $0xb90] sm:$0xf]  ;;  %v9184_v25 = vor.u32 %v12548_v59, %v12546_v4  ;;  %v11195_v44 = vld [vmem:[#allocation8 + $0xb04] sm:$0xf0]  ;;  %v3720_v59 = vrot.slane %v3718_v15, 1 }
 0x1a6   : > { %3910 = vmatpush.bf16.msrb.mxu1 %v9280_v8  ;;  %v2398_v7 = vadd.f32 %v2397_v49, %v2379_v5  ;;  %v11213_v8 = vld [vmem:[#allocation8 + $0xb94] sm:$0xf0]  ;;  %v3704_v5 = vshll.u32 %v12551_v61, 16  ;;  %v9239_v49 = vld [vmem:[#allocation8 + $0xb80] sm:$0xf]  ;;  %v9176_v51 = vor.u32 %v11195_v44, %v12569_v40 }
 0x1a7   : > { %3928 = vmatpush.bf16.msrb.mxu2 %v9220_v63  ;;  %v12535_v35 = vadd.f32 %v2432_v1, %v12496_v10  ;;  %v9249_v10 = vld [vmem:[#allocation8 + $0xb98] sm:$0xf0]  ;;  %v3701_v1 = vshrl.u32 %v12551_v61, 16  ;;  %v9343_v15 = vld [vmem:[#allocation8 + $0xc50] sm:$0xf] }
 0x1a8   : > { %3946 = vmatpush.bf16.msrb.mxu3 %v9284_v11  ;;  %v12544_v63 = vadd.f32 %v2398_v7, %v12499_v45  ;;  %v9196_v11 = vor.u32 %v11198_v34, %v9193_v37  ;;  %v9252_v31 = vor.u32 %v12541_v3, %v9249_v10  ;;  %v11256_v7 = vld [vmem:[#allocation8 + $0xcf4] sm:$0xf]  ;;  %v3706_v41 = vrot.slane %v3704_v5, 2 }
 0x1a9   : > { %3893 = vmatpush.bf16.msrb.mxu0 %v9208_v36  ;;  %v9248_v36 = vor.u32 %v11213_v8, %v9247_v19 }
 0x1aa   : > { %3911 = vmatpush.bf16.msrb.mxu1 %v9272_v38  ;;  %v12567_v38 = vld [vmem:[#allocation8 + $0xb84] sm:$0xf] }
 0x1ab   : > { %3929 = vmatpush.bf16.msrb.mxu2 %v9212_v23  ;;  %v2415_v45 = vpop.f32.mrf.mxu2  ;;  %v12557_v23 = vld [vmem:[#allocation8 + $0xb04] sm:$0xf] }
 0x1ac   : > { %3947 = vmatpush.bf16.msrb.mxu3 %v9276_v18  ;;  %v2433_v12 = vpop.f32.mrf.mxu3  ;;  %v12559_v18 = vld [vmem:[#allocation8 + $0xb08] sm:$0xf0]  ;;  %v2382_v27 = vpop.f32.mrf.mxu0  ;;  %3588 = vmatmul.bf16.gmra.mxu0 %v12521_v47 }
 0x1ad   : > { %3894 = vmatpush.bf16.msrb.mxu0 %v9200_v46  ;;  %v2434_v24 = vadd.f32 %v2433_v12, %v2415_v45  ;;  %v2400_v39 = vpop.f32.mrf.mxu1  ;;  %v3713_v46 = vshll.u32 %v12514_v54, 16  ;;  %3606 = vmatmul.bf16.gmra.mxu1 %v12525_v2 }
 0x1ae   : > { %3912 = vmatpush.bf16.msrb.mxu1 %v9264_v58  ;;  %v2401_v37 = vadd.f32 %v2400_v39, %v2382_v27  ;;  %3624 = vmatmul.bf16.gmra.mxu2 %v12521_v47  ;;  %v9425_v58 = vld [vmem:[#allocation8 + $0xcf8] sm:$0xf0]  ;;  %v9244_v47 = vor.u32 %v12567_v38, %v9241_v28  ;;  %v11239_v27 = vld [vmem:[#allocation8 + $0xc64] sm:$0xf0]  ;;  %v3699_v38 = vor.u32 %v12573_v50, %v12571_v52  ;;  %v11237_v50 = vld [vmem:[#allocation8 + $0xc54] sm:$0xf0] }
 0x1af   : > { %3930 = vmatpush.bf16.msrb.mxu2 %v9204_v53  ;;  %v12578_v34 = vadd.f32 %v2434_v24, %v12505_v33  ;;  %v11211_v53 = vld [vmem:[#allocation8 + $0xb84] sm:$0xf0]  ;;  %v9361_v33 = vld [vmem:[#allocation8 + $0xc78] sm:$0xf0]  ;;  %3642 = vmatmul.bf16.gmra.mxu3 %v12525_v2  ;;  %v3703_v2 = vrot.slane %v3701_v1, 1  ;;  %v3715_v10 = vrot.slane %v3713_v46, 2  ;;  %v9428_v8 = vor.u32 %v11256_v7, %v9425_v58 }
 0x1b0   : > { %3948 = vmatpush.bf16.msrb.mxu3 %v9268_v43  ;;  %v3710_v43 = vshrl.u32 %v12514_v54, 16  ;;  %v12587_v26 = vadd.f32 %v2401_v37, %v12508_v0  ;;  %v9180_v54 = vor.u32 %v12557_v23, %v12559_v18  ;;  %v9240_v6 = vor.u32 %v11211_v53, %v9239_v49  ;;  %v9423_v0 = vld [vmem:[#allocation8 + $0xcf0] sm:$0xf]  ;;  %v9417_v23 = vld [vmem:[#allocation8 + $0xce8] sm:$0xf0] }
 0x1b1   : > { %3895 = vmatpush.bf16.msrb.mxu0 %v9192_v20  ;;  %v9364_v19 = vor.u32 %v11240_v56, %v9361_v33  ;;  %v9424_v12 = vor.u32 %v11257_v60, %v9423_v0  ;;  %v9351_v18 = vld [vmem:[#allocation8 + $0xc60] sm:$0xf]  ;;  %v9356_v28 = vor.u32 %v11238_v21, %v9353_v14  ;;  %v12600_v39 = vor.u32 %v3706_v41, %v3703_v2  ;;  %v9345_v49 = vld [vmem:[#allocation8 + $0xc58] sm:$0xf0]  ;;  %v11253_v56 = vld [vmem:[#allocation8 + $0xcd4] sm:$0xf0] }
 0x1b2   : > { %3913 = vmatpush.bf16.msrb.mxu1 %v9256_v57  ;;  %v9360_v57 = vor.u32 %v11241_v29, %v9359_v22  ;;  %v9352_v44 = vor.u32 %v11239_v27, %v9351_v18  ;;  %v9409_v46 = vld [vmem:[#allocation8 + $0xcd8] sm:$0xf0]  ;;  %v9344_v0 = vor.u32 %v11237_v50, %v9343_v15  ;;  %v9401_v2 = vld [vmem:[#allocation8 + $0xcc8] sm:$0xf0]  ;;  %v9335_v41 = vld [vmem:[#allocation8 + $0xc40] sm:$0xf] }
 0x1b3   : > { %3931 = vmatpush.bf16.msrb.mxu2 %v9196_v11  ;;  %v2418_v3 = vpop.f32.mrf.mxu2  ;;  %v3712_v11 = vrot.slane %v3710_v43, 1  ;;  %v11252_v43 = vld [vmem:[#allocation8 + $0xcd4] sm:$0xf]  ;;  %v9329_v21 = vld [vmem:[#allocation8 + $0xc38] sm:$0xf0] }
 0x1b4   : > { %3949 = vmatpush.bf16.msrb.mxu3 %v9260_v42  ;;  %v2436_v4 = vpop.f32.mrf.mxu3  ;;  %v3723_v42 = vrot.slane %v3721_v48, 2  ;;  %v2384_v20 = vpop.f32.mrf.mxu0  ;;  %v9407_v48 = vld [vmem:[#allocation8 + $0xcd0] sm:$0xf]  ;;  %v11248_v14 = vld [vmem:[#allocation8 + $0xcb4] sm:$0xf] }
 0x1b5   : > { %3896 = vmatpush.bf16.msrb.mxu0 %v9184_v25  ;;  %v2437_v45 = vadd.f32 %v2436_v4, %v2418_v3  ;;  %v2402_v24 = vpop.f32.mrf.mxu1  ;;  %v11255_v25 = vld [vmem:[#allocation8 + $0xce4] sm:$0xf0]  ;;  %v3716_v5 = vor.u32 %v3715_v10, %v3712_v11  ;;  %v9408_v60 = vor.u32 %v11253_v56, %v9407_v48  ;;  %v11250_v3 = vld [vmem:[#allocation8 + $0xcc4] sm:$0xf]  ;;  %v9399_v10 = vld [vmem:[#allocation8 + $0xcc0] sm:$0xf] }
 0x1b6   : > { %3914 = vmatpush.bf16.msrb.mxu1 %v9248_v36  ;;  %v12602_v37 = vor.u32 %v3723_v42, %v3720_v59  ;;  %v11235_v11 = vld [vmem:[#allocation8 + $0xc44] sm:$0xf0]  ;;  %v11249_v24 = vld [vmem:[#allocation8 + $0xcb4] sm:$0xf0] }
 0x1b7   : > { %3932 = vmatpush.bf16.msrb.mxu2 %v9188_v13  ;;  %v11254_v13 = vld [vmem:[#allocation8 + $0xce4] sm:$0xf]  ;;  %v12596_v36 = vadd.f32 %v2437_v45, %v12517_v55  ;;  %v11236_v55 = vld [vmem:[#allocation8 + $0xc54] sm:$0xf]  ;;  %v11251_v4 = vld [vmem:[#allocation8 + $0xcc4] sm:$0xf0]  ;;  %v9336_v20 = vor.u32 %v11235_v11, %v9335_v41 }
 0x1b8   : > { %3950 = vmatpush.bf16.msrb.mxu3 %v9252_v31  ;;  %v9415_v31 = vld [vmem:[#allocation8 + $0xce0] sm:$0xf]  ;;  %v9420_v40 = vor.u32 %v11254_v13, %v9417_v23  ;;  %v3725_v58 = vsel %vm1277_vm2, %v3716_v5, %v12602_v37  ;;  %v9348_v22 = vor.u32 %v11236_v55, %v9345_v49  ;;  %v9327_v13 = vld [vmem:[#allocation8 + $0xc30] sm:$0xf]  ;;  %v11233_v23 = vld [vmem:[#allocation8 + $0xc34] sm:$0xf0] }
 0x1b9   : > { %3897 = vmatpush.bf16.msrb.mxu0 %v9176_v51  ;;  %v9416_v1 = vor.u32 %v11255_v25, %v9415_v31  ;;  %v11234_v51 = vld [vmem:[#allocation8 + $0xc44] sm:$0xf]  ;;  %v11231_v15 = vld [vmem:[#allocation8 + $0xc24] sm:$0xf0]  ;;  %v3968_v11 = vld [vmem:[#allocation2 + $0x8] sm:$0xcc] }
 0x1ba   : > { %3915 = vmatpush.bf16.msrb.mxu1 %v9240_v6  ;;  %v9337_v6 = vld [vmem:[#allocation8 + $0xc48] sm:$0xf0]  ;;  %v11247_v50 = vld [vmem:[#allocation8 + $0xca4] sm:$0xf0]  ;;  %v11226_v41 = vld [vmem:[#allocation8 + $0xc04] sm:$0xf] }
 0x1bb   : > { %3933 = vmatpush.bf16.msrb.mxu2 %v9180_v54  ;;  %v2420_v53 = vpop.f32.mrf.mxu2  ;;  %v3708_v54 = vsel %vm1277_vm2, %v3699_v38, %v12600_v39  ;;  %v9340_v42 = vor.u32 %v11234_v51, %v9337_v6  ;;  %v9377_v51 = vld [vmem:[#allocation8 + $0xc98] sm:$0xf0]  ;;  %v9311_v6 = vld [vmem:[#allocation8 + $0xc10] sm:$0xf] }
 0x1bc   : > { %3951 = vmatpush.bf16.msrb.mxu3 %v9244_v47  ;;  %v2438_v52 = vpop.f32.mrf.mxu3  ;;  %v2693_v33 = vpop.f32.mrf.mxu0  ;;  %v9412_v47 = vor.u32 %v11252_v43, %v9409_v46  ;;  %3898 = vmatmul.bf16.vlgmr.msrb.gmra.mxu0 %v3708_v54  ;;  %v11246_v53 = vld [vmem:[#allocation8 + $0xca4] sm:$0xf]  ;;  %v9385_v43 = vld [vmem:[#allocation8 + $0xca8] sm:$0xf0]  ;;  %v9319_v46 = vld [vmem:[#allocation8 + $0xc20] sm:$0xf] }
 0x1bd   : > { %4177 = vmatpush.bf16.msra.mxu0 %v9360_v57  ;;  %v2711_v7 = vpop.f32.mrf.mxu1  ;;  %3916 = vmatmul.bf16.vlgmr.msrb.gmra.mxu1 %v3725_v58  ;;  %v9400_v57 = vor.u32 %v11251_v4, %v9399_v10  ;;  %v9383_v52 = vld [vmem:[#allocation8 + $0xca0] sm:$0xf] }
 0x1be   : > { %4195 = vmatpush.bf16.msra.mxu1 %v9424_v12  ;;  %v2712_v29 = vadd.f32 %v2711_v7, %v2693_v33  ;;  %3934 = vmatmul.bf16.vlgmr.msrb.gmra.mxu2 %v3708_v54  ;;  %v9393_v12 = vld [vmem:[#allocation8 + $0xcb8] sm:$0xf0]  ;;  %v9388_v33 = vor.u32 %v11246_v53, %v9385_v43  ;;  %v11228_v54 = vld [vmem:[#allocation8 + $0xc14] sm:$0xf] }
 0x1bf   : > { %4213 = vmatpush.bf16.msra.mxu2 %v9364_v19  ;;  %3952 = vmatmul.bf16.vlgmr.msrb.gmra.mxu3 %v3725_v58  ;;  %v9404_v19 = vor.u32 %v11250_v3, %v9401_v2  ;;  %v11244_v7 = vld [vmem:[#allocation8 + $0xc94] sm:$0xf]  ;;  %v11245_v3 = vld [vmem:[#allocation8 + $0xc94] sm:$0xf0] }
 0x1c0   : > { %4231 = vmatpush.bf16.msra.mxu3 %v9428_v8  ;;  %v12609_v59 = vadd.f32 %v2712_v29, %v12532_v9  ;;  %v11232_v8 = vld [vmem:[#allocation8 + $0xc34] sm:$0xf]  ;;  %v9391_v9 = vld [vmem:[#allocation8 + $0xcb0] sm:$0xf]  ;;  %v11229_v29 = vld [vmem:[#allocation8 + $0xc14] sm:$0xf0] }
 0x1c1   : > { %4178 = vmatpush.bf16.msra.mxu0 %v9352_v44  ;;  %v9332_v38 = vor.u32 %v11232_v8, %v9329_v21  ;;  %v11230_v44 = vld [vmem:[#allocation8 + $0xc24] sm:$0xf]  ;;  %v9392_v49 = vor.u32 %v11249_v24, %v9391_v9  ;;  %v9305_v8 = vld [vmem:[#allocation8 + $0xc08] sm:$0xf0]  ;;  %v11272_v9 = vld [vmem:[#allocation8 + $0xd74] sm:$0xf] }
 0x1c2   : > { %4196 = vmatpush.bf16.msra.mxu1 %v9416_v1  ;;  %v9321_v1 = vld [vmem:[#allocation8 + $0xc28] sm:$0xf0]  ;;  %v11242_v21 = vld [vmem:[#allocation8 + $0xc84] sm:$0xf]  ;;  %v9489_v24 = vld [vmem:[#allocation8 + $0xd78] sm:$0xf0] }
 0x1c3   : > { %4214 = vmatpush.bf16.msra.mxu2 %v9356_v28  ;;  %v2729_v45 = vpop.f32.mrf.mxu2  ;;  %v9396_v28 = vor.u32 %v11248_v14, %v9393_v12  ;;  %v9324_v56 = vor.u32 %v11230_v44, %v9321_v1  ;;  %v9369_v14 = vld [vmem:[#allocation8 + $0xc88] sm:$0xf0]  ;;  %v9303_v12 = vld [vmem:[#allocation8 + $0xc00] sm:$0xf]  ;;  %v4004_v44 = vunpack.c.h.b16 %v3968_v11  ;;  %v9551_v1 = vld [vmem:[#allocation8 + $0xdf0] sm:$0xf] }
 0x1c4   : > { %4232 = vmatpush.bf16.msra.mxu3 %v9420_v40  ;;  %v2747_v18 = vpop.f32.mrf.mxu3  ;;  %v2695_v31 = vpop.f32.mrf.mxu0  ;;  %v9328_v40 = vor.u32 %v11233_v23, %v9327_v13  ;;  %v11227_v13 = vld [vmem:[#allocation8 + $0xc04] sm:$0xf0]  ;;  %v9367_v23 = vld [vmem:[#allocation8 + $0xc80] sm:$0xf] }
 0x1c5   : > { %4179 = vmatpush.bf16.msra.mxu0 %v9344_v0  ;;  %v2748_v27 = vadd.f32 %v2747_v18, %v2729_v45  ;;  %v2713_v25 = vpop.f32.mrf.mxu1  ;;  %v11243_v18 = vld [vmem:[#allocation8 + $0xc84] sm:$0xf0] }
 0x1c6   : > { %4197 = vmatpush.bf16.msra.mxu1 %v9408_v60  ;;  %v2714_v55 = vadd.f32 %v2713_v25, %v2695_v31  ;;  %v9375_v60 = vld [vmem:[#allocation8 + $0xc90] sm:$0xf]  ;;  %v11288_v31 = vld [vmem:[#allocation8 + $0xdf4] sm:$0xf]  ;;  %v9553_v25 = vld [vmem:[#allocation8 + $0xdf8] sm:$0xf0]  ;;  %v9368_v53 = vor.u32 %v11243_v18, %v9367_v23 }
 0x1c7   : > { %4215 = vmatpush.bf16.msra.mxu2 %v9348_v22  ;;  %v12612_v5 = vadd.f32 %v2748_v27, %v12535_v35  ;;  %v9313_v35 = vld [vmem:[#allocation8 + $0xc18] sm:$0xf0]  ;;  %v9320_v22 = vor.u32 %v11231_v15, %v9319_v46  ;;  %v9492_v46 = vor.u32 %v11272_v9, %v9489_v24  ;;  %v11270_v15 = vld [vmem:[#allocation8 + $0xd64] sm:$0xf] }
 0x1c8   : > { %4233 = vmatpush.bf16.msra.mxu3 %v9412_v47  ;;  %v12615_v48 = vadd.f32 %v2714_v55, %v12544_v63  ;;  %v9384_v47 = vor.u32 %v11247_v50, %v9383_v52  ;;  %v9316_v4 = vor.u32 %v11228_v54, %v9313_v35  ;;  %v11289_v55 = vld [vmem:[#allocation8 + $0xdf4] sm:$0xf0]  ;;  %v9481_v52 = vld [vmem:[#allocation8 + $0xd68] sm:$0xf0] }
 0x1c9   : > { %4180 = vmatpush.bf16.msra.mxu0 %v9336_v20  ;;  %v9552_v35 = vor.u32 %v11289_v55, %v9551_v1  ;;  %v9463_v1 = vld [vmem:[#allocation8 + $0xd40] sm:$0xf]  ;;  %v11267_v55 = vld [vmem:[#allocation8 + $0xd44] sm:$0xf0] }
 0x1ca   : > { %4198 = vmatpush.bf16.msra.mxu1 %v9400_v57  ;;  %v9376_v57 = vor.u32 %v11245_v3, %v9375_v60  ;;  %v9484_v3 = vor.u32 %v11270_v15, %v9481_v52  ;;  %v9457_v15 = vld [vmem:[#allocation8 + $0xd38] sm:$0xf0]  ;;  %v11280_v52 = vld [vmem:[#allocation8 + $0xdb4] sm:$0xf] }
 0x1cb   : > { %4216 = vmatpush.bf16.msra.mxu2 %v9340_v42  ;;  %v2731_v58 = vpop.f32.mrf.mxu2  ;;  %v9380_v42 = vor.u32 %v11244_v7, %v9377_v51  ;;  %v11286_v7 = vld [vmem:[#allocation8 + $0xde4] sm:$0xf]  ;;  %v12631_v51 = vpack.c.b16 %v12444_v32, %v4004_v44 }
 0x1cc   : > { %4234 = vmatpush.bf16.msra.mxu3 %v9404_v19  ;;  %v2749_v0 = vpop.f32.mrf.mxu3  ;;  %v2698_v2 = vpop.f32.mrf.mxu0  ;;  %v9312_v19 = vor.u32 %v11229_v29, %v9311_v6  ;;  %3903 = vmatmul.bf16.gmra.mxu0 %v12600_v39  ;;  %v11271_v6 = vld [vmem:[#allocation8 + $0xd64] sm:$0xf0]  ;;  %v9543_v29 = vld [vmem:[#allocation8 + $0xde0] sm:$0xf]  ;;  %v11282_v44 = vld [vmem:[#allocation8 + $0xdc4] sm:$0xf] }
 0x1cd   : > { %4181 = vmatpush.bf16.msra.mxu0 %v9328_v40  ;;  %v2750_v63 = vadd.f32 %v2749_v0, %v2731_v58  ;;  %v2716_v10 = vpop.f32.mrf.mxu1  ;;  %3921 = vmatmul.bf16.gmra.mxu1 %v12602_v37  ;;  %v9372_v40 = vor.u32 %v11242_v21, %v9369_v14  ;;  %v9545_v58 = vld [vmem:[#allocation8 + $0xde8] sm:$0xf0]  ;;  %v11287_v0 = vld [vmem:[#allocation8 + $0xde4] sm:$0xf0]  ;;  %v11284_v21 = vld [vmem:[#allocation8 + $0xdd4] sm:$0xf] }
 0x1ce   : > { %4199 = vmatpush.bf16.msra.mxu1 %v9392_v49  ;;  %v2717_v20 = vadd.f32 %v2716_v10, %v2698_v2  ;;  %3939 = vmatmul.bf16.gmra.mxu2 %v12600_v39  ;;  %v11273_v39 = vld [vmem:[#allocation8 + $0xd74] sm:$0xf0]  ;;  %v9544_v10 = vor.u32 %v11287_v0, %v9543_v29  ;;  %v9537_v14 = vld [vmem:[#allocation8 + $0xdd8] sm:$0xf0] }
 0x1cf   : > { %4217 = vmatpush.bf16.msra.mxu2 %v9332_v38  ;;  %v12618_v45 = vadd.f32 %v2750_v63, %v12578_v34  ;;  %3957 = vmatmul.bf16.gmra.mxu3 %v12602_v37  ;;  %v4003_v34 = vunpack.c.l.b16 %v3968_v11  ;;  %v9487_v38 = vld [vmem:[#allocation8 + $0xd70] sm:$0xf]  ;;  %v9556_v37 = vor.u32 %v11288_v31, %v9553_v25  ;;  %v9548_v63 = vor.u32 %v11286_v7, %v9545_v58  ;;  %v11266_v31 = vld [vmem:[#allocation8 + $0xd44] sm:$0xf]  ;;  %v9465_v25 = vld [vmem:[#allocation8 + $0xd48] sm:$0xf0] }
 0x1d0   : > { %4235 = vmatpush.bf16.msra.mxu3 %v9396_v28  ;;  %v12623_v27 = vadd.f32 %v2717_v20, %v12587_v26  ;;  %v9308_v28 = vor.u32 %v11226_v41, %v9305_v8  ;;  %v9304_v26 = vor.u32 %v11227_v13, %v9303_v12  ;;  %v9488_v54 = vor.u32 %v11273_v39, %v9487_v38  ;;  %v9471_v20 = vld [vmem:[#allocation8 + $0xd50] sm:$0xf]  ;;  %v11285_v13 = vld [vmem:[#allocation8 + $0xdd4] sm:$0xf0]  ;;  %v9529_v39 = vld [vmem:[#allocation8 + $0xdc8] sm:$0xf0] }
 0x1d1   : > { %4182 = vmatpush.bf16.msra.mxu0 %v9320_v22  ;;  %v9479_v22 = vld [vmem:[#allocation8 + $0xd60] sm:$0xf]  ;;  %v12638_v41 = vrot.slane %v12551_v61, 2  ;;  %v11269_v61 = vld [vmem:[#allocation8 + $0xd54] sm:$0xf0] }
 0x1d2   : > { %4200 = vmatpush.bf16.msra.mxu1 %v9384_v47  ;;  %v9480_v11 = vor.u32 %v11271_v6, %v9479_v22  ;;  %v9535_v12 = vld [vmem:[#allocation8 + $0xdd0] sm:$0xf]  ;;  %v11265_v58 = vld [vmem:[#allocation8 + $0xd34] sm:$0xf0] }
 0x1d3   : > { %4218 = vmatpush.bf16.msra.mxu2 %v9324_v56  ;;  %v2734_v49 = vpop.f32.mrf.mxu2  ;;  %v9455_v7 = vld [vmem:[#allocation8 + $0xd30] sm:$0xf]  ;;  %v11281_v6 = vld [vmem:[#allocation8 + $0xdb4] sm:$0xf0] }
 0x1d4   : > { %4236 = vmatpush.bf16.msra.mxu3 %v9388_v33  ;;  %v2752_v43 = vpop.f32.mrf.mxu3  ;;  %v2700_v56 = vpop.f32.mrf.mxu0  ;;  %v12628_v33 = vpack.c.b16 %v12442_v30, %v4003_v34  ;;  %v9540_v34 = vor.u32 %v11284_v21, %v9537_v14  ;;  %v4255_v22 = vld [vmem:[#allocation2 + $0x20] sm:$0x77] }
 0x1d5   : > { %4183 = vmatpush.bf16.msra.mxu0 %v9312_v19  ;;  %v2753_v50 = vadd.f32 %v2752_v43, %v2734_v49  ;;  %v2718_v47 = vpop.f32.mrf.mxu1  ;;  %v9473_v19 = vld [vmem:[#allocation8 + $0xd58] sm:$0xf0]  ;;  %v9527_v49 = vld [vmem:[#allocation8 + $0xdc0] sm:$0xf]  ;;  %v11264_v43 = vld [vmem:[#allocation8 + $0xd34] sm:$0xf]  ;;  %v4290_v21 = vunpack.c.l.b16 %v4255_v22 }
 0x1d6   : > { %4201 = vmatpush.bf16.msra.mxu1 %v9376_v57  ;;  %v4007_v2 = vrot.slane %v12628_v33, 2  ;;  %v9519_v47 = vld [vmem:[#allocation8 + $0xdb0] sm:$0xf] }
 0x1d7   : > { %4219 = vmatpush.bf16.msra.mxu2 %v9316_v4  ;;  %v12634_v60 = vadd.f32 %v2753_v50, %v12596_v36  ;;  %v4010_v4 = vrot.slane %v12631_v51, 2  ;;  %v12642_v36 = vrot.slane %v12562_v62, 2  ;;  %v9521_v50 = vld [vmem:[#allocation8 + $0xdb8] sm:$0xf0] }
 0x1d8   : > { %4237 = vmatpush.bf16.msra.mxu3 %v9380_v42  ;;  %v11268_v42 = vld [vmem:[#allocation8 + $0xd54] sm:$0xf]  ;;  %v4009_v18 = vsel %vm1593_vm3, %v4007_v2, %v12638_v41 }
 0x1d9   : > { %4184 = vmatpush.bf16.msra.mxu0 %v9304_v26  ;;  %v4012_v9 = vsel %vm1593_vm3, %v4010_v4, %v12642_v36  ;;  %v9476_v24 = vor.u32 %v11268_v42, %v9473_v19  ;;  %v11283_v26 = vld [vmem:[#allocation8 + $0xdc4] sm:$0xf0]  ;;  %v9456_v4 = vor.u32 %v11265_v58, %v9455_v7  ;;  %v11278_v42 = vld [vmem:[#allocation8 + $0xda4] sm:$0xf]  ;;  %v9513_v19 = vld [vmem:[#allocation8 + $0xda8] sm:$0xf0] }
 0x1da   : > { %4202 = vmatpush.bf16.msra.mxu1 %v9368_v53  ;;  %v9497_v7 = vld [vmem:[#allocation8 + $0xd88] sm:$0xf0]  ;;  %v12686_v58 = vld [vmem:[#allocation8 + $0xd00] sm:$0xf] }
 0x1db   : > { %4220 = vmatpush.bf16.msra.mxu2 %v9308_v28  ;;  %v2736_v8 = vpop.f32.mrf.mxu2  ;;  %v9472_v28 = vor.u32 %v11269_v61, %v9471_v20  ;;  %v11263_v61 = vld [vmem:[#allocation8 + $0xd24] sm:$0xf0] }
 0x1dc   : > { %4238 = vmatpush.bf16.msra.mxu3 %v9372_v40  ;;  %v2754_v57 = vpop.f32.mrf.mxu3  ;;  %v2972_v23 = vpop.f32.mrf.mxu0  ;;  %v9536_v40 = vor.u32 %v11285_v13, %v9535_v12  ;;  %4185 = vmatmul.bf16.vlgmr.msra.gmra.mxu0 %v4009_v18  ;;  %v9447_v8 = vld [vmem:[#allocation8 + $0xd20] sm:$0xf]  ;;  %v11279_v13 = vld [vmem:[#allocation8 + $0xda4] sm:$0xf0] }
 0x1dd   : > { %4492 = vmatpush.bf16.msrb.mxu0 %v9488_v54  ;;  %v2990_v62 = vpop.f32.mrf.mxu1  ;;  %4203 = vmatmul.bf16.vlgmr.msra.gmra.mxu1 %v4012_v9  ;;  %v9464_v54 = vor.u32 %v11267_v55, %v9463_v1  ;;  %v9520_v57 = vor.u32 %v11281_v6, %v9519_v47  ;;  %v9511_v12 = vld [vmem:[#allocation8 + $0xda0] sm:$0xf]  ;;  %v4298_v1 = vshll.u32 %v12628_v33, 16  ;;  %v9448_v55 = vor.u32 %v11263_v61, %v9447_v8  ;;  %v11304_v8 = vld [vmem:[#allocation8 + $0xe74] sm:$0xf] }
 0x1de   : > { %4510 = vmatpush.bf16.msrb.mxu1 %v9552_v35  ;;  %v2991_v38 = vadd.f32 %v2990_v62, %v2972_v23  ;;  %4221 = vmatmul.bf16.vlgmr.msra.gmra.mxu2 %v4009_v18  ;;  %v9528_v35 = vor.u32 %v11283_v26, %v9527_v49  ;;  %v12654_v23 = vld [vmem:[#allocation8 + $0xd14] sm:$0xf]  ;;  %v12656_v18 = vld [vmem:[#allocation8 + $0xd18] sm:$0xf0]  ;;  %v9512_v49 = vor.u32 %v11279_v13, %v9511_v12  ;;  %v9615_v61 = vld [vmem:[#allocation8 + $0xe70] sm:$0xf] }
 0x1df   : > { %4528 = vmatpush.bf16.msrb.mxu2 %v9492_v46  ;;  %4239 = vmatmul.bf16.vlgmr.msra.gmra.mxu3 %v4012_v9  ;;  %v9468_v46 = vor.u32 %v11266_v31, %v9465_v25  ;;  %v12658_v62 = vld [vmem:[#allocation8 + $0xd94] sm:$0xf]  ;;  %v4291_v9 = vunpack.c.h.b16 %v4255_v22  ;;  %v12663_v31 = vld [vmem:[#allocation8 + $0xd10] sm:$0xf]  ;;  %v12665_v25 = vld [vmem:[#allocation8 + $0xd14] sm:$0xf0] }
 0x1e0   : > { %4546 = vmatpush.bf16.msrb.mxu3 %v9556_v37  ;;  %v12649_v53 = vadd.f32 %v2991_v38, %v12609_v59  ;;  %v9532_v37 = vor.u32 %v11282_v44, %v9529_v39  ;;  %v9516_v38 = vor.u32 %v11278_v42, %v9513_v19  ;;  %v12668_v44 = vpack.c.b16 %v4290_v21, %v12337_v17 }
 0x1e1   : > { %4493 = vmatpush.bf16.msrb.mxu0 %v9480_v11  ;;  %v9460_v11 = vor.u32 %v11264_v43, %v9457_v15  ;;  %v4295_v39 = vshrl.u32 %v12628_v33, 16  ;;  %v9444_v43 = vor.u32 %v12654_v23, %v12656_v18  ;;  %v12679_v15 = vpack.c.b16 %v4291_v9, %v12348_v16  ;;  %v11305_v23 = vld [vmem:[#allocation8 + $0xe74] sm:$0xf0] }
 0x1e2   : > { %4511 = vmatpush.bf16.msrb.mxu1 %v9544_v10  ;;  %v9524_v10 = vor.u32 %v11280_v52, %v9521_v50  ;;  %v12690_v6 = vrot.slane %v4298_v1, 3  ;;  %v11321_v18 = vld [vmem:[#allocation8 + $0xef4] sm:$0xf0]  ;;  %v9609_v1 = vld [vmem:[#allocation8 + $0xe68] sm:$0xf0] }
 0x1e3   : > { %4529 = vmatpush.bf16.msrb.mxu2 %v9484_v3  ;;  %v3008_v56 = vpop.f32.mrf.mxu2  ;;  %v11262_v3 = vld [vmem:[#allocation8 + $0xd24] sm:$0xf]  ;;  %v12688_v47 = vrot.slane %v4295_v39, 2  ;;  %v4320_v42 = vshrl.u32 %v12679_v15, 16  ;;  %v4323_v19 = vshll.u32 %v12679_v15, 16 }
 0x1e4   : > { %4547 = vmatpush.bf16.msrb.mxu3 %v9548_v63  ;;  %v3026_v59 = vpop.f32.mrf.mxu3  ;;  %v2974_v0 = vpop.f32.mrf.mxu0  ;;  %v9449_v63 = vld [vmem:[#allocation8 + $0xd28] sm:$0xf0]  ;;  %v11302_v39 = vld [vmem:[#allocation8 + $0xe64] sm:$0xf] }
 0x1e5   : > { %4494 = vmatpush.bf16.msrb.mxu0 %v9472_v28  ;;  %v3027_v29 = vadd.f32 %v3026_v59, %v3008_v56  ;;  %v2992_v2 = vpop.f32.mrf.mxu1  ;;  %v9503_v28 = vld [vmem:[#allocation8 + $0xd90] sm:$0xf]  ;;  %v9440_v56 = vor.u32 %v12665_v25, %v12663_v31  ;;  %v11259_v59 = vld [vmem:[#allocation8 + $0xd04] sm:$0xf0]  ;;  %v4322_v25 = vrot.slane %v4320_v42, 2 }
 0x1e6   : > { %4512 = vmatpush.bf16.msrb.mxu1 %v9536_v40  ;;  %v2993_v20 = vadd.f32 %v2992_v2, %v2974_v0  ;;  %v11277_v40 = vld [vmem:[#allocation8 + $0xd94] sm:$0xf0]  ;;  %v4306_v0 = vshll.u32 %v12668_v44, 16  ;;  %v9495_v2 = vld [vmem:[#allocation8 + $0xd80] sm:$0xf]  ;;  %v9432_v12 = vor.u32 %v11259_v59, %v12686_v58 }
 0x1e7   : > { %4530 = vmatpush.bf16.msrb.mxu2 %v9476_v24  ;;  %v12652_v14 = vadd.f32 %v3027_v29, %v12612_v5  ;;  %v9505_v5 = vld [vmem:[#allocation8 + $0xd98] sm:$0xf0]  ;;  %v4303_v29 = vshrl.u32 %v12668_v44, 16  ;;  %v9599_v42 = vld [vmem:[#allocation8 + $0xe50] sm:$0xf] }
 0x1e8   : > { %4548 = vmatpush.bf16.msrb.mxu3 %v9540_v34  ;;  %v12661_v24 = vadd.f32 %v2993_v20, %v12615_v48  ;;  %v9452_v34 = vor.u32 %v11262_v3, %v9449_v63  ;;  %v9508_v33 = vor.u32 %v12658_v62, %v9505_v5  ;;  %v11320_v20 = vld [vmem:[#allocation8 + $0xef4] sm:$0xf]  ;;  %v4308_v9 = vrot.slane %v4306_v0, 3 }
 0x1e9   : > { %4495 = vmatpush.bf16.msrb.mxu0 %v9464_v54  ;;  %v9504_v54 = vor.u32 %v11277_v40, %v9503_v28 }
 0x1ea   : > { %4513 = vmatpush.bf16.msrb.mxu1 %v9528_v35  ;;  %v12684_v35 = vld [vmem:[#allocation8 + $0xd84] sm:$0xf] }
 0x1eb   : > { %4531 = vmatpush.bf16.msrb.mxu2 %v9468_v46  ;;  %v3010_v48 = vpop.f32.mrf.mxu2  ;;  %v12674_v46 = vld [vmem:[#allocation8 + $0xd04] sm:$0xf] }
 0x1ec   : > { %4549 = vmatpush.bf16.msrb.mxu3 %v9532_v37  ;;  %v3028_v26 = vpop.f32.mrf.mxu3  ;;  %v12676_v37 = vld [vmem:[#allocation8 + $0xd08] sm:$0xf0]  ;;  %v2977_v50 = vpop.f32.mrf.mxu0  ;;  %4190 = vmatmul.bf16.gmra.mxu0 %v12638_v41 }
 0x1ed   : > { %4496 = vmatpush.bf16.msrb.mxu0 %v9456_v4  ;;  %v3029_v52 = vadd.f32 %v3028_v26, %v3010_v48  ;;  %v2995_v22 = vpop.f32.mrf.mxu1  ;;  %v4315_v4 = vshll.u32 %v12631_v51, 16  ;;  %4208 = vmatmul.bf16.gmra.mxu1 %v12642_v36 }
 0x1ee   : > { %4514 = vmatpush.bf16.msrb.mxu1 %v9520_v57  ;;  %v2996_v63 = vadd.f32 %v2995_v22, %v2977_v50  ;;  %4226 = vmatmul.bf16.gmra.mxu2 %v12638_v41  ;;  %v9681_v57 = vld [vmem:[#allocation8 + $0xef8] sm:$0xf0]  ;;  %v9500_v41 = vor.u32 %v12684_v35, %v9497_v7  ;;  %v11303_v50 = vld [vmem:[#allocation8 + $0xe64] sm:$0xf0]  ;;  %v4301_v35 = vor.u32 %v12690_v6, %v12688_v47  ;;  %v11301_v6 = vld [vmem:[#allocation8 + $0xe54] sm:$0xf0] }
 0x1ef   : > { %4532 = vmatpush.bf16.msrb.mxu2 %v9460_v11  ;;  %v12695_v3 = vadd.f32 %v3029_v52, %v12618_v45  ;;  %v11275_v11 = vld [vmem:[#allocation8 + $0xd84] sm:$0xf0]  ;;  %v9617_v45 = vld [vmem:[#allocation8 + $0xe78] sm:$0xf0]  ;;  %4244 = vmatmul.bf16.gmra.mxu3 %v12642_v36  ;;  %v4305_v36 = vrot.slane %v4303_v29, 2  ;;  %v4317_v5 = vrot.slane %v4315_v4, 3  ;;  %v9684_v40 = vor.u32 %v11320_v20, %v9681_v57 }
 0x1f0   : > { %4550 = vmatpush.bf16.msrb.mxu3 %v9524_v10  ;;  %v4312_v10 = vshrl.u32 %v12631_v51, 16  ;;  %v12704_v21 = vadd.f32 %v2996_v63, %v12623_v27  ;;  %v9436_v51 = vor.u32 %v12674_v46, %v12676_v37  ;;  %v9496_v13 = vor.u32 %v11275_v11, %v9495_v2  ;;  %v9679_v27 = vld [vmem:[#allocation8 + $0xef0] sm:$0xf]  ;;  %v9673_v46 = vld [vmem:[#allocation8 + $0xee8] sm:$0xf0] }
 0x1f1   : > { %4497 = vmatpush.bf16.msrb.mxu0 %v9448_v55  ;;  %v9620_v28 = vor.u32 %v11304_v8, %v9617_v45  ;;  %v9680_v26 = vor.u32 %v11321_v18, %v9679_v27  ;;  %v9607_v37 = vld [vmem:[#allocation8 + $0xe60] sm:$0xf]  ;;  %v9612_v7 = vor.u32 %v11302_v39, %v9609_v1  ;;  %v12717_v22 = vor.u32 %v4308_v9, %v4305_v36  ;;  %v9601_v2 = vld [vmem:[#allocation8 + $0xe58] sm:$0xf0]  ;;  %v11317_v8 = vld [vmem:[#allocation8 + $0xed4] sm:$0xf0] }
 0x1f2   : > { %4515 = vmatpush.bf16.msrb.mxu1 %v9512_v49  ;;  %v9616_v49 = vor.u32 %v11305_v23, %v9615_v61  ;;  %v9608_v59 = vor.u32 %v11303_v50, %v9607_v37  ;;  %v9665_v4 = vld [vmem:[#allocation8 + $0xed8] sm:$0xf0]  ;;  %v9600_v27 = vor.u32 %v11301_v6, %v9599_v42  ;;  %v9657_v36 = vld [vmem:[#allocation8 + $0xec8] sm:$0xf0]  ;;  %v9591_v9 = vld [vmem:[#allocation8 + $0xe40] sm:$0xf] }
 0x1f3   : > { %4533 = vmatpush.bf16.msrb.mxu2 %v9452_v34  ;;  %v3013_v62 = vpop.f32.mrf.mxu2  ;;  %v4314_v34 = vrot.slane %v4312_v10, 2  ;;  %v11316_v10 = vld [vmem:[#allocation8 + $0xed4] sm:$0xf]  ;;  %v9585_v39 = vld [vmem:[#allocation8 + $0xe38] sm:$0xf0] }
 0x1f4   : > { %4551 = vmatpush.bf16.msrb.mxu3 %v9516_v38  ;;  %v3031_v31 = vpop.f32.mrf.mxu3  ;;  %v4325_v38 = vrot.slane %v4323_v19, 3  ;;  %v2979_v55 = vpop.f32.mrf.mxu0  ;;  %v9663_v19 = vld [vmem:[#allocation8 + $0xed0] sm:$0xf]  ;;  %v11312_v1 = vld [vmem:[#allocation8 + $0xeb4] sm:$0xf] }
 0x1f5   : > { %4498 = vmatpush.bf16.msrb.mxu0 %v9440_v56  ;;  %v3032_v48 = vadd.f32 %v3031_v31, %v3013_v62  ;;  %v2997_v52 = vpop.f32.mrf.mxu1  ;;  %v11319_v56 = vld [vmem:[#allocation8 + $0xee4] sm:$0xf0]  ;;  %v4318_v0 = vor.u32 %v4317_v5, %v4314_v34  ;;  %v9664_v18 = vor.u32 %v11317_v8, %v9663_v19  ;;  %v11314_v62 = vld [vmem:[#allocation8 + $0xec4] sm:$0xf]  ;;  %v9655_v5 = vld [vmem:[#allocation8 + $0xec0] sm:$0xf] }
 0x1f6   : > { %4516 = vmatpush.bf16.msrb.mxu1 %v9504_v54  ;;  %v12719_v63 = vor.u32 %v4325_v38, %v4322_v25  ;;  %v11299_v34 = vld [vmem:[#allocation8 + $0xe44] sm:$0xf0]  ;;  %v11313_v52 = vld [vmem:[#allocation8 + $0xeb4] sm:$0xf0] }
 0x1f7   : > { %4534 = vmatpush.bf16.msrb.mxu2 %v9444_v43  ;;  %v11318_v43 = vld [vmem:[#allocation8 + $0xee4] sm:$0xf]  ;;  %v12713_v54 = vadd.f32 %v3032_v48, %v12634_v60  ;;  %v11300_v60 = vld [vmem:[#allocation8 + $0xe54] sm:$0xf]  ;;  %v11315_v31 = vld [vmem:[#allocation8 + $0xec4] sm:$0xf0]  ;;  %v9592_v55 = vor.u32 %v11299_v34, %v9591_v9 }
 0x1f8   : > { %4552 = vmatpush.bf16.msrb.mxu3 %v9508_v33  ;;  %v9671_v33 = vld [vmem:[#allocation8 + $0xee0] sm:$0xf]  ;;  %v9676_v58 = vor.u32 %v11318_v43, %v9673_v46  ;;  %v4327_v57 = vsel %vm1881_vm4, %v4318_v0, %v12719_v63  ;;  %v9604_v61 = vor.u32 %v11300_v60, %v9601_v2  ;;  %v9583_v43 = vld [vmem:[#allocation8 + $0xe30] sm:$0xf]  ;;  %v11297_v46 = vld [vmem:[#allocation8 + $0xe34] sm:$0xf0] }
 0x1f9   : > { %4499 = vmatpush.bf16.msrb.mxu0 %v9432_v12  ;;  %v9672_v29 = vor.u32 %v11319_v56, %v9671_v33  ;;  %v11298_v12 = vld [vmem:[#allocation8 + $0xe44] sm:$0xf]  ;;  %v11295_v42 = vld [vmem:[#allocation8 + $0xe24] sm:$0xf0]  ;;  %v4570_v34 = vld [vmem:[#allocation2 + $0x8] sm:$0x88] }
 0x1fa   : > { %4517 = vmatpush.bf16.msrb.mxu1 %v9496_v13  ;;  %v9593_v13 = vld [vmem:[#allocation8 + $0xe48] sm:$0xf0]  ;;  %v11311_v6 = vld [vmem:[#allocation8 + $0xea4] sm:$0xf0]  ;;  %v11290_v9 = vld [vmem:[#allocation8 + $0xe04] sm:$0xf] }
 0x1fb   : > { %4535 = vmatpush.bf16.msrb.mxu2 %v9436_v51  ;;  %v3015_v11 = vpop.f32.mrf.mxu2  ;;  %v4310_v51 = vsel %vm1881_vm4, %v4301_v35, %v12717_v22  ;;  %v9596_v38 = vor.u32 %v11298_v12, %v9593_v13  ;;  %v9633_v12 = vld [vmem:[#allocation8 + $0xe98] sm:$0xf0]  ;;  %v9567_v13 = vld [vmem:[#allocation8 + $0xe10] sm:$0xf] }
 0x1fc   : > { %4553 = vmatpush.bf16.msrb.mxu3 %v9500_v41  ;;  %v3033_v47 = vpop.f32.mrf.mxu3  ;;  %v3297_v45 = vpop.f32.mrf.mxu0  ;;  %v9668_v41 = vor.u32 %v11316_v10, %v9665_v4  ;;  %4500 = vmatmul.bf16.vlgmr.msrb.gmra.mxu0 %v4310_v51  ;;  %v11310_v11 = vld [vmem:[#allocation8 + $0xea4] sm:$0xf]  ;;  %v9641_v10 = vld [vmem:[#allocation8 + $0xea8] sm:$0xf0]  ;;  %v9575_v4 = vld [vmem:[#allocation8 + $0xe20] sm:$0xf] }
 0x1fd   : > { %4779 = vmatpush.bf16.msra.mxu0 %v9616_v49  ;;  %v3315_v20 = vpop.f32.mrf.mxu1  ;;  %4518 = vmatmul.bf16.vlgmr.msrb.gmra.mxu1 %v4327_v57  ;;  %v9656_v49 = vor.u32 %v11315_v31, %v9655_v5  ;;  %v9639_v47 = vld [vmem:[#allocation8 + $0xea0] sm:$0xf] }
 0x1fe   : > { %4797 = vmatpush.bf16.msra.mxu1 %v9680_v26  ;;  %v3316_v23 = vadd.f32 %v3315_v20, %v3297_v45  ;;  %4536 = vmatmul.bf16.vlgmr.msrb.gmra.mxu2 %v4310_v51  ;;  %v9649_v26 = vld [vmem:[#allocation8 + $0xeb8] sm:$0xf0]  ;;  %v9644_v45 = vor.u32 %v11310_v11, %v9641_v10  ;;  %v11292_v51 = vld [vmem:[#allocation8 + $0xe14] sm:$0xf] }
 0x1ff   : > { %4815 = vmatpush.bf16.msra.mxu2 %v9620_v28  ;;  %4554 = vmatmul.bf16.vlgmr.msrb.gmra.mxu3 %v4327_v57  ;;  %v9660_v28 = vor.u32 %v11314_v62, %v9657_v36  ;;  %v11308_v20 = vld [vmem:[#allocation8 + $0xe94] sm:$0xf]  ;;  %v11309_v62 = vld [vmem:[#allocation8 + $0xe94] sm:$0xf0] }
 0x200   : > { %4833 = vmatpush.bf16.msra.mxu3 %v9684_v40  ;;  %v12726_v25 = vadd.f32 %v3316_v23, %v12649_v53  ;;  %v11296_v40 = vld [vmem:[#allocation8 + $0xe34] sm:$0xf]  ;;  %v9647_v53 = vld [vmem:[#allocation8 + $0xeb0] sm:$0xf]  ;;  %v11293_v23 = vld [vmem:[#allocation8 + $0xe14] sm:$0xf0] }
 0x201   : > { %4780 = vmatpush.bf16.msra.mxu0 %v9608_v59  ;;  %v9588_v35 = vor.u32 %v11296_v40, %v9585_v39  ;;  %v11294_v59 = vld [vmem:[#allocation8 + $0xe24] sm:$0xf]  ;;  %v9648_v2 = vor.u32 %v11313_v52, %v9647_v53  ;;  %v9561_v40 = vld [vmem:[#allocation8 + $0xe08] sm:$0xf0]  ;;  %v11336_v53 = vld [vmem:[#allocation8 + $0xf74] sm:$0xf] }
 0x202   : > { %4798 = vmatpush.bf16.msra.mxu1 %v9672_v29  ;;  %v9577_v29 = vld [vmem:[#allocation8 + $0xe28] sm:$0xf0]  ;;  %v11306_v39 = vld [vmem:[#allocation8 + $0xe84] sm:$0xf]  ;;  %v9745_v52 = vld [vmem:[#allocation8 + $0xf78] sm:$0xf0] }
 0x203   : > { %4816 = vmatpush.bf16.msra.mxu2 %v9612_v7  ;;  %v3333_v48 = vpop.f32.mrf.mxu2  ;;  %v9652_v7 = vor.u32 %v11312_v1, %v9649_v26  ;;  %v9580_v8 = vor.u32 %v11294_v59, %v9577_v29  ;;  %v9625_v1 = vld [vmem:[#allocation8 + $0xe88] sm:$0xf0]  ;;  %v9559_v26 = vld [vmem:[#allocation8 + $0xe00] sm:$0xf]  ;;  %v4606_v59 = vunpack.c.h.b16 %v4570_v34  ;;  %v9807_v29 = vld [vmem:[#allocation8 + $0xff0] sm:$0xf] }
 0x204   : > { %4834 = vmatpush.bf16.msra.mxu3 %v9676_v58  ;;  %v3351_v37 = vpop.f32.mrf.mxu3  ;;  %v3299_v33 = vpop.f32.mrf.mxu0  ;;  %v9584_v58 = vor.u32 %v11297_v46, %v9583_v43  ;;  %v11291_v43 = vld [vmem:[#allocation8 + $0xe04] sm:$0xf0]  ;;  %v9623_v46 = vld [vmem:[#allocation8 + $0xe80] sm:$0xf] }
 0x205   : > { %4781 = vmatpush.bf16.msra.mxu0 %v9600_v27  ;;  %v3352_v50 = vadd.f32 %v3351_v37, %v3333_v48  ;;  %v3317_v56 = vpop.f32.mrf.mxu1  ;;  %v11307_v37 = vld [vmem:[#allocation8 + $0xe84] sm:$0xf0] }
 0x206   : > { %4799 = vmatpush.bf16.msra.mxu1 %v9664_v18  ;;  %v3318_v60 = vadd.f32 %v3317_v56, %v3299_v33  ;;  %v9631_v18 = vld [vmem:[#allocation8 + $0xe90] sm:$0xf]  ;;  %v11352_v33 = vld [vmem:[#allocation8 + $0xff4] sm:$0xf]  ;;  %v9809_v56 = vld [vmem:[#allocation8 + $0xff8] sm:$0xf0]  ;;  %v9624_v11 = vor.u32 %v11307_v37, %v9623_v46 }
 0x207   : > { %4817 = vmatpush.bf16.msra.mxu2 %v9604_v61  ;;  %v12729_v0 = vadd.f32 %v3352_v50, %v12652_v14  ;;  %v9569_v14 = vld [vmem:[#allocation8 + $0xe18] sm:$0xf0]  ;;  %v9576_v61 = vor.u32 %v11295_v42, %v9575_v4  ;;  %v9748_v4 = vor.u32 %v11336_v53, %v9745_v52  ;;  %v11334_v42 = vld [vmem:[#allocation8 + $0xf64] sm:$0xf] }
 0x208   : > { %4835 = vmatpush.bf16.msra.mxu3 %v9668_v41  ;;  %v12732_v19 = vadd.f32 %v3318_v60, %v12661_v24  ;;  %v9640_v41 = vor.u32 %v11311_v6, %v9639_v47  ;;  %v9572_v31 = vor.u32 %v11292_v51, %v9569_v14  ;;  %v11353_v60 = vld [vmem:[#allocation8 + $0xff4] sm:$0xf0]  ;;  %v9737_v47 = vld [vmem:[#allocation8 + $0xf68] sm:$0xf0] }
 0x209   : > { %4782 = vmatpush.bf16.msra.mxu0 %v9592_v55  ;;  %v9808_v14 = vor.u32 %v11353_v60, %v9807_v29  ;;  %v9719_v29 = vld [vmem:[#allocation8 + $0xf40] sm:$0xf]  ;;  %v11331_v60 = vld [vmem:[#allocation8 + $0xf44] sm:$0xf0] }
 0x20a   : > { %4800 = vmatpush.bf16.msra.mxu1 %v9656_v49  ;;  %v9632_v49 = vor.u32 %v11309_v62, %v9631_v18  ;;  %v9740_v62 = vor.u32 %v11334_v42, %v9737_v47  ;;  %v9713_v42 = vld [vmem:[#allocation8 + $0xf38] sm:$0xf0]  ;;  %v11344_v47 = vld [vmem:[#allocation8 + $0xfb4] sm:$0xf] }
 0x20b   : > { %4818 = vmatpush.bf16.msra.mxu2 %v9596_v38  ;;  %v3335_v57 = vpop.f32.mrf.mxu2  ;;  %v9636_v38 = vor.u32 %v11308_v20, %v9633_v12  ;;  %v11350_v20 = vld [vmem:[#allocation8 + $0xfe4] sm:$0xf]  ;;  %v12748_v12 = vpack.c.b16 %v12444_v32, %v4606_v59 }
 0x20c   : > { %4836 = vmatpush.bf16.msra.mxu3 %v9660_v28  ;;  %v3353_v27 = vpop.f32.mrf.mxu3  ;;  %v3302_v36 = vpop.f32.mrf.mxu0  ;;  %v9568_v28 = vor.u32 %v11293_v23, %v9567_v13  ;;  %4505 = vmatmul.bf16.gmra.mxu0 %v12717_v22  ;;  %v11335_v13 = vld [vmem:[#allocation8 + $0xf64] sm:$0xf0]  ;;  %v9799_v23 = vld [vmem:[#allocation8 + $0xfe0] sm:$0xf]  ;;  %v11346_v59 = vld [vmem:[#allocation8 + $0xfc4] sm:$0xf] }
 0x20d   : > { %4783 = vmatpush.bf16.msra.mxu0 %v9584_v58  ;;  %v3354_v24 = vadd.f32 %v3353_v27, %v3335_v57  ;;  %v3320_v5 = vpop.f32.mrf.mxu1  ;;  %4523 = vmatmul.bf16.gmra.mxu1 %v12719_v63  ;;  %v9628_v58 = vor.u32 %v11306_v39, %v9625_v1  ;;  %v9801_v57 = vld [vmem:[#allocation8 + $0xfe8] sm:$0xf0]  ;;  %v11351_v27 = vld [vmem:[#allocation8 + $0xfe4] sm:$0xf0]  ;;  %v11348_v39 = vld [vmem:[#allocation8 + $0xfd4] sm:$0xf] }
 0x20e   : > { %4801 = vmatpush.bf16.msra.mxu1 %v9648_v2  ;;  %v3321_v55 = vadd.f32 %v3320_v5, %v3302_v36  ;;  %4541 = vmatmul.bf16.gmra.mxu2 %v12717_v22  ;;  %v11337_v22 = vld [vmem:[#allocation8 + $0xf74] sm:$0xf0]  ;;  %v9800_v5 = vor.u32 %v11351_v27, %v9799_v23  ;;  %v9793_v1 = vld [vmem:[#allocation8 + $0xfd8] sm:$0xf0] }
 0x20f   : > { %4819 = vmatpush.bf16.msra.mxu2 %v9588_v35  ;;  %v12735_v48 = vadd.f32 %v3354_v24, %v12695_v3  ;;  %4559 = vmatmul.bf16.gmra.mxu3 %v12719_v63  ;;  %v4605_v3 = vunpack.c.l.b16 %v4570_v34  ;;  %v9743_v35 = vld [vmem:[#allocation8 + $0xf70] sm:$0xf]  ;;  %v9812_v63 = vor.u32 %v11352_v33, %v9809_v56  ;;  %v9804_v24 = vor.u32 %v11350_v20, %v9801_v57  ;;  %v11330_v33 = vld [vmem:[#allocation8 + $0xf44] sm:$0xf]  ;;  %v9721_v56 = vld [vmem:[#allocation8 + $0xf48] sm:$0xf0] }
 0x210   : > { %4837 = vmatpush.bf16.msra.mxu3 %v9652_v7  ;;  %v12740_v50 = vadd.f32 %v3321_v55, %v12704_v21  ;;  %v9564_v7 = vor.u32 %v11290_v9, %v9561_v40  ;;  %v9560_v21 = vor.u32 %v11291_v43, %v9559_v26  ;;  %v9744_v51 = vor.u32 %v11337_v22, %v9743_v35  ;;  %v9727_v55 = vld [vmem:[#allocation8 + $0xf50] sm:$0xf]  ;;  %v11349_v43 = vld [vmem:[#allocation8 + $0xfd4] sm:$0xf0]  ;;  %v9785_v22 = vld [vmem:[#allocation8 + $0xfc8] sm:$0xf0] }
 0x211   : > { %4784 = vmatpush.bf16.msra.mxu0 %v9576_v61  ;;  %v9735_v61 = vld [vmem:[#allocation8 + $0xf60] sm:$0xf]  ;;  %v12755_v9 = vrot.slane %v12668_v44, 3  ;;  %v11333_v44 = vld [vmem:[#allocation8 + $0xf54] sm:$0xf0] }
 0x212   : > { %4802 = vmatpush.bf16.msra.mxu1 %v9640_v41  ;;  %v9736_v34 = vor.u32 %v11335_v13, %v9735_v61  ;;  %v9791_v26 = vld [vmem:[#allocation8 + $0xfd0] sm:$0xf]  ;;  %v11329_v57 = vld [vmem:[#allocation8 + $0xf34] sm:$0xf0] }
 0x213   : > { %4820 = vmatpush.bf16.msra.mxu2 %v9580_v8  ;;  %v3338_v2 = vpop.f32.mrf.mxu2  ;;  %v9711_v20 = vld [vmem:[#allocation8 + $0xf30] sm:$0xf]  ;;  %v11345_v13 = vld [vmem:[#allocation8 + $0xfb4] sm:$0xf0] }
 0x214   : > { %4838 = vmatpush.bf16.msra.mxu3 %v9644_v45  ;;  %v3356_v10 = vpop.f32.mrf.mxu3  ;;  %v3304_v8 = vpop.f32.mrf.mxu0  ;;  %v12745_v45 = vpack.c.b16 %v12442_v30, %v4605_v3  ;;  %v9796_v3 = vor.u32 %v11348_v39, %v9793_v1  ;;  %v4857_v61 = vld [vmem:[#allocation2 + $0x20] sm:$0xff] }
 0x215   : > { %4785 = vmatpush.bf16.msra.mxu0 %v9568_v28  ;;  %v3357_v6 = vadd.f32 %v3356_v10, %v3338_v2  ;;  %v3322_v41 = vpop.f32.mrf.mxu1  ;;  %v9729_v28 = vld [vmem:[#allocation8 + $0xf58] sm:$0xf0]  ;;  %v9783_v2 = vld [vmem:[#allocation8 + $0xfc0] sm:$0xf]  ;;  %v11328_v10 = vld [vmem:[#allocation8 + $0xf34] sm:$0xf]  ;;  %v12768_v39 = vunpack.c.l.b16 %v4857_v61 }
 0x216   : > { %4803 = vmatpush.bf16.msra.mxu1 %v9632_v49  ;;  %v4609_v36 = vrot.slane %v12745_v45, 3  ;;  %v9775_v41 = vld [vmem:[#allocation8 + $0xfb0] sm:$0xf] }
 0x217   : > { %4821 = vmatpush.bf16.msra.mxu2 %v9572_v31  ;;  %v12751_v18 = vadd.f32 %v3357_v6, %v12713_v54  ;;  %v4612_v31 = vrot.slane %v12748_v12, 3  ;;  %v12759_v54 = vrot.slane %v12679_v15, 3  ;;  %v9777_v6 = vld [vmem:[#allocation8 + $0xfb8] sm:$0xf0] }
 0x218   : > { %4839 = vmatpush.bf16.msra.mxu3 %v9636_v38  ;;  %v11332_v38 = vld [vmem:[#allocation8 + $0xf54] sm:$0xf]  ;;  %v4611_v37 = vsel %vm2197_vm5, %v4609_v36, %v12755_v9 }
 0x219   : > { %4786 = vmatpush.bf16.msra.mxu0 %v9560_v21  ;;  %v4614_v53 = vsel %vm2197_vm5, %v4612_v31, %v12759_v54  ;;  %v9732_v52 = vor.u32 %v11332_v38, %v9729_v28  ;;  %v11347_v21 = vld [vmem:[#allocation8 + $0xfc4] sm:$0xf0]  ;;  %v9712_v31 = vor.u32 %v11329_v57, %v9711_v20  ;;  %v11342_v38 = vld [vmem:[#allocation8 + $0xfa4] sm:$0xf]  ;;  %v9769_v28 = vld [vmem:[#allocation8 + $0xfa8] sm:$0xf0] }
 0x21a   : > { %4804 = vmatpush.bf16.msra.mxu1 %v9624_v11  ;;  %v9753_v20 = vld [vmem:[#allocation8 + $0xf88] sm:$0xf0]  ;;  %v12805_v57 = vld [vmem:[#allocation8 + $0xf00] sm:$0xf] }
 0x21b   : > { %4822 = vmatpush.bf16.msra.mxu2 %v9564_v7  ;;  %v3340_v40 = vpop.f32.mrf.mxu2  ;;  %v9728_v7 = vor.u32 %v11333_v44, %v9727_v55  ;;  %v11327_v44 = vld [vmem:[#allocation8 + $0xf24] sm:$0xf0] }
 0x21c   : > { %4840 = vmatpush.bf16.msra.mxu3 %v9628_v58  ;;  %v3358_v49 = vpop.f32.mrf.mxu3  ;;  %v3584_v46 = vpop.f32.mrf.mxu0  ;;  %v9792_v58 = vor.u32 %v11349_v43, %v9791_v26  ;;  %4787 = vmatmul.bf16.vlgmr.msra.gmra.mxu0 %v4611_v37  ;;  %v9703_v40 = vld [vmem:[#allocation8 + $0xf20] sm:$0xf]  ;;  %v11343_v43 = vld [vmem:[#allocation8 + $0xfa4] sm:$0xf0] }
 0x21d   : > { %5094 = vmatpush.bf16.msrb.mxu0 %v9744_v51  ;;  %v3602_v15 = vpop.f32.mrf.mxu1  ;;  %4805 = vmatmul.bf16.vlgmr.msra.gmra.mxu1 %v4614_v53  ;;  %v9720_v51 = vor.u32 %v11331_v60, %v9719_v29  ;;  %v9776_v49 = vor.u32 %v11345_v13, %v9775_v41  ;;  %v9767_v26 = vld [vmem:[#allocation8 + $0xfa0] sm:$0xf]  ;;  %v4900_v29 = vshll.u32 %v12745_v45, 16  ;;  %v9704_v60 = vor.u32 %v11327_v44, %v9703_v40  ;;  %v11368_v40 = vld [vmem:[#allocation8 + $0x1074] sm:$0xf] }
 0x21e   : > { %5112 = vmatpush.bf16.msrb.mxu1 %v9808_v14  ;;  %v3603_v35 = vadd.f32 %v3602_v15, %v3584_v46  ;;  %4823 = vmatmul.bf16.vlgmr.msra.gmra.mxu2 %v4611_v37  ;;  %v9784_v14 = vor.u32 %v11347_v21, %v9783_v2  ;;  %v12773_v46 = vld [vmem:[#allocation8 + $0xf14] sm:$0xf]  ;;  %v12775_v37 = vld [vmem:[#allocation8 + $0xf18] sm:$0xf0]  ;;  %v9768_v2 = vor.u32 %v11343_v43, %v9767_v26  ;;  %v9871_v26 = vld [vmem:[#allocation8 + $0x1070] sm:$0xf] }
 0x21f   : > { %5130 = vmatpush.bf16.msrb.mxu2 %v9748_v4  ;;  %4841 = vmatmul.bf16.vlgmr.msra.gmra.mxu3 %v4614_v53  ;;  %v9724_v4 = vor.u32 %v11330_v33, %v9721_v56  ;;  %v12777_v15 = vld [vmem:[#allocation8 + $0xf94] sm:$0xf]  ;;  %v12779_v53 = vunpack.c.h.b16 %v4857_v61  ;;  %v12784_v33 = vld [vmem:[#allocation8 + $0xf10] sm:$0xf]  ;;  %v12786_v56 = vld [vmem:[#allocation8 + $0xf14] sm:$0xf0] }
 0x220   : > { %5148 = vmatpush.bf16.msrb.mxu3 %v9812_v63  ;;  %v12766_v11 = vadd.f32 %v3603_v35, %v12726_v25  ;;  %v9788_v63 = vor.u32 %v11346_v59, %v9785_v22  ;;  %v9772_v35 = vor.u32 %v11342_v38, %v9769_v28  ;;  %v4894_v59 = vpack.c.b16 %v12768_v39, %v12337_v17  ;;  %v11384_v44 = vld [vmem:[#allocation8 + $0x10f4] sm:$0xf] }
 0x221   : > { %5095 = vmatpush.bf16.msrb.mxu0 %v9736_v34  ;;  %v9716_v34 = vor.u32 %v11328_v10, %v9713_v42  ;;  %v4897_v22 = vshrl.u32 %v12745_v45, 16  ;;  %v9700_v10 = vor.u32 %v12773_v46, %v12775_v37  ;;  %v4895_v42 = vpack.c.b16 %v12779_v53, %v12348_v16  ;;  %v11369_v37 = vld [vmem:[#allocation8 + $0x1074] sm:$0xf0] }
 0x222   : > { %5113 = vmatpush.bf16.msrb.mxu1 %v9800_v5  ;;  %v9780_v5 = vor.u32 %v11344_v47, %v9777_v6  ;;  %v12809_v13 = vrot.slane %v4900_v29, 4  ;;  %v11366_v29 = vld [vmem:[#allocation8 + $0x1064] sm:$0xf] }
 0x223   : > { %5131 = vmatpush.bf16.msrb.mxu2 %v9740_v62  ;;  %v3620_v8 = vpop.f32.mrf.mxu2  ;;  %v11326_v62 = vld [vmem:[#allocation8 + $0xf24] sm:$0xf]  ;;  %v12807_v41 = vrot.slane %v4897_v22, 3  ;;  %v4922_v38 = vshrl.u32 %v4895_v42, 16  ;;  %v4925_v28 = vshll.u32 %v4895_v42, 16 }
 0x224   : > { %5149 = vmatpush.bf16.msrb.mxu3 %v9804_v24  ;;  %v3638_v25 = vpop.f32.mrf.mxu3  ;;  %v3586_v27 = vpop.f32.mrf.mxu0  ;;  %v9705_v24 = vld [vmem:[#allocation8 + $0xf28] sm:$0xf0]  ;;  %v9863_v42 = vld [vmem:[#allocation8 + $0x1060] sm:$0xf] }
 0x225   : > { %5096 = vmatpush.bf16.msrb.mxu0 %v9728_v7  ;;  %v3639_v23 = vadd.f32 %v3638_v25, %v3620_v8  ;;  %v3604_v36 = vpop.f32.mrf.mxu1  ;;  %v9759_v7 = vld [vmem:[#allocation8 + $0xf90] sm:$0xf]  ;;  %v9696_v8 = vor.u32 %v12786_v56, %v12784_v33  ;;  %v11323_v25 = vld [vmem:[#allocation8 + $0xf04] sm:$0xf0] }
 0x226   : > { %5114 = vmatpush.bf16.msrb.mxu1 %v9792_v58  ;;  %v3605_v55 = vadd.f32 %v3604_v36, %v3586_v27  ;;  %v11341_v58 = vld [vmem:[#allocation8 + $0xf94] sm:$0xf0]  ;;  %v4908_v27 = vshll.u32 %v4894_v59, 16  ;;  %v9751_v36 = vld [vmem:[#allocation8 + $0xf80] sm:$0xf]  ;;  %v9688_v43 = vor.u32 %v11323_v25, %v12805_v57 }
 0x227   : > { %5132 = vmatpush.bf16.msrb.mxu2 %v9732_v52  ;;  %v12771_v1 = vadd.f32 %v3639_v23, %v12729_v0  ;;  %v9708_v0 = vor.u32 %v11326_v62, %v9705_v24  ;;  %v4905_v23 = vshrl.u32 %v4894_v59, 16 }
 0x228   : > { %5150 = vmatpush.bf16.msrb.mxu3 %v9796_v3  ;;  %v12782_v52 = vadd.f32 %v3605_v55, %v12732_v19  ;;  %v9761_v3 = vld [vmem:[#allocation8 + $0xf98] sm:$0xf0] }
 0x229   : > { %5097 = vmatpush.bf16.msrb.mxu0 %v9720_v51  ;;  %v9764_v45 = vor.u32 %v12777_v15, %v9761_v3  ;;  %v9760_v51 = vor.u32 %v11341_v58, %v9759_v7  ;;  %v9873_v55 = vld [vmem:[#allocation8 + $0x1078] sm:$0xf0]  ;;  %v11385_v15 = vld [vmem:[#allocation8 + $0x10f4] sm:$0xf0]  ;;  %v4910_v3 = vrot.slane %v4908_v27, 4  ;;  %v4924_v7 = vrot.slane %v4922_v38, 3 }
 0x22a   : > { %5115 = vmatpush.bf16.msrb.mxu1 %v9784_v14  ;;  %v12803_v14 = vld [vmem:[#allocation8 + $0xf84] sm:$0xf]  ;;  %v4927_v58 = vrot.slane %v4925_v28, 4  ;;  %v9876_v59 = vor.u32 %v11368_v40, %v9873_v55  ;;  %v9855_v38 = vld [vmem:[#allocation8 + $0x1050] sm:$0xf] }
 0x22b   : > { %5133 = vmatpush.bf16.msrb.mxu2 %v9724_v4  ;;  %v3622_v19 = vpop.f32.mrf.mxu2  ;;  %v12794_v4 = vld [vmem:[#allocation8 + $0xf04] sm:$0xf]  ;;  %v9919_v28 = vld [vmem:[#allocation8 + $0x10d0] sm:$0xf]  ;;  %v11381_v40 = vld [vmem:[#allocation8 + $0x10d4] sm:$0xf0] }
 0x22c   : > { %5151 = vmatpush.bf16.msrb.mxu3 %v9788_v63  ;;  %v3640_v21 = vpop.f32.mrf.mxu3  ;;  %v12796_v63 = vld [vmem:[#allocation8 + $0xf08] sm:$0xf0]  ;;  %v3589_v6 = vpop.f32.mrf.mxu0  ;;  %4792 = vmatmul.bf16.gmra.mxu0 %v12755_v9 }
 0x22d   : > { %5098 = vmatpush.bf16.msrb.mxu0 %v9712_v31  ;;  %v3641_v47 = vadd.f32 %v3640_v21, %v3622_v19  ;;  %v3607_v61 = vpop.f32.mrf.mxu1  ;;  %v4917_v31 = vshll.u32 %v12748_v12, 16  ;;  %4810 = vmatmul.bf16.gmra.mxu1 %v12759_v54  ;;  %v9865_v19 = vld [vmem:[#allocation8 + $0x1068] sm:$0xf0]  ;;  %v9872_v21 = vor.u32 %v11369_v37, %v9871_v26 }
 0x22e   : > { %5116 = vmatpush.bf16.msrb.mxu1 %v9776_v49  ;;  %v3608_v24 = vadd.f32 %v3607_v61, %v3589_v6  ;;  %4828 = vmatmul.bf16.gmra.mxu2 %v12755_v9  ;;  %v9692_v49 = vor.u32 %v12794_v4, %v12796_v63  ;;  %v9756_v9 = vor.u32 %v12803_v14, %v9753_v20  ;;  %v11382_v4 = vld [vmem:[#allocation8 + $0x10e4] sm:$0xf]  ;;  %v9929_v63 = vld [vmem:[#allocation8 + $0x10e8] sm:$0xf0]  ;;  %v11367_v6 = vld [vmem:[#allocation8 + $0x1064] sm:$0xf0] }
 0x22f   : > { %5134 = vmatpush.bf16.msrb.mxu2 %v9716_v34  ;;  %v12812_v62 = vadd.f32 %v3641_v47, %v12735_v48  ;;  %v11339_v34 = vld [vmem:[#allocation8 + $0xf84] sm:$0xf0]  ;;  %4846 = vmatmul.bf16.gmra.mxu3 %v12759_v54  ;;  %v4907_v54 = vrot.slane %v4905_v23, 3  ;;  %v4919_v56 = vrot.slane %v4917_v31, 4  ;;  %v4903_v14 = vor.u32 %v12809_v13, %v12807_v41  ;;  %v9921_v31 = vld [vmem:[#allocation8 + $0x10d8] sm:$0xf0] }
 0x230   : > { %5152 = vmatpush.bf16.msrb.mxu3 %v9780_v5  ;;  %v4914_v5 = vshrl.u32 %v12748_v12, 16  ;;  %v12819_v48 = vadd.f32 %v3608_v24, %v12740_v50  ;;  %v9937_v12 = vld [vmem:[#allocation8 + $0x10f8] sm:$0xf0]  ;;  %v9752_v46 = vor.u32 %v11339_v34, %v9751_v36  ;;  %v9935_v50 = vld [vmem:[#allocation8 + $0x10f0] sm:$0xf]  ;;  %v9868_v20 = vor.u32 %v11366_v29, %v9865_v19 }
 0x231   : > { %5099 = vmatpush.bf16.msrb.mxu0 %v9704_v60  ;;  %v9940_v22 = vor.u32 %v11384_v44, %v9937_v12  ;;  %v9932_v57 = vor.u32 %v11382_v4, %v9929_v63  ;;  %v12832_v61 = vor.u32 %v4910_v3, %v4907_v54  ;;  %v9864_v25 = vor.u32 %v11367_v6, %v9863_v42  ;;  %v9857_v36 = vld [vmem:[#allocation8 + $0x1058] sm:$0xf0]  ;;  %v11365_v13 = vld [vmem:[#allocation8 + $0x1054] sm:$0xf0]  ;;  %v9913_v54 = vld [vmem:[#allocation8 + $0x10c8] sm:$0xf0] }
 0x232   : > { %5117 = vmatpush.bf16.msrb.mxu1 %v9768_v2  ;;  %v4916_v33 = vrot.slane %v4914_v5, 3  ;;  %v12834_v24 = vor.u32 %v4927_v58, %v4924_v7  ;;  %v11380_v5 = vld [vmem:[#allocation8 + $0x10d4] sm:$0xf]  ;;  %v9847_v3 = vld [vmem:[#allocation8 + $0x1040] sm:$0xf] }
 0x233   : > { %5135 = vmatpush.bf16.msrb.mxu2 %v9708_v0  ;;  %v3625_v0 = vpop.f32.mrf.mxu2  ;;  %v9841_v29 = vld [vmem:[#allocation8 + $0x1038] sm:$0xf0]  ;;  %v11376_v19 = vld [vmem:[#allocation8 + $0x10b4] sm:$0xf]  ;;  %v9839_v4 = vld [vmem:[#allocation8 + $0x1030] sm:$0xf] }
 0x234   : > { %5153 = vmatpush.bf16.msrb.mxu3 %v9772_v35  ;;  %v3643_v35 = vpop.f32.mrf.mxu3  ;;  %v3591_v2 = vpop.f32.mrf.mxu0  ;;  %v4920_v27 = vor.u32 %v4919_v56, %v4916_v33  ;;  %v11363_v33 = vld [vmem:[#allocation8 + $0x1044] sm:$0xf0]  ;;  %v9911_v56 = vld [vmem:[#allocation8 + $0x10c0] sm:$0xf]  ;;  %v11361_v63 = vld [vmem:[#allocation8 + $0x1034] sm:$0xf0] }
 0x235   : > { %5100 = vmatpush.bf16.msrb.mxu0 %v9696_v8  ;;  %v3644_v60 = vadd.f32 %v3643_v35, %v3625_v0  ;;  %v3609_v47 = vpop.f32.mrf.mxu1  ;;  %v11383_v8 = vld [vmem:[#allocation8 + $0x10e4] sm:$0xf0]  ;;  %v11378_v0 = vld [vmem:[#allocation8 + $0x10c4] sm:$0xf]  ;;  %v9848_v2 = vor.u32 %v11363_v33, %v9847_v3  ;;  %v9817_v33 = vld [vmem:[#allocation8 + $0x1008] sm:$0xf0] }
 0x236   : > { %5118 = vmatpush.bf16.msrb.mxu1 %v9760_v51  ;;  %v4929_v12 = vsel %vm2485_vm6, %v4920_v27, %v12834_v24  ;;  %v11379_v35 = vld [vmem:[#allocation8 + $0x10c4] sm:$0xf0]  ;;  %v11377_v47 = vld [vmem:[#allocation8 + $0x10b4] sm:$0xf0]  ;;  %v11354_v3 = vld [vmem:[#allocation8 + $0x1004] sm:$0xf] }
 0x237   : > { %5136 = vmatpush.bf16.msrb.mxu2 %v9700_v10  ;;  %v9936_v10 = vor.u32 %v11385_v15, %v9935_v50  ;;  %v12828_v51 = vadd.f32 %v3644_v60, %v12751_v18  ;;  %v11364_v18 = vld [vmem:[#allocation8 + $0x1054] sm:$0xf]  ;;  %v9856_v50 = vor.u32 %v11365_v13, %v9855_v38  ;;  %v9920_v15 = vor.u32 %v11381_v40, %v9919_v28  ;;  %v11359_v38 = vld [vmem:[#allocation8 + $0x1024] sm:$0xf0] }
 0x238   : > { %5154 = vmatpush.bf16.msrb.mxu3 %v9764_v45  ;;  %v9927_v45 = vld [vmem:[#allocation8 + $0x10e0] sm:$0xf]  ;;  %v9860_v26 = vor.u32 %v11364_v18, %v9857_v36  ;;  %v11375_v13 = vld [vmem:[#allocation8 + $0x10a4] sm:$0xf0] }
 0x239   : > { %5101 = vmatpush.bf16.msrb.mxu0 %v9688_v43  ;;  %v9928_v23 = vor.u32 %v11383_v8, %v9927_v45  ;;  %v11362_v43 = vld [vmem:[#allocation8 + $0x1044] sm:$0xf] }
 0x23a   : > { %5119 = vmatpush.bf16.msrb.mxu1 %v9752_v46  ;;  %v9849_v46 = vld [vmem:[#allocation8 + $0x1048] sm:$0xf0] }
 0x23b   : > { %5137 = vmatpush.bf16.msrb.mxu2 %v9692_v49  ;;  %v3627_v34 = vpop.f32.mrf.mxu2  ;;  %v4912_v49 = vsel %vm2485_vm6, %v4903_v14, %v12832_v61  ;;  %v9852_v58 = vor.u32 %v11362_v43, %v9849_v46  ;;  %v9889_v43 = vld [vmem:[#allocation8 + $0x1098] sm:$0xf0]  ;;  %v9823_v46 = vld [vmem:[#allocation8 + $0x1010] sm:$0xf] }
 0x23c   : > { %5155 = vmatpush.bf16.msrb.mxu3 %v9756_v9  ;;  %v3645_v41 = vpop.f32.mrf.mxu3  ;;  %v3899_v55 = vpop.f32.mrf.mxu0  ;;  %v9924_v9 = vor.u32 %v11380_v5, %v9921_v31  ;;  %5102 = vmatmul.bf16.vlgmr.msrb.gmra.mxu0 %v4912_v49  ;;  %v11374_v34 = vld [vmem:[#allocation8 + $0x10a4] sm:$0xf]  ;;  %v9897_v5 = vld [vmem:[#allocation8 + $0x10a8] sm:$0xf0]  ;;  %v9831_v31 = vld [vmem:[#allocation8 + $0x1020] sm:$0xf] }
 0x23d   : > { %5373 = vmatpush.bf16.msra.mxu0 %v9872_v21  ;;  %v3917_v44 = vpop.f32.mrf.mxu1  ;;  %5120 = vmatmul.bf16.vlgmr.msrb.gmra.mxu1 %v4929_v12  ;;  %v9912_v21 = vor.u32 %v11379_v35, %v9911_v56  ;;  %v9895_v41 = vld [vmem:[#allocation8 + $0x10a0] sm:$0xf]  ;;  %v11370_v56 = vld [vmem:[#allocation8 + $0x1084] sm:$0xf] }
 0x23e   : > { %5391 = vmatpush.bf16.msra.mxu1 %v9936_v10  ;;  %v3918_v37 = vadd.f32 %v3917_v44, %v3899_v55  ;;  %5138 = vmatmul.bf16.vlgmr.msrb.gmra.mxu2 %v4912_v49  ;;  %v9905_v10 = vld [vmem:[#allocation8 + $0x10b8] sm:$0xf0]  ;;  %v9900_v55 = vor.u32 %v11374_v34, %v9897_v5  ;;  %v11356_v49 = vld [vmem:[#allocation8 + $0x1014] sm:$0xf] }
 0x23f   : > { %5409 = vmatpush.bf16.msra.mxu2 %v9876_v59  ;;  %5156 = vmatmul.bf16.vlgmr.msrb.gmra.mxu3 %v4929_v12  ;;  %v9916_v59 = vor.u32 %v11378_v0, %v9913_v54  ;;  %v11372_v44 = vld [vmem:[#allocation8 + $0x1094] sm:$0xf]  ;;  %v11373_v0 = vld [vmem:[#allocation8 + $0x1094] sm:$0xf0] }
 0x240   : > { %5427 = vmatpush.bf16.msra.mxu3 %v9940_v22  ;;  %v12841_v7 = vadd.f32 %v3918_v37, %v12766_v11  ;;  %v11360_v22 = vld [vmem:[#allocation8 + $0x1034] sm:$0xf]  ;;  %v9903_v11 = vld [vmem:[#allocation8 + $0x10b0] sm:$0xf]  ;;  %v11357_v37 = vld [vmem:[#allocation8 + $0x1014] sm:$0xf0] }
 0x241   : > { %5374 = vmatpush.bf16.msra.mxu0 %v9864_v25  ;;  %v9844_v14 = vor.u32 %v11360_v22, %v9841_v29  ;;  %v11358_v25 = vld [vmem:[#allocation8 + $0x1024] sm:$0xf]  ;;  %v9904_v36 = vor.u32 %v11377_v47, %v9903_v11  ;;  %v9824_v22 = vor.u32 %v11357_v37, %v9823_v46  ;;  %v9881_v29 = vld [vmem:[#allocation8 + $0x1088] sm:$0xf0]  ;;  %v10001_v11 = vld [vmem:[#allocation8 + $0x1178] sm:$0xf0] }
 0x242   : > { %5392 = vmatpush.bf16.msra.mxu1 %v9928_v23  ;;  %v9833_v23 = vld [vmem:[#allocation8 + $0x1028] sm:$0xf0]  ;;  %v11416_v47 = vld [vmem:[#allocation8 + $0x11f4] sm:$0xf] }
 0x243   : > { %5410 = vmatpush.bf16.msra.mxu2 %v9868_v20  ;;  %v3935_v60 = vpop.f32.mrf.mxu2  ;;  %v9908_v20 = vor.u32 %v11376_v19, %v9905_v10  ;;  %v9836_v40 = vor.u32 %v11358_v25, %v9833_v23  ;;  %v9815_v19 = vld [vmem:[#allocation8 + $0x1000] sm:$0xf]  ;;  %v10063_v25 = vld [vmem:[#allocation8 + $0x11f0] sm:$0xf]  ;;  %v11417_v23 = vld [vmem:[#allocation8 + $0x11f4] sm:$0xf0] }
 0x244   : > { %5428 = vmatpush.bf16.msra.mxu3 %v9932_v57  ;;  %v3953_v42 = vpop.f32.mrf.mxu3  ;;  %v3901_v45 = vpop.f32.mrf.mxu0  ;;  %v9840_v57 = vor.u32 %v11361_v63, %v9839_v4  ;;  %v9879_v4 = vld [vmem:[#allocation8 + $0x1080] sm:$0xf]  ;;  %v11371_v63 = vld [vmem:[#allocation8 + $0x1084] sm:$0xf0] }
 0x245   : > { %5375 = vmatpush.bf16.msra.mxu0 %v9856_v50  ;;  %v3954_v6 = vadd.f32 %v3953_v42, %v3935_v60  ;;  %v3919_v8 = vpop.f32.mrf.mxu1  ;;  %v11355_v60 = vld [vmem:[#allocation8 + $0x1004] sm:$0xf0]  ;;  %v11400_v42 = vld [vmem:[#allocation8 + $0x1174] sm:$0xf] }
 0x246   : > { %5393 = vmatpush.bf16.msra.mxu1 %v9920_v15  ;;  %v3920_v18 = vadd.f32 %v3919_v8, %v3901_v45  ;;  %v9887_v15 = vld [vmem:[#allocation8 + $0x1090] sm:$0xf]  ;;  %v11401_v8 = vld [vmem:[#allocation8 + $0x1174] sm:$0xf0]  ;;  %v10004_v34 = vor.u32 %v11400_v42, %v10001_v11 }
 0x247   : > { %5411 = vmatpush.bf16.msra.mxu2 %v9860_v26  ;;  %v12844_v27 = vadd.f32 %v3954_v6, %v12771_v1  ;;  %v9825_v1 = vld [vmem:[#allocation8 + $0x1018] sm:$0xf0]  ;;  %v9832_v26 = vor.u32 %v11359_v38, %v9831_v31  ;;  %v9888_v10 = vor.u32 %v11373_v0, %v9887_v15  ;;  %v11398_v31 = vld [vmem:[#allocation8 + $0x1164] sm:$0xf]  ;;  %v11396_v0 = vld [vmem:[#allocation8 + $0x1154] sm:$0xf] }
 0x248   : > { %5429 = vmatpush.bf16.msra.mxu3 %v9924_v9  ;;  %v12847_v28 = vadd.f32 %v3920_v18, %v12782_v52  ;;  %v9896_v9 = vor.u32 %v11375_v13, %v9895_v41  ;;  %v10065_v6 = vld [vmem:[#allocation8 + $0x11f8] sm:$0xf0]  ;;  %v9816_v18 = vor.u32 %v11355_v60, %v9815_v19  ;;  %v5206_v19 = vpack.c.b16 %v12348_v16, %v12444_v32  ;;  %v11392_v32 = vld [vmem:[#allocation8 + $0x1134] sm:$0xf] }
 0x249   : > { %5376 = vmatpush.bf16.msra.mxu0 %v9848_v2  ;;  %v10068_v5 = vor.u32 %v11416_v47, %v10065_v6  ;;  %v9975_v6 = vld [vmem:[#allocation8 + $0x1140] sm:$0xf] }
 0x24a   : > { %5394 = vmatpush.bf16.msra.mxu1 %v9912_v21 }
 0x24b   : > { %5412 = vmatpush.bf16.msra.mxu2 %v9852_v58  ;;  %v3937_v12 = vpop.f32.mrf.mxu2  ;;  %v9828_v58 = vor.u32 %v11356_v49, %v9825_v1  ;;  %v10057_v49 = vld [vmem:[#allocation8 + $0x11e8] sm:$0xf0]  ;;  %v9991_v1 = vld [vmem:[#allocation8 + $0x1160] sm:$0xf] }
 0x24c   : > { %5430 = vmatpush.bf16.msra.mxu3 %v9916_v59  ;;  %v3955_v50 = vpop.f32.mrf.mxu3  ;;  %v3904_v54 = vpop.f32.mrf.mxu0  ;;  %v9892_v59 = vor.u32 %v11372_v44, %v9889_v43  ;;  %5107 = vmatmul.bf16.gmra.mxu0 %v12832_v61 }
 0x24d   : > { %5377 = vmatpush.bf16.msra.mxu0 %v9840_v57  ;;  %v3956_v52 = vadd.f32 %v3955_v50, %v3937_v12  ;;  %v3922_v35 = vpop.f32.mrf.mxu1  ;;  %5125 = vmatmul.bf16.gmra.mxu1 %v12834_v24  ;;  %v9884_v57 = vor.u32 %v11370_v56, %v9881_v29  ;;  %v11399_v12 = vld [vmem:[#allocation8 + $0x1164] sm:$0xf0]  ;;  %v9983_v56 = vld [vmem:[#allocation8 + $0x1150] sm:$0xf] }
 0x24e   : > { %5395 = vmatpush.bf16.msra.mxu1 %v9904_v36  ;;  %v3923_v21 = vadd.f32 %v3922_v35, %v3904_v54  ;;  %5143 = vmatmul.bf16.gmra.mxu2 %v12832_v61  ;;  %v9992_v50 = vor.u32 %v11399_v12, %v9991_v1 }
 0x24f   : > { %5413 = vmatpush.bf16.msra.mxu2 %v9844_v14  ;;  %v12850_v2 = vadd.f32 %v3956_v52, %v12812_v62  ;;  %5161 = vmatmul.bf16.gmra.mxu3 %v12834_v24  ;;  %v9999_v62 = vld [vmem:[#allocation8 + $0x1170] sm:$0xf]  ;;  %v330_v14 = vld [vmem:[%s12082_s17 + $0x10] sm:$0xff]  ;;  %v9993_v24 = vld [vmem:[#allocation8 + $0x1168] sm:$0xf0] }
 0x250   : > { %5431 = vmatpush.bf16.msra.mxu3 %v9908_v20  ;;  %v12855_v45 = vadd.f32 %v3923_v21, %v12819_v48  ;;  %v9820_v20 = vor.u32 %v11354_v3, %v9817_v33  ;;  %333 = vst [vmem:[#allocation2 + $0x28] sm:$0xff] %v330_v14  ;;  %v9880_v48 = vor.u32 %v11371_v63, %v9879_v4  ;;  %v9985_v52 = vld [vmem:[#allocation8 + $0x1158] sm:$0xf0]  ;;  %v11412_v3 = vld [vmem:[#allocation8 + $0x11d4] sm:$0xf] }
 0x251   : > { %5378 = vmatpush.bf16.msra.mxu0 %v9832_v26  ;;  %v10000_v13 = vor.u32 %v11401_v8, %v9999_v62  ;;  %v10055_v26 = vld [vmem:[#allocation8 + $0x11e0] sm:$0xf]  ;;  %v9996_v46 = vor.u32 %v11398_v31, %v9993_v24  ;;  %v10049_v33 = vld [vmem:[#allocation8 + $0x11d8] sm:$0xf0]  ;;  %v9988_v21 = vor.u32 %v11396_v0, %v9985_v52  ;;  %v11394_v4 = vld [vmem:[#allocation8 + $0x1144] sm:$0xf] }
 0x252   : > { %5396 = vmatpush.bf16.msra.mxu1 %v9896_v9  ;;  %v11415_v9 = vld [vmem:[#allocation8 + $0x11e4] sm:$0xf0]  ;;  %v9977_v63 = vld [vmem:[#allocation8 + $0x1148] sm:$0xf0]  ;;  %v10039_v8 = vld [vmem:[#allocation8 + $0x11c0] sm:$0xf] }
 0x253   : > { %5414 = vmatpush.bf16.msra.mxu2 %v9836_v40  ;;  %v3940_v61 = vpop.f32.mrf.mxu2  ;;  %v10064_v40 = vor.u32 %v11417_v23, %v10063_v25  ;;  %v10056_v15 = vor.u32 %v11415_v9, %v10055_v26  ;;  %v11395_v62 = vld [vmem:[#allocation8 + $0x1144] sm:$0xf0]  ;;  %v11408_v23 = vld [vmem:[#allocation8 + $0x11b4] sm:$0xf]  ;;  %v10031_v31 = vld [vmem:[#allocation8 + $0x11b0] sm:$0xf] }
 0x254   : > { %5432 = vmatpush.bf16.msra.mxu3 %v9900_v55  ;;  %v3958_v36 = vpop.f32.mrf.mxu3  ;;  %v3906_v41 = vpop.f32.mrf.mxu0  ;;  %v11414_v55 = vld [vmem:[#allocation8 + $0x11e4] sm:$0xf]  ;;  %v11411_v14 = vld [vmem:[#allocation8 + $0x11c4] sm:$0xf0]  ;;  %v9961_v9 = vld [vmem:[#allocation8 + $0x1128] sm:$0xf0] }
 0x255   : > { %5379 = vmatpush.bf16.msra.mxu0 %v9824_v22  ;;  %v3959_v38 = vadd.f32 %v3958_v36, %v3940_v61  ;;  %v3924_v44 = vpop.f32.mrf.mxu1  ;;  %v10060_v37 = vor.u32 %v11414_v55, %v10057_v49  ;;  %v11413_v22 = vld [vmem:[#allocation8 + $0x11d4] sm:$0xf0]  ;;  %v10033_v61 = vld [vmem:[#allocation8 + $0x11b8] sm:$0xf0]  ;;  %v9976_v36 = vor.u32 %v11395_v62, %v9975_v6  ;;  %v5452_v41 = vld [vmem:[#allocation2 + $0x18] sm:$0xff]  ;;  %v5207_v62 = vpack.c.b16 %v12768_v39, %v12768_v39 }
 0x256   : > { %5397 = vmatpush.bf16.msra.mxu1 %v9888_v10  ;;  %v10052_v10 = vor.u32 %v11412_v3, %v10049_v33  ;;  %v10036_v1 = vor.u32 %v11408_v23, %v10033_v61  ;;  %v11390_v26 = vld [vmem:[#allocation8 + $0x1124] sm:$0xf]  ;;  %v9959_v0 = vld [vmem:[#allocation8 + $0x1120] sm:$0xf]  ;;  %v11391_v52 = vld [vmem:[#allocation8 + $0x1124] sm:$0xf0]  ;;  %v12873_v3 = vunpack.c.l.b16 %v5452_v41 }
 0x257   : > { %5415 = vmatpush.bf16.msra.mxu2 %v9828_v58  ;;  %v12861_v43 = vadd.f32 %v3959_v38, %v12828_v51  ;;  %v5205_v51 = vpack.c.b16 %v12337_v17, %v12442_v30  ;;  %v11397_v58 = vld [vmem:[#allocation8 + $0x1154] sm:$0xf0]  ;;  %v11410_v17 = vld [vmem:[#allocation8 + $0x11c4] sm:$0xf]  ;;  %v10041_v30 = vld [vmem:[#allocation8 + $0x11c8] sm:$0xf0] }
 0x258   : > { %5433 = vmatpush.bf16.msra.mxu3 %v9892_v59  ;;  %v10047_v59 = vld [vmem:[#allocation8 + $0x11d0] sm:$0xf]  ;;  %v9984_v11 = vor.u32 %v11397_v58, %v9983_v56  ;;  %v10044_v25 = vor.u32 %v11410_v17, %v10041_v30  ;;  %v5451_v38 = vld [vmem:[#allocation2 + $0x10] sm:$0xff]  ;;  %v11407_v56 = vld [vmem:[#allocation8 + $0x11a4] sm:$0xf0]  ;;  %v12875_v58 = vunpack.c.h.b16 %v5452_v41 }
 0x259   : > { %5380 = vmatpush.bf16.msra.mxu0 %v9816_v18  ;;  %v10048_v47 = vor.u32 %v11413_v22, %v10047_v59  ;;  %v9967_v18 = vld [vmem:[#allocation8 + $0x1130] sm:$0xf]  ;;  %v10023_v33 = vld [vmem:[#allocation8 + $0x11a0] sm:$0xf]  ;;  %v9953_v22 = vld [vmem:[#allocation8 + $0x1118] sm:$0xf0] }
 0x25a   : > { %5398 = vmatpush.bf16.msra.mxu1 %v9880_v48  ;;  %v11405_v17 = vld [vmem:[#allocation8 + $0x1194] sm:$0xf0]  ;;  %v12890_v23 = vld [vmem:[#allocation8 + $0x1104] sm:$0xf]  ;;  %v9945_v61 = vld [vmem:[#allocation8 + $0x1108] sm:$0xf0] }
 0x25b   : > { %5416 = vmatpush.bf16.msra.mxu2 %v9820_v20  ;;  %v3942_v54 = vpop.f32.mrf.mxu2  ;;  %v9969_v20 = vld [vmem:[#allocation8 + $0x1138] sm:$0xf0] }
 0x25c   : > { %5434 = vmatpush.bf16.msra.mxu3 %v9884_v57  ;;  %v3960_v35 = vpop.f32.mrf.mxu3  ;;  %v4186_v29 = vpop.f32.mrf.mxu0  ;;  %5381 = vmatmul.bf16.vlgmr.msra.gmra.mxu0 %v5205_v51  ;;  %v9980_v57 = vor.u32 %v11394_v4, %v9977_v63  ;;  %v9972_v55 = vor.u32 %v11392_v32, %v9969_v20  ;;  %v5492_v54 = vunpack.c.l.b16 %v5451_v38  ;;  %v9960_v63 = vor.u32 %v11391_v52, %v9959_v0 }
 0x25d   : > { %5698 = vmatpush.bf16.msrb.mxu0 %v10000_v13  ;;  %v4204_v60 = vpop.f32.mrf.mxu1  ;;  %5399 = vmatmul.bf16.vlgmr.msra.gmra.mxu1 %v5206_v19  ;;  %v5454_v35 = vld [vmem:[#allocation2 + $0x28] sm:$0x11]  ;;  %v9948_v0 = vor.u32 %v12890_v23, %v9945_v61 }
 0x25e   : > { %5716 = vmatpush.bf16.msrb.mxu1 %v10064_v40  ;;  %v4205_v42 = vadd.f32 %v4204_v60, %v4186_v29  ;;  %5417 = vmatmul.bf16.vlgmr.msra.gmra.mxu2 %v5205_v51  ;;  %v5493_v51 = vunpack.c.h.b16 %v5451_v38  ;;  %v9964_v29 = vor.u32 %v11390_v26, %v9961_v9  ;;  %v11404_v60 = vld [vmem:[#allocation8 + $0x1194] sm:$0xf]  ;;  %v5498_v30 = vunpack.c.l.b16 %v5454_v35  ;;  %v10129_v26 = vld [vmem:[#allocation8 + $0x1278] sm:$0xf0] }
 0x25f   : > { %5734 = vmatpush.bf16.msrb.mxu2 %v10004_v34  ;;  %5435 = vmatmul.bf16.vlgmr.msra.gmra.mxu3 %v5206_v19  ;;  %v10040_v34 = vor.u32 %v11411_v14, %v10039_v8  ;;  %v5499_v8 = vunpack.c.h.b16 %v5454_v35  ;;  %v11449_v35 = vld [vmem:[#allocation8 + $0x12f4] sm:$0xf0] }
 0x260   : > { %5752 = vmatpush.bf16.msrb.mxu3 %v10068_v5  ;;  %v12868_v16 = vadd.f32 %v4205_v42, %v12841_v7  ;;  %v11393_v5 = vld [vmem:[#allocation8 + $0x1134] sm:$0xf0]  ;;  %v10024_v42 = vor.u32 %v11407_v56, %v10023_v33  ;;  %v12886_v14 = vpack.c.b16 %v12875_v58, %v5493_v51  ;;  %v10191_v56 = vld [vmem:[#allocation8 + $0x12f0] sm:$0xf] }
 0x261   : > { %5699 = vmatpush.bf16.msrb.mxu0 %v9992_v50  ;;  %v11409_v7 = vld [vmem:[#allocation8 + $0x11b4] sm:$0xf0]  ;;  %v9968_v44 = vor.u32 %v11393_v5, %v9967_v18  ;;  %v11402_v18 = vld [vmem:[#allocation8 + $0x1184] sm:$0xf] }
 0x262   : > { %5717 = vmatpush.bf16.msrb.mxu1 %v10056_v15  ;;  %v10032_v12 = vor.u32 %v11409_v7, %v10031_v31  ;;  %v10025_v15 = vld [vmem:[#allocation8 + $0x11a8] sm:$0xf0]  ;;  %v9943_v7 = vld [vmem:[#allocation8 + $0x1100] sm:$0xf]  ;;  %v11433_v33 = vld [vmem:[#allocation8 + $0x1274] sm:$0xf0] }
 0x263   : > { %5735 = vmatpush.bf16.msrb.mxu2 %v9996_v46  ;;  %v4222_v48 = vpop.f32.mrf.mxu2  ;;  %v11406_v46 = vld [vmem:[#allocation8 + $0x11a4] sm:$0xf]  ;;  %v10009_v31 = vld [vmem:[#allocation8 + $0x1188] sm:$0xf0] }
 0x264   : > { %5753 = vmatpush.bf16.msrb.mxu3 %v10060_v37  ;;  %v4240_v24 = vpop.f32.mrf.mxu3  ;;  %v4188_v40 = vpop.f32.mrf.mxu0  ;;  %v10028_v19 = vor.u32 %v11406_v46, %v10025_v15  ;;  %v11448_v46 = vld [vmem:[#allocation8 + $0x12f4] sm:$0xf]  ;;  %v10127_v15 = vld [vmem:[#allocation8 + $0x1270] sm:$0xf]  ;;  %v10012_v52 = vor.u32 %v11402_v18, %v10009_v31 }
 0x265   : > { %5700 = vmatpush.bf16.msrb.mxu0 %v9984_v11  ;;  %v4241_v13 = vadd.f32 %v4240_v24, %v4222_v48  ;;  %v4206_v49 = vpop.f32.mrf.mxu1  ;;  %v11389_v11 = vld [vmem:[#allocation8 + $0x1114] sm:$0xf0]  ;;  %v11387_v24 = vld [vmem:[#allocation8 + $0x1104] sm:$0xf0]  ;;  %v11428_v31 = vld [vmem:[#allocation8 + $0x1254] sm:$0xf] }
 0x266   : > { %5718 = vmatpush.bf16.msrb.mxu1 %v10048_v47  ;;  %v4207_v50 = vadd.f32 %v4206_v49, %v4188_v40  ;;  %v10015_v47 = vld [vmem:[#allocation8 + $0x1190] sm:$0xf]  ;;  %v11403_v40 = vld [vmem:[#allocation8 + $0x1184] sm:$0xf0] }
 0x267   : > { %5736 = vmatpush.bf16.msrb.mxu2 %v9988_v21  ;;  %v12871_v37 = vadd.f32 %v4241_v13, %v12844_v27  ;;  %v11388_v27 = vld [vmem:[#allocation8 + $0x1114] sm:$0xf]  ;;  %v10017_v21 = vld [vmem:[#allocation8 + $0x1198] sm:$0xf0]  ;;  %v10016_v5 = vor.u32 %v11405_v17, %v10015_v47  ;;  %v10007_v13 = vld [vmem:[#allocation8 + $0x1180] sm:$0xf]  ;;  %v10128_v17 = vor.u32 %v11433_v33, %v10127_v15 }
 0x268   : > { %5754 = vmatpush.bf16.msrb.mxu3 %v10052_v10  ;;  %v12878_v59 = vadd.f32 %v4207_v50, %v12847_v28  ;;  %v9951_v10 = vld [vmem:[#allocation8 + $0x1110] sm:$0xf]  ;;  %v12881_v28 = vpack.c.b16 %v12873_v3, %v5492_v54  ;;  %v10193_v50 = vld [vmem:[#allocation8 + $0x12f8] sm:$0xf0]  ;;  %v9944_v54 = vor.u32 %v11387_v24, %v9943_v7  ;;  %v11444_v24 = vld [vmem:[#allocation8 + $0x12d4] sm:$0xf] }
 0x269   : > { %5701 = vmatpush.bf16.msrb.mxu0 %v9976_v36  ;;  %v10020_v36 = vor.u32 %v11404_v60, %v10017_v21  ;;  %v10113_v7 = vld [vmem:[#allocation8 + $0x1258] sm:$0xf0] }
 0x26a   : > { %5719 = vmatpush.bf16.msrb.mxu1 %v10040_v34  ;;  %v9952_v34 = vor.u32 %v11389_v11, %v9951_v10  ;;  %v5507_v49 = vshll.u32 %v12881_v28, 16  ;;  %v10116_v15 = vor.u32 %v11428_v31, %v10113_v7 }
 0x26b   : > { %5737 = vmatpush.bf16.msrb.mxu2 %v9980_v57  ;;  %v4224_v4 = vpop.f32.mrf.mxu2  ;;  %v5208_v57 = vpack.c.b16 %v12779_v53, %v12779_v53 }
 0x26c   : > { %5755 = vmatpush.bf16.msrb.mxu3 %v10044_v25  ;;  %v4242_v6 = vpop.f32.mrf.mxu3  ;;  %v4191_v20 = vpop.f32.mrf.mxu0  ;;  %v9956_v25 = vor.u32 %v11388_v27, %v9953_v22  ;;  %5386 = vmatmul.bf16.gmra.mxu0 %v5207_v62  ;;  %v10008_v27 = vor.u32 %v11403_v40, %v10007_v13  ;;  %v10111_v13 = vld [vmem:[#allocation8 + $0x1250] sm:$0xf] }
 0x26d   : > { %5702 = vmatpush.bf16.msrb.mxu0 %v9968_v44  ;;  %v4243_v32 = vadd.f32 %v4242_v6, %v4224_v4  ;;  %v4209_v48 = vpop.f32.mrf.mxu1  ;;  %v12901_v44 = vpack.c.b16 %v5499_v8, %v12779_v53  ;;  %5404 = vmatmul.bf16.gmra.mxu1 %v5208_v57  ;;  %v10196_v4 = vor.u32 %v11448_v46, %v10193_v50  ;;  %v10185_v6 = vld [vmem:[#allocation8 + $0x12e8] sm:$0xf0] }
 0x26e   : > { %5720 = vmatpush.bf16.msrb.mxu1 %v10032_v12  ;;  %v4210_v41 = vadd.f32 %v4209_v48, %v4191_v20  ;;  %5422 = vmatmul.bf16.gmra.mxu2 %v5207_v62  ;;  %v11432_v12 = vld [vmem:[#allocation8 + $0x1274] sm:$0xf]  ;;  %v10119_v62 = vld [vmem:[#allocation8 + $0x1260] sm:$0xf]  ;;  %v11447_v20 = vld [vmem:[#allocation8 + $0x12e4] sm:$0xf0] }
 0x26f   : > { %5738 = vmatpush.bf16.msrb.mxu2 %v9972_v55  ;;  %v12893_v38 = vadd.f32 %v4243_v32, %v12850_v2  ;;  %v12896_v55 = vpack.c.b16 %v5498_v30, %v12768_v39  ;;  %v5519_v2 = vshll.u32 %v12886_v14, 16  ;;  %5440 = vmatmul.bf16.gmra.mxu3 %v5208_v57  ;;  %v5524_v21 = vshll.u32 %v12901_v44, 16  ;;  %v11431_v32 = vld [vmem:[#allocation8 + $0x1264] sm:$0xf0] }
 0x270   : > { %5756 = vmatpush.bf16.msrb.mxu3 %v10036_v1  ;;  %v5505_v1 = vshrl.u32 %v12881_v28, 16  ;;  %v12905_v9 = vadd.f32 %v4210_v41, %v12855_v45  ;;  %v5509_v45 = vrot.slane %v5507_v49, 1  ;;  %v10132_v10 = vor.u32 %v11432_v12, %v10129_v26  ;;  %v11446_v28 = vld [vmem:[#allocation8 + $0x12e4] sm:$0xf]  ;;  %v10177_v41 = vld [vmem:[#allocation8 + $0x12d8] sm:$0xf0] }
 0x271   : > { %5703 = vmatpush.bf16.msrb.mxu0 %v9960_v63  ;;  %v5512_v22 = vshll.u32 %v12896_v55, 16  ;;  %v5521_v60 = vrot.slane %v5519_v2, 1  ;;  %v11430_v63 = vld [vmem:[#allocation8 + $0x1264] sm:$0xf]  ;;  %v10192_v30 = vor.u32 %v11449_v35, %v10191_v56  ;;  %v10188_v23 = vor.u32 %v11446_v28, %v10185_v6  ;;  %v11429_v49 = vld [vmem:[#allocation8 + $0x1254] sm:$0xf0] }
 0x272   : > { %5721 = vmatpush.bf16.msrb.mxu1 %v10024_v42  ;;  %v10121_v42 = vld [vmem:[#allocation8 + $0x1268] sm:$0xf0]  ;;  %v5510_v61 = vor.u32 %v5509_v45, %v5505_v1  ;;  %v10120_v48 = vor.u32 %v11431_v32, %v10119_v62  ;;  %v10175_v1 = vld [vmem:[#allocation8 + $0x12d0] sm:$0xf]  ;;  %v11445_v2 = vld [vmem:[#allocation8 + $0x12d4] sm:$0xf0]  ;;  %v10112_v56 = vor.u32 %v11429_v49, %v10111_v13 }
 0x273   : > { %5739 = vmatpush.bf16.msrb.mxu2 %v9964_v29  ;;  %v4227_v51 = vpop.f32.mrf.mxu2  ;;  %v5517_v29 = vshrl.u32 %v12886_v14, 16  ;;  %v10183_v14 = vld [vmem:[#allocation8 + $0x12e0] sm:$0xf]  ;;  %v12914_v18 = vrot.slane %v5512_v22, 1  ;;  %v10176_v35 = vor.u32 %v11445_v2, %v10175_v1  ;;  %v11427_v22 = vld [vmem:[#allocation8 + $0x1244] sm:$0xf0] }
 0x274   : > { %5757 = vmatpush.bf16.msrb.mxu3 %v10028_v19  ;;  %v4245_v19 = vpop.f32.mrf.mxu3  ;;  %v4193_v47 = vpop.f32.mrf.mxu0  ;;  %v10103_v45 = vld [vmem:[#allocation8 + $0x1240] sm:$0xf]  ;;  %v10095_v28 = vld [vmem:[#allocation8 + $0x1230] sm:$0xf]  ;;  %v11425_v6 = vld [vmem:[#allocation8 + $0x1234] sm:$0xf0] }
 0x275   : > { %5704 = vmatpush.bf16.msrb.mxu0 %v9952_v34  ;;  %v4246_v11 = vadd.f32 %v4245_v19, %v4227_v51  ;;  %v4211_v8 = vpop.f32.mrf.mxu1  ;;  %v5522_v34 = vor.u32 %v5521_v60, %v5517_v29  ;;  %v5515_v26 = vsel %vm677_vm0, %v5510_v61, %v12914_v18  ;;  %v11442_v51 = vld [vmem:[#allocation8 + $0x12c4] sm:$0xf]  ;;  %v10167_v29 = vld [vmem:[#allocation8 + $0x12c0] sm:$0xf]  ;;  %v11443_v19 = vld [vmem:[#allocation8 + $0x12c4] sm:$0xf0]  ;;  %v10104_v47 = vor.u32 %v11427_v22, %v10103_v45 }
 0x276   : > { %5722 = vmatpush.bf16.msrb.mxu1 %v10016_v5  ;;  %v12916_v5 = vrot.slane %v5524_v21, 1  ;;  %v11441_v8 = vld [vmem:[#allocation8 + $0x12b4] sm:$0xf0]  ;;  %v10087_v13 = vld [vmem:[#allocation8 + $0x1220] sm:$0xf] }
 0x277   : > { %5740 = vmatpush.bf16.msrb.mxu2 %v9956_v25  ;;  %v12912_v57 = vadd.f32 %v4246_v11, %v12861_v43  ;;  %v10124_v25 = vor.u32 %v11430_v63, %v10121_v42  ;;  %v10097_v63 = vld [vmem:[#allocation8 + $0x1238] sm:$0xf0]  ;;  %v11440_v42 = vld [vmem:[#allocation8 + $0x12b4] sm:$0xf]  ;;  %v10151_v49 = vld [vmem:[#allocation8 + $0x12a0] sm:$0xf] }
 0x278   : > { %5758 = vmatpush.bf16.msrb.mxu3 %v10020_v36  ;;  %v10184_v36 = vor.u32 %v11447_v20, %v10183_v14  ;;  %v5527_v50 = vsel %vm677_vm0, %v5522_v34, %v12916_v5  ;;  %v10089_v34 = vld [vmem:[#allocation8 + $0x1228] sm:$0xf0]  ;;  %v11439_v1 = vld [vmem:[#allocation8 + $0x12a4] sm:$0xf0]  ;;  %v11437_v45 = vld [vmem:[#allocation8 + $0x1294] sm:$0xf0] }
 0x279   : > { %5705 = vmatpush.bf16.msrb.mxu0 %v9944_v54  ;;  %v10105_v54 = vld [vmem:[#allocation8 + $0x1248] sm:$0xf0] }
 0x27a   : > { %5723 = vmatpush.bf16.msrb.mxu1 %v10008_v27  ;;  %v10169_v27 = vld [vmem:[#allocation8 + $0x12c8] sm:$0xf0] }
 0x27b   : > { %5741 = vmatpush.bf16.msrb.mxu2 %v9948_v0  ;;  %v4229_v43 = vpop.f32.mrf.mxu2  ;;  %v10180_v0 = vor.u32 %v11444_v24, %v10177_v41  ;;  %v11438_v24 = vld [vmem:[#allocation8 + $0x12a4] sm:$0xf]  ;;  %v10153_v41 = vld [vmem:[#allocation8 + $0x12a8] sm:$0xf0] }
 0x27c   : > { %5759 = vmatpush.bf16.msrb.mxu3 %v10012_v52  ;;  %v4247_v40 = vpop.f32.mrf.mxu3  ;;  %v4501_v12 = vpop.f32.mrf.mxu0  ;;  %v11426_v52 = vld [vmem:[#allocation8 + $0x1244] sm:$0xf]  ;;  %5706 = vmatmul.bf16.vlgmr.msrb.gmra.mxu0 %v5515_v26 }
 0x27d   : > { %5985 = vmatpush.bf16.msra.mxu0 %v10128_v17  ;;  %v4519_v46 = vpop.f32.mrf.mxu1  ;;  %5724 = vmatmul.bf16.vlgmr.msrb.gmra.mxu1 %v5527_v50  ;;  %v10108_v21 = vor.u32 %v11426_v52, %v10105_v54  ;;  %v10168_v17 = vor.u32 %v11443_v19, %v10167_v29  ;;  %v11423_v40 = vld [vmem:[#allocation8 + $0x1224] sm:$0xf0]  ;;  %v10152_v54 = vor.u32 %v11439_v1, %v10151_v49 }
 0x27e   : > { %6003 = vmatpush.bf16.msra.mxu1 %v10192_v30  ;;  %v4520_v33 = vadd.f32 %v4519_v46, %v4501_v12  ;;  %5742 = vmatmul.bf16.vlgmr.msrb.gmra.mxu2 %v5515_v26  ;;  %v10161_v30 = vld [vmem:[#allocation8 + $0x12b8] sm:$0xf0]  ;;  %v5531_v12 = vshrl.u32 %v12901_v44, 16  ;;  %v11420_v46 = vld [vmem:[#allocation8 + $0x1214] sm:$0xf]  ;;  %v10088_v52 = vor.u32 %v11423_v40, %v10087_v13 }
 0x27f   : > { %6021 = vmatpush.bf16.msra.mxu2 %v10132_v10  ;;  %5760 = vmatmul.bf16.vlgmr.msrb.gmra.mxu3 %v5527_v50  ;;  %v10172_v10 = vor.u32 %v11442_v51, %v10169_v27  ;;  %v10164_v61 = vor.u32 %v11440_v42, %v10161_v30  ;;  %v10081_v50 = vld [vmem:[#allocation8 + $0x1218] sm:$0xf0]  ;;  %v10143_v27 = vld [vmem:[#allocation8 + $0x1290] sm:$0xf]  ;;  %v10137_v30 = vld [vmem:[#allocation8 + $0x1288] sm:$0xf0] }
 0x280   : > { %6039 = vmatpush.bf16.msra.mxu3 %v10196_v4  ;;  %v12923_v60 = vadd.f32 %v4520_v33, %v12868_v16  ;;  %v11424_v4 = vld [vmem:[#allocation8 + $0x1234] sm:$0xf]  ;;  %v10159_v16 = vld [vmem:[#allocation8 + $0x12b0] sm:$0xf]  ;;  %v10145_v33 = vld [vmem:[#allocation8 + $0x1298] sm:$0xf0]  ;;  %v5533_v19 = vor.u32 %v5531_v12, %v12916_v5 }
 0x281   : > { %5986 = vmatpush.bf16.msra.mxu0 %v10120_v48  ;;  %v10096_v48 = vor.u32 %v11425_v6, %v10095_v28  ;;  %v10160_v43 = vor.u32 %v11441_v8, %v10159_v16  ;;  %v10144_v6 = vor.u32 %v11437_v45, %v10143_v27  ;;  %v11419_v5 = vld [vmem:[#allocation8 + $0x1204] sm:$0xf0]  ;;  %v10135_v16 = vld [vmem:[#allocation8 + $0x1280] sm:$0xf]  ;;  %v11462_v12 = vld [vmem:[#allocation8 + $0x1364] sm:$0xf] }
 0x282   : > { %6004 = vmatpush.bf16.msra.mxu1 %v10184_v36  ;;  %v11422_v36 = vld [vmem:[#allocation8 + $0x1224] sm:$0xf]  ;;  %v11435_v8 = vld [vmem:[#allocation8 + $0x1284] sm:$0xf0] }
 0x283   : > { %6022 = vmatpush.bf16.msra.mxu2 %v10124_v25  ;;  %v4537_v11 = vpop.f32.mrf.mxu2  ;;  %v5528_v25 = vshrl.u32 %v12896_v55, 16  ;;  %v10092_v26 = vor.u32 %v11422_v36, %v10089_v34  ;;  %v11479_v27 = vld [vmem:[#allocation8 + $0x13e4] sm:$0xf0] }
 0x284   : > { %6040 = vmatpush.bf16.msra.mxu3 %v10188_v23  ;;  %v4555_v62 = vpop.f32.mrf.mxu3  ;;  %v4503_v14 = vpop.f32.mrf.mxu0  ;;  %v10100_v23 = vor.u32 %v11424_v4, %v10097_v63  ;;  %v10084_v63 = vor.u32 %v11420_v46, %v10081_v50 }
 0x285   : > { %5987 = vmatpush.bf16.msra.mxu0 %v10112_v56  ;;  %v4556_v32 = vadd.f32 %v4555_v62, %v4537_v11  ;;  %v4521_v20 = vpop.f32.mrf.mxu1  ;;  %v10079_v56 = vld [vmem:[#allocation8 + $0x1210] sm:$0xf]  ;;  %v10071_v62 = vld [vmem:[#allocation8 + $0x1200] sm:$0xf] }
 0x286   : > { %6005 = vmatpush.bf16.msra.mxu1 %v10176_v35  ;;  %v4522_v7 = vadd.f32 %v4521_v20, %v4503_v14  ;;  %v11421_v35 = vld [vmem:[#allocation8 + $0x1214] sm:$0xf0]  ;;  %v10257_v14 = vld [vmem:[#allocation8 + $0x1378] sm:$0xf0]  ;;  %v10072_v13 = vor.u32 %v11419_v5, %v10071_v62  ;;  %v10303_v62 = vld [vmem:[#allocation8 + $0x13d0] sm:$0xf] }
 0x287   : > { %6023 = vmatpush.bf16.msra.mxu2 %v10116_v15  ;;  %v12927_v31 = vadd.f32 %v4556_v32, %v12871_v37  ;;  %v10156_v37 = vor.u32 %v11438_v24, %v10153_v41  ;;  %v11436_v15 = vld [vmem:[#allocation8 + $0x1294] sm:$0xf]  ;;  %v10080_v11 = vor.u32 %v11421_v35, %v10079_v56  ;;  %v11481_v24 = vld [vmem:[#allocation8 + $0x13f4] sm:$0xf0] }
 0x288   : > { %6041 = vmatpush.bf16.msra.mxu3 %v10180_v0  ;;  %v12930_v2 = vadd.f32 %v4522_v7, %v12878_v59  ;;  %v5530_v59 = vor.u32 %v5528_v25, %v12914_v18  ;;  %v10148_v42 = vor.u32 %v11436_v15, %v10145_v33  ;;  %v11464_v32 = vld [vmem:[#allocation8 + $0x1374] sm:$0xf]  ;;  %v11465_v7 = vld [vmem:[#allocation8 + $0x1374] sm:$0xf0]  ;;  %v10247_v33 = vld [vmem:[#allocation8 + $0x1360] sm:$0xf] }
 0x289   : > { %5988 = vmatpush.bf16.msra.mxu0 %v10104_v47  ;;  %v10073_v47 = vld [vmem:[#allocation8 + $0x1208] sm:$0xf0]  ;;  %v10260_v49 = vor.u32 %v11464_v32, %v10257_v14  ;;  %v11477_v5 = vld [vmem:[#allocation8 + $0x13d4] sm:$0xf0] }
 0x28a   : > { %6006 = vmatpush.bf16.msra.mxu1 %v10168_v17  ;;  %v11434_v17 = vld [vmem:[#allocation8 + $0x1284] sm:$0xf] }
 0x28b   : > { %6024 = vmatpush.bf16.msra.mxu2 %v10108_v21  ;;  %v4539_v0 = vpop.f32.mrf.mxu2  ;;  %v11418_v21 = vld [vmem:[#allocation8 + $0x1204] sm:$0xf]  ;;  %v10140_v36 = vor.u32 %v11434_v17, %v10137_v30  ;;  %v11476_v17 = vld [vmem:[#allocation8 + $0x13d4] sm:$0xf]  ;;  %v10305_v30 = vld [vmem:[#allocation8 + $0x13d8] sm:$0xf0] }
 0x28c   : > { %6042 = vmatpush.bf16.msra.mxu3 %v10172_v10  ;;  %v4557_v51 = vpop.f32.mrf.mxu3  ;;  %v4506_v29 = vpop.f32.mrf.mxu0  ;;  %v5776_v10 = vld [vmem:[#allocation2 + $0x10] sm:$0xee]  ;;  %5711 = vmatmul.bf16.gmra.mxu0 %v5530_v59 }
 0x28d   : > { %5989 = vmatpush.bf16.msra.mxu0 %v10096_v48  ;;  %v4558_v22 = vadd.f32 %v4557_v51, %v4539_v0  ;;  %v4524_v4 = vpop.f32.mrf.mxu1  ;;  %5729 = vmatmul.bf16.gmra.mxu1 %v5533_v19  ;;  %v5811_v25 = vunpack.c.l.b16 %v5776_v10  ;;  %v10076_v48 = vor.u32 %v11418_v21, %v10073_v47  ;;  %v5812_v34 = vunpack.c.h.b16 %v5776_v10  ;;  %v11463_v51 = vld [vmem:[#allocation8 + $0x1364] sm:$0xf0] }
 0x28e   : > { %6007 = vmatpush.bf16.msra.mxu1 %v10160_v43  ;;  %v4525_v18 = vadd.f32 %v4524_v4, %v4506_v29  ;;  %5747 = vmatmul.bf16.gmra.mxu2 %v5530_v59  ;;  %v10319_v43 = vld [vmem:[#allocation8 + $0x13f0] sm:$0xf]  ;;  %v10311_v59 = vld [vmem:[#allocation8 + $0x13e0] sm:$0xf]  ;;  %v12952_v21 = vrot.slane %v12896_v55, 1  ;;  %v10248_v10 = vor.u32 %v11463_v51, %v10247_v33 }
 0x28f   : > { %6025 = vmatpush.bf16.msra.mxu2 %v10100_v23  ;;  %v12936_v28 = vadd.f32 %v4558_v22, %v12893_v38  ;;  %5765 = vmatmul.bf16.gmra.mxu3 %v5533_v19  ;;  %v11480_v38 = vld [vmem:[#allocation8 + $0x13f4] sm:$0xf]  ;;  %v10321_v23 = vld [vmem:[#allocation8 + $0x13f8] sm:$0xf0]  ;;  %v12942_v50 = vpack.c.b16 %v12873_v3, %v5811_v25  ;;  %v10320_v0 = vor.u32 %v11481_v24, %v10319_v43  ;;  %v11461_v55 = vld [vmem:[#allocation8 + $0x1354] sm:$0xf0] }
 0x290   : > { %6043 = vmatpush.bf16.msra.mxu3 %v10164_v61  ;;  %v12939_v20 = vadd.f32 %v4525_v18, %v12905_v9  ;;  %v10255_v61 = vld [vmem:[#allocation8 + $0x1370] sm:$0xf]  ;;  %v10136_v9 = vor.u32 %v11435_v8, %v10135_v16  ;;  %v10324_v1 = vor.u32 %v11480_v38, %v10321_v23  ;;  %v12945_v35 = vpack.c.b16 %v12875_v58, %v5812_v34  ;;  %v11458_v38 = vld [vmem:[#allocation8 + $0x1344] sm:$0xf]  ;;  %v10233_v23 = vld [vmem:[#allocation8 + $0x1348] sm:$0xf0] }
 0x291   : > { %5990 = vmatpush.bf16.msra.mxu0 %v10088_v52  ;;  %v10256_v15 = vor.u32 %v11465_v7, %v10255_v61  ;;  %v11478_v52 = vld [vmem:[#allocation8 + $0x13e4] sm:$0xf]  ;;  %v5815_v19 = vrot.slane %v12942_v50, 1  ;;  %v10312_v4 = vor.u32 %v11479_v27, %v10311_v59  ;;  %v10239_v18 = vld [vmem:[#allocation8 + $0x1350] sm:$0xf]  ;;  %v10308_v25 = vor.u32 %v11476_v17, %v10305_v30 }
 0x292   : > { %6008 = vmatpush.bf16.msra.mxu1 %v10152_v54  ;;  %v10313_v54 = vld [vmem:[#allocation8 + $0x13e8] sm:$0xf0]  ;;  %v11474_v34 = vld [vmem:[#allocation8 + $0x13c4] sm:$0xf]  ;;  %v10231_v43 = vld [vmem:[#allocation8 + $0x1340] sm:$0xf] }
 0x293   : > { %6026 = vmatpush.bf16.msra.mxu2 %v10092_v26  ;;  %v4542_v41 = vpop.f32.mrf.mxu2  ;;  %v10249_v26 = vld [vmem:[#allocation8 + $0x1368] sm:$0xf0]  ;;  %v10316_v29 = vor.u32 %v11478_v52, %v10313_v54  ;;  %v5817_v8 = vsel %vm989_vm1, %v5815_v19, %v12952_v21  ;;  %v11459_v24 = vld [vmem:[#allocation8 + $0x1344] sm:$0xf0]  ;;  %v10223_v52 = vld [vmem:[#allocation8 + $0x1330] sm:$0xf] }
 0x294   : > { %6044 = vmatpush.bf16.msra.mxu3 %v10156_v37  ;;  %v4560_v40 = vpop.f32.mrf.mxu3  ;;  %v4508_v46 = vpop.f32.mrf.mxu0  ;;  %v10252_v22 = vor.u32 %v11462_v12, %v10249_v26  ;;  %v10297_v7 = vld [vmem:[#allocation8 + $0x13c8] sm:$0xf0]  ;;  %v10225_v12 = vld [vmem:[#allocation8 + $0x1338] sm:$0xf0]  ;;  %v11472_v26 = vld [vmem:[#allocation8 + $0x13b4] sm:$0xf] }
 0x295   : > { %5991 = vmatpush.bf16.msra.mxu0 %v10080_v11  ;;  %v4561_v37 = vadd.f32 %v4560_v40, %v4542_v41  ;;  %v4526_v56 = vpop.f32.mrf.mxu1  ;;  %v10241_v11 = vld [vmem:[#allocation8 + $0x1358] sm:$0xf0]  ;;  %v10295_v41 = vld [vmem:[#allocation8 + $0x13c0] sm:$0xf]  ;;  %v11456_v40 = vld [vmem:[#allocation8 + $0x1334] sm:$0xf] }
 0x296   : > { %6009 = vmatpush.bf16.msra.mxu1 %v10144_v6  ;;  %v11457_v54 = vld [vmem:[#allocation8 + $0x1334] sm:$0xf0]  ;;  %v10287_v56 = vld [vmem:[#allocation8 + $0x13b0] sm:$0xf] }
 0x297   : > { %6027 = vmatpush.bf16.msra.mxu2 %v10084_v63  ;;  %v12948_v45 = vadd.f32 %v4561_v37, %v12912_v57  ;;  %v5818_v63 = vrot.slane %v12945_v35, 1  ;;  %v12956_v57 = vrot.slane %v12901_v44, 1  ;;  %v10289_v37 = vld [vmem:[#allocation8 + $0x13b8] sm:$0xf0]  ;;  %v11473_v51 = vld [vmem:[#allocation8 + $0x13b4] sm:$0xf0] }
 0x298   : > { %6045 = vmatpush.bf16.msra.mxu3 %v10148_v42  ;;  %v11460_v42 = vld [vmem:[#allocation8 + $0x1354] sm:$0xf]  ;;  %v6063_v33 = vld [vmem:[#allocation2 + $0x28] sm:$0x33] }
 0x299   : > { %5992 = vmatpush.bf16.msra.mxu0 %v10072_v13  ;;  %v5820_v32 = vsel %vm989_vm1, %v5818_v63, %v12956_v57  ;;  %v10244_v14 = vor.u32 %v11460_v42, %v10241_v11  ;;  %v11475_v13 = vld [vmem:[#allocation8 + $0x13c4] sm:$0xf0]  ;;  %v10224_v63 = vor.u32 %v11457_v54, %v10223_v52  ;;  %v11470_v42 = vld [vmem:[#allocation8 + $0x13a4] sm:$0xf]  ;;  %v10281_v11 = vld [vmem:[#allocation8 + $0x13a8] sm:$0xf0]  ;;  %v6098_v17 = vunpack.c.l.b16 %v6063_v33 }
 0x29a   : > { %6010 = vmatpush.bf16.msra.mxu1 %v10136_v9  ;;  %v10265_v52 = vld [vmem:[#allocation8 + $0x1388] sm:$0xf0]  ;;  %v13000_v54 = vld [vmem:[#allocation8 + $0x1300] sm:$0xf] }
 0x29b   : > { %6028 = vmatpush.bf16.msra.mxu2 %v10076_v48  ;;  %v4544_v47 = vpop.f32.mrf.mxu2  ;;  %v10240_v48 = vor.u32 %v11461_v55, %v10239_v18  ;;  %v11455_v55 = vld [vmem:[#allocation8 + $0x1324] sm:$0xf0] }
 0x29c   : > { %6046 = vmatpush.bf16.msra.mxu3 %v10140_v36  ;;  %v4562_v6 = vpop.f32.mrf.mxu3  ;;  %v4788_v16 = vpop.f32.mrf.mxu0  ;;  %v10304_v36 = vor.u32 %v11477_v5, %v10303_v62  ;;  %5993 = vmatmul.bf16.vlgmr.msra.gmra.mxu0 %v5817_v8  ;;  %v10215_v47 = vld [vmem:[#allocation8 + $0x1320] sm:$0xf]  ;;  %v11471_v5 = vld [vmem:[#allocation8 + $0x13a4] sm:$0xf0] }
 0x29d   : > { %6300 = vmatpush.bf16.msrb.mxu0 %v10256_v15  ;;  %v4806_v44 = vpop.f32.mrf.mxu1  ;;  %6011 = vmatmul.bf16.vlgmr.msra.gmra.mxu1 %v5820_v32  ;;  %v10232_v15 = vor.u32 %v11459_v24, %v10231_v43  ;;  %v10288_v6 = vor.u32 %v11473_v51, %v10287_v56  ;;  %v10279_v62 = vld [vmem:[#allocation8 + $0x13a0] sm:$0xf]  ;;  %v6106_v43 = vshll.u32 %v12942_v50, 16  ;;  %v10216_v24 = vor.u32 %v11455_v55, %v10215_v47  ;;  %v11496_v47 = vld [vmem:[#allocation8 + $0x1474] sm:$0xf] }
 0x29e   : > { %6318 = vmatpush.bf16.msrb.mxu1 %v10320_v0  ;;  %v4807_v61 = vadd.f32 %v4806_v44, %v4788_v16  ;;  %6029 = vmatmul.bf16.vlgmr.msra.gmra.mxu2 %v5817_v8  ;;  %v10296_v0 = vor.u32 %v11475_v13, %v10295_v41  ;;  %v12968_v16 = vld [vmem:[#allocation8 + $0x1314] sm:$0xf]  ;;  %v12970_v8 = vld [vmem:[#allocation8 + $0x1318] sm:$0xf0]  ;;  %v10280_v41 = vor.u32 %v11471_v5, %v10279_v62  ;;  %v10383_v55 = vld [vmem:[#allocation8 + $0x1470] sm:$0xf] }
 0x29f   : > { %6336 = vmatpush.bf16.msrb.mxu2 %v10260_v49  ;;  %6047 = vmatmul.bf16.vlgmr.msra.gmra.mxu3 %v5820_v32  ;;  %v10236_v49 = vor.u32 %v11458_v38, %v10233_v23  ;;  %v12972_v44 = vld [vmem:[#allocation8 + $0x1394] sm:$0xf]  ;;  %v6099_v32 = vunpack.c.h.b16 %v6063_v33  ;;  %v12977_v38 = vld [vmem:[#allocation8 + $0x1310] sm:$0xf]  ;;  %v12979_v23 = vld [vmem:[#allocation8 + $0x1314] sm:$0xf0] }
 0x2a0   : > { %6354 = vmatpush.bf16.msrb.mxu3 %v10324_v1  ;;  %v12963_v9 = vadd.f32 %v4807_v61, %v12923_v60  ;;  %v10300_v1 = vor.u32 %v11474_v34, %v10297_v7  ;;  %v10284_v61 = vor.u32 %v11470_v42, %v10281_v11  ;;  %v12982_v34 = vpack.c.b16 %v6098_v17, %v12768_v39 }
 0x2a1   : > { %6301 = vmatpush.bf16.msrb.mxu0 %v10248_v10  ;;  %v10228_v10 = vor.u32 %v11456_v40, %v10225_v12  ;;  %v6103_v7 = vshrl.u32 %v12942_v50, 16  ;;  %v10212_v40 = vor.u32 %v12968_v16, %v12970_v8  ;;  %v12993_v12 = vpack.c.b16 %v6099_v32, %v12779_v53  ;;  %v11497_v16 = vld [vmem:[#allocation8 + $0x1474] sm:$0xf0] }
 0x2a2   : > { %6319 = vmatpush.bf16.msrb.mxu1 %v10312_v4  ;;  %v10292_v4 = vor.u32 %v11472_v26, %v10289_v37  ;;  %v13004_v51 = vrot.slane %v6106_v43, 2  ;;  %v11513_v8 = vld [vmem:[#allocation8 + $0x14f4] sm:$0xf0]  ;;  %v10377_v43 = vld [vmem:[#allocation8 + $0x1468] sm:$0xf0] }
 0x2a3   : > { %6337 = vmatpush.bf16.msrb.mxu2 %v10252_v22  ;;  %v4824_v46 = vpop.f32.mrf.mxu2  ;;  %v11454_v22 = vld [vmem:[#allocation8 + $0x1324] sm:$0xf]  ;;  %v13002_v56 = vrot.slane %v6103_v7, 1  ;;  %v6128_v42 = vshrl.u32 %v12993_v12, 16  ;;  %v6131_v11 = vshll.u32 %v12993_v12, 16 }
 0x2a4   : > { %6355 = vmatpush.bf16.msrb.mxu3 %v10316_v29  ;;  %v4842_v60 = vpop.f32.mrf.mxu3  ;;  %v4790_v27 = vpop.f32.mrf.mxu0  ;;  %v10217_v29 = vld [vmem:[#allocation8 + $0x1328] sm:$0xf0]  ;;  %v11494_v7 = vld [vmem:[#allocation8 + $0x1464] sm:$0xf] }
 0x2a5   : > { %6302 = vmatpush.bf16.msrb.mxu0 %v10240_v48  ;;  %v4843_v59 = vadd.f32 %v4842_v60, %v4824_v46  ;;  %v4808_v19 = vpop.f32.mrf.mxu1  ;;  %v10271_v48 = vld [vmem:[#allocation8 + $0x1390] sm:$0xf]  ;;  %v10208_v46 = vor.u32 %v12979_v23, %v12977_v38  ;;  %v11451_v60 = vld [vmem:[#allocation8 + $0x1304] sm:$0xf0]  ;;  %v6130_v23 = vrot.slane %v6128_v42, 1 }
 0x2a6   : > { %6320 = vmatpush.bf16.msrb.mxu1 %v10304_v36  ;;  %v4809_v18 = vadd.f32 %v4808_v19, %v4790_v27  ;;  %v11469_v36 = vld [vmem:[#allocation8 + $0x1394] sm:$0xf0]  ;;  %v6114_v27 = vshll.u32 %v12982_v34, 16  ;;  %v10263_v19 = vld [vmem:[#allocation8 + $0x1380] sm:$0xf]  ;;  %v10200_v62 = vor.u32 %v11451_v60, %v13000_v54 }
 0x2a7   : > { %6338 = vmatpush.bf16.msrb.mxu2 %v10244_v14  ;;  %v12966_v30 = vadd.f32 %v4843_v59, %v12927_v31  ;;  %v10273_v31 = vld [vmem:[#allocation8 + $0x1398] sm:$0xf0]  ;;  %v6111_v59 = vshrl.u32 %v12982_v34, 16  ;;  %v10367_v42 = vld [vmem:[#allocation8 + $0x1450] sm:$0xf] }
 0x2a8   : > { %6356 = vmatpush.bf16.msrb.mxu3 %v10308_v25  ;;  %v12975_v14 = vadd.f32 %v4809_v18, %v12930_v2  ;;  %v10220_v25 = vor.u32 %v11454_v22, %v10217_v29  ;;  %v10276_v50 = vor.u32 %v12972_v44, %v10273_v31  ;;  %v11512_v18 = vld [vmem:[#allocation8 + $0x14f4] sm:$0xf]  ;;  %v6116_v32 = vrot.slane %v6114_v27, 2 }
 0x2a9   : > { %6303 = vmatpush.bf16.msrb.mxu0 %v10232_v15  ;;  %v10272_v15 = vor.u32 %v11469_v36, %v10271_v48 }
 0x2aa   : > { %6321 = vmatpush.bf16.msrb.mxu1 %v10296_v0  ;;  %v12998_v0 = vld [vmem:[#allocation8 + $0x1384] sm:$0xf] }
 0x2ab   : > { %6339 = vmatpush.bf16.msrb.mxu2 %v10236_v49  ;;  %v4826_v2 = vpop.f32.mrf.mxu2  ;;  %v12988_v49 = vld [vmem:[#allocation8 + $0x1304] sm:$0xf] }
 0x2ac   : > { %6357 = vmatpush.bf16.msrb.mxu3 %v10300_v1  ;;  %v4844_v13 = vpop.f32.mrf.mxu3  ;;  %v12990_v1 = vld [vmem:[#allocation8 + $0x1308] sm:$0xf0]  ;;  %v4793_v37 = vpop.f32.mrf.mxu0  ;;  %5998 = vmatmul.bf16.gmra.mxu0 %v12952_v21 }
 0x2ad   : > { %6304 = vmatpush.bf16.msrb.mxu0 %v10224_v63  ;;  %v4845_v26 = vadd.f32 %v4844_v13, %v4826_v2  ;;  %v4811_v33 = vpop.f32.mrf.mxu1  ;;  %v6123_v63 = vshll.u32 %v12945_v35, 16  ;;  %6016 = vmatmul.bf16.gmra.mxu1 %v12956_v57 }
 0x2ae   : > { %6322 = vmatpush.bf16.msrb.mxu1 %v10288_v6  ;;  %v4812_v29 = vadd.f32 %v4811_v33, %v4793_v37  ;;  %6034 = vmatmul.bf16.gmra.mxu2 %v12952_v21  ;;  %v10449_v6 = vld [vmem:[#allocation8 + $0x14f8] sm:$0xf0]  ;;  %v10268_v21 = vor.u32 %v12998_v0, %v10265_v52  ;;  %v11495_v37 = vld [vmem:[#allocation8 + $0x1464] sm:$0xf0]  ;;  %v6109_v0 = vor.u32 %v13004_v51, %v13002_v56  ;;  %v11493_v51 = vld [vmem:[#allocation8 + $0x1454] sm:$0xf0] }
 0x2af   : > { %6340 = vmatpush.bf16.msrb.mxu2 %v10228_v10  ;;  %v13009_v22 = vadd.f32 %v4845_v26, %v12936_v28  ;;  %v11467_v10 = vld [vmem:[#allocation8 + $0x1384] sm:$0xf0]  ;;  %v10385_v28 = vld [vmem:[#allocation8 + $0x1478] sm:$0xf0]  ;;  %6052 = vmatmul.bf16.gmra.mxu3 %v12956_v57  ;;  %v6113_v57 = vrot.slane %v6111_v59, 1  ;;  %v6125_v31 = vrot.slane %v6123_v63, 2  ;;  %v10452_v36 = vor.u32 %v11512_v18, %v10449_v6 }
 0x2b0   : > { %6358 = vmatpush.bf16.msrb.mxu3 %v10292_v4  ;;  %v6120_v4 = vshrl.u32 %v12945_v35, 16  ;;  %v13018_v17 = vadd.f32 %v4812_v29, %v12939_v20  ;;  %v10204_v35 = vor.u32 %v12988_v49, %v12990_v1  ;;  %v10264_v5 = vor.u32 %v11467_v10, %v10263_v19  ;;  %v10447_v20 = vld [vmem:[#allocation8 + $0x14f0] sm:$0xf]  ;;  %v10441_v49 = vld [vmem:[#allocation8 + $0x14e8] sm:$0xf0] }
 0x2b1   : > { %6305 = vmatpush.bf16.msrb.mxu0 %v10216_v24  ;;  %v10388_v48 = vor.u32 %v11496_v47, %v10385_v28  ;;  %v10448_v13 = vor.u32 %v11513_v8, %v10447_v20  ;;  %v10375_v1 = vld [vmem:[#allocation8 + $0x1460] sm:$0xf]  ;;  %v10380_v52 = vor.u32 %v11494_v7, %v10377_v43  ;;  %v13031_v33 = vor.u32 %v6116_v32, %v6113_v57  ;;  %v10369_v19 = vld [vmem:[#allocation8 + $0x1458] sm:$0xf0]  ;;  %v11509_v47 = vld [vmem:[#allocation8 + $0x14d4] sm:$0xf0] }
 0x2b2   : > { %6323 = vmatpush.bf16.msrb.mxu1 %v10280_v41  ;;  %v10384_v41 = vor.u32 %v11497_v16, %v10383_v55  ;;  %v10376_v60 = vor.u32 %v11495_v37, %v10375_v1  ;;  %v10433_v63 = vld [vmem:[#allocation8 + $0x14d8] sm:$0xf0]  ;;  %v10368_v20 = vor.u32 %v11493_v51, %v10367_v42  ;;  %v10425_v57 = vld [vmem:[#allocation8 + $0x14c8] sm:$0xf0]  ;;  %v10359_v32 = vld [vmem:[#allocation8 + $0x1440] sm:$0xf] }
 0x2b3   : > { %6341 = vmatpush.bf16.msrb.mxu2 %v10220_v25  ;;  %v4829_v44 = vpop.f32.mrf.mxu2  ;;  %v6122_v25 = vrot.slane %v6120_v4, 1  ;;  %v11508_v4 = vld [vmem:[#allocation8 + $0x14d4] sm:$0xf]  ;;  %v10353_v7 = vld [vmem:[#allocation8 + $0x1438] sm:$0xf0] }
 0x2b4   : > { %6359 = vmatpush.bf16.msrb.mxu3 %v10284_v61  ;;  %v4847_v38 = vpop.f32.mrf.mxu3  ;;  %v6133_v61 = vrot.slane %v6131_v11, 2  ;;  %v4795_v24 = vpop.f32.mrf.mxu0  ;;  %v10431_v11 = vld [vmem:[#allocation8 + $0x14d0] sm:$0xf]  ;;  %v11504_v43 = vld [vmem:[#allocation8 + $0x14b4] sm:$0xf] }
 0x2b5   : > { %6306 = vmatpush.bf16.msrb.mxu0 %v10208_v46  ;;  %v4848_v2 = vadd.f32 %v4847_v38, %v4829_v44  ;;  %v4813_v26 = vpop.f32.mrf.mxu1  ;;  %v11511_v46 = vld [vmem:[#allocation8 + $0x14e4] sm:$0xf0]  ;;  %v6126_v27 = vor.u32 %v6125_v31, %v6122_v25  ;;  %v10432_v8 = vor.u32 %v11509_v47, %v10431_v11  ;;  %v11506_v44 = vld [vmem:[#allocation8 + $0x14c4] sm:$0xf]  ;;  %v10423_v31 = vld [vmem:[#allocation8 + $0x14c0] sm:$0xf] }
 0x2b6   : > { %6324 = vmatpush.bf16.msrb.mxu1 %v10272_v15  ;;  %v13033_v29 = vor.u32 %v6133_v61, %v6130_v23  ;;  %v11491_v25 = vld [vmem:[#allocation8 + $0x1444] sm:$0xf0]  ;;  %v11505_v26 = vld [vmem:[#allocation8 + $0x14b4] sm:$0xf0] }
 0x2b7   : > { %6342 = vmatpush.bf16.msrb.mxu2 %v10212_v40  ;;  %v11510_v40 = vld [vmem:[#allocation8 + $0x14e4] sm:$0xf]  ;;  %v13027_v15 = vadd.f32 %v4848_v2, %v12948_v45  ;;  %v11492_v45 = vld [vmem:[#allocation8 + $0x1454] sm:$0xf]  ;;  %v11507_v38 = vld [vmem:[#allocation8 + $0x14c4] sm:$0xf0]  ;;  %v10360_v24 = vor.u32 %v11491_v25, %v10359_v32 }
 0x2b8   : > { %6360 = vmatpush.bf16.msrb.mxu3 %v10276_v50  ;;  %v10439_v50 = vld [vmem:[#allocation8 + $0x14e0] sm:$0xf]  ;;  %v10444_v54 = vor.u32 %v11510_v40, %v10441_v49  ;;  %v6135_v6 = vsel %vm1277_vm2, %v6126_v27, %v13033_v29  ;;  %v10372_v55 = vor.u32 %v11492_v45, %v10369_v19  ;;  %v10351_v40 = vld [vmem:[#allocation8 + $0x1430] sm:$0xf]  ;;  %v11489_v49 = vld [vmem:[#allocation8 + $0x1434] sm:$0xf0] }
 0x2b9   : > { %6307 = vmatpush.bf16.msrb.mxu0 %v10200_v62  ;;  %v10440_v59 = vor.u32 %v11511_v46, %v10439_v50  ;;  %v11490_v62 = vld [vmem:[#allocation8 + $0x1444] sm:$0xf]  ;;  %v11487_v42 = vld [vmem:[#allocation8 + $0x1424] sm:$0xf0] }
 0x2ba   : > { %6325 = vmatpush.bf16.msrb.mxu1 %v10264_v5  ;;  %v10361_v5 = vld [vmem:[#allocation8 + $0x1448] sm:$0xf0]  ;;  %v11503_v51 = vld [vmem:[#allocation8 + $0x14a4] sm:$0xf0]  ;;  %v11482_v32 = vld [vmem:[#allocation8 + $0x1404] sm:$0xf] }
 0x2bb   : > { %6343 = vmatpush.bf16.msrb.mxu2 %v10204_v35  ;;  %v4831_v10 = vpop.f32.mrf.mxu2  ;;  %v6118_v35 = vsel %vm1277_vm2, %v6109_v0, %v13031_v33  ;;  %v10364_v61 = vor.u32 %v11490_v62, %v10361_v5  ;;  %v10401_v62 = vld [vmem:[#allocation8 + $0x1498] sm:$0xf0]  ;;  %v10335_v5 = vld [vmem:[#allocation8 + $0x1410] sm:$0xf]  ;;  %v6378_v25 = vld [vmem:[#allocation2 + $0x10] sm:$0xcc] }
 0x2bc   : > { %6361 = vmatpush.bf16.msrb.mxu3 %v10268_v21  ;;  %v4849_v56 = vpop.f32.mrf.mxu3  ;;  %v5103_v28 = vpop.f32.mrf.mxu0  ;;  %v10436_v21 = vor.u32 %v11508_v4, %v10433_v63  ;;  %6308 = vmatmul.bf16.vlgmr.msrb.gmra.mxu0 %v6118_v35  ;;  %v11502_v10 = vld [vmem:[#allocation8 + $0x14a4] sm:$0xf]  ;;  %v10409_v4 = vld [vmem:[#allocation8 + $0x14a8] sm:$0xf0]  ;;  %v10343_v63 = vld [vmem:[#allocation8 + $0x1420] sm:$0xf] }
 0x2bd   : > { %6587 = vmatpush.bf16.msra.mxu0 %v10384_v41  ;;  %v5121_v18 = vpop.f32.mrf.mxu1  ;;  %6326 = vmatmul.bf16.vlgmr.msrb.gmra.mxu1 %v6135_v6  ;;  %v10424_v41 = vor.u32 %v11507_v38, %v10423_v31  ;;  %v10407_v56 = vld [vmem:[#allocation8 + $0x14a0] sm:$0xf] }
 0x2be   : > { %6605 = vmatpush.bf16.msra.mxu1 %v10448_v13  ;;  %v5122_v16 = vadd.f32 %v5121_v18, %v5103_v28  ;;  %6344 = vmatmul.bf16.vlgmr.msrb.gmra.mxu2 %v6118_v35  ;;  %v10417_v13 = vld [vmem:[#allocation8 + $0x14b8] sm:$0xf0]  ;;  %v10412_v28 = vor.u32 %v11502_v10, %v10409_v4  ;;  %v11484_v35 = vld [vmem:[#allocation8 + $0x1414] sm:$0xf] }
 0x2bf   : > { %6623 = vmatpush.bf16.msra.mxu2 %v10388_v48  ;;  %6362 = vmatmul.bf16.vlgmr.msrb.gmra.mxu3 %v6135_v6  ;;  %v10428_v48 = vor.u32 %v11506_v44, %v10425_v57  ;;  %v11500_v18 = vld [vmem:[#allocation8 + $0x1494] sm:$0xf]  ;;  %v11501_v44 = vld [vmem:[#allocation8 + $0x1494] sm:$0xf0] }
 0x2c0   : > { %6641 = vmatpush.bf16.msra.mxu3 %v10452_v36  ;;  %v13040_v23 = vadd.f32 %v5122_v16, %v12963_v9  ;;  %v11488_v36 = vld [vmem:[#allocation8 + $0x1434] sm:$0xf]  ;;  %v10415_v9 = vld [vmem:[#allocation8 + $0x14b0] sm:$0xf]  ;;  %v11485_v16 = vld [vmem:[#allocation8 + $0x1414] sm:$0xf0] }
 0x2c1   : > { %6588 = vmatpush.bf16.msra.mxu0 %v10376_v60  ;;  %v10356_v0 = vor.u32 %v11488_v36, %v10353_v7  ;;  %v11486_v60 = vld [vmem:[#allocation8 + $0x1424] sm:$0xf]  ;;  %v10416_v19 = vor.u32 %v11505_v26, %v10415_v9  ;;  %v10329_v36 = vld [vmem:[#allocation8 + $0x1408] sm:$0xf0]  ;;  %v11528_v9 = vld [vmem:[#allocation8 + $0x1574] sm:$0xf] }
 0x2c2   : > { %6606 = vmatpush.bf16.msra.mxu1 %v10440_v59  ;;  %v10345_v59 = vld [vmem:[#allocation8 + $0x1428] sm:$0xf0]  ;;  %v11498_v7 = vld [vmem:[#allocation8 + $0x1484] sm:$0xf]  ;;  %v10513_v26 = vld [vmem:[#allocation8 + $0x1578] sm:$0xf0] }
 0x2c3   : > { %6624 = vmatpush.bf16.msra.mxu2 %v10380_v52  ;;  %v5139_v2 = vpop.f32.mrf.mxu2  ;;  %v10420_v52 = vor.u32 %v11504_v43, %v10417_v13  ;;  %v10348_v47 = vor.u32 %v11486_v60, %v10345_v59  ;;  %v10393_v43 = vld [vmem:[#allocation8 + $0x1488] sm:$0xf0]  ;;  %v10327_v13 = vld [vmem:[#allocation8 + $0x1400] sm:$0xf]  ;;  %v6414_v60 = vunpack.c.h.b16 %v6378_v25  ;;  %v10575_v59 = vld [vmem:[#allocation8 + $0x15f0] sm:$0xf] }
 0x2c4   : > { %6642 = vmatpush.bf16.msra.mxu3 %v10444_v54  ;;  %v5157_v1 = vpop.f32.mrf.mxu3  ;;  %v5105_v50 = vpop.f32.mrf.mxu0  ;;  %v10352_v54 = vor.u32 %v11489_v49, %v10351_v40  ;;  %v11483_v40 = vld [vmem:[#allocation8 + $0x1404] sm:$0xf0]  ;;  %v10391_v49 = vld [vmem:[#allocation8 + $0x1480] sm:$0xf] }
 0x2c5   : > { %6589 = vmatpush.bf16.msra.mxu0 %v10368_v20  ;;  %v5158_v37 = vadd.f32 %v5157_v1, %v5139_v2  ;;  %v5123_v46 = vpop.f32.mrf.mxu1  ;;  %v11499_v1 = vld [vmem:[#allocation8 + $0x1484] sm:$0xf0] }
 0x2c6   : > { %6607 = vmatpush.bf16.msra.mxu1 %v10432_v8  ;;  %v5124_v45 = vadd.f32 %v5123_v46, %v5105_v50  ;;  %v10399_v8 = vld [vmem:[#allocation8 + $0x1490] sm:$0xf]  ;;  %v11544_v50 = vld [vmem:[#allocation8 + $0x15f4] sm:$0xf]  ;;  %v10577_v46 = vld [vmem:[#allocation8 + $0x15f8] sm:$0xf0]  ;;  %v10392_v10 = vor.u32 %v11499_v1, %v10391_v49 }
 0x2c7   : > { %6625 = vmatpush.bf16.msra.mxu2 %v10372_v55  ;;  %v13043_v27 = vadd.f32 %v5158_v37, %v12966_v30  ;;  %v10337_v30 = vld [vmem:[#allocation8 + $0x1418] sm:$0xf0]  ;;  %v10344_v55 = vor.u32 %v11487_v42, %v10343_v63  ;;  %v10516_v63 = vor.u32 %v11528_v9, %v10513_v26  ;;  %v11526_v42 = vld [vmem:[#allocation8 + $0x1564] sm:$0xf] }
 0x2c8   : > { %6643 = vmatpush.bf16.msra.mxu3 %v10436_v21  ;;  %v13046_v11 = vadd.f32 %v5124_v45, %v12975_v14  ;;  %v10408_v21 = vor.u32 %v11503_v51, %v10407_v56  ;;  %v10340_v38 = vor.u32 %v11484_v35, %v10337_v30  ;;  %v11545_v45 = vld [vmem:[#allocation8 + $0x15f4] sm:$0xf0]  ;;  %v10505_v56 = vld [vmem:[#allocation8 + $0x1568] sm:$0xf0] }
 0x2c9   : > { %6590 = vmatpush.bf16.msra.mxu0 %v10360_v24  ;;  %v10576_v30 = vor.u32 %v11545_v45, %v10575_v59  ;;  %v10487_v59 = vld [vmem:[#allocation8 + $0x1540] sm:$0xf]  ;;  %v11523_v45 = vld [vmem:[#allocation8 + $0x1544] sm:$0xf0] }
 0x2ca   : > { %6608 = vmatpush.bf16.msra.mxu1 %v10424_v41  ;;  %v10400_v41 = vor.u32 %v11501_v44, %v10399_v8  ;;  %v10508_v44 = vor.u32 %v11526_v42, %v10505_v56  ;;  %v10481_v42 = vld [vmem:[#allocation8 + $0x1538] sm:$0xf0]  ;;  %v11536_v56 = vld [vmem:[#allocation8 + $0x15b4] sm:$0xf] }
 0x2cb   : > { %6626 = vmatpush.bf16.msra.mxu2 %v10364_v61  ;;  %v5141_v6 = vpop.f32.mrf.mxu2  ;;  %v10404_v61 = vor.u32 %v11500_v18, %v10401_v62  ;;  %v11542_v18 = vld [vmem:[#allocation8 + $0x15e4] sm:$0xf]  ;;  %v13062_v62 = vpack.c.b16 %v12875_v58, %v6414_v60 }
 0x2cc   : > { %6644 = vmatpush.bf16.msra.mxu3 %v10428_v48  ;;  %v5159_v20 = vpop.f32.mrf.mxu3  ;;  %v5108_v57 = vpop.f32.mrf.mxu0  ;;  %v10336_v48 = vor.u32 %v11485_v16, %v10335_v5  ;;  %6313 = vmatmul.bf16.gmra.mxu0 %v13031_v33  ;;  %v11527_v5 = vld [vmem:[#allocation8 + $0x1564] sm:$0xf0]  ;;  %v10567_v16 = vld [vmem:[#allocation8 + $0x15e0] sm:$0xf]  ;;  %v11538_v60 = vld [vmem:[#allocation8 + $0x15c4] sm:$0xf] }
 0x2cd   : > { %6591 = vmatpush.bf16.msra.mxu0 %v10352_v54  ;;  %v5160_v14 = vadd.f32 %v5159_v20, %v5141_v6  ;;  %v5126_v31 = vpop.f32.mrf.mxu1  ;;  %6331 = vmatmul.bf16.gmra.mxu1 %v13033_v29  ;;  %v10396_v54 = vor.u32 %v11498_v7, %v10393_v43  ;;  %v10569_v6 = vld [vmem:[#allocation8 + $0x15e8] sm:$0xf0]  ;;  %v11543_v20 = vld [vmem:[#allocation8 + $0x15e4] sm:$0xf0]  ;;  %v11540_v7 = vld [vmem:[#allocation8 + $0x15d4] sm:$0xf] }
 0x2ce   : > { %6609 = vmatpush.bf16.msra.mxu1 %v10416_v19  ;;  %v5127_v24 = vadd.f32 %v5126_v31, %v5108_v57  ;;  %6349 = vmatmul.bf16.gmra.mxu2 %v13031_v33  ;;  %v11529_v33 = vld [vmem:[#allocation8 + $0x1574] sm:$0xf0]  ;;  %v10568_v31 = vor.u32 %v11543_v20, %v10567_v16  ;;  %v10561_v43 = vld [vmem:[#allocation8 + $0x15d8] sm:$0xf0] }
 0x2cf   : > { %6627 = vmatpush.bf16.msra.mxu2 %v10356_v0  ;;  %v13049_v2 = vadd.f32 %v5160_v14, %v13009_v22  ;;  %6367 = vmatmul.bf16.gmra.mxu3 %v13033_v29  ;;  %v6413_v22 = vunpack.c.l.b16 %v6378_v25  ;;  %v10511_v0 = vld [vmem:[#allocation8 + $0x1570] sm:$0xf]  ;;  %v10580_v29 = vor.u32 %v11544_v50, %v10577_v46  ;;  %v10572_v14 = vor.u32 %v11542_v18, %v10569_v6  ;;  %v11522_v50 = vld [vmem:[#allocation8 + $0x1544] sm:$0xf]  ;;  %v10489_v46 = vld [vmem:[#allocation8 + $0x1548] sm:$0xf0] }
 0x2d0   : > { %6645 = vmatpush.bf16.msra.mxu3 %v10420_v52  ;;  %v13054_v37 = vadd.f32 %v5127_v24, %v13018_v17  ;;  %v10332_v52 = vor.u32 %v11482_v32, %v10329_v36  ;;  %v10328_v17 = vor.u32 %v11483_v40, %v10327_v13  ;;  %v10512_v35 = vor.u32 %v11529_v33, %v10511_v0  ;;  %v10495_v24 = vld [vmem:[#allocation8 + $0x1550] sm:$0xf]  ;;  %v11541_v40 = vld [vmem:[#allocation8 + $0x15d4] sm:$0xf0]  ;;  %v10553_v33 = vld [vmem:[#allocation8 + $0x15c8] sm:$0xf0] }
 0x2d1   : > { %6592 = vmatpush.bf16.msra.mxu0 %v10344_v55  ;;  %v10503_v55 = vld [vmem:[#allocation8 + $0x1560] sm:$0xf]  ;;  %v13069_v32 = vrot.slane %v12982_v34, 2  ;;  %v11525_v34 = vld [vmem:[#allocation8 + $0x1554] sm:$0xf0] }
 0x2d2   : > { %6610 = vmatpush.bf16.msra.mxu1 %v10408_v21  ;;  %v10504_v25 = vor.u32 %v11527_v5, %v10503_v55  ;;  %v10559_v13 = vld [vmem:[#allocation8 + $0x15d0] sm:$0xf]  ;;  %v11521_v6 = vld [vmem:[#allocation8 + $0x1534] sm:$0xf0] }
 0x2d3   : > { %6628 = vmatpush.bf16.msra.mxu2 %v10348_v47  ;;  %v5144_v19 = vpop.f32.mrf.mxu2  ;;  %v10479_v18 = vld [vmem:[#allocation8 + $0x1530] sm:$0xf]  ;;  %v6665_v55 = vld [vmem:[#allocation2 + $0x28] sm:$0x77] }
 0x2d4   : > { %6646 = vmatpush.bf16.msra.mxu3 %v10412_v28  ;;  %v5162_v4 = vpop.f32.mrf.mxu3  ;;  %v5110_v47 = vpop.f32.mrf.mxu0  ;;  %v13059_v28 = vpack.c.b16 %v12873_v3, %v6413_v22  ;;  %v10564_v22 = vor.u32 %v11540_v7, %v10561_v43  ;;  %v11537_v5 = vld [vmem:[#allocation8 + $0x15b4] sm:$0xf0]  ;;  %v6700_v7 = vunpack.c.l.b16 %v6665_v55 }
 0x2d5   : > { %6593 = vmatpush.bf16.msra.mxu0 %v10336_v48  ;;  %v5163_v51 = vadd.f32 %v5162_v4, %v5144_v19  ;;  %v5128_v21 = vpop.f32.mrf.mxu1  ;;  %v10497_v48 = vld [vmem:[#allocation8 + $0x1558] sm:$0xf0]  ;;  %v10551_v19 = vld [vmem:[#allocation8 + $0x15c0] sm:$0xf]  ;;  %v11520_v4 = vld [vmem:[#allocation8 + $0x1534] sm:$0xf] }
 0x2d6   : > { %6611 = vmatpush.bf16.msra.mxu1 %v10400_v41  ;;  %v6417_v57 = vrot.slane %v13059_v28, 2  ;;  %v10543_v21 = vld [vmem:[#allocation8 + $0x15b0] sm:$0xf] }
 0x2d7   : > { %6629 = vmatpush.bf16.msra.mxu2 %v10340_v38  ;;  %v13065_v8 = vadd.f32 %v5163_v51, %v13027_v15  ;;  %v6420_v38 = vrot.slane %v13062_v62, 2  ;;  %v13073_v15 = vrot.slane %v12993_v12, 2  ;;  %v10545_v51 = vld [vmem:[#allocation8 + $0x15b8] sm:$0xf0] }
 0x2d8   : > { %6647 = vmatpush.bf16.msra.mxu3 %v10404_v61  ;;  %v11524_v61 = vld [vmem:[#allocation8 + $0x1554] sm:$0xf]  ;;  %v6419_v1 = vsel %vm1593_vm3, %v6417_v57, %v13069_v32 }
 0x2d9   : > { %6594 = vmatpush.bf16.msra.mxu0 %v10328_v17  ;;  %v6422_v9 = vsel %vm1593_vm3, %v6420_v38, %v13073_v15  ;;  %v10500_v26 = vor.u32 %v11524_v61, %v10497_v48  ;;  %v11539_v17 = vld [vmem:[#allocation8 + $0x15c4] sm:$0xf0]  ;;  %v10480_v38 = vor.u32 %v11521_v6, %v10479_v18  ;;  %v11534_v61 = vld [vmem:[#allocation8 + $0x15a4] sm:$0xf]  ;;  %v10537_v48 = vld [vmem:[#allocation8 + $0x15a8] sm:$0xf0] }
 0x2da   : > { %6612 = vmatpush.bf16.msra.mxu1 %v10392_v10  ;;  %v10521_v18 = vld [vmem:[#allocation8 + $0x1588] sm:$0xf0]  ;;  %v13117_v6 = vld [vmem:[#allocation8 + $0x1500] sm:$0xf] }
 0x2db   : > { %6630 = vmatpush.bf16.msra.mxu2 %v10332_v52  ;;  %v5146_v36 = vpop.f32.mrf.mxu2  ;;  %v10496_v52 = vor.u32 %v11525_v34, %v10495_v24  ;;  %v11519_v34 = vld [vmem:[#allocation8 + $0x1524] sm:$0xf0] }
 0x2dc   : > { %6648 = vmatpush.bf16.msra.mxu3 %v10396_v54  ;;  %v5164_v41 = vpop.f32.mrf.mxu3  ;;  %v5382_v49 = vpop.f32.mrf.mxu0  ;;  %v10560_v54 = vor.u32 %v11541_v40, %v10559_v13  ;;  %6595 = vmatmul.bf16.vlgmr.msra.gmra.mxu0 %v6419_v1  ;;  %v10471_v36 = vld [vmem:[#allocation8 + $0x1520] sm:$0xf]  ;;  %v11535_v40 = vld [vmem:[#allocation8 + $0x15a4] sm:$0xf0] }
 0x2dd   : > { %6902 = vmatpush.bf16.msrb.mxu0 %v10512_v35  ;;  %v5400_v12 = vpop.f32.mrf.mxu1  ;;  %6613 = vmatmul.bf16.vlgmr.msra.gmra.mxu1 %v6422_v9  ;;  %v10488_v35 = vor.u32 %v11523_v45, %v10487_v59  ;;  %v10544_v41 = vor.u32 %v11537_v5, %v10543_v21  ;;  %v10535_v13 = vld [vmem:[#allocation8 + $0x15a0] sm:$0xf]  ;;  %v6708_v59 = vshll.u32 %v13059_v28, 16  ;;  %v10472_v45 = vor.u32 %v11519_v34, %v10471_v36  ;;  %v11560_v36 = vld [vmem:[#allocation8 + $0x1674] sm:$0xf] }
 0x2de   : > { %6920 = vmatpush.bf16.msrb.mxu1 %v10576_v30  ;;  %v5401_v0 = vadd.f32 %v5400_v12, %v5382_v49  ;;  %6631 = vmatmul.bf16.vlgmr.msra.gmra.mxu2 %v6419_v1  ;;  %v10552_v30 = vor.u32 %v11539_v17, %v10551_v19  ;;  %v13085_v49 = vld [vmem:[#allocation8 + $0x1514] sm:$0xf]  ;;  %v13087_v1 = vld [vmem:[#allocation8 + $0x1518] sm:$0xf0]  ;;  %v10536_v19 = vor.u32 %v11535_v40, %v10535_v13  ;;  %v10639_v34 = vld [vmem:[#allocation8 + $0x1670] sm:$0xf] }
 0x2df   : > { %6938 = vmatpush.bf16.msrb.mxu2 %v10516_v63  ;;  %6649 = vmatmul.bf16.vlgmr.msra.gmra.mxu3 %v6422_v9  ;;  %v10492_v63 = vor.u32 %v11522_v50, %v10489_v46  ;;  %v13089_v12 = vld [vmem:[#allocation8 + $0x1594] sm:$0xf]  ;;  %v6701_v9 = vunpack.c.h.b16 %v6665_v55  ;;  %v13094_v50 = vld [vmem:[#allocation8 + $0x1510] sm:$0xf]  ;;  %v13096_v46 = vld [vmem:[#allocation8 + $0x1514] sm:$0xf0] }
 0x2e0   : > { %6956 = vmatpush.bf16.msrb.mxu3 %v10580_v29  ;;  %v13080_v10 = vadd.f32 %v5401_v0, %v13040_v23  ;;  %v10556_v29 = vor.u32 %v11538_v60, %v10553_v33  ;;  %v10540_v0 = vor.u32 %v11534_v61, %v10537_v48  ;;  %v13099_v60 = vpack.c.b16 %v6700_v7, %v12768_v39 }
 0x2e1   : > { %6903 = vmatpush.bf16.msrb.mxu0 %v10504_v25  ;;  %v10484_v25 = vor.u32 %v11520_v4, %v10481_v42  ;;  %v6705_v33 = vshrl.u32 %v13059_v28, 16  ;;  %v10468_v4 = vor.u32 %v13085_v49, %v13087_v1  ;;  %v13110_v42 = vpack.c.b16 %v6701_v9, %v12779_v53  ;;  %v11561_v49 = vld [vmem:[#allocation8 + $0x1674] sm:$0xf0] }
 0x2e2   : > { %6921 = vmatpush.bf16.msrb.mxu1 %v10568_v31  ;;  %v10548_v31 = vor.u32 %v11536_v56, %v10545_v51  ;;  %v13121_v5 = vrot.slane %v6708_v59, 3  ;;  %v11577_v1 = vld [vmem:[#allocation8 + $0x16f4] sm:$0xf0]  ;;  %v10633_v59 = vld [vmem:[#allocation8 + $0x1668] sm:$0xf0] }
 0x2e3   : > { %6939 = vmatpush.bf16.msrb.mxu2 %v10508_v44  ;;  %v5418_v47 = vpop.f32.mrf.mxu2  ;;  %v11518_v44 = vld [vmem:[#allocation8 + $0x1524] sm:$0xf]  ;;  %v13119_v21 = vrot.slane %v6705_v33, 2  ;;  %v6730_v61 = vshrl.u32 %v13110_v42, 16  ;;  %v6733_v48 = vshll.u32 %v13110_v42, 16 }
 0x2e4   : > { %6957 = vmatpush.bf16.msrb.mxu3 %v10572_v14  ;;  %v5436_v23 = vpop.f32.mrf.mxu3  ;;  %v5384_v20 = vpop.f32.mrf.mxu0  ;;  %v10473_v14 = vld [vmem:[#allocation8 + $0x1528] sm:$0xf0]  ;;  %v11558_v33 = vld [vmem:[#allocation8 + $0x1664] sm:$0xf] }
 0x2e5   : > { %6904 = vmatpush.bf16.msrb.mxu0 %v10496_v52  ;;  %v5437_v16 = vadd.f32 %v5436_v23, %v5418_v47  ;;  %v5402_v57 = vpop.f32.mrf.mxu1  ;;  %v10527_v52 = vld [vmem:[#allocation8 + $0x1590] sm:$0xf]  ;;  %v10464_v47 = vor.u32 %v13096_v46, %v13094_v50  ;;  %v11515_v23 = vld [vmem:[#allocation8 + $0x1504] sm:$0xf0]  ;;  %v6732_v46 = vrot.slane %v6730_v61, 2 }
 0x2e6   : > { %6922 = vmatpush.bf16.msrb.mxu1 %v10560_v54  ;;  %v5403_v24 = vadd.f32 %v5402_v57, %v5384_v20  ;;  %v11533_v54 = vld [vmem:[#allocation8 + $0x1594] sm:$0xf0]  ;;  %v6716_v20 = vshll.u32 %v13099_v60, 16  ;;  %v10519_v57 = vld [vmem:[#allocation8 + $0x1580] sm:$0xf]  ;;  %v10456_v13 = vor.u32 %v11515_v23, %v13117_v6 }
 0x2e7   : > { %6940 = vmatpush.bf16.msrb.mxu2 %v10500_v26  ;;  %v13083_v43 = vadd.f32 %v5437_v16, %v13043_v27  ;;  %v10529_v27 = vld [vmem:[#allocation8 + $0x1598] sm:$0xf0]  ;;  %v6713_v16 = vshrl.u32 %v13099_v60, 16  ;;  %v10623_v61 = vld [vmem:[#allocation8 + $0x1650] sm:$0xf] }
 0x2e8   : > { %6958 = vmatpush.bf16.msrb.mxu3 %v10564_v22  ;;  %v13092_v26 = vadd.f32 %v5403_v24, %v13046_v11  ;;  %v10476_v22 = vor.u32 %v11518_v44, %v10473_v14  ;;  %v10532_v28 = vor.u32 %v13089_v12, %v10529_v27  ;;  %v11576_v24 = vld [vmem:[#allocation8 + $0x16f4] sm:$0xf]  ;;  %v6718_v9 = vrot.slane %v6716_v20, 3 }
 0x2e9   : > { %6905 = vmatpush.bf16.msrb.mxu0 %v10488_v35  ;;  %v10528_v35 = vor.u32 %v11533_v54, %v10527_v52 }
 0x2ea   : > { %6923 = vmatpush.bf16.msrb.mxu1 %v10552_v30  ;;  %v13115_v30 = vld [vmem:[#allocation8 + $0x1584] sm:$0xf] }
 0x2eb   : > { %6941 = vmatpush.bf16.msrb.mxu2 %v10492_v63  ;;  %v5420_v11 = vpop.f32.mrf.mxu2  ;;  %v13105_v63 = vld [vmem:[#allocation8 + $0x1504] sm:$0xf] }
 0x2ec   : > { %6959 = vmatpush.bf16.msrb.mxu3 %v10556_v29  ;;  %v5438_v17 = vpop.f32.mrf.mxu3  ;;  %v13107_v29 = vld [vmem:[#allocation8 + $0x1508] sm:$0xf0]  ;;  %v5387_v51 = vpop.f32.mrf.mxu0  ;;  %6600 = vmatmul.bf16.gmra.mxu0 %v13069_v32 }
 0x2ed   : > { %6906 = vmatpush.bf16.msrb.mxu0 %v10480_v38  ;;  %v5439_v56 = vadd.f32 %v5438_v17, %v5420_v11  ;;  %v5405_v55 = vpop.f32.mrf.mxu1  ;;  %v6725_v38 = vshll.u32 %v13062_v62, 16  ;;  %6618 = vmatmul.bf16.gmra.mxu1 %v13073_v15 }
 0x2ee   : > { %6924 = vmatpush.bf16.msrb.mxu1 %v10544_v41  ;;  %v5406_v14 = vadd.f32 %v5405_v55, %v5387_v51  ;;  %6636 = vmatmul.bf16.gmra.mxu2 %v13069_v32  ;;  %v10705_v41 = vld [vmem:[#allocation8 + $0x16f8] sm:$0xf0]  ;;  %v10524_v32 = vor.u32 %v13115_v30, %v10521_v18  ;;  %v11559_v51 = vld [vmem:[#allocation8 + $0x1664] sm:$0xf0]  ;;  %v6711_v30 = vor.u32 %v13121_v5, %v13119_v21  ;;  %v11557_v5 = vld [vmem:[#allocation8 + $0x1654] sm:$0xf0] }
 0x2ef   : > { %6942 = vmatpush.bf16.msrb.mxu2 %v10484_v25  ;;  %v13126_v44 = vadd.f32 %v5439_v56, %v13049_v2  ;;  %v11531_v25 = vld [vmem:[#allocation8 + $0x1584] sm:$0xf0]  ;;  %v10641_v2 = vld [vmem:[#allocation8 + $0x1678] sm:$0xf0]  ;;  %6654 = vmatmul.bf16.gmra.mxu3 %v13073_v15  ;;  %v6715_v15 = vrot.slane %v6713_v16, 2  ;;  %v6727_v27 = vrot.slane %v6725_v38, 3  ;;  %v10708_v54 = vor.u32 %v11576_v24, %v10705_v41 }
 0x2f0   : > { %6960 = vmatpush.bf16.msrb.mxu3 %v10548_v31  ;;  %v6722_v31 = vshrl.u32 %v13062_v62, 16  ;;  %v13135_v7 = vadd.f32 %v5406_v14, %v13054_v37  ;;  %v10460_v62 = vor.u32 %v13105_v63, %v13107_v29  ;;  %v10520_v40 = vor.u32 %v11531_v25, %v10519_v57  ;;  %v10703_v37 = vld [vmem:[#allocation8 + $0x16f0] sm:$0xf]  ;;  %v10697_v63 = vld [vmem:[#allocation8 + $0x16e8] sm:$0xf0] }
 0x2f1   : > { %6907 = vmatpush.bf16.msrb.mxu0 %v10472_v45  ;;  %v10644_v52 = vor.u32 %v11560_v36, %v10641_v2  ;;  %v10704_v17 = vor.u32 %v11577_v1, %v10703_v37  ;;  %v10631_v29 = vld [vmem:[#allocation8 + $0x1660] sm:$0xf]  ;;  %v10636_v18 = vor.u32 %v11558_v33, %v10633_v59  ;;  %v13148_v55 = vor.u32 %v6718_v9, %v6715_v15  ;;  %v10625_v57 = vld [vmem:[#allocation8 + $0x1658] sm:$0xf0]  ;;  %v11573_v36 = vld [vmem:[#allocation8 + $0x16d4] sm:$0xf0] }
 0x2f2   : > { %6925 = vmatpush.bf16.msrb.mxu1 %v10536_v19  ;;  %v10640_v19 = vor.u32 %v11561_v49, %v10639_v34  ;;  %v10632_v23 = vor.u32 %v11559_v51, %v10631_v29  ;;  %v10689_v38 = vld [vmem:[#allocation8 + $0x16d8] sm:$0xf0]  ;;  %v10624_v37 = vor.u32 %v11557_v5, %v10623_v61  ;;  %v10681_v15 = vld [vmem:[#allocation8 + $0x16c8] sm:$0xf0]  ;;  %v10615_v9 = vld [vmem:[#allocation8 + $0x1640] sm:$0xf] }
 0x2f3   : > { %6943 = vmatpush.bf16.msrb.mxu2 %v10476_v22  ;;  %v5423_v12 = vpop.f32.mrf.mxu2  ;;  %v6724_v22 = vrot.slane %v6722_v31, 2  ;;  %v11572_v31 = vld [vmem:[#allocation8 + $0x16d4] sm:$0xf]  ;;  %v10609_v33 = vld [vmem:[#allocation8 + $0x1638] sm:$0xf0] }
 0x2f4   : > { %6961 = vmatpush.bf16.msrb.mxu3 %v10540_v0  ;;  %v5441_v50 = vpop.f32.mrf.mxu3  ;;  %v6735_v0 = vrot.slane %v6733_v48, 3  ;;  %v5389_v45 = vpop.f32.mrf.mxu0  ;;  %v10687_v48 = vld [vmem:[#allocation8 + $0x16d0] sm:$0xf]  ;;  %v11568_v59 = vld [vmem:[#allocation8 + $0x16b4] sm:$0xf] }
 0x2f5   : > { %6908 = vmatpush.bf16.msrb.mxu0 %v10464_v47  ;;  %v5442_v11 = vadd.f32 %v5441_v50, %v5423_v12  ;;  %v5407_v56 = vpop.f32.mrf.mxu1  ;;  %v11575_v47 = vld [vmem:[#allocation8 + $0x16e4] sm:$0xf0]  ;;  %v6728_v20 = vor.u32 %v6727_v27, %v6724_v22  ;;  %v10688_v1 = vor.u32 %v11573_v36, %v10687_v48  ;;  %v11570_v12 = vld [vmem:[#allocation8 + $0x16c4] sm:$0xf]  ;;  %v10679_v27 = vld [vmem:[#allocation8 + $0x16c0] sm:$0xf] }
 0x2f6   : > { %6926 = vmatpush.bf16.msrb.mxu1 %v10528_v35  ;;  %v13150_v14 = vor.u32 %v6735_v0, %v6732_v46  ;;  %v11555_v22 = vld [vmem:[#allocation8 + $0x1644] sm:$0xf0]  ;;  %v11569_v56 = vld [vmem:[#allocation8 + $0x16b4] sm:$0xf0] }
 0x2f7   : > { %6944 = vmatpush.bf16.msrb.mxu2 %v10468_v4  ;;  %v11574_v4 = vld [vmem:[#allocation8 + $0x16e4] sm:$0xf]  ;;  %v13144_v35 = vadd.f32 %v5442_v11, %v13065_v8  ;;  %v11556_v8 = vld [vmem:[#allocation8 + $0x1654] sm:$0xf]  ;;  %v11571_v50 = vld [vmem:[#allocation8 + $0x16c4] sm:$0xf0]  ;;  %v10616_v45 = vor.u32 %v11555_v22, %v10615_v9 }
 0x2f8   : > { %6962 = vmatpush.bf16.msrb.mxu3 %v10532_v28  ;;  %v10695_v28 = vld [vmem:[#allocation8 + $0x16e0] sm:$0xf]  ;;  %v10700_v6 = vor.u32 %v11574_v4, %v10697_v63  ;;  %v6737_v41 = vsel %vm1881_vm4, %v6728_v20, %v13150_v14  ;;  %v10628_v34 = vor.u32 %v11556_v8, %v10625_v57  ;;  %v10607_v4 = vld [vmem:[#allocation8 + $0x1630] sm:$0xf]  ;;  %v11553_v63 = vld [vmem:[#allocation8 + $0x1634] sm:$0xf0] }
 0x2f9   : > { %6909 = vmatpush.bf16.msrb.mxu0 %v10456_v13  ;;  %v10696_v16 = vor.u32 %v11575_v47, %v10695_v28  ;;  %v11554_v13 = vld [vmem:[#allocation8 + $0x1644] sm:$0xf]  ;;  %v11551_v61 = vld [vmem:[#allocation8 + $0x1624] sm:$0xf0] }
 0x2fa   : > { %6927 = vmatpush.bf16.msrb.mxu1 %v10520_v40  ;;  %v10617_v40 = vld [vmem:[#allocation8 + $0x1648] sm:$0xf0]  ;;  %v11567_v5 = vld [vmem:[#allocation8 + $0x16a4] sm:$0xf0]  ;;  %v11546_v9 = vld [vmem:[#allocation8 + $0x1604] sm:$0xf] }
 0x2fb   : > { %6945 = vmatpush.bf16.msrb.mxu2 %v10460_v62  ;;  %v5425_v25 = vpop.f32.mrf.mxu2  ;;  %v6720_v62 = vsel %vm1881_vm4, %v6711_v30, %v13148_v55  ;;  %v10620_v0 = vor.u32 %v11554_v13, %v10617_v40  ;;  %v10657_v13 = vld [vmem:[#allocation8 + $0x1698] sm:$0xf0]  ;;  %v10591_v40 = vld [vmem:[#allocation8 + $0x1610] sm:$0xf]  ;;  %v6980_v22 = vld [vmem:[#allocation2 + $0x10] sm:$0x88] }
 0x2fc   : > { %6963 = vmatpush.bf16.msrb.mxu3 %v10524_v32  ;;  %v5443_v21 = vpop.f32.mrf.mxu3  ;;  %v5707_v2 = vpop.f32.mrf.mxu0  ;;  %v10692_v32 = vor.u32 %v11572_v31, %v10689_v38  ;;  %6910 = vmatmul.bf16.vlgmr.msrb.gmra.mxu0 %v6720_v62  ;;  %v11566_v25 = vld [vmem:[#allocation8 + $0x16a4] sm:$0xf]  ;;  %v10665_v31 = vld [vmem:[#allocation8 + $0x16a8] sm:$0xf0]  ;;  %v10599_v38 = vld [vmem:[#allocation8 + $0x1620] sm:$0xf] }
 0x2fd   : > { %7189 = vmatpush.bf16.msra.mxu0 %v10640_v19  ;;  %v5725_v24 = vpop.f32.mrf.mxu1  ;;  %6928 = vmatmul.bf16.vlgmr.msrb.gmra.mxu1 %v6737_v41  ;;  %v10680_v19 = vor.u32 %v11571_v50, %v10679_v27  ;;  %v10663_v21 = vld [vmem:[#allocation8 + $0x16a0] sm:$0xf] }
 0x2fe   : > { %7207 = vmatpush.bf16.msra.mxu1 %v10704_v17  ;;  %v5726_v49 = vadd.f32 %v5725_v24, %v5707_v2  ;;  %6946 = vmatmul.bf16.vlgmr.msrb.gmra.mxu2 %v6720_v62  ;;  %v10673_v17 = vld [vmem:[#allocation8 + $0x16b8] sm:$0xf0]  ;;  %v10668_v2 = vor.u32 %v11566_v25, %v10665_v31  ;;  %v11548_v62 = vld [vmem:[#allocation8 + $0x1614] sm:$0xf] }
 0x2ff   : > { %7225 = vmatpush.bf16.msra.mxu2 %v10644_v52  ;;  %6964 = vmatmul.bf16.vlgmr.msrb.gmra.mxu3 %v6737_v41  ;;  %v10684_v52 = vor.u32 %v11570_v12, %v10681_v15  ;;  %v11564_v24 = vld [vmem:[#allocation8 + $0x1694] sm:$0xf]  ;;  %v11565_v12 = vld [vmem:[#allocation8 + $0x1694] sm:$0xf0] }
 0x300   : > { %7243 = vmatpush.bf16.msra.mxu3 %v10708_v54  ;;  %v13157_v46 = vadd.f32 %v5726_v49, %v13080_v10  ;;  %v11552_v54 = vld [vmem:[#allocation8 + $0x1634] sm:$0xf]  ;;  %v10671_v10 = vld [vmem:[#allocation8 + $0x16b0] sm:$0xf]  ;;  %v11549_v49 = vld [vmem:[#allocation8 + $0x1614] sm:$0xf0] }
 0x301   : > { %7190 = vmatpush.bf16.msra.mxu0 %v10632_v23  ;;  %v10612_v30 = vor.u32 %v11552_v54, %v10609_v33  ;;  %v11550_v23 = vld [vmem:[#allocation8 + $0x1624] sm:$0xf]  ;;  %v10672_v57 = vor.u32 %v11569_v56, %v10671_v10  ;;  %v10585_v54 = vld [vmem:[#allocation8 + $0x1608] sm:$0xf0]  ;;  %v11592_v10 = vld [vmem:[#allocation8 + $0x1774] sm:$0xf] }
 0x302   : > { %7208 = vmatpush.bf16.msra.mxu1 %v10696_v16  ;;  %v10601_v16 = vld [vmem:[#allocation8 + $0x1628] sm:$0xf0]  ;;  %v11562_v33 = vld [vmem:[#allocation8 + $0x1684] sm:$0xf]  ;;  %v10769_v56 = vld [vmem:[#allocation8 + $0x1778] sm:$0xf0] }
 0x303   : > { %7226 = vmatpush.bf16.msra.mxu2 %v10636_v18  ;;  %v5743_v11 = vpop.f32.mrf.mxu2  ;;  %v10676_v18 = vor.u32 %v11568_v59, %v10673_v17  ;;  %v10604_v36 = vor.u32 %v11550_v23, %v10601_v16  ;;  %v10649_v59 = vld [vmem:[#allocation8 + $0x1688] sm:$0xf0]  ;;  %v10583_v17 = vld [vmem:[#allocation8 + $0x1600] sm:$0xf]  ;;  %v7016_v23 = vunpack.c.h.b16 %v6980_v22  ;;  %v10831_v16 = vld [vmem:[#allocation8 + $0x17f0] sm:$0xf] }
 0x304   : > { %7244 = vmatpush.bf16.msra.mxu3 %v10700_v6  ;;  %v5761_v29 = vpop.f32.mrf.mxu3  ;;  %v5709_v28 = vpop.f32.mrf.mxu0  ;;  %v10608_v6 = vor.u32 %v11553_v63, %v10607_v4  ;;  %v11547_v4 = vld [vmem:[#allocation8 + $0x1604] sm:$0xf0]  ;;  %v10647_v63 = vld [vmem:[#allocation8 + $0x1680] sm:$0xf] }
 0x305   : > { %7191 = vmatpush.bf16.msra.mxu0 %v10624_v37  ;;  %v5762_v51 = vadd.f32 %v5761_v29, %v5743_v11  ;;  %v5727_v47 = vpop.f32.mrf.mxu1  ;;  %v11563_v29 = vld [vmem:[#allocation8 + $0x1684] sm:$0xf0] }
 0x306   : > { %7209 = vmatpush.bf16.msra.mxu1 %v10688_v1  ;;  %v5728_v8 = vadd.f32 %v5727_v47, %v5709_v28  ;;  %v10655_v1 = vld [vmem:[#allocation8 + $0x1690] sm:$0xf]  ;;  %v11608_v28 = vld [vmem:[#allocation8 + $0x17f4] sm:$0xf]  ;;  %v10833_v47 = vld [vmem:[#allocation8 + $0x17f8] sm:$0xf0]  ;;  %v10648_v25 = vor.u32 %v11563_v29, %v10647_v63 }
 0x307   : > { %7227 = vmatpush.bf16.msra.mxu2 %v10628_v34  ;;  %v13160_v20 = vadd.f32 %v5762_v51, %v13083_v43  ;;  %v10593_v43 = vld [vmem:[#allocation8 + $0x1618] sm:$0xf0]  ;;  %v10600_v34 = vor.u32 %v11551_v61, %v10599_v38  ;;  %v10772_v38 = vor.u32 %v11592_v10, %v10769_v56  ;;  %v11590_v61 = vld [vmem:[#allocation8 + $0x1764] sm:$0xf] }
 0x308   : > { %7245 = vmatpush.bf16.msra.mxu3 %v10692_v32  ;;  %v13163_v48 = vadd.f32 %v5728_v8, %v13092_v26  ;;  %v10664_v32 = vor.u32 %v11567_v5, %v10663_v21  ;;  %v10596_v50 = vor.u32 %v11548_v62, %v10593_v43  ;;  %v11609_v8 = vld [vmem:[#allocation8 + $0x17f4] sm:$0xf0]  ;;  %v10761_v21 = vld [vmem:[#allocation8 + $0x1768] sm:$0xf0]  ;;  %v11586_v56 = vld [vmem:[#allocation8 + $0x1744] sm:$0xf] }
 0x309   : > { %7192 = vmatpush.bf16.msra.mxu0 %v10616_v45  ;;  %v10832_v43 = vor.u32 %v11609_v8, %v10831_v16  ;;  %v10807_v16 = vld [vmem:[#allocation8 + $0x17c0] sm:$0xf]  ;;  %v11603_v8 = vld [vmem:[#allocation8 + $0x17c4] sm:$0xf0] }
 0x30a   : > { %7210 = vmatpush.bf16.msra.mxu1 %v10680_v19  ;;  %v10656_v19 = vor.u32 %v11565_v12, %v10655_v1 }
 0x30b   : > { %7228 = vmatpush.bf16.msra.mxu2 %v10620_v0  ;;  %v5745_v41 = vpop.f32.mrf.mxu2  ;;  %v10660_v0 = vor.u32 %v11564_v24, %v10657_v13  ;;  %v11606_v24 = vld [vmem:[#allocation8 + $0x17e4] sm:$0xf]  ;;  %v13179_v13 = vpack.c.b16 %v12875_v58, %v7016_v23  ;;  %v10743_v23 = vld [vmem:[#allocation8 + $0x1740] sm:$0xf] }
 0x30c   : > { %7246 = vmatpush.bf16.msra.mxu3 %v10684_v52  ;;  %v5763_v37 = vpop.f32.mrf.mxu3  ;;  %v5712_v15 = vpop.f32.mrf.mxu0  ;;  %v10592_v52 = vor.u32 %v11549_v49, %v10591_v40  ;;  %6915 = vmatmul.bf16.gmra.mxu0 %v13148_v55  ;;  %v11591_v40 = vld [vmem:[#allocation8 + $0x1764] sm:$0xf0]  ;;  %v10823_v49 = vld [vmem:[#allocation8 + $0x17e0] sm:$0xf] }
 0x30d   : > { %7193 = vmatpush.bf16.msra.mxu0 %v10608_v6  ;;  %v5764_v26 = vadd.f32 %v5763_v37, %v5745_v41  ;;  %v5730_v27 = vpop.f32.mrf.mxu1  ;;  %6933 = vmatmul.bf16.gmra.mxu1 %v13150_v14  ;;  %v10652_v6 = vor.u32 %v11562_v33, %v10649_v59  ;;  %v10825_v41 = vld [vmem:[#allocation8 + $0x17e8] sm:$0xf0]  ;;  %v11607_v37 = vld [vmem:[#allocation8 + $0x17e4] sm:$0xf0]  ;;  %v10751_v33 = vld [vmem:[#allocation8 + $0x1750] sm:$0xf] }
 0x30e   : > { %7211 = vmatpush.bf16.msra.mxu1 %v10672_v57  ;;  %v5731_v45 = vadd.f32 %v5730_v27, %v5712_v15  ;;  %6951 = vmatmul.bf16.gmra.mxu2 %v13148_v55  ;;  %v11593_v55 = vld [vmem:[#allocation8 + $0x1774] sm:$0xf0]  ;;  %v10828_v12 = vor.u32 %v11606_v24, %v10825_v41  ;;  %v13186_v15 = vrot.slane %v13099_v60, 3  ;;  %v11588_v27 = vld [vmem:[#allocation8 + $0x1754] sm:$0xf] }
 0x30f   : > { %7229 = vmatpush.bf16.msra.mxu2 %v10612_v30  ;;  %v13166_v11 = vadd.f32 %v5764_v26, %v13126_v44  ;;  %6969 = vmatmul.bf16.gmra.mxu3 %v13150_v14  ;;  %v7015_v44 = vunpack.c.l.b16 %v6980_v22  ;;  %v10767_v30 = vld [vmem:[#allocation8 + $0x1770] sm:$0xf]  ;;  %v10836_v14 = vor.u32 %v11608_v28, %v10833_v47  ;;  %v7022_v22 = vrot.slane %v13179_v13, 3  ;;  %v11589_v60 = vld [vmem:[#allocation8 + $0x1754] sm:$0xf0] }
 0x310   : > { %7247 = vmatpush.bf16.msra.mxu3 %v10676_v18  ;;  %v13171_v51 = vadd.f32 %v5731_v45, %v13135_v7  ;;  %v10588_v18 = vor.u32 %v11546_v9, %v10585_v54  ;;  %v10584_v7 = vor.u32 %v11547_v4, %v10583_v17  ;;  %v10768_v62 = vor.u32 %v11593_v55, %v10767_v30  ;;  %v10817_v54 = vld [vmem:[#allocation8 + $0x17d8] sm:$0xf0]  ;;  %v10815_v45 = vld [vmem:[#allocation8 + $0x17d0] sm:$0xf]  ;;  %v11587_v55 = vld [vmem:[#allocation8 + $0x1744] sm:$0xf0] }
 0x311   : > { %7194 = vmatpush.bf16.msra.mxu0 %v10600_v34  ;;  %v10759_v34 = vld [vmem:[#allocation8 + $0x1760] sm:$0xf]  ;;  %v10824_v9 = vor.u32 %v11607_v37, %v10823_v49  ;;  %v10752_v47 = vor.u32 %v11589_v60, %v10751_v33  ;;  %v11601_v41 = vld [vmem:[#allocation8 + $0x17b4] sm:$0xf0]  ;;  %v11583_v33 = vld [vmem:[#allocation8 + $0x1724] sm:$0xf0] }
 0x312   : > { %7212 = vmatpush.bf16.msra.mxu1 %v10664_v32  ;;  %v10760_v58 = vor.u32 %v11591_v40, %v10759_v34  ;;  %v7267_v34 = vld [vmem:[#allocation2 + $0x28] sm:$0xff]  ;;  %v11599_v60 = vld [vmem:[#allocation8 + $0x17a4] sm:$0xf0] }
 0x313   : > { %7230 = vmatpush.bf16.msra.mxu2 %v10604_v36  ;;  %v5748_v57 = vpop.f32.mrf.mxu2 }
 0x314   : > { %7248 = vmatpush.bf16.msra.mxu3 %v10668_v2  ;;  %v5766_v31 = vpop.f32.mrf.mxu3  ;;  %v5714_v36 = vpop.f32.mrf.mxu0  ;;  %v13176_v2 = vpack.c.b16 %v12873_v3, %v7015_v44  ;;  %v10764_v3 = vor.u32 %v11590_v61, %v10761_v21  ;;  %v10745_v44 = vld [vmem:[#allocation8 + $0x1748] sm:$0xf0]  ;;  %v10744_v21 = vor.u32 %v11587_v55, %v10743_v23 }
 0x315   : > { %7195 = vmatpush.bf16.msra.mxu0 %v10592_v52  ;;  %v5767_v5 = vadd.f32 %v5766_v31, %v5748_v57  ;;  %v5732_v32 = vpop.f32.mrf.mxu1  ;;  %v11604_v52 = vld [vmem:[#allocation8 + $0x17d4] sm:$0xf]  ;;  %v10801_v36 = vld [vmem:[#allocation8 + $0x17b8] sm:$0xf0] }
 0x316   : > { %7213 = vmatpush.bf16.msra.mxu1 %v10656_v19  ;;  %v7019_v26 = vrot.slane %v13176_v2, 3  ;;  %v11605_v19 = vld [vmem:[#allocation8 + $0x17d4] sm:$0xf0]  ;;  %v10820_v10 = vor.u32 %v11604_v52, %v10817_v54  ;;  %v11584_v31 = vld [vmem:[#allocation8 + $0x1734] sm:$0xf]  ;;  %v7302_v54 = vunpack.c.l.b16 %v7267_v34 }
 0x317   : > { %7231 = vmatpush.bf16.msra.mxu2 %v10596_v50  ;;  %v13182_v1 = vadd.f32 %v5767_v5, %v13144_v35  ;;  %v13190_v35 = vrot.slane %v13110_v42, 3  ;;  %v10753_v50 = vld [vmem:[#allocation8 + $0x1758] sm:$0xf0]  ;;  %v10816_v30 = vor.u32 %v11605_v19, %v10815_v45  ;;  %v10808_v5 = vor.u32 %v11603_v8, %v10807_v16  ;;  %v10727_v52 = vld [vmem:[#allocation8 + $0x1720] sm:$0xf] }
 0x318   : > { %7249 = vmatpush.bf16.msra.mxu3 %v10660_v0  ;;  %v7021_v4 = vsel %vm2197_vm5, %v7019_v26, %v13186_v15  ;;  %v10756_v29 = vor.u32 %v11588_v27, %v10753_v50  ;;  %v11582_v26 = vld [vmem:[#allocation8 + $0x1724] sm:$0xf]  ;;  %v11580_v19 = vld [vmem:[#allocation8 + $0x1714] sm:$0xf] }
 0x319   : > { %7196 = vmatpush.bf16.msra.mxu0 %v10584_v7  ;;  %v7024_v63 = vsel %vm2197_vm5, %v7022_v22, %v13190_v35  ;;  %v10748_v7 = vor.u32 %v11586_v56, %v10745_v44  ;;  %v11598_v50 = vld [vmem:[#allocation8 + $0x17a4] sm:$0xf]  ;;  %v10728_v44 = vor.u32 %v11583_v33, %v10727_v52 }
 0x31a   : > { %7214 = vmatpush.bf16.msra.mxu1 %v10648_v25  ;;  %v11578_v8 = vld [vmem:[#allocation8 + $0x1704] sm:$0xf] }
 0x31b   : > { %7232 = vmatpush.bf16.msra.mxu2 %v10588_v18  ;;  %v5750_v0 = vpop.f32.mrf.mxu2  ;;  %v11602_v18 = vld [vmem:[#allocation8 + $0x17c4] sm:$0xf] }
 0x31c   : > { %7250 = vmatpush.bf16.msra.mxu3 %v10652_v6  ;;  %v5768_v59 = vpop.f32.mrf.mxu3  ;;  %v5994_v17 = vpop.f32.mrf.mxu0  ;;  %v10809_v6 = vld [vmem:[#allocation8 + $0x17c8] sm:$0xf0]  ;;  %7197 = vmatmul.bf16.vlgmr.msra.gmra.mxu0 %v7021_v4 }
 0x31d   : > { %7504 = vmatpush.bf16.msrb.mxu0 %v10768_v62  ;;  %v6012_v42 = vpop.f32.mrf.mxu1  ;;  %7215 = vmatmul.bf16.vlgmr.msra.gmra.mxu1 %v7024_v63  ;;  %v10812_v25 = vor.u32 %v11602_v18, %v10809_v6  ;;  %v10735_v62 = vld [vmem:[#allocation8 + $0x1730] sm:$0xf]  ;;  %v10793_v0 = vld [vmem:[#allocation8 + $0x17a8] sm:$0xf0]  ;;  %v10791_v59 = vld [vmem:[#allocation8 + $0x17a0] sm:$0xf] }
 0x31e   : > { %7522 = vmatpush.bf16.msrb.mxu1 %v10832_v43  ;;  %v6013_v28 = vadd.f32 %v6012_v42, %v5994_v17  ;;  %7233 = vmatmul.bf16.vlgmr.msra.gmra.mxu2 %v7021_v4  ;;  %v11585_v43 = vld [vmem:[#allocation8 + $0x1734] sm:$0xf0]  ;;  %v10721_v17 = vld [vmem:[#allocation8 + $0x1718] sm:$0xf0]  ;;  %v7303_v4 = vunpack.c.h.b16 %v7267_v34  ;;  %v10796_v42 = vor.u32 %v11598_v50, %v10793_v0  ;;  %v11595_v34 = vld [vmem:[#allocation8 + $0x1784] sm:$0xf0] }
 0x31f   : > { %7540 = vmatpush.bf16.msrb.mxu2 %v10772_v38  ;;  %7251 = vmatmul.bf16.vlgmr.msra.gmra.mxu3 %v7024_v63  ;;  %v10737_v38 = vld [vmem:[#allocation8 + $0x1738] sm:$0xf0]  ;;  %v11596_v63 = vld [vmem:[#allocation8 + $0x1794] sm:$0xf]  ;;  %v11597_v18 = vld [vmem:[#allocation8 + $0x1794] sm:$0xf0]  ;;  %v10724_v16 = vor.u32 %v11580_v19, %v10721_v17 }
 0x320   : > { %7558 = vmatpush.bf16.msrb.mxu3 %v10836_v14  ;;  %v13197_v57 = vadd.f32 %v6013_v28, %v13157_v46  ;;  %v11600_v14 = vld [vmem:[#allocation8 + $0x17b4] sm:$0xf]  ;;  %v10799_v46 = vld [vmem:[#allocation8 + $0x17b0] sm:$0xf]  ;;  %v10740_v37 = vor.u32 %v11584_v31, %v10737_v38  ;;  %v10792_v28 = vor.u32 %v11599_v60, %v10791_v59 }
 0x321   : > { %7505 = vmatpush.bf16.msrb.mxu0 %v10760_v58  ;;  %v10729_v58 = vld [vmem:[#allocation8 + $0x1728] sm:$0xf0]  ;;  %v10800_v27 = vor.u32 %v11601_v41, %v10799_v46  ;;  %v10775_v41 = vld [vmem:[#allocation8 + $0x1780] sm:$0xf] }
 0x322   : > { %7523 = vmatpush.bf16.msrb.mxu1 %v10824_v9 }
 0x323   : > { %7541 = vmatpush.bf16.msrb.mxu2 %v10764_v3  ;;  %v6030_v61 = vpop.f32.mrf.mxu2  ;;  %v10804_v3 = vor.u32 %v11600_v14, %v10801_v36  ;;  %v10777_v36 = vld [vmem:[#allocation8 + $0x1788] sm:$0xf0] }
 0x324   : > { %7559 = vmatpush.bf16.msrb.mxu3 %v10828_v12  ;;  %v6048_v24 = vpop.f32.mrf.mxu3  ;;  %v5996_v40 = vpop.f32.mrf.mxu0  ;;  %v10736_v12 = vor.u32 %v11585_v43, %v10735_v62  ;;  %v10711_v43 = vld [vmem:[#allocation8 + $0x1700] sm:$0xf] }
 0x325   : > { %7506 = vmatpush.bf16.msrb.mxu0 %v10752_v47  ;;  %v6049_v32 = vadd.f32 %v6048_v24, %v6030_v61  ;;  %v6014_v49 = vpop.f32.mrf.mxu1  ;;  %v11581_v47 = vld [vmem:[#allocation8 + $0x1714] sm:$0xf0]  ;;  %v7310_v24 = vshll.u32 %v13176_v2, 16 }
 0x326   : > { %7524 = vmatpush.bf16.msrb.mxu1 %v10816_v30  ;;  %v6015_v22 = vadd.f32 %v6014_v49, %v5996_v40  ;;  %v10783_v30 = vld [vmem:[#allocation8 + $0x1790] sm:$0xf] }
 0x327   : > { %7542 = vmatpush.bf16.msrb.mxu2 %v10756_v29  ;;  %v13200_v9 = vadd.f32 %v6049_v32, %v13160_v20  ;;  %v10732_v20 = vor.u32 %v11582_v26, %v10729_v58  ;;  %v10785_v29 = vld [vmem:[#allocation8 + $0x1798] sm:$0xf0]  ;;  %v10784_v61 = vor.u32 %v11597_v18, %v10783_v30  ;;  %v10776_v26 = vor.u32 %v11595_v34, %v10775_v41 }
 0x328   : > { %7560 = vmatpush.bf16.msrb.mxu3 %v10820_v10  ;;  %v13203_v45 = vadd.f32 %v6015_v22, %v13163_v48  ;;  %v10719_v10 = vld [vmem:[#allocation8 + $0x1710] sm:$0xf]  ;;  %v7304_v48 = vpack.c.b16 %v7302_v54, %v12768_v39  ;;  %v10788_v38 = vor.u32 %v11596_v63, %v10785_v29  ;;  %v7312_v50 = vrot.slane %v7310_v24, 4 }
 0x329   : > { %7507 = vmatpush.bf16.msrb.mxu0 %v10744_v21  ;;  %v10720_v14 = vor.u32 %v11581_v47, %v10719_v10  ;;  %v10713_v21 = vld [vmem:[#allocation8 + $0x1708] sm:$0xf0] }
 0x32a   : > { %7525 = vmatpush.bf16.msrb.mxu1 %v10808_v5  ;;  %v11594_v5 = vld [vmem:[#allocation8 + $0x1784] sm:$0xf]  ;;  %v7315_v46 = vshrl.u32 %v7304_v48, 16  ;;  %v7318_v49 = vshll.u32 %v7304_v48, 16 }
 0x32b   : > { %7543 = vmatpush.bf16.msrb.mxu2 %v10748_v7  ;;  %v6032_v56 = vpop.f32.mrf.mxu2  ;;  %v7307_v7 = vshrl.u32 %v13176_v2, 16  ;;  %v10780_v40 = vor.u32 %v11594_v5, %v10777_v36  ;;  %v7324_v2 = vshrl.u32 %v13179_v13, 16 }
 0x32c   : > { %7561 = vmatpush.bf16.msrb.mxu3 %v10812_v25  ;;  %v6050_v6 = vpop.f32.mrf.mxu3  ;;  %v5999_v55 = vpop.f32.mrf.mxu0  ;;  %v7305_v25 = vpack.c.b16 %v7303_v4, %v12779_v53  ;;  %7202 = vmatmul.bf16.gmra.mxu0 %v13186_v15  ;;  %v11579_v53 = vld [vmem:[#allocation8 + $0x1704] sm:$0xf0]  ;;  %v7317_v0 = vrot.slane %v7315_v46, 3  ;;  %v7320_v52 = vrot.slane %v7318_v49, 4 }
 0x32d   : > { %7508 = vmatpush.bf16.msrb.mxu0 %v10736_v12  ;;  %v6051_v23 = vadd.f32 %v6050_v6, %v6032_v56  ;;  %v6017_v31 = vpop.f32.mrf.mxu1  ;;  %7220 = vmatmul.bf16.gmra.mxu1 %v13190_v35  ;;  %v7309_v22 = vrot.slane %v7307_v7, 3  ;;  %v7326_v33 = vrot.slane %v7324_v2, 3 }
 0x32e   : > { %7526 = vmatpush.bf16.msrb.mxu1 %v10800_v27  ;;  %v6018_v62 = vadd.f32 %v6017_v31, %v5999_v55  ;;  %7238 = vmatmul.bf16.gmra.mxu2 %v13186_v15  ;;  %v7332_v15 = vshrl.u32 %v7305_v25, 16  ;;  %v7321_v4 = vor.u32 %v7320_v52, %v7317_v0 }
 0x32f   : > { %7544 = vmatpush.bf16.msrb.mxu2 %v10740_v37  ;;  %v13209_v39 = vadd.f32 %v6051_v23, %v13166_v11  ;;  %7256 = vmatmul.bf16.gmra.mxu3 %v13190_v35  ;;  %v10716_v11 = vor.u32 %v11578_v8, %v10713_v21  ;;  %v7327_v37 = vshll.u32 %v13179_v13, 16  ;;  %v7313_v17 = vor.u32 %v7312_v50, %v7309_v22 }
 0x330   : > { %7562 = vmatpush.bf16.msrb.mxu3 %v10804_v3  ;;  %v13215_v32 = vadd.f32 %v6018_v62, %v13171_v51  ;;  %v7335_v3 = vshll.u32 %v7305_v25, 16  ;;  %v10712_v51 = vor.u32 %v11579_v53, %v10711_v43  ;;  %v7334_v13 = vrot.slane %v7332_v15, 3 }
 0x331   : > { %7509 = vmatpush.bf16.msrb.mxu0 %v10728_v44  ;;  %v7329_v59 = vrot.slane %v7327_v37, 4  ;;  %v7322_v56 = vsel %vm2485_vm6, %v7313_v17, %v7321_v4 }
 0x332   : > { %7527 = vmatpush.bf16.msrb.mxu1 %v10792_v28  ;;  %v7337_v60 = vrot.slane %v7335_v3, 4 }
 0x333   : > { %7545 = vmatpush.bf16.msrb.mxu2 %v10732_v20  ;;  %v6035_v12 = vpop.f32.mrf.mxu2  ;;  %v7330_v20 = vor.u32 %v7329_v59, %v7326_v33 }
 0x334   : > { %7563 = vmatpush.bf16.msrb.mxu3 %v10796_v42  ;;  %v6053_v58 = vpop.f32.mrf.mxu3  ;;  %v6001_v35 = vpop.f32.mrf.mxu0  ;;  %v7338_v42 = vor.u32 %v7337_v60, %v7334_v13 }
 0x335   : > { %7510 = vmatpush.bf16.msrb.mxu0 %v10720_v14  ;;  %v6054_v27 = vadd.f32 %v6053_v58, %v6035_v12  ;;  %v6019_v54 = vpop.f32.mrf.mxu1 }
 0x336   : > { %7528 = vmatpush.bf16.msrb.mxu1 %v10784_v61  ;;  %v7339_v28 = vsel %vm2485_vm6, %v7330_v20, %v7338_v42 }
 0x337   : > { %7546 = vmatpush.bf16.msrb.mxu2 %v10724_v16  ;;  %v6062_v19 = vadd.f32 %v6054_v27, %v13182_v1 }
 0x338   : > { %7564 = vmatpush.bf16.msrb.mxu3 %v10788_v38 }
 0x339   : > { %7511 = vmatpush.bf16.msrb.mxu0 %v10712_v51 }
 0x33a   : > { %7529 = vmatpush.bf16.msrb.mxu1 %v10776_v26 }
 0x33b   : > { %7547 = vmatpush.bf16.msrb.mxu2 %v10716_v11  ;;  %v6037_v63 = vpop.f32.mrf.mxu2 }
 0x33c   : > { %7565 = vmatpush.bf16.msrb.mxu3 %v10780_v40  ;;  %v6055_v29 = vpop.f32.mrf.mxu3  ;;  %v6309_v10 = vpop.f32.mrf.mxu0  ;;  %7512 = vmatmul.bf16.vlgmr.msrb.gmra.mxu0 %v7322_v56 }
 0x33d   : > { %v6327_v44 = vpop.f32.mrf.mxu1  ;;  %7530 = vmatmul.bf16.vlgmr.msrb.gmra.mxu1 %v7339_v28 }
 0x33e   : > { %v6328_v47 = vadd.f32 %v6327_v44, %v6309_v10  ;;  %7548 = vmatmul.bf16.vlgmr.msrb.gmra.mxu2 %v7322_v56 }
 0x33f   : > { %7566 = vmatmul.bf16.vlgmr.msrb.gmra.mxu3 %v7339_v28 }
 0x340   : > { %v6372_v30 = vadd.f32 %v6328_v47, %v13197_v57 }
 0x343   : > { %v6345_v1 = vpop.f32.mrf.mxu2 }
 0x344   : > { %v6363_v18 = vpop.f32.mrf.mxu3  ;;  %v6311_v6 = vpop.f32.mrf.mxu0 }
 0x345   : > { %v6364_v48 = vadd.f32 %v6363_v18, %v6345_v1  ;;  %v6329_v23 = vpop.f32.mrf.mxu1 }
 0x346   : > { %v6330_v16 = vadd.f32 %v6329_v23, %v6311_v6 }
 0x347   : > { %v6373_v55 = vadd.f32 %v6364_v48, %v13200_v9 }
 0x348   : > { %v6374_v8 = vadd.f32 %v6330_v16, %v13203_v45 }
 0x34b   : > { %v6347_v7 = vpop.f32.mrf.mxu2 }
 0x34c   : > { %v6365_v25 = vpop.f32.mrf.mxu3  ;;  %v6314_v38 = vpop.f32.mrf.mxu0  ;;  %7517 = vmatmul.bf16.gmra.mxu0 %v7321_v4 }
 0x34d   : > { %v6366_v31 = vadd.f32 %v6365_v25, %v6347_v7  ;;  %v6332_v14 = vpop.f32.mrf.mxu1  ;;  %7535 = vmatmul.bf16.gmra.mxu1 %v7338_v42 }
 0x34e   : > { %v6333_v57 = vadd.f32 %v6332_v14, %v6314_v38  ;;  %7553 = vmatmul.bf16.gmra.mxu2 %v7321_v4 }
 0x34f   : > { %v6375_v61 = vadd.f32 %v6366_v31, %v13209_v39  ;;  %7571 = vmatmul.bf16.gmra.mxu3 %v7338_v42 }
 0x350   : > { %v6376_v21 = vadd.f32 %v6333_v57, %v13215_v32 }
 0x353   : > { %v6350_v5 = vpop.f32.mrf.mxu2 }
 0x354   : > { %v6368_v36 = vpop.f32.mrf.mxu3  ;;  %v6316_v62 = vpop.f32.mrf.mxu0 }
 0x355   : > { %v6369_v9 = vadd.f32 %v6368_v36, %v6350_v5  ;;  %v6334_v43 = vpop.f32.mrf.mxu1 }
 0x357   : > { %v6377_v45 = vadd.f32 %v6369_v9, %v6062_v19 }
 0x35b   : > { %v6352_v24 = vpop.f32.mrf.mxu2 }
 0x35c   : > { %v6370_v46 = vpop.f32.mrf.mxu3  ;;  %v6596_v53 = vpop.f32.mrf.mxu0 }
 0x35d   : > { %v6614_v41 = vpop.f32.mrf.mxu1 }
 0x35e   : > { %v6615_v34 = vadd.f32 %v6614_v41, %v6596_v53 }
 0x360   : > { %v6659_v11 = vadd.f32 %v6615_v34, %v6372_v30 }
 0x363   : > { %v6632_v39 = vpop.f32.mrf.mxu2 }
 0x364   : > { %v6650_v40 = vpop.f32.mrf.mxu3  ;;  %v6598_v2 = vpop.f32.mrf.mxu0 }
 0x365   : > { %v6651_v49 = vadd.f32 %v6650_v40, %v6632_v39  ;;  %v6616_v37 = vpop.f32.mrf.mxu1 }
 0x366   : > { %v6617_v15 = vadd.f32 %v6616_v37, %v6598_v2 }
 0x367   : > { %v13229_v32 = vadd.f32 %v6651_v49, %v6373_v55 }
 0x368   : > { %v6661_v3 = vadd.f32 %v6617_v15, %v6374_v8 }
 0x36b   : > { %v6634_v12 = vpop.f32.mrf.mxu2 }
 0x36c   : > { %v6652_v51 = vpop.f32.mrf.mxu3  ;;  %v6601_v58 = vpop.f32.mrf.mxu0 }
 0x36d   : > { %v6653_v26 = vadd.f32 %v6652_v51, %v6634_v12  ;;  %v6619_v22 = vpop.f32.mrf.mxu1 }
 0x36e   : > { %v6620_v35 = vadd.f32 %v6619_v22, %v6601_v58 }
 0x36f   : > { %v13231_v27 = vadd.f32 %v6653_v26, %v6375_v61 }
 0x370   : > { %v6663_v50 = vadd.f32 %v6620_v35, %v6376_v21 }
 0x373   : > { %v6637_v0 = vpop.f32.mrf.mxu2 }
 0x374   : > { %v6655_v52 = vpop.f32.mrf.mxu3  ;;  %v6603_v33 = vpop.f32.mrf.mxu0 }
 0x375   : > { %v6656_v54 = vadd.f32 %v6655_v52, %v6637_v0  ;;  %v6621_v59 = vpop.f32.mrf.mxu1 }
 0x377   : > { %v13233_v13 = vadd.f32 %v6656_v54, %v6377_v45 }
 0x37b   : > { %v6639_v60 = vpop.f32.mrf.mxu2 }
 0x37c   : > { %v6657_v19 = vpop.f32.mrf.mxu3  ;;  %v6911_v17 = vpop.f32.mrf.mxu0 }
 0x37d   : > { %v6929_v4 = vpop.f32.mrf.mxu1 }
 0x37e   : > { %v6930_v20 = vadd.f32 %v6929_v4, %v6911_v17 }
 0x380   : > { %v6974_v42 = vadd.f32 %v6930_v20, %v6659_v11 }
 0x383   : > { %v6947_v63 = vpop.f32.mrf.mxu2 }
 0x384   : > { %v6965_v29 = vpop.f32.mrf.mxu3  ;;  %v6913_v10 = vpop.f32.mrf.mxu0 }
 0x385   : > { %v6931_v56 = vpop.f32.mrf.mxu1  ;;  %v6966_v39 = vadd.f32 %v6965_v29, %v6947_v63 }
 0x386   : > { %v6932_v44 = vadd.f32 %v6931_v56, %v6913_v10 }
 0x387   : > { %v6975_v37 = vadd.f32 %v6966_v39, %v13229_v32 }
 0x388   : > { %v6976_v28 = vadd.f32 %v6932_v44, %v6661_v3 }
 0x38b   : > { %v6949_v47 = vpop.f32.mrf.mxu2 }
 0x38c   : > { %v6967_v30 = vpop.f32.mrf.mxu3  ;;  %v6916_v1 = vpop.f32.mrf.mxu0 }
 0x38d   : > { %v6934_v18 = vpop.f32.mrf.mxu1 }
 0x38e   : > { %v6935_v48 = vadd.f32 %v6934_v18, %v6916_v1 }
 0x390   : > { %v13235_v6 = vadd.f32 %v6935_v48, %v6663_v50  ;;  %v6968_v50 = vadd.f32 %v6967_v30, %v6949_v47 }
 0x392   : > { %v6977_v19 = vadd.f32 %v6968_v50, %v13231_v27 }
 0x393   : > { %v6952_v23 = vpop.f32.mrf.mxu2 }
 0x394   : > { %v6970_v55 = vpop.f32.mrf.mxu3  ;;  %v6918_v16 = vpop.f32.mrf.mxu0 }
 0x395   : > { %v6936_v8 = vpop.f32.mrf.mxu1  ;;  %v6971_v44 = vadd.f32 %v6970_v55, %v6952_v23 }
 0x397   : > { %v6979_v48 = vadd.f32 %v6971_v44, %v13233_v13 }
 0x39b   : > { %v6954_v7 = vpop.f32.mrf.mxu2 }
 0x39c   : > { %v6972_v25 = vpop.f32.mrf.mxu3  ;;  %v7198_v31 = vpop.f32.mrf.mxu0 }
 0x39d   : > { %v7216_v38 = vpop.f32.mrf.mxu1 }
 0x39e   : > { %v7217_v40 = vadd.f32 %v7216_v38, %v7198_v31 }
 0x3a0   : > { %v7261_v15 = vadd.f32 %v7217_v40, %v6974_v42 }
 0x3a3   : > { %v7234_v14 = vpop.f32.mrf.mxu2 }
 0x3a4   : > { %v7252_v61 = vpop.f32.mrf.mxu3  ;;  %v7200_v57 = vpop.f32.mrf.mxu0 }
 0x3a5   : > { %v7218_v21 = vpop.f32.mrf.mxu1  ;;  %v7253_v49 = vadd.f32 %v7252_v61, %v7234_v14 }
 0x3a6   : > { %v7219_v0 = vadd.f32 %v7218_v21, %v7200_v57 }
 0x3a7   : > { %v7262_v51 = vadd.f32 %v7253_v49, %v6975_v37 }
 0x3a8   : > { %v7263_v32 = vadd.f32 %v7219_v0, %v6976_v28 }
 0x3ab   : > { %v7236_v5 = vpop.f32.mrf.mxu2 }
 0x3ac   : > { %v7254_v36 = vpop.f32.mrf.mxu3  ;;  %v7203_v9 = vpop.f32.mrf.mxu0 }
 0x3ad   : > { %v7221_v62 = vpop.f32.mrf.mxu1  ;;  %v7255_v54 = vadd.f32 %v7254_v36, %v7236_v5 }
 0x3ae   : > { %v7222_v47 = vadd.f32 %v7221_v62, %v7203_v9 }
 0x3af   : > { %v7264_v42 = vadd.f32 %v7255_v54, %v6977_v19 }
 0x3b0   : > { %v7265_v16 = vadd.f32 %v7222_v47, %v13235_v6 }
 0x3b3   : > { %v7239_v43 = vpop.f32.mrf.mxu2 }
 0x3b4   : > { %v7257_v45 = vpop.f32.mrf.mxu3  ;;  %v7205_v24 = vpop.f32.mrf.mxu0 }
 0x3b5   : > { %v7223_v46 = vpop.f32.mrf.mxu1  ;;  %v7258_v27 = vadd.f32 %v7257_v45, %v7239_v43 }
 0x3b7   : > { %v7266_v23 = vadd.f32 %v7258_v27, %v6979_v48 }
 0x3bb   : > { %v7241_v53 = vpop.f32.mrf.mxu2 }
 0x3bc   : > { %v7259_v41 = vpop.f32.mrf.mxu3  ;;  %v7513_v34 = vpop.f32.mrf.mxu0 }
 0x3bd   : > { %v7531_v11 = vpop.f32.mrf.mxu1 }
 0x3be   : > { %v7532_v2 = vadd.f32 %v7531_v11, %v7513_v34 }
 0x3c0   : > { %v7576_v26 = vadd.f32 %v7532_v2, %v7261_v15 }
 0x3c2   : > { %v7582_v33 = vmax.f32 %v7576_v26, 0.0 }
 0x3c3   : > { %v7549_v3 = vpop.f32.mrf.mxu2 }
 0x3c4   : > { %v7567_v12 = vpop.f32.mrf.mxu3  ;;  %v7515_v22 = vpop.f32.mrf.mxu0 }
 0x3c5   : > { %v7568_v58 = vadd.f32 %v7567_v12, %v7549_v3  ;;  %v7533_v35 = vpop.f32.mrf.mxu1 }
 0x3c6   : > { %v7534_v60 = vadd.f32 %v7533_v35, %v7515_v22 }
 0x3c7   : > { %v7577_v52 = vadd.f32 %v7568_v58, %v7262_v51 }
 0x3c8   : > { %v7578_v63 = vadd.f32 %v7534_v60, %v7263_v32 }
 0x3c9   : > { %v7583_v59 = vmax.f32 %v7577_v52, 0.0 }
 0x3ca   : > { %v7584_v28 = vmax.f32 %v7578_v63, 0.0 }
 0x3cb   : > { %v7588_v17 = vpack.c.bf16 %v7583_v59, %v7582_v33  ;;  %v7551_v4 = vpop.f32.mrf.mxu2 }
 0x3cc   : > { %v7569_v20 = vpop.f32.mrf.mxu3  ;;  %v7518_v10 = vpop.f32.mrf.mxu0 }
 0x3cd   : > { %7591 = vst [vmem:[%s13240_s21] sm:$0xff] %v7588_v17  ;;  %v7570_v29 = vadd.f32 %v7569_v20, %v7551_v4  ;;  %v7536_v56 = vpop.f32.mrf.mxu1 }
 0x3ce   : > { %v7537_v18 = vadd.f32 %v7536_v56, %v7518_v10 }
 0x3cf   : > { %v7579_v30 = vadd.f32 %v7570_v29, %v7264_v42 }
 0x3d0   : > { %v7580_v55 = vadd.f32 %v7537_v18, %v7265_v16 }
 0x3d1   : > { %v7585_v1 = vmax.f32 %v7579_v30, 0.0 }
 0x3d2   : > { %v7586_v6 = vmax.f32 %v7580_v55, 0.0 }
 0x3d3   : > { %v7589_v8 = vpack.c.bf16 %v7585_v1, %v7584_v28  ;;  %v7554_v7 = vpop.f32.mrf.mxu2 }
 0x3d4   : > { %v7572_v25 = vpop.f32.mrf.mxu3  ;;  %v7520_v38 = vpop.f32.mrf.mxu0 }
 0x3d5   : > { %7592 = vst [vmem:[%s13240_s21 + $0x8] sm:$0xff] %v7589_v8  ;;  %v7573_v31 = vadd.f32 %v7572_v25, %v7554_v7  ;;  %v7538_v14 = vpop.f32.mrf.mxu1 }
 0x3d7   : > { %v7581_v13 = vadd.f32 %v7573_v31, %v7266_v23 }
 0x3d9   : > { %v7587_v61 = vmax.f32 %v7581_v13, 0.0 }
 0x3db   : > { %v7590_v57 = vpack.c.bf16 %v7587_v61, %v7586_v6  ;;  %v7556_v21 = vpop.f32.mrf.mxu2 }
 0x3dc   : > { %v7574_v5 = vpop.f32.mrf.mxu3 }
 0x3dd   : > { %7593 = vst [vmem:[%s13240_s21 + $0x10] sm:$0xff] %v7590_v57 }
 0x3de   : > { %11854 = shalt.err (!%p11851_p0)
}
 0x3df   : > { %s11927_s10 = smov 128   ;;  %s11928_s8 = smov 8  }
 0x3e0   : > { %11627 = dma.vmem_to_hbm [thread:$0]  (%p12032_p7), %s7611_s18, 384, %s7613_s27, %s7595_s29, %s11927_s10, %s11927_s10, %s11928_s8  }
 0x3e1 PF: > { %s7627_s19 = sand.u32 1, %s11901_s15   ;;  %p11644_p3 = pnand %p7751_p11, %p11999_p6 }
 0x3e2   : > { %s7628_s12 = scalar_lea.sflag [#allocation5], %s7627_s19 }
 0x3e3   : > { %p11645_p5 = pneg %p11644_p3 }
 0x3e5   : > { %11896 = dma.done.wait (%p11645_p5), %s7628_s12, 384  }
 0x3e6   : > { %11898 = vsyncadd (%p11645_p5), %s7628_s12, 4294966912  ;;  %s24_s20 = sadd.s32 1, %s11921_s20   ;;  %s13313_s25 = sld [smem:[#allocation17_spill]] }
 0x3e7   : > { %p21_p9 = scmp.ge.s32.totalorder %s24_s20, 4   ;;  %s13314_s17 = sld [smem:[#allocation20_spill]] }
 0x3e8   : > { %s13315_s18 = sld [smem:[#allocation18_spill]]  ;;  %s13317_s15 = smov %s11905_s16 }
 0x3e9   : > { %s13316_s19 = sld [smem:[#allocation19_spill]]  ;;  %23 = sbr.rel (!%p21_p9) target bundleno = 12 (0xc), region = 125 }
 0x3ec   : > { %s13318_s16 = smov %s13313_s25 }
 0x3ee   :  { %7634 = vsyncpa [#allocation4], 1 }
 0x3ef   :  { %7636 = vsyncpa [#allocation4 + $0x1], 1 }
 0x3f0   :  { %7637 = vsyncpa [#allocation7], 1 }
 0x3f1   :  { %7639 = vsyncpa [#allocation7 + $0x1], 1 }
 0x3f2   :  { %7640 = vsyncpa [#allocation10], 1 }
 0x3f3   :  { %7641 = vsyncpa [#allocation5], 1 }
 0x3f4   :  { %7643 = vsyncpa [#allocation5 + $0x1], 1 }

</bundles_post_ra>
